<compile_context>
chip_gen: v7x
topology: tpu7x:2x2x1
jax: 0.10.0
libtpu: 0.0.40
codegen_flags: <defaults>
</compile_context>

<pallas_src>
import numpy as np
import jax
import jax.numpy as jnp
from jax import lax
from jax.experimental import pallas as pl
from jax.experimental.pallas import tpu as pltpu

# ----------------------------- config (stand-in for argparse args) -----------
IMG_SIZE = 16          # args.img_size  -> init_size = 4
LATENT_DIM = 32        # args.latent_dim
CHANNELS = 3           # args.channels
BATCH = 2
INIT_SIZE = IMG_SIZE // 4
LANES = 128            # every stage is kept 128-lane dense


def _vmem_spec():
    return pl.BlockSpec(memory_space=pltpu.MemorySpace.VMEM)


# ----------------------------- in-kernel helpers ------------------------------
def _bn2d(x, eps, gamma=None, beta=None):
    """Training-mode BatchNorm over rows of an (M, C) slab (biased variance)."""
    m = x.shape[0]
    mean = jnp.sum(x, axis=0, keepdims=True) * (1.0 / m)
    cen = x - mean
    var = jnp.sum(cen * cen, axis=0, keepdims=True) * (1.0 / m)
    y = cen * lax.rsqrt(var + eps)
    if gamma is not None:
        y = y * gamma + beta
    return y


def _fill_padded(x, p_ref):
    """Store x (B,H,W,C) into the interior of halo buffer p_ref (B,H+2,W+2,C).

    One dense interior store + 4 thin halo-strip stores (the interior is fully
    rewritten, so the buffer is never zeroed wholesale)."""
    B, H, W, C = x.shape
    zrow = jnp.zeros((B, 1, W + 2, C), jnp.float32)
    zcol = jnp.zeros((B, H + 2, 1, C), jnp.float32)
    p_ref[:, 1:H + 1, 1:W + 1, :] = x
    p_ref[:, 0:1, :, :] = zrow
    p_ref[:, H + 1:H + 2, :, :] = zrow
    p_ref[:, :, 0:1, :] = zcol
    p_ref[:, :, W + 1:W + 2, :] = zcol


def _conv3x3(xp_ref, w_ref):
    """3x3 'same' conv as 9 accumulating MXU matmuls (no im2col slab).

    xp_ref: (B, H+2, W+2, Cin) f32 halo buffer; w_ref: (9, Cin, Cout) bf16.
    Returns (B*H*W, Cout) f32 rows in (b, h, w) order."""
    B, Hp, Wp, C = xp_ref.shape
    H, W = Hp - 2, Wp - 2
    M = B * H * W
    xp = xp_ref[...]                                   # one bulk load
    acc = jnp.zeros((M, w_ref.shape[-1]), jnp.float32)
    for kh in range(3):
        for kw in range(3):
            tap = xp[:, kh:kh + H, kw:kw + W, :].reshape(M, C)
            acc = acc + jnp.dot(tap.astype(jnp.bfloat16), w_ref[kh * 3 + kw],
                                preferred_element_type=jnp.float32)
    return acc


# ----------------------------- fused forward kernel ---------------------------
def generator_kernel(z_ref, l1w_ref, l1b_ref, bn0g_ref, bn0b_ref,
                     up1m_ref, c1w_ref, bn1g_ref, bn1b_ref,
                     up2m_ref, c2w_ref, bn2g_ref, bn2b_ref,
                     c3w_ref, c3b_ref,
                     o_ref,
                     pad1_ref, pad2_ref, pad3_ref):
    B = z_ref.shape[0]
    s = INIT_SIZE
    C = LANES
    bf16 = jnp.bfloat16

    # ---- l1: z @ W + b (bf16 MXU matmul, f32 accumulate) ----------------------
    h0 = jnp.dot(z_ref[...].astype(bf16), l1w_ref[...],
                 preferred_element_type=jnp.float32) + l1b_ref[...]    # (B, s*s*C)

    # ---- conv_blocks0: BatchNorm2d(128, eps=1e-5) -----------------------------
    # 16 aligned lane-group slices -> (s*s*B, C) rows (row = (h*s+w)*B + b),
    # one vectorised BN pass; the value stays in vregs (no scratch round trip).
    x0 = jnp.concatenate([h0[:, q * C:(q + 1) * C] for q in range(s * s)], axis=0)
    x0 = _bn2d(x0, 1e-5, bn0g_ref[...], bn0b_ref[...])

    # ---- conv_blocks1: up x2 -> Conv3x3(128->128) -> BN(0.8) -> LeakyReLU -----
    h1 = 2 * s
    up1 = jnp.dot(up1m_ref[...], x0.astype(bf16),
                  preferred_element_type=jnp.float32)                  # (B*h1*h1, C)
    _fill_padded(up1.reshape(B, h1, h1, C), pad1_ref)
    y = _conv3x3(pad1_ref, c1w_ref)                                    # (B*h1*h1, C)
    y = _bn2d(y, 0.8, bn1g_ref[...], bn1b_ref[...])
    y = jnp.where(y >= 0.0, y, 0.2 * y)

    # ---- conv_blocks2 (a): up x2 -> Conv3x3(128->64, lane-padded) -> BN -> LReLU
    h2 = 2 * h1
    up2 = jnp.dot(up2m_ref[...], y.astype(bf16),
                  preferred_element_type=jnp.float32)                  # (B*h2*h2, C)
    _fill_padded(up2.reshape(B, h2, h2, C), pad2_ref)
    y = _conv3x3(pad2_ref, c2w_ref)
    y = _bn2d(y, 0.8, bn2g_ref[...], bn2b_ref[...])
    y = jnp.where(y >= 0.0, y, 0.2 * y)

    # ---- conv_blocks2 (b): Conv3x3(64->C, lane-padded) -> Tanh -> BN(no affine)
    _fill_padded(y.reshape(B, h2, h2, C), pad3_ref)
    y = _conv3x3(pad3_ref, c3w_ref) + c3b_ref[...]
    y = jnp.tanh(y)
    o_ref[...] = _bn2d(y, 1e-5).astype(o_ref.dtype)


# ----------------------------- wrapper -----------------------------------------
@jax.jit
def generator_forward(z, p):
    B = z.shape[0]
    s = INIT_SIZE
    H = 4 * s                                     # = IMG_SIZE
    M = B * H * H
    out2d = pl.pallas_call(
        generator_kernel,
        out_shape=jax.ShapeDtypeStruct((M, LANES), jnp.float32),
        in_specs=[_vmem_spec()] * 15,
        out_specs=_vmem_spec(),
        scratch_shapes=[
            pltpu.VMEM((B, 2 * s + 2, 2 * s + 2, LANES), jnp.float32),  # conv1 halo
            pltpu.VMEM((B, 4 * s + 2, 4 * s + 2, LANES), jnp.float32),  # conv2 halo
            pltpu.VMEM((B, 4 * s + 2, 4 * s + 2, LANES), jnp.float32),  # conv3 halo
        ],
    )(z, p["l1_w"], p["l1_b"], p["bn0_g"], p["bn0_b"],
      p["up1_m"], p["c1_w"], p["bn1_g"], p["bn1_b"],
      p["up2_m"], p["c2_w"], p["bn2_g"], p["bn2_b"],
      p["c3_w"], p["c3_b"])
    # lane-dense (M, 128) kernel output -> keep the real channels, back to NCHW
    img = out2d.reshape(B, H, H, LANES)[:, :, :, :CHANNELS]
    return jnp.transpose(img, (0, 3, 1, 2))                            # (B, C, 16, 16)


# ----------------------------- upsample selection matrices ---------------------
def _upsample_matrix_p_major(batch, s):
    """(B*2s*2s, s*s*B) 0/1 matrix: output rows in (b,h2,w2) order, source rows
    in ((h*s + w)*B + b) order (the order produced by the BN0 lane-group concat)."""
    ho = 2 * s
    m = np.zeros((batch * ho * ho, s * s * batch), np.float32)
    for b in range(batch):
        for h2 in range(ho):
            for w2 in range(ho):
                o = (b * ho + h2) * ho + w2
                src = ((h2 // 2) * s + (w2 // 2)) * batch + b
                m[o, src] = 1.0
    return jnp.asarray(m, jnp.bfloat16)


def _upsample_matrix_b_major(batch, hin):
    """(B*2h*2h, B*h*h) 0/1 matrix; both sides in (b, h, w) row order."""
    ho = 2 * hin
    m = np.zeros((batch * ho * ho, batch * hin * hin), np.float32)
    for b in range(batch):
        for h2 in range(ho):
            for w2 in range(ho):
                o = (b * ho + h2) * ho + w2
                src = (b * hin + h2 // 2) * hin + w2 // 2
                m[o, src] = 1.0
    return jnp.asarray(m, jnp.bfloat16)


# ----------------------------- parameter init ----------------------------------
def init_params(key, batch=BATCH):
    s = INIT_SIZE
    ks = jax.random.split(key, 6)
    std = 0.05
    p = {}

    # l1: torch Linear(latent_dim, 128*s*s): weight (out,in), bias (out,)
    w_t = std * jax.random.normal(ks[0], (128 * s * s, LATENT_DIM), jnp.float32)
    b_t = std * jax.random.normal(ks[1], (128 * s * s,), jnp.float32)
    # torch column o = c*s*s + h*s + w  ->  kernel column q = (h*s + w)*128 + c
    l1w = (w_t.T.reshape(LATENT_DIM, 128, s, s)
           .transpose(0, 2, 3, 1).reshape(LATENT_DIM, 128 * s * s))
    p["l1_w"] = l1w.astype(jnp.bfloat16)
    p["l1_b"] = b_t.reshape(128, s, s).transpose(1, 2, 0).reshape(1, 128 * s * s)

    # conv weights: torch (Cout, Cin, 3, 3) -> per-tap (9, Cin_pad, Cout_pad) bf16
    c1 = std * jax.random.normal(ks[2], (128, 128, 3, 3), jnp.float32)
    c2 = std * jax.random.normal(ks[3], (64, 128, 3, 3), jnp.float32)
    c3 = std * jax.random.normal(ks[4], (CHANNELS, 64, 3, 3), jnp.float32)
    c3b = std * jax.random.normal(ks[5], (CHANNELS,), jnp.float32)

    p["c1_w"] = (jnp.transpose(c1, (2, 3, 1, 0))
                 .reshape(9, 128, 128).astype(jnp.bfloat16))
    # conv2: 64 output channels zero-padded to 128 lanes (lane-dense pipeline)
    c2m = jnp.transpose(c2, (2, 3, 1, 0)).reshape(9, 128, 64)
    p["c2_w"] = jnp.pad(c2m, ((0, 0), (0, 0), (0, LANES - 64))).astype(jnp.bfloat16)
    # conv3: its input is the 128-lane conv2 output (lanes 64+ are exactly zero),
    # so pad input-channel rows; output channels zero-padded to 128 lanes too.
    c3m = jnp.transpose(c3, (2, 3, 1, 0)).reshape(9, 64, CHANNELS)
    c3m = jnp.pad(c3m, ((0, 0), (0, LANES - 64), (0, LANES - CHANNELS)))
    p["c3_w"] = c3m.astype(jnp.bfloat16)
    p["c3_b"] = jnp.pad(c3b, (0, LANES - CHANNELS)).reshape(1, LANES)

    # conv1/conv2 biases intentionally dropped: a per-output-channel constant is
    # cancelled exactly by the batch-statistics BatchNorm that follows each conv.

    # BatchNorm2d affine params (torch default init: weight=1, bias=0); the
    # zero-padded lanes stay identity and their activations are exactly zero.
    for name in ("bn0", "bn1", "bn2"):
        p[name + "_g"] = jnp.ones((1, LANES), jnp.float32)
        p[name + "_b"] = jnp.zeros((1, LANES), jnp.float32)

    # nearest-2x upsampling as 0/1 row-selection matrices (applied on the MXU)
    p["up1_m"] = _upsample_matrix_p_major(batch, s)
    p["up2_m"] = _upsample_matrix_b_major(batch, 2 * s)
    return p


if __name__ == "__main__":
    key = jax.random.PRNGKey(0)
    kz, kp = jax.random.split(key)
    z = jax.random.normal(kz, (BATCH, LATENT_DIM), jnp.float32)
    params = init_params(kp, BATCH)

    img = generator_forward(z, params)
    jax.block_until_ready(img)

    assert img.shape == (BATCH, CHANNELS, IMG_SIZE, IMG_SIZE), img.shape
    assert img.dtype == jnp.float32
    assert bool(jnp.all(jnp.isfinite(img)))
    print("KERNEL_OK")
</pallas_src>

<mosaic_0001>
module attributes {stable_mosaic.version = 11 : i64} {
  func.func @generator_kernel(%arg0: memref<2x32xf32, #tpu.memory_space<vmem>>, %arg1: memref<32x2048xbf16, #tpu.memory_space<vmem>>, %arg2: memref<1x2048xf32, #tpu.memory_space<vmem>>, %arg3: memref<1x128xf32, #tpu.memory_space<vmem>>, %arg4: memref<1x128xf32, #tpu.memory_space<vmem>>, %arg5: memref<128x32xbf16, #tpu.memory_space<vmem>>, %arg6: memref<9x128x128xbf16, #tpu.memory_space<vmem>>, %arg7: memref<1x128xf32, #tpu.memory_space<vmem>>, %arg8: memref<1x128xf32, #tpu.memory_space<vmem>>, %arg9: memref<512x128xbf16, #tpu.memory_space<vmem>>, %arg10: memref<9x128x128xbf16, #tpu.memory_space<vmem>>, %arg11: memref<1x128xf32, #tpu.memory_space<vmem>>, %arg12: memref<1x128xf32, #tpu.memory_space<vmem>>, %arg13: memref<9x128x128xbf16, #tpu.memory_space<vmem>>, %arg14: memref<1x128xf32, #tpu.memory_space<vmem>>, %arg15: memref<512x128xf32, #tpu.memory_space<vmem>>, %arg16: memref<2x10x10x128xf32, #tpu.memory_space<vmem>>, %arg17: memref<2x18x18x128xf32, #tpu.memory_space<vmem>>, %arg18: memref<2x18x18x128xf32, #tpu.memory_space<vmem>>) attributes {dimension_semantics = [], scalar_prefetch = 0 : i64, scratch_operands = 3 : i64, tpu.core_type = #tpu.core_type<tc>} {
    %c0 = arith.constant 0 : index
    %c0_0 = arith.constant 0 : index
    %0 = vector.load %arg0[%c0, %c0_0] : memref<2x32xf32, #tpu.memory_space<vmem>>, vector<2x32xf32>
    %1 = arith.truncf %0 : vector<2x32xf32> to vector<2x32xbf16>
    %c0_1 = arith.constant 0 : index
    %c0_2 = arith.constant 0 : index
    %2 = vector.load %arg1[%c0_1, %c0_2] : memref<32x2048xbf16, #tpu.memory_space<vmem>>, vector<32x2048xbf16>
    %cst = arith.constant dense<0.000000e+00> : vector<2x2048xf32>
    %3 = tpu.matmul %1, %2, %cst {dimension_numbers = #tpu.dot_dimension_numbers<[1], [0], [0], [1], [0, 0, 1, 1], [], []>} : vector<2x32xbf16>, vector<32x2048xbf16>, vector<2x2048xf32> -> vector<2x2048xf32>
    %c0_3 = arith.constant 0 : index
    %c0_4 = arith.constant 0 : index
    %4 = vector.load %arg2[%c0_3, %c0_4] : memref<1x2048xf32, #tpu.memory_space<vmem>>, vector<1x2048xf32>
    %5 = vector.broadcast %4 : vector<1x2048xf32> to vector<2x2048xf32>
    %6 = arith.addf %3, %5 : vector<2x2048xf32>
    %7 = vector.extract_strided_slice %6 {offsets = [0, 0], sizes = [2, 128], strides = [1, 1]} : vector<2x2048xf32> to vector<2x128xf32>
    %8 = vector.extract_strided_slice %6 {offsets = [0, 128], sizes = [2, 128], strides = [1, 1]} : vector<2x2048xf32> to vector<2x128xf32>
    %9 = vector.extract_strided_slice %6 {offsets = [0, 256], sizes = [2, 128], strides = [1, 1]} : vector<2x2048xf32> to vector<2x128xf32>
    %10 = vector.extract_strided_slice %6 {offsets = [0, 384], sizes = [2, 128], strides = [1, 1]} : vector<2x2048xf32> to vector<2x128xf32>
    %11 = vector.extract_strided_slice %6 {offsets = [0, 512], sizes = [2, 128], strides = [1, 1]} : vector<2x2048xf32> to vector<2x128xf32>
    %12 = vector.extract_strided_slice %6 {offsets = [0, 640], sizes = [2, 128], strides = [1, 1]} : vector<2x2048xf32> to vector<2x128xf32>
    %13 = vector.extract_strided_slice %6 {offsets = [0, 768], sizes = [2, 128], strides = [1, 1]} : vector<2x2048xf32> to vector<2x128xf32>
    %14 = vector.extract_strided_slice %6 {offsets = [0, 896], sizes = [2, 128], strides = [1, 1]} : vector<2x2048xf32> to vector<2x128xf32>
    %15 = vector.extract_strided_slice %6 {offsets = [0, 1024], sizes = [2, 128], strides = [1, 1]} : vector<2x2048xf32> to vector<2x128xf32>
    %16 = vector.extract_strided_slice %6 {offsets = [0, 1152], sizes = [2, 128], strides = [1, 1]} : vector<2x2048xf32> to vector<2x128xf32>
    %17 = vector.extract_strided_slice %6 {offsets = [0, 1280], sizes = [2, 128], strides = [1, 1]} : vector<2x2048xf32> to vector<2x128xf32>
    %18 = vector.extract_strided_slice %6 {offsets = [0, 1408], sizes = [2, 128], strides = [1, 1]} : vector<2x2048xf32> to vector<2x128xf32>
    %19 = vector.extract_strided_slice %6 {offsets = [0, 1536], sizes = [2, 128], strides = [1, 1]} : vector<2x2048xf32> to vector<2x128xf32>
    %20 = vector.extract_strided_slice %6 {offsets = [0, 1664], sizes = [2, 128], strides = [1, 1]} : vector<2x2048xf32> to vector<2x128xf32>
    %21 = vector.extract_strided_slice %6 {offsets = [0, 1792], sizes = [2, 128], strides = [1, 1]} : vector<2x2048xf32> to vector<2x128xf32>
    %22 = vector.extract_strided_slice %6 {offsets = [0, 1920], sizes = [2, 128], strides = [1, 1]} : vector<2x2048xf32> to vector<2x128xf32>
    %23 = tpu.concatenate %7, %8, %9, %10, %11, %12, %13, %14, %15, %16, %17, %18, %19, %20, %21, %22 in 0 : vector<2x128xf32>, vector<2x128xf32>, vector<2x128xf32>, vector<2x128xf32>, vector<2x128xf32>, vector<2x128xf32>, vector<2x128xf32>, vector<2x128xf32>, vector<2x128xf32>, vector<2x128xf32>, vector<2x128xf32>, vector<2x128xf32>, vector<2x128xf32>, vector<2x128xf32>, vector<2x128xf32>, vector<2x128xf32> -> vector<32x128xf32>
    %c0_5 = arith.constant 0 : index
    %c0_6 = arith.constant 0 : index
    %24 = vector.load %arg3[%c0_5, %c0_6] : memref<1x128xf32, #tpu.memory_space<vmem>>, vector<1x128xf32>
    %c0_7 = arith.constant 0 : index
    %c0_8 = arith.constant 0 : index
    %25 = vector.load %arg4[%c0_7, %c0_8] : memref<1x128xf32, #tpu.memory_space<vmem>>, vector<1x128xf32>
    %cst_9 = arith.constant dense<0.000000e+00> : vector<128xf32>
    %26 = vector.multi_reduction <add>, %23, %cst_9 [0] : vector<32x128xf32> to vector<128xf32>
    %27 = vector.shape_cast %26 : vector<128xf32> to vector<1x128xf32>
    %cst_10 = arith.constant 3.125000e-02 : f32
    %28 = vector.broadcast %cst_10 : f32 to vector<1x128xf32>
    %29 = arith.mulf %27, %28 : vector<1x128xf32>
    %30 = vector.broadcast %29 : vector<1x128xf32> to vector<32x128xf32>
    %31 = arith.subf %23, %30 : vector<32x128xf32>
    %32 = arith.mulf %31, %31 : vector<32x128xf32>
    %cst_11 = arith.constant dense<0.000000e+00> : vector<128xf32>
    %33 = vector.multi_reduction <add>, %32, %cst_11 [0] : vector<32x128xf32> to vector<128xf32>
    %34 = vector.shape_cast %33 : vector<128xf32> to vector<1x128xf32>
    %cst_12 = arith.constant 3.125000e-02 : f32
    %35 = vector.broadcast %cst_12 : f32 to vector<1x128xf32>
    %36 = arith.mulf %34, %35 : vector<1x128xf32>
    %cst_13 = arith.constant 9.99999974E-6 : f32
    %37 = vector.broadcast %cst_13 : f32 to vector<1x128xf32>
    %38 = arith.addf %36, %37 : vector<1x128xf32>
    %39 = math.rsqrt %38 : vector<1x128xf32>
    %40 = vector.broadcast %39 : vector<1x128xf32> to vector<32x128xf32>
    %41 = arith.mulf %31, %40 : vector<32x128xf32>
    %42 = vector.broadcast %24 : vector<1x128xf32> to vector<32x128xf32>
    %43 = arith.mulf %41, %42 : vector<32x128xf32>
    %44 = vector.broadcast %25 : vector<1x128xf32> to vector<32x128xf32>
    %45 = arith.addf %43, %44 : vector<32x128xf32>
    %c0_14 = arith.constant 0 : index
    %c0_15 = arith.constant 0 : index
    %46 = vector.load %arg5[%c0_14, %c0_15] : memref<128x32xbf16, #tpu.memory_space<vmem>>, vector<128x32xbf16>
    %47 = arith.truncf %45 : vector<32x128xf32> to vector<32x128xbf16>
    %cst_16 = arith.constant dense<0.000000e+00> : vector<128x128xf32>
    %48 = tpu.matmul %46, %47, %cst_16 {dimension_numbers = #tpu.dot_dimension_numbers<[1], [0], [0], [1], [0, 0, 1, 1], [], []>} : vector<128x32xbf16>, vector<32x128xbf16>, vector<128x128xf32> -> vector<128x128xf32>
    %49 = vector.shape_cast %48 : vector<128x128xf32> to vector<2x8x8x128xf32>
    %cst_17 = arith.constant 0.000000e+00 : f32
    %50 = vector.broadcast %cst_17 : f32 to vector<2x1x10x128xf32>
    %cst_18 = arith.constant 0.000000e+00 : f32
    %51 = vector.broadcast %cst_18 : f32 to vector<2x10x1x128xf32>
    %c0_19 = arith.constant 0 : index
    %c1 = arith.constant 1 : index
    %c1_20 = arith.constant 1 : index
    %c0_21 = arith.constant 0 : index
    %52 = vector.load %arg16[%c0_19, %c1, %c1_20, %c0_21] : memref<2x10x10x128xf32, #tpu.memory_space<vmem>>, vector<2x8x8x128xf32>
    tpu.vector_store %arg16[%c0_19, %c1, %c1_20, %c0_21], %49 {strides = array<i32>} : memref<2x10x10x128xf32, #tpu.memory_space<vmem>>, vector<2x8x8x128xf32>,
    %c0_22 = arith.constant 0 : index
    %c0_23 = arith.constant 0 : index
    %c0_24 = arith.constant 0 : index
    %c0_25 = arith.constant 0 : index
    %53 = vector.load %arg16[%c0_22, %c0_23, %c0_24, %c0_25] : memref<2x10x10x128xf32, #tpu.memory_space<vmem>>, vector<2x1x10x128xf32>
    tpu.vector_store %arg16[%c0_22, %c0_23, %c0_24, %c0_25], %50 {strides = array<i32>} : memref<2x10x10x128xf32, #tpu.memory_space<vmem>>, vector<2x1x10x128xf32>,
    %c0_26 = arith.constant 0 : index
    %c9 = arith.constant 9 : index
    %c0_27 = arith.constant 0 : index
    %c0_28 = arith.constant 0 : index
    %54 = vector.load %arg16[%c0_26, %c9, %c0_27, %c0_28] : memref<2x10x10x128xf32, #tpu.memory_space<vmem>>, vector<2x1x10x128xf32>
    tpu.vector_store %arg16[%c0_26, %c9, %c0_27, %c0_28], %50 {strides = array<i32>} : memref<2x10x10x128xf32, #tpu.memory_space<vmem>>, vector<2x1x10x128xf32>,
    %c0_29 = arith.constant 0 : index
    %c0_30 = arith.constant 0 : index
    %c0_31 = arith.constant 0 : index
    %c0_32 = arith.constant 0 : index
    %55 = vector.load %arg16[%c0_29, %c0_30, %c0_31, %c0_32] : memref<2x10x10x128xf32, #tpu.memory_space<vmem>>, vector<2x10x1x128xf32>
    tpu.vector_store %arg16[%c0_29, %c0_30, %c0_31, %c0_32], %51 {strides = array<i32>} : memref<2x10x10x128xf32, #tpu.memory_space<vmem>>, vector<2x10x1x128xf32>,
    %c0_33 = arith.constant 0 : index
    %c0_34 = arith.constant 0 : index
    %c9_35 = arith.constant 9 : index
    %c0_36 = arith.constant 0 : index
    %56 = vector.load %arg16[%c0_33, %c0_34, %c9_35, %c0_36] : memref<2x10x10x128xf32, #tpu.memory_space<vmem>>, vector<2x10x1x128xf32>
    tpu.vector_store %arg16[%c0_33, %c0_34, %c9_35, %c0_36], %51 {strides = array<i32>} : memref<2x10x10x128xf32, #tpu.memory_space<vmem>>, vector<2x10x1x128xf32>,
    %c0_37 = arith.constant 0 : index
    %c0_38 = arith.constant 0 : index
    %c0_39 = arith.constant 0 : index
    %c0_40 = arith.constant 0 : index
    %57 = vector.load %arg16[%c0_37, %c0_38, %c0_39, %c0_40] : memref<2x10x10x128xf32, #tpu.memory_space<vmem>>, vector<2x10x10x128xf32>
    %cst_41 = arith.constant 0.000000e+00 : f32
    %58 = vector.broadcast %cst_41 : f32 to vector<128x128xf32>
    %59 = vector.extract_strided_slice %57 {offsets = [0, 0, 0, 0], sizes = [2, 8, 8, 128], strides = [1, 1, 1, 1]} : vector<2x10x10x128xf32> to vector<2x8x8x128xf32>
    %60 = vector.shape_cast %59 : vector<2x8x8x128xf32> to vector<128x128xf32>
    %61 = arith.truncf %60 : vector<128x128xf32> to vector<128x128xbf16>
    %c0_42 = arith.constant 0 : index
    %c0_43 = arith.constant 0 : index
    %c0_44 = arith.constant 0 : index
    %62 = vector.load %arg6[%c0_42, %c0_43, %c0_44] : memref<9x128x128xbf16, #tpu.memory_space<vmem>>, vector<1x128x128xbf16>
    %63 = vector.shape_cast %62 : vector<1x128x128xbf16> to vector<128x128xbf16>
    %cst_45 = arith.constant dense<0.000000e+00> : vector<128x128xf32>
    %64 = tpu.matmul %61, %63, %cst_45 {dimension_numbers = #tpu.dot_dimension_numbers<[1], [0], [0], [1], [0, 0, 1, 1], [], []>} : vector<128x128xbf16>, vector<128x128xbf16>, vector<128x128xf32> -> vector<128x128xf32>
    %65 = arith.addf %58, %64 : vector<128x128xf32>
    %66 = vector.extract_strided_slice %57 {offsets = [0, 0, 1, 0], sizes = [2, 8, 8, 128], strides = [1, 1, 1, 1]} : vector<2x10x10x128xf32> to vector<2x8x8x128xf32>
    %67 = vector.shape_cast %66 : vector<2x8x8x128xf32> to vector<128x128xf32>
    %68 = arith.truncf %67 : vector<128x128xf32> to vector<128x128xbf16>
    %c1_46 = arith.constant 1 : index
    %c0_47 = arith.constant 0 : index
    %c0_48 = arith.constant 0 : index
    %69 = vector.load %arg6[%c1_46, %c0_47, %c0_48] : memref<9x128x128xbf16, #tpu.memory_space<vmem>>, vector<1x128x128xbf16>
    %70 = vector.shape_cast %69 : vector<1x128x128xbf16> to vector<128x128xbf16>
    %cst_49 = arith.constant dense<0.000000e+00> : vector<128x128xf32>
    %71 = tpu.matmul %68, %70, %cst_49 {dimension_numbers = #tpu.dot_dimension_numbers<[1], [0], [0], [1], [0, 0, 1, 1], [], []>} : vector<128x128xbf16>, vector<128x128xbf16>, vector<128x128xf32> -> vector<128x128xf32>
    %72 = arith.addf %65, %71 : vector<128x128xf32>
    %73 = vector.extract_strided_slice %57 {offsets = [0, 0, 2, 0], sizes = [2, 8, 8, 128], strides = [1, 1, 1, 1]} : vector<2x10x10x128xf32> to vector<2x8x8x128xf32>
    %74 = vector.shape_cast %73 : vector<2x8x8x128xf32> to vector<128x128xf32>
    %75 = arith.truncf %74 : vector<128x128xf32> to vector<128x128xbf16>
    %c2 = arith.constant 2 : index
    %c0_50 = arith.constant 0 : index
    %c0_51 = arith.constant 0 : index
    %76 = vector.load %arg6[%c2, %c0_50, %c0_51] : memref<9x128x128xbf16, #tpu.memory_space<vmem>>, vector<1x128x128xbf16>
    %77 = vector.shape_cast %76 : vector<1x128x128xbf16> to vector<128x128xbf16>
    %cst_52 = arith.constant dense<0.000000e+00> : vector<128x128xf32>
    %78 = tpu.matmul %75, %77, %cst_52 {dimension_numbers = #tpu.dot_dimension_numbers<[1], [0], [0], [1], [0, 0, 1, 1], [], []>} : vector<128x128xbf16>, vector<128x128xbf16>, vector<128x128xf32> -> vector<128x128xf32>
    %79 = arith.addf %72, %78 : vector<128x128xf32>
    %80 = vector.extract_strided_slice %57 {offsets = [0, 1, 0, 0], sizes = [2, 8, 8, 128], strides = [1, 1, 1, 1]} : vector<2x10x10x128xf32> to vector<2x8x8x128xf32>
    %81 = vector.shape_cast %80 : vector<2x8x8x128xf32> to vector<128x128xf32>
    %82 = arith.truncf %81 : vector<128x128xf32> to vector<128x128xbf16>
    %c3 = arith.constant 3 : index
    %c0_53 = arith.constant 0 : index
    %c0_54 = arith.constant 0 : index
    %83 = vector.load %arg6[%c3, %c0_53, %c0_54] : memref<9x128x128xbf16, #tpu.memory_space<vmem>>, vector<1x128x128xbf16>
    %84 = vector.shape_cast %83 : vector<1x128x128xbf16> to vector<128x128xbf16>
    %cst_55 = arith.constant dense<0.000000e+00> : vector<128x128xf32>
    %85 = tpu.matmul %82, %84, %cst_55 {dimension_numbers = #tpu.dot_dimension_numbers<[1], [0], [0], [1], [0, 0, 1, 1], [], []>} : vector<128x128xbf16>, vector<128x128xbf16>, vector<128x128xf32> -> vector<128x128xf32>
    %86 = arith.addf %79, %85 : vector<128x128xf32>
    %87 = vector.extract_strided_slice %57 {offsets = [0, 1, 1, 0], sizes = [2, 8, 8, 128], strides = [1, 1, 1, 1]} : vector<2x10x10x128xf32> to vector<2x8x8x128xf32>
    %88 = vector.shape_cast %87 : vector<2x8x8x128xf32> to vector<128x128xf32>
    %89 = arith.truncf %88 : vector<128x128xf32> to vector<128x128xbf16>
    %c4 = arith.constant 4 : index
    %c0_56 = arith.constant 0 : index
    %c0_57 = arith.constant 0 : index
    %90 = vector.load %arg6[%c4, %c0_56, %c0_57] : memref<9x128x128xbf16, #tpu.memory_space<vmem>>, vector<1x128x128xbf16>
    %91 = vector.shape_cast %90 : vector<1x128x128xbf16> to vector<128x128xbf16>
    %cst_58 = arith.constant dense<0.000000e+00> : vector<128x128xf32>
    %92 = tpu.matmul %89, %91, %cst_58 {dimension_numbers = #tpu.dot_dimension_numbers<[1], [0], [0], [1], [0, 0, 1, 1], [], []>} : vector<128x128xbf16>, vector<128x128xbf16>, vector<128x128xf32> -> vector<128x128xf32>
    %93 = arith.addf %86, %92 : vector<128x128xf32>
    %94 = vector.extract_strided_slice %57 {offsets = [0, 1, 2, 0], sizes = [2, 8, 8, 128], strides = [1, 1, 1, 1]} : vector<2x10x10x128xf32> to vector<2x8x8x128xf32>
    %95 = vector.shape_cast %94 : vector<2x8x8x128xf32> to vector<128x128xf32>
    %96 = arith.truncf %95 : vector<128x128xf32> to vector<128x128xbf16>
    %c5 = arith.constant 5 : index
    %c0_59 = arith.constant 0 : index
    %c0_60 = arith.constant 0 : index
    %97 = vector.load %arg6[%c5, %c0_59, %c0_60] : memref<9x128x128xbf16, #tpu.memory_space<vmem>>, vector<1x128x128xbf16>
    %98 = vector.shape_cast %97 : vector<1x128x128xbf16> to vector<128x128xbf16>
    %cst_61 = arith.constant dense<0.000000e+00> : vector<128x128xf32>
    %99 = tpu.matmul %96, %98, %cst_61 {dimension_numbers = #tpu.dot_dimension_numbers<[1], [0], [0], [1], [0, 0, 1, 1], [], []>} : vector<128x128xbf16>, vector<128x128xbf16>, vector<128x128xf32> -> vector<128x128xf32>
    %100 = arith.addf %93, %99 : vector<128x128xf32>
    %101 = vector.extract_strided_slice %57 {offsets = [0, 2, 0, 0], sizes = [2, 8, 8, 128], strides = [1, 1, 1, 1]} : vector<2x10x10x128xf32> to vector<2x8x8x128xf32>
    %102 = vector.shape_cast %101 : vector<2x8x8x128xf32> to vector<128x128xf32>
    %103 = arith.truncf %102 : vector<128x128xf32> to vector<128x128xbf16>
    %c6 = arith.constant 6 : index
    %c0_62 = arith.constant 0 : index
    %c0_63 = arith.constant 0 : index
    %104 = vector.load %arg6[%c6, %c0_62, %c0_63] : memref<9x128x128xbf16, #tpu.memory_space<vmem>>, vector<1x128x128xbf16>
    %105 = vector.shape_cast %104 : vector<1x128x128xbf16> to vector<128x128xbf16>
    %cst_64 = arith.constant dense<0.000000e+00> : vector<128x128xf32>
    %106 = tpu.matmul %103, %105, %cst_64 {dimension_numbers = #tpu.dot_dimension_numbers<[1], [0], [0], [1], [0, 0, 1, 1], [], []>} : vector<128x128xbf16>, vector<128x128xbf16>, vector<128x128xf32> -> vector<128x128xf32>
    %107 = arith.addf %100, %106 : vector<128x128xf32>
    %108 = vector.extract_strided_slice %57 {offsets = [0, 2, 1, 0], sizes = [2, 8, 8, 128], strides = [1, 1, 1, 1]} : vector<2x10x10x128xf32> to vector<2x8x8x128xf32>
    %109 = vector.shape_cast %108 : vector<2x8x8x128xf32> to vector<128x128xf32>
    %110 = arith.truncf %109 : vector<128x128xf32> to vector<128x128xbf16>
    %c7 = arith.constant 7 : index
    %c0_65 = arith.constant 0 : index
    %c0_66 = arith.constant 0 : index
    %111 = vector.load %arg6[%c7, %c0_65, %c0_66] : memref<9x128x128xbf16, #tpu.memory_space<vmem>>, vector<1x128x128xbf16>
    %112 = vector.shape_cast %111 : vector<1x128x128xbf16> to vector<128x128xbf16>
    %cst_67 = arith.constant dense<0.000000e+00> : vector<128x128xf32>
    %113 = tpu.matmul %110, %112, %cst_67 {dimension_numbers = #tpu.dot_dimension_numbers<[1], [0], [0], [1], [0, 0, 1, 1], [], []>} : vector<128x128xbf16>, vector<128x128xbf16>, vector<128x128xf32> -> vector<128x128xf32>
    %114 = arith.addf %107, %113 : vector<128x128xf32>
    %115 = vector.extract_strided_slice %57 {offsets = [0, 2, 2, 0], sizes = [2, 8, 8, 128], strides = [1, 1, 1, 1]} : vector<2x10x10x128xf32> to vector<2x8x8x128xf32>
    %116 = vector.shape_cast %115 : vector<2x8x8x128xf32> to vector<128x128xf32>
    %117 = arith.truncf %116 : vector<128x128xf32> to vector<128x128xbf16>
    %c8 = arith.constant 8 : index
    %c0_68 = arith.constant 0 : index
    %c0_69 = arith.constant 0 : index
    %118 = vector.load %arg6[%c8, %c0_68, %c0_69] : memref<9x128x128xbf16, #tpu.memory_space<vmem>>, vector<1x128x128xbf16>
    %119 = vector.shape_cast %118 : vector<1x128x128xbf16> to vector<128x128xbf16>
    %cst_70 = arith.constant dense<0.000000e+00> : vector<128x128xf32>
    %120 = tpu.matmul %117, %119, %cst_70 {dimension_numbers = #tpu.dot_dimension_numbers<[1], [0], [0], [1], [0, 0, 1, 1], [], []>} : vector<128x128xbf16>, vector<128x128xbf16>, vector<128x128xf32> -> vector<128x128xf32>
    %121 = arith.addf %114, %120 : vector<128x128xf32>
    %c0_71 = arith.constant 0 : index
    %c0_72 = arith.constant 0 : index
    %122 = vector.load %arg7[%c0_71, %c0_72] : memref<1x128xf32, #tpu.memory_space<vmem>>, vector<1x128xf32>
    %c0_73 = arith.constant 0 : index
    %c0_74 = arith.constant 0 : index
    %123 = vector.load %arg8[%c0_73, %c0_74] : memref<1x128xf32, #tpu.memory_space<vmem>>, vector<1x128xf32>
    %cst_75 = arith.constant dense<0.000000e+00> : vector<128xf32>
    %124 = vector.multi_reduction <add>, %121, %cst_75 [0] : vector<128x128xf32> to vector<128xf32>
    %125 = vector.shape_cast %124 : vector<128xf32> to vector<1x128xf32>
    %cst_76 = arith.constant 7.812500e-03 : f32
    %126 = vector.broadcast %cst_76 : f32 to vector<1x128xf32>
    %127 = arith.mulf %125, %126 : vector<1x128xf32>
    %128 = vector.broadcast %127 : vector<1x128xf32> to vector<128x128xf32>
    %129 = arith.subf %121, %128 : vector<128x128xf32>
    %130 = arith.mulf %129, %129 : vector<128x128xf32>
    %cst_77 = arith.constant dense<0.000000e+00> : vector<128xf32>
    %131 = vector.multi_reduction <add>, %130, %cst_77 [0] : vector<128x128xf32> to vector<128xf32>
    %132 = vector.shape_cast %131 : vector<128xf32> to vector<1x128xf32>
    %cst_78 = arith.constant 7.812500e-03 : f32
    %133 = vector.broadcast %cst_78 : f32 to vector<1x128xf32>
    %134 = arith.mulf %132, %133 : vector<1x128xf32>
    %cst_79 = arith.constant 8.000000e-01 : f32
    %135 = vector.broadcast %cst_79 : f32 to vector<1x128xf32>
    %136 = arith.addf %134, %135 : vector<1x128xf32>
    %137 = math.rsqrt %136 : vector<1x128xf32>
    %138 = vector.broadcast %137 : vector<1x128xf32> to vector<128x128xf32>
    %139 = arith.mulf %129, %138 : vector<128x128xf32>
    %140 = vector.broadcast %122 : vector<1x128xf32> to vector<128x128xf32>
    %141 = arith.mulf %139, %140 : vector<128x128xf32>
    %142 = vector.broadcast %123 : vector<1x128xf32> to vector<128x128xf32>
    %143 = arith.addf %141, %142 : vector<128x128xf32>
    %cst_80 = arith.constant 0.000000e+00 : f32
    %144 = vector.broadcast %cst_80 : f32 to vector<128x128xf32>
    %145 = arith.cmpf oge, %143, %144 : vector<128x128xf32>
    %cst_81 = arith.constant 2.000000e-01 : f32
    %146 = vector.broadcast %cst_81 : f32 to vector<128x128xf32>
    %147 = arith.mulf %146, %143 : vector<128x128xf32>
    %148 = arith.select %145, %143, %147 : vector<128x128xi1>, vector<128x128xf32>
    %c0_82 = arith.constant 0 : index
    %c0_83 = arith.constant 0 : index
    %149 = vector.load %arg9[%c0_82, %c0_83] : memref<512x128xbf16, #tpu.memory_space<vmem>>, vector<512x128xbf16>
    %150 = arith.truncf %148 : vector<128x128xf32> to vector<128x128xbf16>
    %cst_84 = arith.constant dense<0.000000e+00> : vector<512x128xf32>
    %151 = tpu.matmul %149, %150, %cst_84 {dimension_numbers = #tpu.dot_dimension_numbers<[1], [0], [0], [1], [0, 0, 1, 1], [], []>} : vector<512x128xbf16>, vector<128x128xbf16>, vector<512x128xf32> -> vector<512x128xf32>
    %152 = vector.shape_cast %151 : vector<512x128xf32> to vector<2x16x16x128xf32>
    %cst_85 = arith.constant 0.000000e+00 : f32
    %153 = vector.broadcast %cst_85 : f32 to vector<2x1x18x128xf32>
    %cst_86 = arith.constant 0.000000e+00 : f32
    %154 = vector.broadcast %cst_86 : f32 to vector<2x18x1x128xf32>
    %c0_87 = arith.constant 0 : index
    %c1_88 = arith.constant 1 : index
    %c1_89 = arith.constant 1 : index
    %c0_90 = arith.constant 0 : index
    %155 = vector.load %arg17[%c0_87, %c1_88, %c1_89, %c0_90] : memref<2x18x18x128xf32, #tpu.memory_space<vmem>>, vector<2x16x16x128xf32>
    tpu.vector_store %arg17[%c0_87, %c1_88, %c1_89, %c0_90], %152 {strides = array<i32>} : memref<2x18x18x128xf32, #tpu.memory_space<vmem>>, vector<2x16x16x128xf32>,
    %c0_91 = arith.constant 0 : index
    %c0_92 = arith.constant 0 : index
    %c0_93 = arith.constant 0 : index
    %c0_94 = arith.constant 0 : index
    %156 = vector.load %arg17[%c0_91, %c0_92, %c0_93, %c0_94] : memref<2x18x18x128xf32, #tpu.memory_space<vmem>>, vector<2x1x18x128xf32>
    tpu.vector_store %arg17[%c0_91, %c0_92, %c0_93, %c0_94], %153 {strides = array<i32>} : memref<2x18x18x128xf32, #tpu.memory_space<vmem>>, vector<2x1x18x128xf32>,
    %c0_95 = arith.constant 0 : index
    %c17 = arith.constant 17 : index
    %c0_96 = arith.constant 0 : index
    %c0_97 = arith.constant 0 : index
    %157 = vector.load %arg17[%c0_95, %c17, %c0_96, %c0_97] : memref<2x18x18x128xf32, #tpu.memory_space<vmem>>, vector<2x1x18x128xf32>
    tpu.vector_store %arg17[%c0_95, %c17, %c0_96, %c0_97], %153 {strides = array<i32>} : memref<2x18x18x128xf32, #tpu.memory_space<vmem>>, vector<2x1x18x128xf32>,
    %c0_98 = arith.constant 0 : index
    %c0_99 = arith.constant 0 : index
    %c0_100 = arith.constant 0 : index
    %c0_101 = arith.constant 0 : index
    %158 = vector.load %arg17[%c0_98, %c0_99, %c0_100, %c0_101] : memref<2x18x18x128xf32, #tpu.memory_space<vmem>>, vector<2x18x1x128xf32>
    tpu.vector_store %arg17[%c0_98, %c0_99, %c0_100, %c0_101], %154 {strides = array<i32>} : memref<2x18x18x128xf32, #tpu.memory_space<vmem>>, vector<2x18x1x128xf32>,
    %c0_102 = arith.constant 0 : index
    %c0_103 = arith.constant 0 : index
    %c17_104 = arith.constant 17 : index
    %c0_105 = arith.constant 0 : index
    %159 = vector.load %arg17[%c0_102, %c0_103, %c17_104, %c0_105] : memref<2x18x18x128xf32, #tpu.memory_space<vmem>>, vector<2x18x1x128xf32>
    tpu.vector_store %arg17[%c0_102, %c0_103, %c17_104, %c0_105], %154 {strides = array<i32>} : memref<2x18x18x128xf32, #tpu.memory_space<vmem>>, vector<2x18x1x128xf32>,
    %c0_106 = arith.constant 0 : index
    %c0_107 = arith.constant 0 : index
    %c0_108 = arith.constant 0 : index
    %c0_109 = arith.constant 0 : index
    %160 = vector.load %arg17[%c0_106, %c0_107, %c0_108, %c0_109] : memref<2x18x18x128xf32, #tpu.memory_space<vmem>>, vector<2x18x18x128xf32>
    %cst_110 = arith.constant 0.000000e+00 : f32
    %161 = vector.broadcast %cst_110 : f32 to vector<512x128xf32>
    %162 = vector.extract_strided_slice %160 {offsets = [0, 0, 0, 0], sizes = [2, 16, 16, 128], strides = [1, 1, 1, 1]} : vector<2x18x18x128xf32> to vector<2x16x16x128xf32>
    %163 = vector.shape_cast %162 : vector<2x16x16x128xf32> to vector<512x128xf32>
    %164 = arith.truncf %163 : vector<512x128xf32> to vector<512x128xbf16>
    %c0_111 = arith.constant 0 : index
    %c0_112 = arith.constant 0 : index
    %c0_113 = arith.constant 0 : index
    %165 = vector.load %arg10[%c0_111, %c0_112, %c0_113] : memref<9x128x128xbf16, #tpu.memory_space<vmem>>, vector<1x128x128xbf16>
    %166 = vector.shape_cast %165 : vector<1x128x128xbf16> to vector<128x128xbf16>
    %cst_114 = arith.constant dense<0.000000e+00> : vector<512x128xf32>
    %167 = tpu.matmul %164, %166, %cst_114 {dimension_numbers = #tpu.dot_dimension_numbers<[1], [0], [0], [1], [0, 0, 1, 1], [], []>} : vector<512x128xbf16>, vector<128x128xbf16>, vector<512x128xf32> -> vector<512x128xf32>
    %168 = arith.addf %161, %167 : vector<512x128xf32>
    %169 = vector.extract_strided_slice %160 {offsets = [0, 0, 1, 0], sizes = [2, 16, 16, 128], strides = [1, 1, 1, 1]} : vector<2x18x18x128xf32> to vector<2x16x16x128xf32>
    %170 = vector.shape_cast %169 : vector<2x16x16x128xf32> to vector<512x128xf32>
    %171 = arith.truncf %170 : vector<512x128xf32> to vector<512x128xbf16>
    %c1_115 = arith.constant 1 : index
    %c0_116 = arith.constant 0 : index
    %c0_117 = arith.constant 0 : index
    %172 = vector.load %arg10[%c1_115, %c0_116, %c0_117] : memref<9x128x128xbf16, #tpu.memory_space<vmem>>, vector<1x128x128xbf16>
    %173 = vector.shape_cast %172 : vector<1x128x128xbf16> to vector<128x128xbf16>
    %cst_118 = arith.constant dense<0.000000e+00> : vector<512x128xf32>
    %174 = tpu.matmul %171, %173, %cst_118 {dimension_numbers = #tpu.dot_dimension_numbers<[1], [0], [0], [1], [0, 0, 1, 1], [], []>} : vector<512x128xbf16>, vector<128x128xbf16>, vector<512x128xf32> -> vector<512x128xf32>
    %175 = arith.addf %168, %174 : vector<512x128xf32>
    %176 = vector.extract_strided_slice %160 {offsets = [0, 0, 2, 0], sizes = [2, 16, 16, 128], strides = [1, 1, 1, 1]} : vector<2x18x18x128xf32> to vector<2x16x16x128xf32>
    %177 = vector.shape_cast %176 : vector<2x16x16x128xf32> to vector<512x128xf32>
    %178 = arith.truncf %177 : vector<512x128xf32> to vector<512x128xbf16>
    %c2_119 = arith.constant 2 : index
    %c0_120 = arith.constant 0 : index
    %c0_121 = arith.constant 0 : index
    %179 = vector.load %arg10[%c2_119, %c0_120, %c0_121] : memref<9x128x128xbf16, #tpu.memory_space<vmem>>, vector<1x128x128xbf16>
    %180 = vector.shape_cast %179 : vector<1x128x128xbf16> to vector<128x128xbf16>
    %cst_122 = arith.constant dense<0.000000e+00> : vector<512x128xf32>
    %181 = tpu.matmul %178, %180, %cst_122 {dimension_numbers = #tpu.dot_dimension_numbers<[1], [0], [0], [1], [0, 0, 1, 1], [], []>} : vector<512x128xbf16>, vector<128x128xbf16>, vector<512x128xf32> -> vector<512x128xf32>
    %182 = arith.addf %175, %181 : vector<512x128xf32>
    %183 = vector.extract_strided_slice %160 {offsets = [0, 1, 0, 0], sizes = [2, 16, 16, 128], strides = [1, 1, 1, 1]} : vector<2x18x18x128xf32> to vector<2x16x16x128xf32>
    %184 = vector.shape_cast %183 : vector<2x16x16x128xf32> to vector<512x128xf32>
    %185 = arith.truncf %184 : vector<512x128xf32> to vector<512x128xbf16>
    %c3_123 = arith.constant 3 : index
    %c0_124 = arith.constant 0 : index
    %c0_125 = arith.constant 0 : index
    %186 = vector.load %arg10[%c3_123, %c0_124, %c0_125] : memref<9x128x128xbf16, #tpu.memory_space<vmem>>, vector<1x128x128xbf16>
    %187 = vector.shape_cast %186 : vector<1x128x128xbf16> to vector<128x128xbf16>
    %cst_126 = arith.constant dense<0.000000e+00> : vector<512x128xf32>
    %188 = tpu.matmul %185, %187, %cst_126 {dimension_numbers = #tpu.dot_dimension_numbers<[1], [0], [0], [1], [0, 0, 1, 1], [], []>} : vector<512x128xbf16>, vector<128x128xbf16>, vector<512x128xf32> -> vector<512x128xf32>
    %189 = arith.addf %182, %188 : vector<512x128xf32>
    %190 = vector.extract_strided_slice %160 {offsets = [0, 1, 1, 0], sizes = [2, 16, 16, 128], strides = [1, 1, 1, 1]} : vector<2x18x18x128xf32> to vector<2x16x16x128xf32>
    %191 = vector.shape_cast %190 : vector<2x16x16x128xf32> to vector<512x128xf32>
    %192 = arith.truncf %191 : vector<512x128xf32> to vector<512x128xbf16>
    %c4_127 = arith.constant 4 : index
    %c0_128 = arith.constant 0 : index
    %c0_129 = arith.constant 0 : index
    %193 = vector.load %arg10[%c4_127, %c0_128, %c0_129] : memref<9x128x128xbf16, #tpu.memory_space<vmem>>, vector<1x128x128xbf16>
    %194 = vector.shape_cast %193 : vector<1x128x128xbf16> to vector<128x128xbf16>
    %cst_130 = arith.constant dense<0.000000e+00> : vector<512x128xf32>
    %195 = tpu.matmul %192, %194, %cst_130 {dimension_numbers = #tpu.dot_dimension_numbers<[1], [0], [0], [1], [0, 0, 1, 1], [], []>} : vector<512x128xbf16>, vector<128x128xbf16>, vector<512x128xf32> -> vector<512x128xf32>
    %196 = arith.addf %189, %195 : vector<512x128xf32>
    %197 = vector.extract_strided_slice %160 {offsets = [0, 1, 2, 0], sizes = [2, 16, 16, 128], strides = [1, 1, 1, 1]} : vector<2x18x18x128xf32> to vector<2x16x16x128xf32>
    %198 = vector.shape_cast %197 : vector<2x16x16x128xf32> to vector<512x128xf32>
    %199 = arith.truncf %198 : vector<512x128xf32> to vector<512x128xbf16>
    %c5_131 = arith.constant 5 : index
    %c0_132 = arith.constant 0 : index
    %c0_133 = arith.constant 0 : index
    %200 = vector.load %arg10[%c5_131, %c0_132, %c0_133] : memref<9x128x128xbf16, #tpu.memory_space<vmem>>, vector<1x128x128xbf16>
    %201 = vector.shape_cast %200 : vector<1x128x128xbf16> to vector<128x128xbf16>
    %cst_134 = arith.constant dense<0.000000e+00> : vector<512x128xf32>
    %202 = tpu.matmul %199, %201, %cst_134 {dimension_numbers = #tpu.dot_dimension_numbers<[1], [0], [0], [1], [0, 0, 1, 1], [], []>} : vector<512x128xbf16>, vector<128x128xbf16>, vector<512x128xf32> -> vector<512x128xf32>
    %203 = arith.addf %196, %202 : vector<512x128xf32>
    %204 = vector.extract_strided_slice %160 {offsets = [0, 2, 0, 0], sizes = [2, 16, 16, 128], strides = [1, 1, 1, 1]} : vector<2x18x18x128xf32> to vector<2x16x16x128xf32>
    %205 = vector.shape_cast %204 : vector<2x16x16x128xf32> to vector<512x128xf32>
    %206 = arith.truncf %205 : vector<512x128xf32> to vector<512x128xbf16>
    %c6_135 = arith.constant 6 : index
    %c0_136 = arith.constant 0 : index
    %c0_137 = arith.constant 0 : index
    %207 = vector.load %arg10[%c6_135, %c0_136, %c0_137] : memref<9x128x128xbf16, #tpu.memory_space<vmem>>, vector<1x128x128xbf16>
    %208 = vector.shape_cast %207 : vector<1x128x128xbf16> to vector<128x128xbf16>
    %cst_138 = arith.constant dense<0.000000e+00> : vector<512x128xf32>
    %209 = tpu.matmul %206, %208, %cst_138 {dimension_numbers = #tpu.dot_dimension_numbers<[1], [0], [0], [1], [0, 0, 1, 1], [], []>} : vector<512x128xbf16>, vector<128x128xbf16>, vector<512x128xf32> -> vector<512x128xf32>
    %210 = arith.addf %203, %209 : vector<512x128xf32>
    %211 = vector.extract_strided_slice %160 {offsets = [0, 2, 1, 0], sizes = [2, 16, 16, 128], strides = [1, 1, 1, 1]} : vector<2x18x18x128xf32> to vector<2x16x16x128xf32>
    %212 = vector.shape_cast %211 : vector<2x16x16x128xf32> to vector<512x128xf32>
    %213 = arith.truncf %212 : vector<512x128xf32> to vector<512x128xbf16>
    %c7_139 = arith.constant 7 : index
    %c0_140 = arith.constant 0 : index
    %c0_141 = arith.constant 0 : index
    %214 = vector.load %arg10[%c7_139, %c0_140, %c0_141] : memref<9x128x128xbf16, #tpu.memory_space<vmem>>, vector<1x128x128xbf16>
    %215 = vector.shape_cast %214 : vector<1x128x128xbf16> to vector<128x128xbf16>
    %cst_142 = arith.constant dense<0.000000e+00> : vector<512x128xf32>
    %216 = tpu.matmul %213, %215, %cst_142 {dimension_numbers = #tpu.dot_dimension_numbers<[1], [0], [0], [1], [0, 0, 1, 1], [], []>} : vector<512x128xbf16>, vector<128x128xbf16>, vector<512x128xf32> -> vector<512x128xf32>
    %217 = arith.addf %210, %216 : vector<512x128xf32>
    %218 = vector.extract_strided_slice %160 {offsets = [0, 2, 2, 0], sizes = [2, 16, 16, 128], strides = [1, 1, 1, 1]} : vector<2x18x18x128xf32> to vector<2x16x16x128xf32>
    %219 = vector.shape_cast %218 : vector<2x16x16x128xf32> to vector<512x128xf32>
    %220 = arith.truncf %219 : vector<512x128xf32> to vector<512x128xbf16>
    %c8_143 = arith.constant 8 : index
    %c0_144 = arith.constant 0 : index
    %c0_145 = arith.constant 0 : index
    %221 = vector.load %arg10[%c8_143, %c0_144, %c0_145] : memref<9x128x128xbf16, #tpu.memory_space<vmem>>, vector<1x128x128xbf16>
    %222 = vector.shape_cast %221 : vector<1x128x128xbf16> to vector<128x128xbf16>
    %cst_146 = arith.constant dense<0.000000e+00> : vector<512x128xf32>
    %223 = tpu.matmul %220, %222, %cst_146 {dimension_numbers = #tpu.dot_dimension_numbers<[1], [0], [0], [1], [0, 0, 1, 1], [], []>} : vector<512x128xbf16>, vector<128x128xbf16>, vector<512x128xf32> -> vector<512x128xf32>
    %224 = arith.addf %217, %223 : vector<512x128xf32>
    %c0_147 = arith.constant 0 : index
    %c0_148 = arith.constant 0 : index
    %225 = vector.load %arg11[%c0_147, %c0_148] : memref<1x128xf32, #tpu.memory_space<vmem>>, vector<1x128xf32>
    %c0_149 = arith.constant 0 : index
    %c0_150 = arith.constant 0 : index
    %226 = vector.load %arg12[%c0_149, %c0_150] : memref<1x128xf32, #tpu.memory_space<vmem>>, vector<1x128xf32>
    %cst_151 = arith.constant dense<0.000000e+00> : vector<128xf32>
    %227 = vector.multi_reduction <add>, %224, %cst_151 [0] : vector<512x128xf32> to vector<128xf32>
    %228 = vector.shape_cast %227 : vector<128xf32> to vector<1x128xf32>
    %cst_152 = arith.constant 0.001953125 : f32
    %229 = vector.broadcast %cst_152 : f32 to vector<1x128xf32>
    %230 = arith.mulf %228, %229 : vector<1x128xf32>
    %231 = vector.broadcast %230 : vector<1x128xf32> to vector<512x128xf32>
    %232 = arith.subf %224, %231 : vector<512x128xf32>
    %233 = arith.mulf %232, %232 : vector<512x128xf32>
    %cst_153 = arith.constant dense<0.000000e+00> : vector<128xf32>
    %234 = vector.multi_reduction <add>, %233, %cst_153 [0] : vector<512x128xf32> to vector<128xf32>
    %235 = vector.shape_cast %234 : vector<128xf32> to vector<1x128xf32>
    %cst_154 = arith.constant 0.001953125 : f32
    %236 = vector.broadcast %cst_154 : f32 to vector<1x128xf32>
    %237 = arith.mulf %235, %236 : vector<1x128xf32>
    %cst_155 = arith.constant 8.000000e-01 : f32
    %238 = vector.broadcast %cst_155 : f32 to vector<1x128xf32>
    %239 = arith.addf %237, %238 : vector<1x128xf32>
    %240 = math.rsqrt %239 : vector<1x128xf32>
    %241 = vector.broadcast %240 : vector<1x128xf32> to vector<512x128xf32>
    %242 = arith.mulf %232, %241 : vector<512x128xf32>
    %243 = vector.broadcast %225 : vector<1x128xf32> to vector<512x128xf32>
    %244 = arith.mulf %242, %243 : vector<512x128xf32>
    %245 = vector.broadcast %226 : vector<1x128xf32> to vector<512x128xf32>
    %246 = arith.addf %244, %245 : vector<512x128xf32>
    %cst_156 = arith.constant 0.000000e+00 : f32
    %247 = vector.broadcast %cst_156 : f32 to vector<512x128xf32>
    %248 = arith.cmpf oge, %246, %247 : vector<512x128xf32>
    %cst_157 = arith.constant 2.000000e-01 : f32
    %249 = vector.broadcast %cst_157 : f32 to vector<512x128xf32>
    %250 = arith.mulf %249, %246 : vector<512x128xf32>
    %251 = arith.select %248, %246, %250 : vector<512x128xi1>, vector<512x128xf32>
    %252 = vector.shape_cast %251 : vector<512x128xf32> to vector<2x16x16x128xf32>
    %cst_158 = arith.constant 0.000000e+00 : f32
    %253 = vector.broadcast %cst_158 : f32 to vector<2x1x18x128xf32>
    %cst_159 = arith.constant 0.000000e+00 : f32
    %254 = vector.broadcast %cst_159 : f32 to vector<2x18x1x128xf32>
    %c0_160 = arith.constant 0 : index
    %c1_161 = arith.constant 1 : index
    %c1_162 = arith.constant 1 : index
    %c0_163 = arith.constant 0 : index
    %255 = vector.load %arg18[%c0_160, %c1_161, %c1_162, %c0_163] : memref<2x18x18x128xf32, #tpu.memory_space<vmem>>, vector<2x16x16x128xf32>
    tpu.vector_store %arg18[%c0_160, %c1_161, %c1_162, %c0_163], %252 {strides = array<i32>} : memref<2x18x18x128xf32, #tpu.memory_space<vmem>>, vector<2x16x16x128xf32>,
    %c0_164 = arith.constant 0 : index
    %c0_165 = arith.constant 0 : index
    %c0_166 = arith.constant 0 : index
    %c0_167 = arith.constant 0 : index
    %256 = vector.load %arg18[%c0_164, %c0_165, %c0_166, %c0_167] : memref<2x18x18x128xf32, #tpu.memory_space<vmem>>, vector<2x1x18x128xf32>
    tpu.vector_store %arg18[%c0_164, %c0_165, %c0_166, %c0_167], %253 {strides = array<i32>} : memref<2x18x18x128xf32, #tpu.memory_space<vmem>>, vector<2x1x18x128xf32>,
    %c0_168 = arith.constant 0 : index
    %c17_169 = arith.constant 17 : index
    %c0_170 = arith.constant 0 : index
    %c0_171 = arith.constant 0 : index
    %257 = vector.load %arg18[%c0_168, %c17_169, %c0_170, %c0_171] : memref<2x18x18x128xf32, #tpu.memory_space<vmem>>, vector<2x1x18x128xf32>
    tpu.vector_store %arg18[%c0_168, %c17_169, %c0_170, %c0_171], %253 {strides = array<i32>} : memref<2x18x18x128xf32, #tpu.memory_space<vmem>>, vector<2x1x18x128xf32>,
    %c0_172 = arith.constant 0 : index
    %c0_173 = arith.constant 0 : index
    %c0_174 = arith.constant 0 : index
    %c0_175 = arith.constant 0 : index
    %258 = vector.load %arg18[%c0_172, %c0_173, %c0_174, %c0_175] : memref<2x18x18x128xf32, #tpu.memory_space<vmem>>, vector<2x18x1x128xf32>
    tpu.vector_store %arg18[%c0_172, %c0_173, %c0_174, %c0_175], %254 {strides = array<i32>} : memref<2x18x18x128xf32, #tpu.memory_space<vmem>>, vector<2x18x1x128xf32>,
    %c0_176 = arith.constant 0 : index
    %c0_177 = arith.constant 0 : index
    %c17_178 = arith.constant 17 : index
    %c0_179 = arith.constant 0 : index
    %259 = vector.load %arg18[%c0_176, %c0_177, %c17_178, %c0_179] : memref<2x18x18x128xf32, #tpu.memory_space<vmem>>, vector<2x18x1x128xf32>
    tpu.vector_store %arg18[%c0_176, %c0_177, %c17_178, %c0_179], %254 {strides = array<i32>} : memref<2x18x18x128xf32, #tpu.memory_space<vmem>>, vector<2x18x1x128xf32>,
    %c0_180 = arith.constant 0 : index
    %c0_181 = arith.constant 0 : index
    %c0_182 = arith.constant 0 : index
    %c0_183 = arith.constant 0 : index
    %260 = vector.load %arg18[%c0_180, %c0_181, %c0_182, %c0_183] : memref<2x18x18x128xf32, #tpu.memory_space<vmem>>, vector<2x18x18x128xf32>
    %cst_184 = arith.constant 0.000000e+00 : f32
    %261 = vector.broadcast %cst_184 : f32 to vector<512x128xf32>
    %262 = vector.extract_strided_slice %260 {offsets = [0, 0, 0, 0], sizes = [2, 16, 16, 128], strides = [1, 1, 1, 1]} : vector<2x18x18x128xf32> to vector<2x16x16x128xf32>
    %263 = vector.shape_cast %262 : vector<2x16x16x128xf32> to vector<512x128xf32>
    %264 = arith.truncf %263 : vector<512x128xf32> to vector<512x128xbf16>
    %c0_185 = arith.constant 0 : index
    %c0_186 = arith.constant 0 : index
    %c0_187 = arith.constant 0 : index
    %265 = vector.load %arg13[%c0_185, %c0_186, %c0_187] : memref<9x128x128xbf16, #tpu.memory_space<vmem>>, vector<1x128x128xbf16>
    %266 = vector.shape_cast %265 : vector<1x128x128xbf16> to vector<128x128xbf16>
    %cst_188 = arith.constant dense<0.000000e+00> : vector<512x128xf32>
    %267 = tpu.matmul %264, %266, %cst_188 {dimension_numbers = #tpu.dot_dimension_numbers<[1], [0], [0], [1], [0, 0, 1, 1], [], []>} : vector<512x128xbf16>, vector<128x128xbf16>, vector<512x128xf32> -> vector<512x128xf32>
    %268 = arith.addf %261, %267 : vector<512x128xf32>
    %269 = vector.extract_strided_slice %260 {offsets = [0, 0, 1, 0], sizes = [2, 16, 16, 128], strides = [1, 1, 1, 1]} : vector<2x18x18x128xf32> to vector<2x16x16x128xf32>
    %270 = vector.shape_cast %269 : vector<2x16x16x128xf32> to vector<512x128xf32>
    %271 = arith.truncf %270 : vector<512x128xf32> to vector<512x128xbf16>
    %c1_189 = arith.constant 1 : index
    %c0_190 = arith.constant 0 : index
    %c0_191 = arith.constant 0 : index
    %272 = vector.load %arg13[%c1_189, %c0_190, %c0_191] : memref<9x128x128xbf16, #tpu.memory_space<vmem>>, vector<1x128x128xbf16>
    %273 = vector.shape_cast %272 : vector<1x128x128xbf16> to vector<128x128xbf16>
    %cst_192 = arith.constant dense<0.000000e+00> : vector<512x128xf32>
    %274 = tpu.matmul %271, %273, %cst_192 {dimension_numbers = #tpu.dot_dimension_numbers<[1], [0], [0], [1], [0, 0, 1, 1], [], []>} : vector<512x128xbf16>, vector<128x128xbf16>, vector<512x128xf32> -> vector<512x128xf32>
    %275 = arith.addf %268, %274 : vector<512x128xf32>
    %276 = vector.extract_strided_slice %260 {offsets = [0, 0, 2, 0], sizes = [2, 16, 16, 128], strides = [1, 1, 1, 1]} : vector<2x18x18x128xf32> to vector<2x16x16x128xf32>
    %277 = vector.shape_cast %276 : vector<2x16x16x128xf32> to vector<512x128xf32>
    %278 = arith.truncf %277 : vector<512x128xf32> to vector<512x128xbf16>
    %c2_193 = arith.constant 2 : index
    %c0_194 = arith.constant 0 : index
    %c0_195 = arith.constant 0 : index
    %279 = vector.load %arg13[%c2_193, %c0_194, %c0_195] : memref<9x128x128xbf16, #tpu.memory_space<vmem>>, vector<1x128x128xbf16>
    %280 = vector.shape_cast %279 : vector<1x128x128xbf16> to vector<128x128xbf16>
    %cst_196 = arith.constant dense<0.000000e+00> : vector<512x128xf32>
    %281 = tpu.matmul %278, %280, %cst_196 {dimension_numbers = #tpu.dot_dimension_numbers<[1], [0], [0], [1], [0, 0, 1, 1], [], []>} : vector<512x128xbf16>, vector<128x128xbf16>, vector<512x128xf32> -> vector<512x128xf32>
    %282 = arith.addf %275, %281 : vector<512x128xf32>
    %283 = vector.extract_strided_slice %260 {offsets = [0, 1, 0, 0], sizes = [2, 16, 16, 128], strides = [1, 1, 1, 1]} : vector<2x18x18x128xf32> to vector<2x16x16x128xf32>
    %284 = vector.shape_cast %283 : vector<2x16x16x128xf32> to vector<512x128xf32>
    %285 = arith.truncf %284 : vector<512x128xf32> to vector<512x128xbf16>
    %c3_197 = arith.constant 3 : index
    %c0_198 = arith.constant 0 : index
    %c0_199 = arith.constant 0 : index
    %286 = vector.load %arg13[%c3_197, %c0_198, %c0_199] : memref<9x128x128xbf16, #tpu.memory_space<vmem>>, vector<1x128x128xbf16>
    %287 = vector.shape_cast %286 : vector<1x128x128xbf16> to vector<128x128xbf16>
    %cst_200 = arith.constant dense<0.000000e+00> : vector<512x128xf32>
    %288 = tpu.matmul %285, %287, %cst_200 {dimension_numbers = #tpu.dot_dimension_numbers<[1], [0], [0], [1], [0, 0, 1, 1], [], []>} : vector<512x128xbf16>, vector<128x128xbf16>, vector<512x128xf32> -> vector<512x128xf32>
    %289 = arith.addf %282, %288 : vector<512x128xf32>
    %290 = vector.extract_strided_slice %260 {offsets = [0, 1, 1, 0], sizes = [2, 16, 16, 128], strides = [1, 1, 1, 1]} : vector<2x18x18x128xf32> to vector<2x16x16x128xf32>
    %291 = vector.shape_cast %290 : vector<2x16x16x128xf32> to vector<512x128xf32>
    %292 = arith.truncf %291 : vector<512x128xf32> to vector<512x128xbf16>
    %c4_201 = arith.constant 4 : index
    %c0_202 = arith.constant 0 : index
    %c0_203 = arith.constant 0 : index
    %293 = vector.load %arg13[%c4_201, %c0_202, %c0_203] : memref<9x128x128xbf16, #tpu.memory_space<vmem>>, vector<1x128x128xbf16>
    %294 = vector.shape_cast %293 : vector<1x128x128xbf16> to vector<128x128xbf16>
    %cst_204 = arith.constant dense<0.000000e+00> : vector<512x128xf32>
    %295 = tpu.matmul %292, %294, %cst_204 {dimension_numbers = #tpu.dot_dimension_numbers<[1], [0], [0], [1], [0, 0, 1, 1], [], []>} : vector<512x128xbf16>, vector<128x128xbf16>, vector<512x128xf32> -> vector<512x128xf32>
    %296 = arith.addf %289, %295 : vector<512x128xf32>
    %297 = vector.extract_strided_slice %260 {offsets = [0, 1, 2, 0], sizes = [2, 16, 16, 128], strides = [1, 1, 1, 1]} : vector<2x18x18x128xf32> to vector<2x16x16x128xf32>
    %298 = vector.shape_cast %297 : vector<2x16x16x128xf32> to vector<512x128xf32>
    %299 = arith.truncf %298 : vector<512x128xf32> to vector<512x128xbf16>
    %c5_205 = arith.constant 5 : index
    %c0_206 = arith.constant 0 : index
    %c0_207 = arith.constant 0 : index
    %300 = vector.load %arg13[%c5_205, %c0_206, %c0_207] : memref<9x128x128xbf16, #tpu.memory_space<vmem>>, vector<1x128x128xbf16>
    %301 = vector.shape_cast %300 : vector<1x128x128xbf16> to vector<128x128xbf16>
    %cst_208 = arith.constant dense<0.000000e+00> : vector<512x128xf32>
    %302 = tpu.matmul %299, %301, %cst_208 {dimension_numbers = #tpu.dot_dimension_numbers<[1], [0], [0], [1], [0, 0, 1, 1], [], []>} : vector<512x128xbf16>, vector<128x128xbf16>, vector<512x128xf32> -> vector<512x128xf32>
    %303 = arith.addf %296, %302 : vector<512x128xf32>
    %304 = vector.extract_strided_slice %260 {offsets = [0, 2, 0, 0], sizes = [2, 16, 16, 128], strides = [1, 1, 1, 1]} : vector<2x18x18x128xf32> to vector<2x16x16x128xf32>
    %305 = vector.shape_cast %304 : vector<2x16x16x128xf32> to vector<512x128xf32>
    %306 = arith.truncf %305 : vector<512x128xf32> to vector<512x128xbf16>
    %c6_209 = arith.constant 6 : index
    %c0_210 = arith.constant 0 : index
    %c0_211 = arith.constant 0 : index
    %307 = vector.load %arg13[%c6_209, %c0_210, %c0_211] : memref<9x128x128xbf16, #tpu.memory_space<vmem>>, vector<1x128x128xbf16>
    %308 = vector.shape_cast %307 : vector<1x128x128xbf16> to vector<128x128xbf16>
    %cst_212 = arith.constant dense<0.000000e+00> : vector<512x128xf32>
    %309 = tpu.matmul %306, %308, %cst_212 {dimension_numbers = #tpu.dot_dimension_numbers<[1], [0], [0], [1], [0, 0, 1, 1], [], []>} : vector<512x128xbf16>, vector<128x128xbf16>, vector<512x128xf32> -> vector<512x128xf32>
    %310 = arith.addf %303, %309 : vector<512x128xf32>
    %311 = vector.extract_strided_slice %260 {offsets = [0, 2, 1, 0], sizes = [2, 16, 16, 128], strides = [1, 1, 1, 1]} : vector<2x18x18x128xf32> to vector<2x16x16x128xf32>
    %312 = vector.shape_cast %311 : vector<2x16x16x128xf32> to vector<512x128xf32>
    %313 = arith.truncf %312 : vector<512x128xf32> to vector<512x128xbf16>
    %c7_213 = arith.constant 7 : index
    %c0_214 = arith.constant 0 : index
    %c0_215 = arith.constant 0 : index
    %314 = vector.load %arg13[%c7_213, %c0_214, %c0_215] : memref<9x128x128xbf16, #tpu.memory_space<vmem>>, vector<1x128x128xbf16>
    %315 = vector.shape_cast %314 : vector<1x128x128xbf16> to vector<128x128xbf16>
    %cst_216 = arith.constant dense<0.000000e+00> : vector<512x128xf32>
    %316 = tpu.matmul %313, %315, %cst_216 {dimension_numbers = #tpu.dot_dimension_numbers<[1], [0], [0], [1], [0, 0, 1, 1], [], []>} : vector<512x128xbf16>, vector<128x128xbf16>, vector<512x128xf32> -> vector<512x128xf32>
    %317 = arith.addf %310, %316 : vector<512x128xf32>
    %318 = vector.extract_strided_slice %260 {offsets = [0, 2, 2, 0], sizes = [2, 16, 16, 128], strides = [1, 1, 1, 1]} : vector<2x18x18x128xf32> to vector<2x16x16x128xf32>
    %319 = vector.shape_cast %318 : vector<2x16x16x128xf32> to vector<512x128xf32>
    %320 = arith.truncf %319 : vector<512x128xf32> to vector<512x128xbf16>
    %c8_217 = arith.constant 8 : index
    %c0_218 = arith.constant 0 : index
    %c0_219 = arith.constant 0 : index
    %321 = vector.load %arg13[%c8_217, %c0_218, %c0_219] : memref<9x128x128xbf16, #tpu.memory_space<vmem>>, vector<1x128x128xbf16>
    %322 = vector.shape_cast %321 : vector<1x128x128xbf16> to vector<128x128xbf16>
    %cst_220 = arith.constant dense<0.000000e+00> : vector<512x128xf32>
    %323 = tpu.matmul %320, %322, %cst_220 {dimension_numbers = #tpu.dot_dimension_numbers<[1], [0], [0], [1], [0, 0, 1, 1], [], []>} : vector<512x128xbf16>, vector<128x128xbf16>, vector<512x128xf32> -> vector<512x128xf32>
    %324 = arith.addf %317, %323 : vector<512x128xf32>
    %c0_221 = arith.constant 0 : index
    %c0_222 = arith.constant 0 : index
    %325 = vector.load %arg14[%c0_221, %c0_222] : memref<1x128xf32, #tpu.memory_space<vmem>>, vector<1x128xf32>
    %326 = vector.broadcast %325 : vector<1x128xf32> to vector<512x128xf32>
    %327 = arith.addf %324, %326 : vector<512x128xf32>
    %328 = math.tanh %327 : vector<512x128xf32>
    %cst_223 = arith.constant dense<0.000000e+00> : vector<128xf32>
    %329 = vector.multi_reduction <add>, %328, %cst_223 [0] : vector<512x128xf32> to vector<128xf32>
    %330 = vector.shape_cast %329 : vector<128xf32> to vector<1x128xf32>
    %cst_224 = arith.constant 0.001953125 : f32
    %331 = vector.broadcast %cst_224 : f32 to vector<1x128xf32>
    %332 = arith.mulf %330, %331 : vector<1x128xf32>
    %333 = vector.broadcast %332 : vector<1x128xf32> to vector<512x128xf32>
    %334 = arith.subf %328, %333 : vector<512x128xf32>
    %335 = arith.mulf %334, %334 : vector<512x128xf32>
    %cst_225 = arith.constant dense<0.000000e+00> : vector<128xf32>
    %336 = vector.multi_reduction <add>, %335, %cst_225 [0] : vector<512x128xf32> to vector<128xf32>
    %337 = vector.shape_cast %336 : vector<128xf32> to vector<1x128xf32>
    %cst_226 = arith.constant 0.001953125 : f32
    %338 = vector.broadcast %cst_226 : f32 to vector<1x128xf32>
    %339 = arith.mulf %337, %338 : vector<1x128xf32>
    %cst_227 = arith.constant 9.99999974E-6 : f32
    %340 = vector.broadcast %cst_227 : f32 to vector<1x128xf32>
    %341 = arith.addf %339, %340 : vector<1x128xf32>
    %342 = math.rsqrt %341 : vector<1x128xf32>
    %343 = vector.broadcast %342 : vector<1x128xf32> to vector<512x128xf32>
    %344 = arith.mulf %334, %343 : vector<512x128xf32>
    %c0_228 = arith.constant 0 : index
    %c0_229 = arith.constant 0 : index
    %345 = vector.load %arg15[%c0_228, %c0_229] : memref<512x128xf32, #tpu.memory_space<vmem>>, vector<512x128xf32>
    tpu.vector_store %arg15[%c0_228, %c0_229], %344 {strides = array<i32>} : memref<512x128xf32, #tpu.memory_space<vmem>>, vector<512x128xf32>,
    return
  }
}

</mosaic_0001>

<bundles_post_ra>
// kernel: generator_forward.1
= control target key start
LH: loop header
LB: loop body
LE: loop exit
PB: predicated region body
PF: predicated region fallthrough
CT: control target
= control target key end

     0   :  { %s24134_s0 = inlined_call_operand.vmem [shape: f32[2,32], index: 0, kind: input, shape index: {}]   ;;  %s24135_s1 = inlined_call_operand.hbm [shape: bf16[32,2048], index: 1, kind: input, shape index: {}]   ;;  %s24136_s2 = inlined_call_operand.vmem [shape: f32[1,2048], index: 2, kind: input, shape index: {}]   ;;  %s24137_s3 = inlined_call_operand.vmem [shape: f32[1,128], index: 3, kind: input, shape index: {}]   ;;  %s24138_s4 = inlined_call_operand.vmem [shape: f32[1,128], index: 4, kind: input, shape index: {}]   ;;  %s24139_s5 = inlined_call_operand.vmem [shape: bf16[128,32], index: 5, kind: input, shape index: {}]   ;;  %s24140_s6 = inlined_call_operand.hbm [shape: bf16[9,128,128], index: 6, kind: input, shape index: {}]   ;;  %s24141_s7 = inlined_call_operand.vmem [shape: f32[1,128], index: 7, kind: input, shape index: {}]   ;;  %s24142_s8 = inlined_call_operand.vmem [shape: f32[1,128], index: 8, kind: input, shape index: {}]   ;;  %s24143_s9 = inlined_call_operand.hbm [shape: bf16[512,128], index: 9, kind: input, shape index: {}]   ;;  %s24144_s10 = inlined_call_operand.hbm [shape: bf16[9,128,128], index: 10, kind: input, shape index: {}]   ;;  %s24145_s11 = inlined_call_operand.vmem [shape: f32[1,128], index: 11, kind: input, shape index: {}]   ;;  %s24146_s12 = inlined_call_operand.vmem [shape: f32[1,128], index: 12, kind: input, shape index: {}]   ;;  %s24147_s13 = inlined_call_operand.hbm [shape: bf16[9,128,128], index: 13, kind: input, shape index: {}]   ;;  %s24148_s14 = inlined_call_operand.vmem [shape: f32[1,128], index: 14, kind: input, shape index: {}]   ;;  %s24149_s15 = inlined_call_operand.vmem [shape: f32[512,128], index: 15, kind: output, shape index: {}]  }
   0x1   :  { %24520 = sst [smem:[#allocation109_spill]] %s24149_s15 }
   0x2   :  { %20 = vsyncpa [#allocation6], 0 }
   0x3   :  { %21 = vsyncpa [#allocation8], 0 }
   0x4   :  { %22 = vsyncpa [#allocation11], 0  ;;  %s18896_s18 = smov [#allocation7]   ;;  %s18780_s22 = scalar_lea.hbm %s24140_s6, 9216 }
   0x5   :  { %s50_s19 = sshll.u32 %s18896_s18, 4  ;;  %p18781_p0 = scmp.ne.s32.totalorder %s24140_s6, %s18780_s22  ;;  %s51_s19 = int_to_ptr.vmem [resolvable:$true] %s50_s19 }
   0x6   :  { %p18784_p1 = scmp.lt.u32.totalorder %s18780_s22, %s24140_s6 }
   0x8   :  { %p18786_p2 = pnand %p18784_p1, %p18781_p0 }
   0xa   :  { %18789 = shalt.err (!%p18786_p2)
}
   0xb   :  { %s18790_s27 = scalar_lea.vmem %s51_s19, 9216  ;;  %p18795_p4 = scmp.lt.s32.totalorder %s51_s19, %s51_s19 }
   0xc   :  { %p18791_p3 = scmp.ne.s32.totalorder %s51_s19, %s18790_s27  ;;  %p18796_p5 = scmp.lt.s32.totalorder %s18790_s27, %s18790_s27 }
   0xe   :  { %p18797_p6 = por %p18796_p5, %p18795_p4 }
  0x10   :  { %p18798_p7 = pnand %p18797_p6, %p18791_p3 }
  0x12   :  { %18801 = shalt.err (!%p18798_p7)
}
  0x13   :  { %s18897_s28 = smov 64   ;;  %s18898_s29 = smov 4  }
  0x14   :  { %56 = dma.hbm_to_vmem [thread:$0]  %s24140_s6, 9216, %s51_s19, [#allocation8], %s18897_s28, %s18897_s28, %s18898_s29  }
  0x15   :  { %s18899_s17 = smov [#allocation10]   ;;  %s18900_s20 = smov [#allocation5]  }
  0x16   :  { %s78_s18 = sshll.u32 %s18899_s17, 4  ;;  %s30_s21 = sshll.u32 %s18900_s20, 4  ;;  %s79_s18 = int_to_ptr.vmem [resolvable:$true] %s78_s18  ;;  %s31_s21 = int_to_ptr.vmem [resolvable:$true] %s30_s21 }
  0x17   :  { %s18802_s24 = scalar_lea.hbm %s24144_s10, 9216 }
  0x18   :  { %p18803_p8 = scmp.ne.s32.totalorder %s24144_s10, %s18802_s24  ;;  %p18806_p9 = scmp.lt.u32.totalorder %s18802_s24, %s24144_s10 }
  0x1a   :  { %p18808_p10 = pnand %p18806_p9, %p18803_p8 }
  0x1c   :  { %18811 = shalt.err (!%p18808_p10)
}
  0x1d   :  { %s18812_s6 = scalar_lea.vmem %s79_s18, 9216  ;;  %p18817_p12 = scmp.lt.s32.totalorder %s79_s18, %s79_s18 }
  0x1e   :  { %p18813_p11 = scmp.ne.s32.totalorder %s79_s18, %s18812_s6  ;;  %p18818_p13 = scmp.lt.s32.totalorder %s18812_s6, %s18812_s6 }
  0x20   :  { %p18819_p0 = por %p18818_p13, %p18817_p12 }
  0x22   :  { %p18820_p1 = pnand %p18819_p0, %p18813_p11 }
  0x24   :  { %18823 = shalt.err (!%p18820_p1)
}
  0x25   :  { %84 = dma.hbm_to_vmem [thread:$0]  %s24144_s10, 9216, %s79_s18, [#allocation11], %s18897_s28, %s18897_s28, %s18898_s29  }
  0x26   :  { %s18824_s17 = scalar_lea.hbm %s24135_s1, 4096 }
  0x27   :  { %p18825_p2 = scmp.ne.s32.totalorder %s24135_s1, %s18824_s17  ;;  %p18828_p3 = scmp.lt.u32.totalorder %s18824_s17, %s24135_s1 }
  0x29   :  { %p18830_p4 = pnand %p18828_p3, %p18825_p2 }
  0x2b   :  { %18833 = shalt.err (!%p18830_p4)
}
  0x2c   :  { %s18834_s25 = scalar_lea.vmem %s31_s21, 4096  ;;  %p18839_p6 = scmp.lt.s32.totalorder %s31_s21, %s31_s21 }
  0x2d   :  { %p18835_p5 = scmp.ne.s32.totalorder %s31_s21, %s18834_s25  ;;  %p18840_p7 = scmp.lt.s32.totalorder %s18834_s25, %s18834_s25 }
  0x2f   :  { %p18841_p8 = por %p18840_p7, %p18839_p6 }
  0x31   :  { %p18842_p9 = pnand %p18841_p8, %p18835_p5 }
  0x33   :  { %18845 = shalt.err (!%p18842_p9)
}
  0x34   :  { %s18901_s10 = smov 1024   ;;  %s18902_s27 = smov [#allocation9]  }
  0x35   :  { %36 = dma.hbm_to_vmem [thread:$0]  %s24135_s1, 4096, %s31_s21, [#allocation6], %s18901_s10, %s18901_s10, %s18897_s28  }
  0x36   :  { %s66_s6 = sshll.u32 %s18902_s27, 4  ;;  %s18903_s19 = smov [#allocation12]   ;;  %s67_s6 = int_to_ptr.vmem [resolvable:$true] %s66_s6 }
  0x37   :  { %s94_s30 = sshll.u32 %s18903_s19, 4  ;;  %s18846_s17 = scalar_lea.hbm %s24143_s9, 4096  ;;  %s19029_s30 = int_to_ptr.vmem [resolvable:$true] %s94_s30 }
  0x38   :  { %p18847_p10 = scmp.ne.s32.totalorder %s24143_s9, %s18846_s17  ;;  %p18850_p11 = scmp.lt.u32.totalorder %s18846_s17, %s24143_s9 }
  0x3a   :  { %p18852_p12 = pnand %p18850_p11, %p18847_p10 }
  0x3c   :  { %18855 = shalt.err (!%p18852_p12)
}
  0x3d   :  { %s18856_s1 = scalar_lea.vmem %s67_s6, 4096  ;;  %p18861_p0 = scmp.lt.s32.totalorder %s67_s6, %s67_s6 }
  0x3e   :  { %p18857_p13 = scmp.ne.s32.totalorder %s67_s6, %s18856_s1  ;;  %p18862_p1 = scmp.lt.s32.totalorder %s18856_s1, %s18856_s1 }
  0x40   :  { %p18863_p2 = por %p18862_p1, %p18861_p0 }
  0x42   :  { %p18864_p3 = pnand %p18863_p2, %p18857_p13 }
  0x44   :  { %18867 = shalt.err (!%p18864_p3)
}
  0x45   :  { %72 = dma.hbm_to_vmem [thread:$0]  %s24143_s9, 4096, %s67_s6, [#allocation8], %s18897_s28, %s18897_s28, %s18898_s29  }
  0x46   :  { %s18868_s26 = scalar_lea.hbm %s24147_s13, 9216 }
  0x47   :  { %p18869_p4 = scmp.ne.s32.totalorder %s24147_s13, %s18868_s26  ;;  %p18872_p5 = scmp.lt.u32.totalorder %s18868_s26, %s24147_s13 }
  0x49   :  { %p18874_p6 = pnand %p18872_p5, %p18869_p4 }
  0x4b   :  { %18877 = shalt.err (!%p18874_p6)
}
  0x4c   :  { %s18878_s17 = scalar_lea.vmem %s19029_s30, 9216  ;;  %p18883_p8 = scmp.lt.s32.totalorder %s19029_s30, %s19029_s30 }
  0x4d   :  { %p18879_p7 = scmp.ne.s32.totalorder %s19029_s30, %s18878_s17  ;;  %p18884_p9 = scmp.lt.s32.totalorder %s18878_s17, %s18878_s17 }
  0x4f   :  { %p18885_p10 = por %p18884_p9, %p18883_p8 }
  0x51   :  { %p18886_p11 = pnand %p18885_p10, %p18879_p7 }
  0x53   :  { %18889 = shalt.err (!%p18886_p11)
}
  0x54   :  { %100 = dma.hbm_to_vmem [thread:$0]  %s24147_s13, 9216, %s19029_s30, [#allocation11], %s18897_s28, %s18897_s28, %s18898_s29  }
  0x55   :  { %18890 = dma.done.wait [#allocation6], 4096  }
  0x56   :  { %18891 = vsyncadd [#allocation6], 4294963200 }
  0x57   :  { %18892 = dma.done.wait [#allocation8], 13312  }
  0x58   :  { %18893 = vsyncadd [#allocation8], 4294953984 }
  0x59   :  { %18894 = dma.done.wait [#allocation11], 18432  }
  0x5a   :  { %18895 = vsyncadd [#allocation11], 4294948864  ;;  %v18904_v0 = vmov 0   ;;  %v121_v1 = vld [vmem:[#allocation5] sm:$0xff]  ;;  %v122_v3 = vld [vmem:[#allocation5 + $0x8] sm:$0xff]  ;;  %vm397_vm0 = vcmask 261120  }
  0x5b   :  { %433 = vmatprep.mubr.bf16.mxu0 %v18904_v0  ;;  %474 = vmatprep.mubr.bf16.mxu1 %v18904_v0  ;;  %v129_v2 = vld [vmem:[#allocation5 + $0x40] sm:$0xff]  ;;  %v130_v5 = vld [vmem:[#allocation5 + $0x48] sm:$0xff]  ;;  %v123_v15 = vld [vmem:[#allocation5 + $0x10] sm:$0xff]  ;;  %vm765_vm1 = vcmask 1041408   ;;  %vm767_vm2 = vcmask 1043456   ;;  %vm24319_vm3 = vcmask 1045504  }
  0x5c   :  { %v14117_v4 = vcombine.high %v121_v1, %v129_v2  ;;  %v14116_v6 = vcombine.low %v121_v1, %v129_v2  ;;  %v137_v7 = vld [vmem:[#allocation5 + $0x80] sm:$0xff]  ;;  %v14119_v9 = vcombine.high %v122_v3, %v130_v5  ;;  %v14118_v10 = vcombine.low %v122_v3, %v130_v5  ;;  %v138_v12 = vld [vmem:[#allocation5 + $0x88] sm:$0xff]  ;;  %v131_v16 = vld [vmem:[#allocation5 + $0x50] sm:$0xff]  ;;  %s25401_s23 = sld [smem:[#allocation109_spill]] }
  0x5d   :  { %v145_v8 = vld [vmem:[#allocation5 + $0xc0] sm:$0xff]  ;;  %v146_v13 = vld [vmem:[#allocation5 + $0xc8] sm:$0xff]  ;;  %v124_v17 = vld [vmem:[#allocation5 + $0x18] sm:$0xff]  ;;  %v14121_v22 = vcombine.high %v123_v15, %v131_v16  ;;  %v14120_v29 = vcombine.low %v123_v15, %v131_v16  ;;  %v157_v5 = vlaneseq  ;;  %vm24320_vm4 = vcmask 1046528  }
  0x5e   :  { %v14133_v11 = vcombine.high %v137_v7, %v145_v8  ;;  %401 = vmatprep.subr.bf16.mxu0 %v14117_v4  ;;  %v14135_v14 = vcombine.high %v138_v12, %v146_v13  ;;  %442 = vmatprep.subr.bf16.mxu1 %v14119_v9  ;;  %v14132_v18 = vcombine.low %v137_v7, %v145_v8  ;;  %v119_v19 = vld [vmem:[%s24134_s0] sm:$0x3]  ;;  %v132_v20 = vld [vmem:[#allocation5 + $0x58] sm:$0xff]  ;;  %v139_v24 = vld [vmem:[#allocation5 + $0x90] sm:$0xff] }
  0x5f   :  { %402 = vmatpush1.bf16.msra.mxu0 %v14116_v6  ;;  %443 = vmatpush1.bf16.msra.mxu1 %v14118_v10  ;;  %v14134_v21 = vcombine.low %v138_v12, %v146_v13  ;;  %v14123_v23 = vcombine.high %v124_v17, %v132_v20  ;;  %v147_v25 = vld [vmem:[#allocation5 + $0xd0] sm:$0xff]  ;;  %v19071_v26 = vpack.c.bf16 %v119_v19, %v119_v19  ;;  %v140_v27 = vld [vmem:[#allocation5 + $0x98] sm:$0xff]  ;;  %v125_v33 = vld [vmem:[#allocation5 + $0x20] sm:$0xff]  ;;  %v19099_v6 = vshrl.u32 %v157_v5, 7 }
  0x60   :  { %403 = vmatprep.subr.bf16.mxu0 %v14133_v11  ;;  %444 = vmatprep.subr.bf16.mxu1 %v14135_v14  ;;  %v148_v28 = vld [vmem:[#allocation5 + $0xd8] sm:$0xff]  ;;  %v14122_v30 = vcombine.low %v124_v17, %v132_v20  ;;  %v14137_v31 = vcombine.high %v139_v24, %v147_v25  ;;  %v133_v34 = vld [vmem:[#allocation5 + $0x60] sm:$0xff]  ;;  %v126_v35 = vld [vmem:[#allocation5 + $0x28] sm:$0xff]  ;;  %v14136_v37 = vcombine.low %v139_v24, %v147_v25 }
  0x61   :  { %v14139_v32 = vcombine.high %v140_v27, %v148_v28  ;;  %v134_v36 = vld [vmem:[#allocation5 + $0x68] sm:$0xff]  ;;  %v141_v38 = vld [vmem:[#allocation5 + $0xa0] sm:$0xff]  ;;  %v14138_v40 = vcombine.low %v140_v27, %v148_v28  ;;  %v14125_v41 = vcombine.high %v125_v33, %v133_v34  ;;  %v14124_v45 = vcombine.low %v125_v33, %v133_v34  ;;  %v127_v46 = vld [vmem:[#allocation5 + $0x30] sm:$0xff] }
  0x62   :  { %v149_v39 = vld [vmem:[#allocation5 + $0xe0] sm:$0xff]  ;;  %v142_v42 = vld [vmem:[#allocation5 + $0xa8] sm:$0xff]  ;;  %v14127_v44 = vcombine.high %v126_v35, %v134_v36  ;;  %v135_v47 = vld [vmem:[#allocation5 + $0x70] sm:$0xff]  ;;  %v14126_v48 = vcombine.low %v126_v35, %v134_v36  ;;  %v167_v7 = vsub.s32 2, %v19099_v6  ;;  %v171_v9 = vsub.s32 3, %v19099_v6 }
  0x63   :  { %404 = vmatpush1.bf16.msra.mxu0 %v14132_v18  ;;  %445 = vmatpush1.bf16.msra.mxu1 %v14134_v21  ;;  %v150_v43 = vld [vmem:[#allocation5 + $0xe8] sm:$0xff]  ;;  %v14141_v49 = vcombine.high %v141_v38, %v149_v39  ;;  %v128_v50 = vld [vmem:[#allocation5 + $0x38] sm:$0xff]  ;;  %v14140_v53 = vcombine.low %v141_v38, %v149_v39  ;;  %v143_v54 = vld [vmem:[#allocation5 + $0xb0] sm:$0xff]  ;;  %v14129_v57 = vcombine.high %v127_v46, %v135_v47  ;;  %v159_v10 = vsub.s32 0, %v19099_v6 }
  0x64   :  { %483 = vmatprep.subr.bf16.mxu0 %v14121_v22  ;;  %524 = vmatprep.subr.bf16.mxu1 %v14123_v23  ;;  %v136_v51 = vld [vmem:[#allocation5 + $0x78] sm:$0xff]  ;;  %v14143_v52 = vcombine.high %v142_v42, %v150_v43  ;;  %v151_v55 = vld [vmem:[#allocation5 + $0xf0] sm:$0xff]  ;;  %v14142_v56 = vcombine.low %v142_v42, %v150_v43  ;;  %v14128_v61 = vcombine.low %v127_v46, %v135_v47  ;;  %v18347_v4 = vld [vmem:[%s24139_s5] sm:$0xff]   ;;  %v183_v24 = vsub.s32 6, %v19099_v6 }
  0x65   :  { %v144_v58 = vld [vmem:[#allocation5 + $0xb8] sm:$0xff]  ;;  %v14131_v60 = vcombine.high %v128_v50, %v136_v51  ;;  %v14130_v62 = vcombine.low %v128_v50, %v136_v51  ;;  %v14145_v63 = vcombine.high %v143_v54, %v151_v55  ;;  %v14144_v2 = vcombine.low %v143_v54, %v151_v55  ;;  %v153_v8 = vld [vmem:[%s24136_s2] sm:$0xff]  ;;  %v18356_v14 = vld [vmem:[#allocation7 + $0x48] sm:$0xff]  }
  0x66   :  { %14148 = vmatmul.mubr.msk.bf16.vlgmr.msra.gmra.mrb[0].mxu0 %vm397_vm0, %v19071_v26  ;;  %14149 = vmatmul.mubr.msk.bf16.vlgmr.msra.gmra.mrb[0].mxu1 %vm397_vm0, %v19071_v26  ;;  %v152_v59 = vld [vmem:[#allocation5 + $0xf8] sm:$0xff]  ;;  %v168_v11 = vrot.slane %v153_v8, %v167_v7  ;;  %v18355_v13 = vld [vmem:[#allocation7 + $0x40] sm:$0xff]   ;;  %v172_v15 = vrot.slane %v153_v8, %v171_v9  ;;  %v160_v16 = vrot.slane %v153_v8, %v159_v10  ;;  %v179_v25 = vsub.s32 5, %v19099_v6  ;;  %v154_v55 = vld [vmem:[%s24136_s2 + $0x8] sm:$0xff] }
  0x67   :  { %484 = vmatpush1.bf16.msra.mxu0 %v14120_v29  ;;  %525 = vmatpush1.bf16.msra.mxu1 %v14122_v30  ;;  %v14147_v1 = vcombine.high %v144_v58, %v152_v59  ;;  %v14146_v3 = vcombine.low %v144_v58, %v152_v59  ;;  %v187_v30 = vsub.s32 7, %v19099_v6  ;;  %v175_v35 = vsub.s32 4, %v19099_v6 }
  0x68   :  { %485 = vmatprep.subr.bf16.mxu0 %v14137_v31  ;;  %526 = vmatprep.subr.bf16.mxu1 %v14139_v32  ;;  %v184_v38 = vrot.slane %v153_v8, %v183_v24  ;;  %v180_v39 = vrot.slane %v153_v8, %v179_v25 }
  0x69   :  { %515 = vmatprep.mubr.bf16.mxu0 %v18904_v0  ;;  %556 = vmatprep.mubr.bf16.mxu1 %v18904_v0  ;;  %v188_v42 = vrot.slane %v153_v8, %v187_v30 }
  0x6b   :  { %486 = vmatpush1.bf16.msra.mxu0 %v14136_v37  ;;  %527 = vmatpush1.bf16.msra.mxu1 %v14138_v40  ;;  %v18358_v40 = vld [vmem:[#allocation7 + $0x58] sm:$0xff]  }
  0x6c   :  { %565 = vmatprep.subr.bf16.mxu0 %v14125_v41  ;;  %606 = vmatprep.subr.bf16.mxu1 %v14127_v44  ;;  %v176_v44 = vrot.slane %v153_v8, %v175_v35 }
  0x6e   :  { %14150 = vmatmul.mubr.msk.bf16.vlgmr.msra.gmra.mrb[4].mxu0 %vm397_vm0, %v19071_v26  ;;  %14151 = vmatmul.mubr.msk.bf16.vlgmr.msra.gmra.mrb[4].mxu1 %vm397_vm0, %v19071_v26 }
  0x6f   :  { %566 = vmatpush1.bf16.msra.mxu0 %v14124_v45  ;;  %607 = vmatpush1.bf16.msra.mxu1 %v14126_v48 }
  0x70   :  { %567 = vmatprep.subr.bf16.mxu0 %v14141_v49  ;;  %608 = vmatprep.subr.bf16.mxu1 %v14143_v52 }
  0x71   :  { %597 = vmatprep.mubr.bf16.mxu0 %v18904_v0  ;;  %638 = vmatprep.mubr.bf16.mxu1 %v18904_v0 }
  0x73   :  { %568 = vmatpush1.bf16.msra.mxu0 %v14140_v53  ;;  %609 = vmatpush1.bf16.msra.mxu1 %v14142_v56 }
  0x74   :  { %647 = vmatprep.subr.bf16.mxu0 %v14129_v57  ;;  %688 = vmatprep.subr.bf16.mxu1 %v14131_v60 }
  0x76   :  { %14152 = vmatmul.mubr.msk.bf16.vlgmr.msra.gmra.mrb[8].mxu0 %vm397_vm0, %v19071_v26  ;;  %14153 = vmatmul.mubr.msk.bf16.vlgmr.msra.gmra.mrb[8].mxu1 %vm397_vm0, %v19071_v26 }
  0x77   :  { %648 = vmatpush1.bf16.msra.mxu0 %v14128_v61  ;;  %689 = vmatpush1.bf16.msra.mxu1 %v14130_v62  ;;  %v200_v62 = vrot.slane %v154_v55, %v167_v7 }
  0x78   :  { %649 = vmatprep.subr.bf16.mxu0 %v14145_v63  ;;  %690 = vmatprep.subr.bf16.mxu1 %v14147_v1 }
  0x79   :  { %679 = vmatprep.mubr.bf16.mxu0 %v18904_v0  ;;  %720 = vmatprep.mubr.bf16.mxu1 %v18904_v0  ;;  %v163_v0 = vsub.s32 1, %v19099_v6 }
  0x7b   :  { %650 = vmatpush1.bf16.msra.mxu0 %v14144_v2  ;;  %691 = vmatpush1.bf16.msra.mxu1 %v14146_v3  ;;  %v164_v12 = vrot.slane %v153_v8, %v163_v0  ;;  %v196_v63 = vrot.slane %v154_v55, %v163_v0  ;;  %v204_v2 = vrot.slane %v154_v55, %v171_v9 }
  0x7c   :  { %15361 = vmatprep.subr.bf16.mxu1 %v18355_v13 }
  0x7e   :  { %14154 = vmatmul.mubr.msk.bf16.vlgmr.msra.gmra.mrb[12].mxu0 %vm397_vm0, %v19071_v26  ;;  %14155 = vmatmul.mubr.msk.bf16.vlgmr.msra.gmra.mrb[12].mxu1 %vm397_vm0, %v19071_v26  ;;  %v18357_v26 = vld [vmem:[#allocation7 + $0x50] sm:$0xff]  }
  0x7f   :  { %15345 = vmatprep.mubr.msk.bf16.mxu0 %vm397_vm0, %v18347_v4  ;;  %15362 = vmatpush3.bf16.msra.mxu1 %v18355_v13  ;;  %v192_v4 = vrot.slane %v154_v55, %v159_v10  ;;  %v216_v10 = vrot.slane %v154_v55, %v183_v24 }
  0x80   :  { %15363 = vmatprep.subr.bf16.mxu1 %v18356_v14 }
  0x83   :  { %15364 = vmatpush3.bf16.msra.mxu1 %v18356_v14 }
  0x84   :  { %15365 = vmatprep.subr.bf16.mxu1 %v18357_v26 }
  0x87   :  { %15366 = vmatpush3.bf16.msra.mxu1 %v18357_v26 }
  0x88   :  { %15367 = vmatprep.subr.bf16.mxu1 %v18358_v40 }
  0x8b   :  { %15368 = vmatpush3.bf16.msra.mxu1 %v18358_v40 }
 0x139   :  { %v435_v17 = vpop.f32.mrb[0].mxu0  ;;  %v476_v18 = vpop.f32.mrb[0].mxu1 }
 0x13a   :  { %v437_v19 = vpop.f32.mrb[1].mxu0  ;;  %v477_v20 = vadd.f32 %v476_v18, %v168_v11  ;;  %v478_v22 = vpop.f32.mrb[1].mxu1  ;;  %v436_v31 = vadd.f32 %v435_v17, %v160_v16 }
 0x13b   :  { %v438_v21 = vadd.f32 %v437_v19, %v164_v12  ;;  %v439_v23 = vpop.f32.mrb[2].mxu0  ;;  %v479_v27 = vadd.f32 %v478_v22, %v172_v15  ;;  %v480_v28 = vpop.f32.mrb[2].mxu1 }
 0x13c   :  { %v440_v29 = vpop.f32.mrb[3].mxu0  ;;  %v733_v32 = vrot.slane %v477_v20, 4  ;;  %v481_v34 = vpop.f32.mrb[3].mxu1  ;;  %v212_v23 = vrot.slane %v154_v55, %v179_v25 }
 0x13d   :  { %v730_v33 = vrot.slane %v438_v21, 6  ;;  %v736_v36 = vrot.slane %v479_v27, 2  ;;  %v220_v27 = vrot.slane %v154_v55, %v187_v30  ;;  %v208_v29 = vrot.slane %v154_v55, %v175_v35 }
 0x13f   :  { %v766_v37 = vsel %vm765_vm1, %v436_v31, %v730_v33 }
 0x140   :  { %v768_v41 = vsel %vm767_vm2, %v766_v37, %v733_v32 }
 0x141   :  { %v19129_v43 = vsel %vm24319_vm3, %v768_v41, %v736_v36  ;;  %v517_v45 = vpop.f32.mrb[4].mxu0  ;;  %v558_v46 = vpop.f32.mrb[4].mxu1 }
 0x142   :  { %v519_v47 = vpop.f32.mrb[5].mxu0  ;;  %v559_v48 = vadd.f32 %v558_v46, %v184_v38  ;;  %v560_v50 = vpop.f32.mrb[5].mxu1  ;;  %v518_v56 = vadd.f32 %v517_v45, %v176_v44 }
 0x143   :  { %v520_v49 = vadd.f32 %v519_v47, %v180_v39  ;;  %v521_v51 = vpop.f32.mrb[6].mxu0  ;;  %v561_v52 = vadd.f32 %v560_v50, %v188_v42  ;;  %v562_v53 = vpop.f32.mrb[6].mxu1 }
 0x144   :  { %v522_v54 = vpop.f32.mrb[7].mxu0  ;;  %v742_v57 = vrot.slane %v559_v48, 4  ;;  %v563_v59 = vpop.f32.mrb[7].mxu1 }
 0x145   :  { %v739_v58 = vrot.slane %v520_v49, 6  ;;  %v745_v60 = vrot.slane %v561_v52, 2 }
 0x147   :  { %v771_v61 = vsel %vm765_vm1, %v518_v56, %v739_v58 }
 0x148   :  { %v772_v1 = vsel %vm767_vm2, %v771_v61, %v742_v57 }
 0x149   :  { %v773_v3 = vsel %vm24319_vm3, %v772_v1, %v745_v60  ;;  %v599_v5 = vpop.f32.mrb[8].mxu0  ;;  %v640_v11 = vpop.f32.mrb[8].mxu1 }
 0x14a   :  { %v782_v8 = vadd.f32 %v773_v3, %v19129_v43  ;;  %v601_v12 = vpop.f32.mrb[9].mxu0  ;;  %v641_v13 = vadd.f32 %v640_v11, %v200_v62  ;;  %v642_v14 = vpop.f32.mrb[9].mxu1  ;;  %v600_v18 = vadd.f32 %v599_v5, %v192_v4 }
 0x14b   :  { %v602_v7 = vadd.f32 %v601_v12, %v196_v63  ;;  %v603_v15 = vpop.f32.mrb[10].mxu0  ;;  %v643_v0 = vadd.f32 %v642_v14, %v204_v2  ;;  %v644_v16 = vpop.f32.mrb[10].mxu1 }
 0x14c   :  { %v604_v17 = vpop.f32.mrb[11].mxu0  ;;  %v751_v19 = vrot.slane %v641_v13, 4  ;;  %v645_v20 = vpop.f32.mrb[11].mxu1 }
 0x14d   :  { %v748_v9 = vrot.slane %v602_v7, 6  ;;  %v754_v21 = vrot.slane %v643_v0, 2 }
 0x14f   :  { %v774_v22 = vsel %vm765_vm1, %v600_v18, %v748_v9  ;;  %v14157_v18 = vld [vmem:[%s24138_s4] ss:$0 sm:$0xff] }
 0x150   :  { %v775_v26 = vsel %vm767_vm2, %v774_v22, %v751_v19 }
 0x151   :  { %v776_v28 = vsel %vm24319_vm3, %v775_v26, %v754_v21  ;;  %v681_v31 = vpop.f32.mrb[12].mxu0  ;;  %v722_v33 = vpop.f32.mrb[12].mxu1 }
 0x152   :  { %v783_v32 = vadd.f32 %v782_v8, %v776_v28  ;;  %v683_v34 = vpop.f32.mrb[13].mxu0  ;;  %v723_v36 = vadd.f32 %v722_v33, %v216_v10  ;;  %v724_v38 = vpop.f32.mrb[13].mxu1  ;;  %v682_v25 = vadd.f32 %v681_v31, %v208_v29  ;;  %v18348_v29 = vld [vmem:[%s24139_s5 + $0x8] sm:$0xff]   ;;  %v18349_v31 = vld [vmem:[%s24139_s5 + $0x10] sm:$0xff]   ;;  %v18351_v33 = vld [vmem:[%s24139_s5 + $0x20] sm:$0xff]  }
 0x153   :  { %v684_v37 = vadd.f32 %v683_v34, %v212_v23  ;;  %v685_v39 = vpop.f32.mrb[14].mxu0  ;;  %v725_v24 = vadd.f32 %v724_v38, %v220_v27  ;;  %v726_v40 = vpop.f32.mrb[14].mxu1  ;;  %v18352_v34 = vld [vmem:[%s24139_s5 + $0x28] sm:$0xff]   ;;  %v19193_v38 = vld [vmem:[#allocation7 + $0x60] sm:$0xff]  }
 0x154   :  { %v686_v41 = vpop.f32.mrb[15].mxu0  ;;  %v760_v42 = vrot.slane %v723_v36, 4  ;;  %v727_v45 = vpop.f32.mrb[15].mxu1  ;;  %v18353_v36 = vld [vmem:[%s24139_s5 + $0x30] sm:$0xff]   ;;  %15369 = vmatprep.subr.bf16.mxu1 %v19193_v38  ;;  %v18905_v39 = vmov 0.0  }
 0x155   :  { %v757_v44 = vrot.slane %v684_v37, 6  ;;  %v763_v6 = vrot.slane %v725_v24, 2  ;;  %v18354_v37 = vld [vmem:[%s24139_s5 + $0x38] sm:$0xff]   ;;  %1032 = vst [vmem:[#allocation2] sm:$0xff] %v18905_v39  ;;  %1033 = vst [vmem:[#allocation2 + $0x8] sm:$0x3] %v18905_v39  ;;  %15370 = vmatpush3.bf16.msra.mxu1 %v19193_v38 }
 0x156   :  { %1042 = vst [vmem:[#allocation2 + $0x10] sm:$0x1] %v18905_v39  ;;  %1062 = vst [vmem:[#allocation2 + $0x19] sm:$0x1] %v18905_v39  ;;  %v18360_v24 = vld [vmem:[#allocation7 + $0x68] sm:$0xff]   ;;  %v18361_v40 = vld [vmem:[#allocation7 + $0x70] sm:$0xff]  }
 0x157   :  { %v777_v30 = vsel %vm765_vm1, %v682_v25, %v757_v44  ;;  %1034 = vst [vmem:[#allocation2 + $0xa0] sm:$0xff] %v18905_v39  ;;  %1035 = vst [vmem:[#allocation2 + $0xa8] sm:$0x3] %v18905_v39  ;;  %15371 = vmatprep.subr.bf16.mxu1 %v18360_v24  ;;  %v18362_v41 = vld [vmem:[#allocation7 + $0x78] sm:$0xff]   ;;  %v19406_v25 = vld [vmem:[#allocation7] sm:$0xff]  }
 0x158   :  { %v778_v35 = vsel %vm767_vm2, %v777_v30, %v760_v42  ;;  %1037 = vst [vmem:[#allocation2 + $0x90] sm:$0xff] %v18905_v39  ;;  %1038 = vst [vmem:[#allocation2 + $0x98] sm:$0x3] %v18905_v39 }
 0x159   :  { %v779_v46 = vsel %vm24319_vm3, %v778_v35, %v763_v6  ;;  %1039 = vst [vmem:[#allocation2 + $0x130] sm:$0xff] %v18905_v39  ;;  %1040 = vst [vmem:[#allocation2 + $0x138] sm:$0x3] %v18905_v39  ;;  %15372 = vmatpush3.bf16.msra.mxu1 %v18360_v24 }
 0x15a   :  { %v784_v47 = vadd.f32 %v783_v32, %v779_v46  ;;  %v18350_v32 = vld [vmem:[%s24139_s5 + $0x18] sm:$0xff]   ;;  %1043 = vst [vmem:[#allocation2 + $0x20] sm:$0x1] %v18905_v39  ;;  %1044 = vst [vmem:[#allocation2 + $0x30] sm:$0x1] %v18905_v39  ;;  %15373 = vmatprep.subr.bf16.mxu1 %v18361_v40 }
 0x15b   :  { %1045 = vst [vmem:[#allocation2 + $0x40] sm:$0x1] %v18905_v39  ;;  %1046 = vst [vmem:[#allocation2 + $0x50] sm:$0x1] %v18905_v39 }
 0x15c   :  { %v785_v48 = vrot.slane %v784_v47, 4  ;;  %1047 = vst [vmem:[#allocation2 + $0x60] sm:$0x1] %v18905_v39  ;;  %1048 = vst [vmem:[#allocation2 + $0x70] sm:$0x1] %v18905_v39 }
 0x15d   :  { %1049 = vst [vmem:[#allocation2 + $0x80] sm:$0x1] %v18905_v39  ;;  %1052 = vst [vmem:[#allocation2 + $0xb0] sm:$0x1] %v18905_v39  ;;  %15374 = vmatpush3.bf16.msra.mxu1 %v18361_v40 }
 0x15e   :  { %v786_v49 = vadd.f32 %v785_v48, %v784_v47  ;;  %1053 = vst [vmem:[#allocation2 + $0xc0] sm:$0x1] %v18905_v39  ;;  %1054 = vst [vmem:[#allocation2 + $0xd0] sm:$0x1] %v18905_v39  ;;  %15375 = vmatprep.subr.bf16.mxu1 %v18362_v41 }
 0x15f   :  { %1055 = vst [vmem:[#allocation2 + $0xe0] sm:$0x1] %v18905_v39  ;;  %1056 = vst [vmem:[#allocation2 + $0xf0] sm:$0x1] %v18905_v39 }
 0x160   :  { %v787_v50 = vrot.slane %v786_v49, 2  ;;  %1057 = vst [vmem:[#allocation2 + $0x100] sm:$0x1] %v18905_v39  ;;  %1058 = vst [vmem:[#allocation2 + $0x110] sm:$0x1] %v18905_v39 }
 0x161   :  { %1059 = vst [vmem:[#allocation2 + $0x120] sm:$0x1] %v18905_v39  ;;  %1063 = vst [vmem:[#allocation2 + $0x29] sm:$0x1] %v18905_v39  ;;  %15376 = vmatpush3.bf16.msra.mxu1 %v18362_v41 }
 0x162   :  { %v788_v51 = vadd.f32 %v787_v50, %v786_v49  ;;  %1064 = vst [vmem:[#allocation2 + $0x39] sm:$0x1] %v18905_v39  ;;  %1065 = vst [vmem:[#allocation2 + $0x49] sm:$0x1] %v18905_v39  ;;  %15393 = vmatprep.subr.bf16.mxu1 %v19406_v25 }
 0x163   :  { %1066 = vst [vmem:[#allocation2 + $0x59] sm:$0x1] %v18905_v39  ;;  %1067 = vst [vmem:[#allocation2 + $0x69] sm:$0x1] %v18905_v39 }
 0x164   :  { %v789_v52 = vrot.slane %v788_v51, 1  ;;  %1068 = vst [vmem:[#allocation2 + $0x79] sm:$0x1] %v18905_v39  ;;  %1069 = vst [vmem:[#allocation2 + $0x89] sm:$0x1] %v18905_v39 }
 0x165   :  { %1072 = vst [vmem:[#allocation2 + $0xb9] sm:$0x1] %v18905_v39  ;;  %1073 = vst [vmem:[#allocation2 + $0xc9] sm:$0x1] %v18905_v39 }
 0x166   :  { %v790_v53 = vadd.f32 %v789_v52, %v788_v51  ;;  %1074 = vst [vmem:[#allocation2 + $0xd9] sm:$0x1] %v18905_v39  ;;  %1075 = vst [vmem:[#allocation2 + $0xe9] sm:$0x1] %v18905_v39 }
 0x167   :  { %1076 = vst [vmem:[#allocation2 + $0xf9] sm:$0x1] %v18905_v39  ;;  %1077 = vst [vmem:[#allocation2 + $0x109] sm:$0x1] %v18905_v39 }
 0x168   :  { %v791_v54 = vmul.f32 0.03125, %v790_v53  ;;  %1078 = vst [vmem:[#allocation2 + $0x119] sm:$0x1] %v18905_v39  ;;  %1079 = vst [vmem:[#allocation2 + $0x129] sm:$0x1] %v18905_v39 }
 0x169   :  { %3751 = vst [vmem:[#allocation3] sm:$0xff] %v18905_v39  ;;  %3752 = vst [vmem:[#allocation3 + $0x8] sm:$0xff] %v18905_v39 }
 0x16a   :  { %v792_v55 = vsub.f32 %v19129_v43, %v791_v54  ;;  %v793_v56 = vsub.f32 %v773_v3, %v791_v54  ;;  %v794_v57 = vsub.f32 %v776_v28, %v791_v54  ;;  %v795_v58 = vsub.f32 %v779_v46, %v791_v54  ;;  %v14156_v3 = vld [vmem:[%s24137_s3] ss:$0 sm:$0xff]  ;;  %3753 = vst [vmem:[#allocation3 + $0x10] sm:$0x3] %v18905_v39 }
 0x16b   :  { %3754 = vst [vmem:[#allocation3 + $0x1b0] sm:$0xff] %v18905_v39  ;;  %3756 = vst [vmem:[#allocation3 + $0x1c0] sm:$0x3] %v18905_v39 }
 0x16c   :  { %v796_v59 = vmul.f32 %v792_v55, %v792_v55  ;;  %v797_v60 = vmul.f32 %v793_v56, %v793_v56  ;;  %v798_v61 = vmul.f32 %v794_v57, %v794_v57  ;;  %v799_v63 = vmul.f32 %v795_v58, %v795_v58  ;;  %3758 = vst [vmem:[#allocation3 + $0x198] sm:$0xff] %v18905_v39 }
 0x16d   :  { %3760 = vst [vmem:[#allocation3 + $0x1a8] sm:$0x3] %v18905_v39  ;;  %3761 = vst [vmem:[#allocation3 + $0x348] sm:$0xff] %v18905_v39 }
 0x16e   :  { %v800_v62 = vadd.f32 %v797_v60, %v796_v59  ;;  %3763 = vst [vmem:[#allocation3 + $0x358] sm:$0x3] %v18905_v39  ;;  %3765 = vst [vmem:[#allocation3 + $0x18] sm:$0x1] %v18905_v39 }
 0x16f   :  { %3766 = vst [vmem:[#allocation3 + $0x30] sm:$0x1] %v18905_v39  ;;  %3767 = vst [vmem:[#allocation3 + $0x48] sm:$0x1] %v18905_v39 }
 0x170   :  { %v801_v1 = vadd.f32 %v800_v62, %v798_v61  ;;  %3768 = vst [vmem:[#allocation3 + $0x60] sm:$0x1] %v18905_v39  ;;  %3769 = vst [vmem:[#allocation3 + $0x78] sm:$0x1] %v18905_v39 }
 0x171   :  { %3770 = vst [vmem:[#allocation3 + $0x90] sm:$0x1] %v18905_v39  ;;  %3771 = vst [vmem:[#allocation3 + $0xa8] sm:$0x1] %v18905_v39 }
 0x172   :  { %v802_v2 = vadd.f32 %v801_v1, %v799_v63  ;;  %3772 = vst [vmem:[#allocation3 + $0xc0] sm:$0x1] %v18905_v39  ;;  %3773 = vst [vmem:[#allocation3 + $0xd8] sm:$0x1] %v18905_v39 }
 0x173   :  { %3774 = vst [vmem:[#allocation3 + $0xf0] sm:$0x1] %v18905_v39  ;;  %3775 = vst [vmem:[#allocation3 + $0x108] sm:$0x1] %v18905_v39 }
 0x174   :  { %v803_v4 = vrot.slane %v802_v2, 4  ;;  %3776 = vst [vmem:[#allocation3 + $0x120] sm:$0x1] %v18905_v39  ;;  %3777 = vst [vmem:[#allocation3 + $0x138] sm:$0x1] %v18905_v39 }
 0x175   :  { %3778 = vst [vmem:[#allocation3 + $0x150] sm:$0x1] %v18905_v39  ;;  %3779 = vst [vmem:[#allocation3 + $0x168] sm:$0x1] %v18905_v39 }
 0x176   :  { %v804_v5 = vadd.f32 %v803_v4, %v802_v2  ;;  %3780 = vst [vmem:[#allocation3 + $0x180] sm:$0x1] %v18905_v39  ;;  %3783 = vst [vmem:[#allocation3 + $0x1c8] sm:$0x1] %v18905_v39 }
 0x177   :  { %3784 = vst [vmem:[#allocation3 + $0x1e0] sm:$0x1] %v18905_v39  ;;  %3785 = vst [vmem:[#allocation3 + $0x1f8] sm:$0x1] %v18905_v39 }
 0x178   :  { %v805_v8 = vrot.slane %v804_v5, 2  ;;  %3786 = vst [vmem:[#allocation3 + $0x210] sm:$0x1] %v18905_v39  ;;  %3787 = vst [vmem:[#allocation3 + $0x228] sm:$0x1] %v18905_v39 }
 0x179   :  { %3788 = vst [vmem:[#allocation3 + $0x240] sm:$0x1] %v18905_v39  ;;  %3789 = vst [vmem:[#allocation3 + $0x258] sm:$0x1] %v18905_v39 }
 0x17a   :  { %v806_v11 = vadd.f32 %v805_v8, %v804_v5  ;;  %3790 = vst [vmem:[#allocation3 + $0x270] sm:$0x1] %v18905_v39  ;;  %3791 = vst [vmem:[#allocation3 + $0x288] sm:$0x1] %v18905_v39 }
 0x17b   :  { %3792 = vst [vmem:[#allocation3 + $0x2a0] sm:$0x1] %v18905_v39  ;;  %3793 = vst [vmem:[#allocation3 + $0x2b8] sm:$0x1] %v18905_v39 }
 0x17c   :  { %v807_v12 = vrot.slane %v806_v11, 1  ;;  %3794 = vst [vmem:[#allocation3 + $0x2d0] sm:$0x1] %v18905_v39  ;;  %3795 = vst [vmem:[#allocation3 + $0x2e8] sm:$0x1] %v18905_v39 }
 0x17d   :  { %3796 = vst [vmem:[#allocation3 + $0x300] sm:$0x1] %v18905_v39  ;;  %3797 = vst [vmem:[#allocation3 + $0x318] sm:$0x1] %v18905_v39 }
 0x17e   :  { %v808_v13 = vadd.f32 %v807_v12, %v806_v11  ;;  %3798 = vst [vmem:[#allocation3 + $0x330] sm:$0x1] %v18905_v39  ;;  %3801 = vst [vmem:[#allocation3 + $0x29] sm:$0x1] %v18905_v39 }
 0x17f   :  { %3802 = vst [vmem:[#allocation3 + $0x41] sm:$0x1] %v18905_v39  ;;  %3803 = vst [vmem:[#allocation3 + $0x59] sm:$0x1] %v18905_v39 }
 0x180   :  { %v809_v7 = vmul.f32 0.03125, %v808_v13  ;;  %3804 = vst [vmem:[#allocation3 + $0x71] sm:$0x1] %v18905_v39  ;;  %3805 = vst [vmem:[#allocation3 + $0x89] sm:$0x1] %v18905_v39 }
 0x181   :  { %3806 = vst [vmem:[#allocation3 + $0xa1] sm:$0x1] %v18905_v39  ;;  %3807 = vst [vmem:[#allocation3 + $0xb9] sm:$0x1] %v18905_v39 }
 0x182   :  { %v810_v14 = vadd.f32 1e-05, %v809_v7  ;;  %3808 = vst [vmem:[#allocation3 + $0xd1] sm:$0x1] %v18905_v39  ;;  %3809 = vst [vmem:[#allocation3 + $0xe9] sm:$0x1] %v18905_v39 }
 0x183   :  { %3810 = vst [vmem:[#allocation3 + $0x101] sm:$0x1] %v18905_v39  ;;  %3811 = vst [vmem:[#allocation3 + $0x119] sm:$0x1] %v18905_v39 }
 0x184   :  { %18603 = vrsqrt.f32 %v810_v14  ;;  %3812 = vst [vmem:[#allocation3 + $0x131] sm:$0x1] %v18905_v39  ;;  %3813 = vst [vmem:[#allocation3 + $0x149] sm:$0x1] %v18905_v39 }
 0x185   :  { %3814 = vst [vmem:[#allocation3 + $0x161] sm:$0x1] %v18905_v39  ;;  %3815 = vst [vmem:[#allocation3 + $0x179] sm:$0x1] %v18905_v39 }
 0x186   :  { %3816 = vst [vmem:[#allocation3 + $0x191] sm:$0x1] %v18905_v39  ;;  %3819 = vst [vmem:[#allocation3 + $0x1d9] sm:$0x1] %v18905_v39 }
 0x187   :  { %3820 = vst [vmem:[#allocation3 + $0x1f1] sm:$0x1] %v18905_v39  ;;  %3821 = vst [vmem:[#allocation3 + $0x209] sm:$0x1] %v18905_v39 }
 0x188   :  { %3822 = vst [vmem:[#allocation3 + $0x221] sm:$0x1] %v18905_v39  ;;  %3823 = vst [vmem:[#allocation3 + $0x239] sm:$0x1] %v18905_v39 }
 0x189   :  { %3824 = vst [vmem:[#allocation3 + $0x251] sm:$0x1] %v18905_v39  ;;  %3825 = vst [vmem:[#allocation3 + $0x269] sm:$0x1] %v18905_v39 }
 0x18a   :  { %3826 = vst [vmem:[#allocation3 + $0x281] sm:$0x1] %v18905_v39  ;;  %3827 = vst [vmem:[#allocation3 + $0x299] sm:$0x1] %v18905_v39 }
 0x18b   :  { %3828 = vst [vmem:[#allocation3 + $0x2b1] sm:$0x1] %v18905_v39  ;;  %3829 = vst [vmem:[#allocation3 + $0x2c9] sm:$0x1] %v18905_v39 }
 0x18c   :  { %3830 = vst [vmem:[#allocation3 + $0x2e1] sm:$0x1] %v18905_v39  ;;  %3831 = vst [vmem:[#allocation3 + $0x2f9] sm:$0x1] %v18905_v39 }
 0x18d   :  { %3832 = vst [vmem:[#allocation3 + $0x311] sm:$0x1] %v18905_v39  ;;  %3833 = vst [vmem:[#allocation3 + $0x329] sm:$0x1] %v18905_v39 }
 0x18e   :  { %v18604_v43 = vpop.eup %18603  ;;  %3834 = vst [vmem:[#allocation3 + $0x341] sm:$0x1] %v18905_v39  ;;  %9030 = vst [vmem:[#allocation4] sm:$0xff] %v18905_v39 }
 0x18f   :  { %v815_v15 = vmul.f32 %v18604_v43, %v795_v58  ;;  %v812_v0 = vmul.f32 %v18604_v43, %v792_v55  ;;  %v813_v16 = vmul.f32 %v18604_v43, %v793_v56  ;;  %v814_v17 = vmul.f32 %v18604_v43, %v794_v57  ;;  %9032 = vst [vmem:[#allocation4 + $0x10] sm:$0x3] %v18905_v39 }
 0x190   :  { %9033 = vst [vmem:[#allocation4 + $0x1b0] sm:$0xff] %v18905_v39  ;;  %9035 = vst [vmem:[#allocation4 + $0x1c0] sm:$0x3] %v18905_v39 }
 0x191   :  { %v822_v19 = vmul.f32 %v14156_v3, %v812_v0  ;;  %v823_v9 = vmul.f32 %v14156_v3, %v813_v16  ;;  %v824_v20 = vmul.f32 %v14156_v3, %v814_v17  ;;  %v825_v21 = vmul.f32 %v14156_v3, %v815_v15  ;;  %9037 = vst [vmem:[#allocation4 + $0x198] sm:$0xff] %v18905_v39  ;;  %v18364_v16 = vld [vmem:[#allocation7 + $0x8] sm:$0xff]  }
 0x192   :  { %9039 = vst [vmem:[#allocation4 + $0x1a8] sm:$0x3] %v18905_v39  ;;  %9040 = vst [vmem:[#allocation4 + $0x348] sm:$0xff] %v18905_v39 }
 0x193   :  { %v832_v22 = vadd.f32 %v14157_v18, %v822_v19  ;;  %v833_v10 = vadd.f32 %v14157_v18, %v823_v9  ;;  %v834_v23 = vadd.f32 %v14157_v18, %v824_v20  ;;  %v835_v26 = vadd.f32 %v14157_v18, %v825_v21  ;;  %9042 = vst [vmem:[#allocation4 + $0x358] sm:$0x3] %v18905_v39 }
 0x194   :  { %9044 = vst [vmem:[#allocation4 + $0x18] sm:$0x1] %v18905_v39  ;;  %9045 = vst [vmem:[#allocation4 + $0x30] sm:$0x1] %v18905_v39 }
 0x195   :  { %v852_v27 = vpack.c.bf16 %v833_v10, %v832_v22  ;;  %v853_v28 = vpack.c.bf16 %v835_v26, %v834_v23  ;;  %9046 = vst [vmem:[#allocation4 + $0x48] sm:$0x1] %v18905_v39  ;;  %9047 = vst [vmem:[#allocation4 + $0x60] sm:$0x1] %v18905_v39 }
 0x196   :  { %9048 = vst [vmem:[#allocation4 + $0x78] sm:$0x1] %v18905_v39  ;;  %9049 = vst [vmem:[#allocation4 + $0x90] sm:$0x1] %v18905_v39 }
 0x197   :  { %15341 = vmatprep.subr.bf16.mxu0 %v852_v27  ;;  %9050 = vst [vmem:[#allocation4 + $0xa8] sm:$0x1] %v18905_v39  ;;  %9051 = vst [vmem:[#allocation4 + $0xc0] sm:$0x1] %v18905_v39 }
 0x198   :  { %15342 = vmatpush3.bf16.msra.mxu0 %v852_v27  ;;  %9052 = vst [vmem:[#allocation4 + $0xd8] sm:$0x1] %v18905_v39  ;;  %9053 = vst [vmem:[#allocation4 + $0xf0] sm:$0x1] %v18905_v39 }
 0x199   :  { %15343 = vmatprep.subr.bf16.mxu0 %v853_v28  ;;  %9054 = vst [vmem:[#allocation4 + $0x108] sm:$0x1] %v18905_v39  ;;  %9055 = vst [vmem:[#allocation4 + $0x120] sm:$0x1] %v18905_v39 }
 0x19a   :  { %9056 = vst [vmem:[#allocation4 + $0x138] sm:$0x1] %v18905_v39  ;;  %9057 = vst [vmem:[#allocation4 + $0x150] sm:$0x1] %v18905_v39 }
 0x19b   :  { %9058 = vst [vmem:[#allocation4 + $0x168] sm:$0x1] %v18905_v39  ;;  %9059 = vst [vmem:[#allocation4 + $0x180] sm:$0x1] %v18905_v39 }
 0x19c   :  { %15344 = vmatpush3.bf16.msra.mxu0 %v853_v28  ;;  %9062 = vst [vmem:[#allocation4 + $0x1c8] sm:$0x1] %v18905_v39  ;;  %9063 = vst [vmem:[#allocation4 + $0x1e0] sm:$0x1] %v18905_v39 }
 0x19d   :  { %9064 = vst [vmem:[#allocation4 + $0x1f8] sm:$0x1] %v18905_v39  ;;  %9065 = vst [vmem:[#allocation4 + $0x210] sm:$0x1] %v18905_v39 }
 0x19e   :  { %9066 = vst [vmem:[#allocation4 + $0x228] sm:$0x1] %v18905_v39  ;;  %9067 = vst [vmem:[#allocation4 + $0x240] sm:$0x1] %v18905_v39 }
 0x19f   :  { %15346 = vmatmul.mubr.msk.bf16.vlgmr.msra.gmra.mrb[16].mxu0 %vm397_vm0, %v18348_v29  ;;  %9068 = vst [vmem:[#allocation4 + $0x258] sm:$0x1] %v18905_v39  ;;  %9069 = vst [vmem:[#allocation4 + $0x270] sm:$0x1] %v18905_v39 }
 0x1a0   :  { %15349 = vmatprep.mubr.msk.bf16.mxu0 %vm397_vm0, %v18349_v31  ;;  %9070 = vst [vmem:[#allocation4 + $0x288] sm:$0x1] %v18905_v39  ;;  %9071 = vst [vmem:[#allocation4 + $0x2a0] sm:$0x1] %v18905_v39 }
 0x1a1   :  { %9072 = vst [vmem:[#allocation4 + $0x2b8] sm:$0x1] %v18905_v39  ;;  %9073 = vst [vmem:[#allocation4 + $0x2d0] sm:$0x1] %v18905_v39 }
 0x1a2   :  { %9074 = vst [vmem:[#allocation4 + $0x2e8] sm:$0x1] %v18905_v39  ;;  %9075 = vst [vmem:[#allocation4 + $0x300] sm:$0x1] %v18905_v39 }
 0x1a3   :  { %9076 = vst [vmem:[#allocation4 + $0x318] sm:$0x1] %v18905_v39  ;;  %9077 = vst [vmem:[#allocation4 + $0x330] sm:$0x1] %v18905_v39 }
 0x1a4   :  { %9080 = vst [vmem:[#allocation4 + $0x29] sm:$0x1] %v18905_v39  ;;  %9081 = vst [vmem:[#allocation4 + $0x41] sm:$0x1] %v18905_v39 }
 0x1a5   :  { %9082 = vst [vmem:[#allocation4 + $0x59] sm:$0x1] %v18905_v39  ;;  %9083 = vst [vmem:[#allocation4 + $0x71] sm:$0x1] %v18905_v39 }
 0x1a6   :  { %9084 = vst [vmem:[#allocation4 + $0x89] sm:$0x1] %v18905_v39  ;;  %9085 = vst [vmem:[#allocation4 + $0xa1] sm:$0x1] %v18905_v39 }
 0x1a7   :  { %15350 = vmatmul.mubr.msk.bf16.gmra.mrb[20].mxu0 %vm397_vm0, %v18350_v32  ;;  %9086 = vst [vmem:[#allocation4 + $0xb9] sm:$0x1] %v18905_v39  ;;  %9087 = vst [vmem:[#allocation4 + $0xd1] sm:$0x1] %v18905_v39  ;;  %v18365_v32 = vld [vmem:[#allocation7 + $0x10] sm:$0xff]  }
 0x1a8   :  { %15353 = vmatprep.mubr.msk.bf16.mxu0 %vm397_vm0, %v18351_v33  ;;  %9088 = vst [vmem:[#allocation4 + $0xe9] sm:$0x1] %v18905_v39  ;;  %9089 = vst [vmem:[#allocation4 + $0x101] sm:$0x1] %v18905_v39 }
 0x1a9   :  { %9090 = vst [vmem:[#allocation4 + $0x119] sm:$0x1] %v18905_v39  ;;  %9091 = vst [vmem:[#allocation4 + $0x131] sm:$0x1] %v18905_v39 }
 0x1aa   :  { %9092 = vst [vmem:[#allocation4 + $0x149] sm:$0x1] %v18905_v39  ;;  %9093 = vst [vmem:[#allocation4 + $0x161] sm:$0x1] %v18905_v39 }
 0x1ab   :  { %9094 = vst [vmem:[#allocation4 + $0x179] sm:$0x1] %v18905_v39  ;;  %9095 = vst [vmem:[#allocation4 + $0x191] sm:$0x1] %v18905_v39 }
 0x1ac   :  { %9098 = vst [vmem:[#allocation4 + $0x1d9] sm:$0x1] %v18905_v39  ;;  %9099 = vst [vmem:[#allocation4 + $0x1f1] sm:$0x1] %v18905_v39 }
 0x1ad   :  { %9100 = vst [vmem:[#allocation4 + $0x209] sm:$0x1] %v18905_v39  ;;  %9101 = vst [vmem:[#allocation4 + $0x221] sm:$0x1] %v18905_v39 }
 0x1ae   :  { %9102 = vst [vmem:[#allocation4 + $0x239] sm:$0x1] %v18905_v39  ;;  %9103 = vst [vmem:[#allocation4 + $0x251] sm:$0x1] %v18905_v39 }
 0x1af   :  { %15354 = vmatmul.mubr.msk.bf16.gmra.mrb[24].mxu0 %vm397_vm0, %v18352_v34  ;;  %9104 = vst [vmem:[#allocation4 + $0x269] sm:$0x1] %v18905_v39  ;;  %9105 = vst [vmem:[#allocation4 + $0x281] sm:$0x1] %v18905_v39 }
 0x1b0   :  { %15357 = vmatprep.mubr.msk.bf16.mxu0 %vm397_vm0, %v18353_v36  ;;  %9106 = vst [vmem:[#allocation4 + $0x299] sm:$0x1] %v18905_v39  ;;  %9107 = vst [vmem:[#allocation4 + $0x2b1] sm:$0x1] %v18905_v39 }
 0x1b1   :  { %9108 = vst [vmem:[#allocation4 + $0x2c9] sm:$0x1] %v18905_v39  ;;  %9109 = vst [vmem:[#allocation4 + $0x2e1] sm:$0x1] %v18905_v39 }
 0x1b2   :  { %9110 = vst [vmem:[#allocation4 + $0x2f9] sm:$0x1] %v18905_v39  ;;  %9111 = vst [vmem:[#allocation4 + $0x311] sm:$0x1] %v18905_v39 }
 0x1b3   :  { %9112 = vst [vmem:[#allocation4 + $0x329] sm:$0x1] %v18905_v39  ;;  %9113 = vst [vmem:[#allocation4 + $0x341] sm:$0x1] %v18905_v39 }
 0x1b4   :  { %1041 = vst [vmem:[#allocation2] sm:$0x1] %v18905_v39  ;;  %1061 = vst [vmem:[#allocation2 + $0x9] sm:$0x1] %v18905_v39 }
 0x1b5   :  { %1050 = vst [vmem:[#allocation2 + $0x90] sm:$0x1] %v18905_v39  ;;  %1051 = vst [vmem:[#allocation2 + $0xa0] sm:$0x1] %v18905_v39 }
 0x1b6   :  { %1060 = vst [vmem:[#allocation2 + $0x130] sm:$0x1] %v18905_v39  ;;  %1070 = vst [vmem:[#allocation2 + $0x99] sm:$0x1] %v18905_v39 }
 0x1b7   :  { %15358 = vmatmul.mubr.msk.bf16.gmra.mrb[28].mxu0 %vm397_vm0, %v18354_v37  ;;  %1071 = vst [vmem:[#allocation2 + $0xa9] sm:$0x1] %v18905_v39  ;;  %1080 = vst [vmem:[#allocation2 + $0x139] sm:$0x1] %v18905_v39 }
 0x1b8   :  { %3764 = vst [vmem:[#allocation3] sm:$0x1] %v18905_v39  ;;  %3781 = vst [vmem:[#allocation3 + $0x198] sm:$0x1] %v18905_v39 }
 0x1b9   :  { %3782 = vst [vmem:[#allocation3 + $0x1b0] sm:$0x1] %v18905_v39  ;;  %3799 = vst [vmem:[#allocation3 + $0x348] sm:$0x1] %v18905_v39 }
 0x1ba   :  { %3800 = vst [vmem:[#allocation3 + $0x11] sm:$0x1] %v18905_v39  ;;  %3817 = vst [vmem:[#allocation3 + $0x1a9] sm:$0x1] %v18905_v39 }
 0x1bb   :  { %3818 = vst [vmem:[#allocation3 + $0x1c1] sm:$0x1] %v18905_v39  ;;  %3835 = vst [vmem:[#allocation3 + $0x359] sm:$0x1] %v18905_v39  ;;  %v19409_v6 = vld [vmem:[#allocation2] sm:$0xff] }
 0x1bc   :  { %9043 = vst [vmem:[#allocation4] sm:$0x1] %v18905_v39  ;;  %9060 = vst [vmem:[#allocation4 + $0x198] sm:$0x1] %v18905_v39  ;;  %v19411_v30 = vld [vmem:[#allocation2 + $0x8] sm:$0x3] }
 0x1bd   :  { %9061 = vst [vmem:[#allocation4 + $0x1b0] sm:$0x1] %v18905_v39  ;;  %9078 = vst [vmem:[#allocation4 + $0x348] sm:$0x1] %v18905_v39  ;;  %v1178_v46 = vrot.slane %v19409_v6, 1  ;;  %v1179_v47 = vrot.slane %v19411_v30, 1 }
 0x1be   :  { %9079 = vst [vmem:[#allocation4 + $0x11] sm:$0x1] %v18905_v39  ;;  %9096 = vst [vmem:[#allocation4 + $0x1a9] sm:$0x1] %v18905_v39  ;;  %v19459_v10 = vld [vmem:[#allocation2 + $0xa0] sm:$0xff] }
 0x1bf   :  { %9097 = vst [vmem:[#allocation4 + $0x1c1] sm:$0x1] %v18905_v39  ;;  %9114 = vst [vmem:[#allocation4 + $0x359] sm:$0x1] %v18905_v39  ;;  %v1180_v54 = vsel %vm24320_vm4, %v1178_v46, %v1179_v47  ;;  %v19477_v39 = vld [vmem:[#allocation2 + $0xa8] sm:$0x3] }
 0x272   :  { %v15347_v42 = vpop.f32.mrb[16].mxu0 }
 0x273   :  { %1018 = vst [vmem:[#allocation2 + $0x31] sm:$0xff] %v15347_v42  ;;  %v952_v44 = vpop.f32.mrb[17].mxu0 }
 0x274   :  { %1016 = vst [vmem:[#allocation2 + $0x11] sm:$0xff] %v952_v44  ;;  %v15348_v45 = vpop.f32.mrb[18].mxu0 }
 0x275   :  { %1019 = vst [vmem:[#allocation2 + $0x41] sm:$0xff] %v15348_v45  ;;  %v955_v35 = vpop.f32.mrb[19].mxu0 }
 0x276   :  { %1017 = vst [vmem:[#allocation2 + $0x21] sm:$0xff] %v955_v35 }
 0x27a   :  { %v15351_v48 = vpop.f32.mrb[20].mxu0  ;;  %v19415_v49 = vld [vmem:[#allocation2 + $0x30] sm:$0xff]  ;;  %v1088_v50 = vld [vmem:[#allocation2 + $0x38] sm:$0x3] }
 0x27b   :  { %1022 = vst [vmem:[#allocation2 + $0x71] sm:$0xff] %v15351_v48  ;;  %v968_v51 = vpop.f32.mrb[21].mxu0  ;;  %v19417_v52 = vld [vmem:[#allocation2 + $0x10] sm:$0xff]  ;;  %v19419_v53 = vld [vmem:[#allocation2 + $0x18] sm:$0x3]  ;;  %v1187_v58 = vrot.slane %v19415_v49, 1 }
 0x27c   :  { %1020 = vst [vmem:[#allocation2 + $0x51] sm:$0xff] %v968_v51  ;;  %v15352_v55 = vpop.f32.mrb[22].mxu0  ;;  %v1181_v56 = vrot.slane %v19417_v52, 1  ;;  %v1182_v57 = vrot.slane %v19419_v53, 1  ;;  %v1188_v59 = vrot.slane %v1088_v50, 1  ;;  %v19425_v60 = vld [vmem:[#allocation2 + $0x40] sm:$0xff] }
 0x27d   :  { %1023 = vst [vmem:[#allocation2 + $0x81] sm:$0xff] %v15352_v55  ;;  %v971_v61 = vpop.f32.mrb[23].mxu0  ;;  %v19427_v62 = vld [vmem:[#allocation2 + $0x20] sm:$0xff]  ;;  %v1086_v63 = vld [vmem:[#allocation2 + $0x28] sm:$0x3]  ;;  %v1567_v13 = vrot.slane %v1088_v50, 2 }
 0x27e   :  { %v1090_v1 = vld [vmem:[#allocation2 + $0x48] sm:$0x3]  ;;  %1021 = vst [vmem:[#allocation2 + $0x61] sm:$0xff] %v971_v61  ;;  %v19432_v4 = vsel %vm24320_vm4, %v1181_v56, %v1182_v57  ;;  %v1184_v5 = vrot.slane %v19427_v62, 1  ;;  %v1185_v8 = vrot.slane %v1086_v63, 1  ;;  %v1564_v11 = vrot.slane %v1086_v63, 2 }
 0x27f   :  { %v1242_v12 = vpack.c.bf16 %v19432_v4, %v1180_v54  ;;  %v1190_v7 = vrot.slane %v19425_v60, 1  ;;  %v1191_v14 = vrot.slane %v1090_v1, 1  ;;  %v19441_v3 = vsel %vm24320_vm4, %v1187_v58, %v1188_v59  ;;  %v18366_v61 = vld [vmem:[#allocation7 + $0x18] sm:$0xff]  }
 0x280   :  { %v19438_v43 = vsel %vm24320_vm4, %v1184_v5, %v1185_v8  ;;  %v1563_v15 = vrot.slane %v19427_v62, 2  ;;  %v1566_v18 = vrot.slane %v19415_v49, 2  ;;  %v1569_v19 = vrot.slane %v19425_v60, 2 }
 0x281   :  { %15377 = vmatprep.mubr.bf16.mxu1 %v1242_v12  ;;  %v19446_v0 = vpack.c.bf16 %v19441_v3, %v19438_v43  ;;  %v19449_v17 = vsel %vm24320_vm4, %v1190_v7, %v1191_v14  ;;  %v1570_v26 = vrot.slane %v1090_v1, 2  ;;  %v1560_v44 = vrot.slane %v19417_v52, 2 }
 0x282   :  { %v15355_v9 = vpop.f32.mrb[24].mxu0  ;;  %v19455_v21 = vld [vmem:[#allocation2 + $0x70] sm:$0xff]  ;;  %v19457_v22 = vld [vmem:[#allocation2 + $0x78] sm:$0x3]  ;;  %v19462_v23 = vsel %vm24319_vm3, %v1563_v15, %v1564_v11  ;;  %v19471_v33 = vsel %vm24319_vm3, %v1566_v18, %v1567_v13  ;;  %v1561_v48 = vrot.slane %v19419_v53, 2  ;;  %v1203_v51 = vrot.slane %v19477_v39, 1 }
 0x283   :  { %24521 = vst [vmem:[#allocation16_spill] sm:$0xff] %v19446_v0  ;;  %24522 = vst [vmem:[#allocation17_spill] sm:$0xff] %v19462_v23  ;;  %v984_v27 = vpop.f32.mrb[25].mxu0  ;;  %15378 = vmatmul.mubr.bf16.vlgmr.msra.gmra.mrb[16].mxu1 %v19446_v0  ;;  %v19465_v28 = vld [vmem:[#allocation2 + $0x50] sm:$0xff]  ;;  %v19467_v29 = vld [vmem:[#allocation2 + $0x58] sm:$0x3]  ;;  %v19481_v24 = vpack.c.bf16 %v19471_v33, %v19462_v23  ;;  %v19488_v45 = vsel %vm24319_vm3, %v1569_v19, %v1570_v26 }
 0x284   :  { %1026 = vst [vmem:[#allocation2 + $0xd1] sm:$0xff] %v15355_v9  ;;  %v1199_v31 = vrot.slane %v19455_v21, 1  ;;  %24523 = vst [vmem:[#allocation18_spill] sm:$0xff] %v19471_v33  ;;  %v15356_v34 = vpop.f32.mrb[26].mxu0  ;;  %15394 = vmatpush3.bf16.msra.mxu1 %v19406_v25  ;;  %v1193_v36 = vrot.slane %v19465_v28, 1  ;;  %v1194_v37 = vrot.slane %v19467_v29, 1  ;;  %v19523_v13 = vsel %vm24319_vm3, %v1560_v44, %v1561_v48 }
 0x285   :  { %1024 = vst [vmem:[#allocation2 + $0xb1] sm:$0xff] %v984_v27  ;;  %v1200_v38 = vrot.slane %v19457_v22, 1  ;;  %1027 = vst [vmem:[#allocation2 + $0xe1] sm:$0xff] %v15356_v34  ;;  %v987_v40 = vpop.f32.mrb[27].mxu0  ;;  %15395 = vmatprep.subr.bf16.mxu1 %v18364_v16  ;;  %v19483_v41 = vld [vmem:[#allocation2 + $0x60] sm:$0xff]  ;;  %v1202_v25 = vrot.slane %v19459_v10, 1 }
 0x286   :  { %v1094_v42 = vld [vmem:[#allocation2 + $0x68] sm:$0x3]  ;;  %1025 = vst [vmem:[#allocation2 + $0xc1] sm:$0xff] %v987_v40  ;;  %v19491_v35 = vsel %vm24320_vm4, %v1193_v36, %v1194_v37  ;;  %v1196_v46 = vrot.slane %v19483_v41, 1  ;;  %v1575_v55 = vrot.slane %v19483_v41, 2  ;;  %v1578_v53 = vrot.slane %v19455_v21, 2 }
 0x287   :  { %v1197_v47 = vrot.slane %v1094_v42, 1  ;;  %v19497_v50 = vpack.c.bf16 %v19491_v35, %v19449_v17  ;;  %v19507_v57 = vsel %vm24320_vm4, %v1199_v31, %v1200_v38  ;;  %v1576_v58 = vrot.slane %v1094_v42, 2 }
 0x288   :  { %15396 = vmatpush3.bf16.msra.mxu1 %v18364_v16  ;;  %v1579_v63 = vrot.slane %v19457_v22, 2  ;;  %v1204_v34 = vsel %vm24320_vm4, %v1202_v25, %v1203_v51  ;;  %v1573_v15 = vrot.slane %v19467_v29, 2 }
 0x289   :  { %24524 = vst [vmem:[#allocation19_spill] sm:$0xff] %v19497_v50  ;;  %v19504_v56 = vsel %vm24320_vm4, %v1196_v46, %v1197_v47  ;;  %15381 = vmatprep.mubr.bf16.mxu1 %v19497_v50  ;;  %15397 = vmatprep.subr.bf16.mxu1 %v18365_v32  ;;  %v19526_v7 = vsel %vm24319_vm3, %v1575_v55, %v1576_v58  ;;  %v18367_v47 = vld [vmem:[#allocation7 + $0x20] sm:$0xff]  }
 0x28a   :  { %v19513_v59 = vpack.c.bf16 %v19507_v57, %v19504_v56  ;;  %v15359_v8 = vpop.f32.mrb[28].mxu0  ;;  %v19539_v26 = vsel %vm24319_vm3, %v1578_v53, %v1579_v63 }
 0x28b   :  { %v19520_v11 = vld [vmem:[#allocation2 + $0xd0] sm:$0xff]  ;;  %v1108_v12 = vld [vmem:[#allocation2 + $0xd8] sm:$0x3]  ;;  %1030 = vst [vmem:[#allocation2 + $0x111] sm:$0xff] %v15359_v8  ;;  %v1000_v16 = vpop.f32.mrb[29].mxu0  ;;  %24526 = vst [vmem:[#allocation21_spill] sm:$0xff] %v19539_v26  ;;  %v19550_v40 = vpack.c.bf16 %v19539_v26, %v19526_v7 }
 0x28c   :  { %24525 = vst [vmem:[#allocation20_spill] sm:$0xff] %v19513_v59  ;;  %15382 = vmatmul.mubr.bf16.gmra.mrb[20].mxu1 %v19513_v59  ;;  %v19533_v18 = vld [vmem:[#allocation2 + $0xb0] sm:$0xff]  ;;  %v19535_v19 = vld [vmem:[#allocation2 + $0xb8] sm:$0x3]  ;;  %v1211_v9 = vrot.slane %v19520_v11, 1  ;;  %v1212_v22 = vrot.slane %v1108_v12, 1 }
 0x28d   :  { %1028 = vst [vmem:[#allocation2 + $0xf1] sm:$0xff] %v1000_v16  ;;  %v15360_v31 = vpop.f32.mrb[30].mxu0  ;;  %15398 = vmatpush3.bf16.msra.mxu1 %v18365_v32  ;;  %v1205_v36 = vrot.slane %v19533_v18, 1  ;;  %v1206_v37 = vrot.slane %v19535_v19, 1  ;;  %v19546_v38 = vld [vmem:[#allocation2 + $0xe0] sm:$0xff]  ;;  %v18369_v32 = vld [vmem:[#allocation7 + $0x30] sm:$0xff]  }
 0x28e   :  { %1031 = vst [vmem:[#allocation2 + $0x121] sm:$0xff] %v15360_v31  ;;  %v1003_v42 = vpop.f32.mrb[31].mxu0  ;;  %15399 = vmatprep.subr.bf16.mxu1 %v18366_v61  ;;  %v19552_v44 = vld [vmem:[#allocation2 + $0xc0] sm:$0xff]  ;;  %v1106_v46 = vld [vmem:[#allocation2 + $0xc8] sm:$0x3]  ;;  %v19562_v53 = vsel %vm24320_vm4, %v1211_v9, %v1212_v22  ;;  %v1590_v31 = vrot.slane %v19520_v11, 2 }
 0x28f   :  { %1029 = vst [vmem:[#allocation2 + $0x101] sm:$0xff] %v1003_v42  ;;  %v19557_v25 = vsel %vm24320_vm4, %v1205_v36, %v1206_v37  ;;  %v1208_v48 = vrot.slane %v19552_v44, 1  ;;  %v1209_v51 = vrot.slane %v1106_v46, 1  ;;  %v1110_v55 = vld [vmem:[#allocation2 + $0xe8] sm:$0x3]  ;;  %v1587_v8 = vrot.slane %v19552_v44, 2 }
 0x290   :  { %v1246_v58 = vpack.c.bf16 %v19557_v25, %v1204_v34  ;;  %v1588_v16 = vrot.slane %v1106_v46, 2  ;;  %v18368_v37 = vld [vmem:[#allocation7 + $0x28] sm:$0xff]   ;;  %v1214_v34 = vrot.slane %v19546_v38, 1  ;;  %v1215_v9 = vrot.slane %v1110_v55, 1 }
 0x291   :  { %15400 = vmatpush3.bf16.msra.mxu1 %v18366_v61  ;;  %v19565_v63 = vsel %vm24320_vm4, %v1208_v48, %v1209_v51  ;;  %v1591_v22 = vrot.slane %v1108_v12, 2  ;;  %v1121_v48 = vpack.c.bf16 %v19417_v52, %v19409_v6  ;;  %v1572_v12 = vrot.slane %v19465_v28, 2 }
 0x292   :  { %15385 = vmatprep.mubr.bf16.mxu1 %v1246_v58  ;;  %v19571_v36 = vpack.c.bf16 %v19562_v53, %v19565_v63  ;;  %15401 = vmatprep.subr.bf16.mxu1 %v18367_v47  ;;  %v19574_v61 = vld [vmem:[#allocation2 + $0x110] sm:$0xff]  ;;  %v1116_v42 = vld [vmem:[#allocation2 + $0x118] sm:$0x3]  ;;  %v19579_v46 = vsel %vm24319_vm3, %v1587_v8, %v1588_v16  ;;  %v19598_v5 = vsel %vm24320_vm4, %v1214_v34, %v1215_v9  ;;  %v1585_v9 = vrot.slane %v19535_v19, 2 }
 0x293   :  { %v1223_v27 = vrot.slane %v19574_v61, 1  ;;  %v19590_v20 = vsel %vm24319_vm3, %v1590_v31, %v1591_v22  ;;  %v1224_v14 = vrot.slane %v1116_v42, 1  ;;  %v1584_v31 = vrot.slane %v19533_v18, 2  ;;  %v18370_v19 = vld [vmem:[#allocation7 + $0x38] sm:$0xff]  }
 0x294   :  { %24527 = vst [vmem:[#allocation22_spill] sm:$0xff] %v19571_v36  ;;  %15386 = vmatmul.mubr.bf16.gmra.mrb[24].mxu1 %v19571_v36  ;;  %v19584_v58 = vld [vmem:[#allocation2 + $0xf0] sm:$0xff]  ;;  %v1112_v54 = vld [vmem:[#allocation2 + $0xf8] sm:$0x3]  ;;  %v19595_v51 = vpack.c.bf16 %v19590_v20, %v19579_v46  ;;  %v1594_v22 = vrot.slane %v1110_v55, 2  ;;  %v1602_v50 = vrot.slane %v19574_v61, 2  ;;  %v19644_v33 = vsel %vm24319_vm3, %v1572_v12, %v1573_v15 }
 0x295   :  { %15402 = vmatpush3.bf16.msra.mxu1 %v18367_v47  ;;  %v1217_v8 = vrot.slane %v19584_v58, 1  ;;  %v1218_v16 = vrot.slane %v1112_v54, 1  ;;  %v1593_v47 = vrot.slane %v19546_v38, 2  ;;  %v1557_v12 = vrot.slane %v19409_v6, 2  ;;  %v18379_v6 = vld [vmem:[#allocation7 + $0xc0] sm:$0xff]  }
 0x296   :  { %15403 = vmatprep.subr.bf16.mxu1 %v18368_v37  ;;  %v19600_v2 = vld [vmem:[#allocation2 + $0x100] sm:$0xff]  ;;  %v1114_v29 = vld [vmem:[#allocation2 + $0x108] sm:$0x3] }
 0x297   :  { %v19605_v1 = vsel %vm24320_vm4, %v1217_v8, %v1218_v16  ;;  %v1220_v36 = vrot.slane %v19600_v2, 1  ;;  %v1221_v59 = vrot.slane %v1114_v29, 1  ;;  %v1599_v0 = vrot.slane %v19600_v2, 2 }
 0x298   :  { %v19611_v34 = vpack.c.bf16 %v19605_v1, %v19598_v5  ;;  %v1600_v26 = vrot.slane %v1114_v29, 2  ;;  %v19619_v8 = vsel %vm24320_vm4, %v1223_v27, %v1224_v14  ;;  %v1603_v16 = vrot.slane %v1116_v42, 2 }
 0x299   :  { %15404 = vmatpush3.bf16.msra.mxu1 %v18368_v37  ;;  %v19616_v55 = vsel %vm24320_vm4, %v1220_v36, %v1221_v59  ;;  %v1596_v37 = vrot.slane %v19584_v58, 2  ;;  %v1597_v29 = vrot.slane %v1112_v54, 2  ;;  %v19633_v14 = vsel %vm24319_vm3, %v1593_v47, %v1594_v22  ;;  %v18371_v47 = vld [vmem:[#allocation7 + $0x80] sm:$0xff]   ;;  %v18378_v54 = vld [vmem:[#allocation7 + $0xb8] sm:$0xff]  }
 0x29a   :  { %15389 = vmatprep.mubr.bf16.mxu1 %v19611_v34  ;;  %v19626_v23 = vpack.c.bf16 %v19619_v8, %v19616_v55  ;;  %15405 = vmatprep.subr.bf16.mxu1 %v18369_v32  ;;  %v19630_v59 = vsel %vm24319_vm3, %v1599_v0, %v1600_v26  ;;  %v19636_v27 = vsel %vm24319_vm3, %v1602_v50, %v1603_v16  ;;  %v18373_v16 = vld [vmem:[#allocation7 + $0x90] sm:$0xff]  }
 0x29b   :  { %v2009_v36 = vpack.c.bf16 %v19565_v63, %v19557_v25  ;;  %v19648_v0 = vpack.c.bf16 %v19636_v27, %v19630_v59  ;;  %v19653_v50 = vsel %vm24319_vm3, %v1584_v31, %v1585_v9  ;;  %v19658_v15 = vsel %vm24319_vm3, %v1596_v37, %v1597_v29  ;;  %v18372_v31 = vld [vmem:[#allocation7 + $0x88] sm:$0xff]   ;;  %v18374_v37 = vld [vmem:[#allocation7 + $0x98] sm:$0xff]   ;;  %v18401_v25 = vld [vmem:[#allocation7 + $0x170] sm:$0xff]  }
 0x29c   :  { %15390 = vmatmul.mubr.bf16.gmra.mrb[28].mxu1 %v19626_v23  ;;  %v19672_v9 = vpack.c.bf16 %v19465_v28, %v19425_v60  ;;  %v1125_v29 = vpack.c.bf16 %v19533_v18, %v19459_v10  ;;  %v19689_v22 = vpack.c.bf16 %v19584_v58, %v19546_v38  ;;  %v19698_v26 = vpack.c.bf16 %v19574_v61, %v19600_v2 }
 0x29d   :  { %15406 = vmatpush3.bf16.msra.mxu1 %v18369_v32  ;;  %15409 = vmatprep.mubr.bf16.mxu1 %v1121_v48  ;;  %v19668_v48 = vpack.c.bf16 %v19415_v49, %v19427_v62  ;;  %v18375_v32 = vld [vmem:[#allocation7 + $0xa0] sm:$0xff]  }
 0x29e   :  { %15407 = vmatprep.subr.bf16.mxu1 %v18370_v19 }
 0x2a1   :  { %15408 = vmatpush3.bf16.msra.mxu1 %v18370_v19  ;;  %v19678_v19 = vpack.c.bf16 %v19455_v21, %v19483_v41 }
 0x2a2   :  { %15425 = vmatprep.subr.bf16.mxu1 %v18371_v47 }
 0x2a4   :  { %15410 = vmatmul.mubr.bf16.vlgmr.msra.gmra.mrb[16].mxu1 %v19668_v48 }
 0x2a5   :  { %15413 = vmatprep.mubr.bf16.mxu1 %v19672_v9  ;;  %15426 = vmatpush3.bf16.msra.mxu1 %v18371_v47  ;;  %v19685_v47 = vpack.c.bf16 %v19520_v11, %v19552_v44 }
 0x2a6   :  { %15427 = vmatprep.subr.bf16.mxu1 %v18372_v31 }
 0x2a9   :  { %15428 = vmatpush3.bf16.msra.mxu1 %v18372_v31  ;;  %v18376_v31 = vld [vmem:[#allocation7 + $0xa8] sm:$0xff]  }
 0x2aa   :  { %15429 = vmatprep.subr.bf16.mxu1 %v18373_v16 }
 0x2ac   :  { %15414 = vmatmul.mubr.bf16.gmra.mrb[20].mxu1 %v19678_v19 }
 0x2ad   :  { %15417 = vmatprep.mubr.bf16.mxu1 %v1125_v29  ;;  %15430 = vmatpush3.bf16.msra.mxu1 %v18373_v16  ;;  %v1558_v29 = vrot.slane %v19411_v30, 2  ;;  %v18377_v16 = vld [vmem:[#allocation7 + $0xb0] sm:$0xff]   ;;  %v18380_v30 = vld [vmem:[#allocation7 + $0xc8] sm:$0xff]  }
 0x2ae   :  { %15431 = vmatprep.subr.bf16.mxu1 %v18374_v37 }
 0x2b1   :  { %15432 = vmatpush3.bf16.msra.mxu1 %v18374_v37  ;;  %v1559_v37 = vsel %vm24319_vm3, %v1557_v12, %v1558_v29  ;;  %v19704_v12 = vpack.c.bf16 %v19644_v33, %v19488_v45 }
 0x2b2   :  { %15433 = vmatprep.subr.bf16.mxu1 %v18375_v32  ;;  %v1621_v42 = vpack.c.bf16 %v19523_v13, %v1559_v37  ;;  %v19715_v37 = vpack.c.bf16 %v19658_v15, %v19633_v14 }
 0x2b4   :  { %15418 = vmatmul.mubr.bf16.gmra.mrb[24].mxu1 %v19685_v47 }
 0x2b5   :  { %15421 = vmatprep.mubr.bf16.mxu1 %v19689_v22  ;;  %15434 = vmatpush3.bf16.msra.mxu1 %v18375_v32  ;;  %v1581_v32 = vrot.slane %v19459_v10, 2  ;;  %v18383_v10 = vld [vmem:[#allocation7 + $0xe0] sm:$0xff]  }
 0x2b6   :  { %15435 = vmatprep.subr.bf16.mxu1 %v18376_v31 }
 0x2b9   :  { %15436 = vmatpush3.bf16.msra.mxu1 %v18376_v31  ;;  %v1582_v31 = vrot.slane %v19477_v39, 2  ;;  %v18384_v39 = vld [vmem:[#allocation7 + $0xe8] sm:$0xff]  }
 0x2ba   :  { %15437 = vmatprep.subr.bf16.mxu1 %v18377_v16 }
 0x2bb   :  { %v1583_v29 = vsel %vm24319_vm3, %v1581_v32, %v1582_v31  ;;  %v24528_v32 = vpack.c.bf16 %v19427_v62, %v19417_v52  ;;  %v18387_v31 = vld [vmem:[#allocation7 + $0x100] sm:$0xff]   ;;  %v18390_v62 = vld [vmem:[#allocation7 + $0x118] sm:$0xff]  }
 0x2bc   :  { %15422 = vmatmul.mubr.bf16.gmra.mrb[28].mxu1 %v19698_v26 }
 0x2bd   :  { %15438 = vmatpush3.bf16.msra.mxu1 %v18377_v16  ;;  %15441 = vmatprep.mubr.bf16.mxu1 %v1621_v42  ;;  %v18381_v42 = vld [vmem:[#allocation7 + $0xd0] sm:$0xff]   ;;  %v1625_v16 = vpack.c.bf16 %v19653_v50, %v1583_v29  ;;  %v24529_v29 = vpack.c.bf16 %v19425_v60, %v19415_v49  ;;  %v24531_v49 = vpack.c.bf16 %v19552_v44, %v19533_v18  ;;  %v18391_v60 = vld [vmem:[#allocation7 + $0x120] sm:$0xff]   ;;  %v18394_v44 = vld [vmem:[#allocation7 + $0x138] sm:$0xff]  }
 0x2be   :  { %15439 = vmatprep.subr.bf16.mxu1 %v18378_v54 }
 0x2c1   :  { %15440 = vmatpush3.bf16.msra.mxu1 %v18378_v54  ;;  %v18382_v54 = vld [vmem:[#allocation7 + $0xd8] sm:$0xff]  }
 0x2c2   :  { %15457 = vmatprep.subr.bf16.mxu1 %v18379_v6 }
 0x2c4   :  { %15442 = vmatmul.mubr.bf16.vlgmr.msra.gmra.mrb[16].mxu1 %v19481_v24 }
 0x2c5   :  { %15445 = vmatprep.mubr.bf16.mxu1 %v19704_v12  ;;  %15458 = vmatpush3.bf16.msra.mxu1 %v18379_v6  ;;  %v18385_v6 = vld [vmem:[#allocation7 + $0xf0] sm:$0xff]  }
 0x2c6   :  { %15459 = vmatprep.subr.bf16.mxu1 %v18380_v30 }
 0x2c9   :  { %15460 = vmatpush3.bf16.msra.mxu1 %v18380_v30  ;;  %v18386_v30 = vld [vmem:[#allocation7 + $0xf8] sm:$0xff]  }
 0x2ca   :  { %15461 = vmatprep.subr.bf16.mxu1 %v18381_v42 }
 0x2cc   :  { %15446 = vmatmul.mubr.bf16.gmra.mrb[20].mxu1 %v19550_v40 }
 0x2cd   :  { %15449 = vmatprep.mubr.bf16.mxu1 %v1625_v16  ;;  %15462 = vmatpush3.bf16.msra.mxu1 %v18381_v42  ;;  %v18388_v42 = vld [vmem:[#allocation7 + $0x108] sm:$0xff]   ;;  %v18389_v16 = vld [vmem:[#allocation7 + $0x110] sm:$0xff]  }
 0x2ce   :  { %15463 = vmatprep.subr.bf16.mxu1 %v18382_v54 }
 0x2d1   :  { %15464 = vmatpush3.bf16.msra.mxu1 %v18382_v54  ;;  %v24530_v54 = vpack.c.bf16 %v19483_v41, %v19465_v28  ;;  %v18392_v28 = vld [vmem:[#allocation7 + $0x128] sm:$0xff]   ;;  %v24532_v41 = vpack.c.bf16 %v19546_v38, %v19520_v11  ;;  %v24534_v11 = vpack.c.bf16 %v19438_v43, %v19432_v4  ;;  %v18397_v4 = vld [vmem:[#allocation7 + $0x150] sm:$0xff]  }
 0x2d2   :  { %15465 = vmatprep.subr.bf16.mxu1 %v18383_v10  ;;  %v1098_v38 = vld [vmem:[#allocation2 + $0x88] sm:$0x3] }
 0x2d4   :  { %15450 = vmatmul.mubr.bf16.gmra.mrb[24].mxu1 %v19595_v51 }
 0x2d5   :  { %15453 = vmatprep.mubr.bf16.mxu1 %v19715_v37  ;;  %15466 = vmatpush3.bf16.msra.mxu1 %v18383_v10  ;;  %v19729_v10 = vld [vmem:[#allocation2 + $0x80] sm:$0xff] }
 0x2d6   :  { %15467 = vmatprep.subr.bf16.mxu1 %v18384_v39  ;;  %v1810_v52 = vpack.c.bf16 %v19729_v10, %v19455_v21  ;;  %v24533_v21 = vpack.c.bf16 %v19600_v2, %v19584_v58  ;;  %v18395_v2 = vld [vmem:[#allocation7 + $0x140] sm:$0xff]   ;;  %v18396_v58 = vld [vmem:[#allocation7 + $0x148] sm:$0xff]  }
 0x2d9   :  { %15468 = vmatpush3.bf16.msra.mxu1 %v18384_v39  ;;  %v18393_v39 = vld [vmem:[#allocation7 + $0x130] sm:$0xff]  }
 0x2da   :  { %15469 = vmatprep.subr.bf16.mxu1 %v18385_v6 }
 0x2dc   :  { %15454 = vmatmul.mubr.bf16.gmra.mrb[28].mxu1 %v19648_v0 }
 0x2dd   :  { %15470 = vmatpush3.bf16.msra.mxu1 %v18385_v6  ;;  %15473 = vmatprep.mubr.bf16.mxu1 %v24528_v32  ;;  %v19742_v6 = vld [vmem:[#allocation2 + $0x120] sm:$0xff]  ;;  %v1998_v32 = vrot.slane %v1098_v38, 1 }
 0x2de   :  { %15471 = vmatprep.subr.bf16.mxu1 %v18386_v30  ;;  %v1814_v18 = vpack.c.bf16 %v19742_v6, %v19574_v61  ;;  %v24535_v61 = vpack.c.bf16 %v19449_v17, %v19441_v3  ;;  %v18399_v3 = vld [vmem:[#allocation7 + $0x160] sm:$0xff]   ;;  %v1118_v17 = vld [vmem:[#allocation2 + $0x128] sm:$0x3] }
 0x2e1   :  { %15472 = vmatpush3.bf16.msra.mxu1 %v18386_v30  ;;  %v1997_v30 = vrot.slane %v19729_v10, 1 }
 0x2e2   :  { %15489 = vmatprep.subr.bf16.mxu1 %v18387_v31 }
 0x2e3   :  { %v19757_v43 = vsel %vm24320_vm4, %v1997_v30, %v1998_v32  ;;  %v18410_v30 = vld [vmem:[#allocation7 + $0x1b8] sm:$0xff]   ;;  %v18415_v32 = vld [vmem:[#allocation7 + $0x1e0] sm:$0xff]  }
 0x2e4   :  { %15474 = vmatmul.mubr.bf16.vlgmr.msra.gmra.mrb[16].mxu1 %v24529_v29  ;;  %v18398_v29 = vld [vmem:[#allocation7 + $0x158] sm:$0xff]  }
 0x2e5   :  { %15477 = vmatprep.mubr.bf16.mxu1 %v24530_v54  ;;  %15490 = vmatpush3.bf16.msra.mxu1 %v18387_v31  ;;  %v24536_v31 = vpack.c.bf16 %v19504_v56, %v19491_v35  ;;  %v18400_v35 = vld [vmem:[#allocation7 + $0x168] sm:$0xff]   ;;  %v2000_v56 = vrot.slane %v19742_v6, 1  ;;  %v2001_v54 = vrot.slane %v1118_v17, 1 }
 0x2e6   :  { %15491 = vmatprep.subr.bf16.mxu1 %v18388_v42 }
 0x2e7   :  { %v19772_v63 = vsel %vm24320_vm4, %v2000_v56, %v2001_v54  ;;  %v18422_v54 = vld [vmem:[#allocation7 + $0x218] sm:$0xff]  }
 0x2e9   :  { %15492 = vmatpush3.bf16.msra.mxu1 %v18388_v42  ;;  %v2008_v42 = vpack.c.bf16 %v19757_v43, %v19507_v57  ;;  %v24537_v57 = vpack.c.bf16 %v19598_v5, %v19562_v53  ;;  %v24539_v5 = vld [vmem:[#allocation17_spill] sm:$0xff] }
 0x2ea   :  { %15493 = vmatprep.subr.bf16.mxu1 %v18389_v16  ;;  %v24540_v53 = vpack.c.bf16 %v24539_v5, %v19523_v13  ;;  %v18405_v13 = vld [vmem:[#allocation7 + $0x190] sm:$0xff]  }
 0x2ec   :  { %15478 = vmatmul.mubr.bf16.gmra.mrb[20].mxu1 %v1810_v52  ;;  %v18402_v52 = vld [vmem:[#allocation7 + $0x178] sm:$0xff]  }
 0x2ed   :  { %15481 = vmatprep.mubr.bf16.mxu1 %v24531_v49  ;;  %15494 = vmatpush3.bf16.msra.mxu1 %v18389_v16  ;;  %v24538_v16 = vpack.c.bf16 %v19616_v55, %v19605_v1  ;;  %v18403_v1 = vld [vmem:[#allocation7 + $0x180] sm:$0xff]   ;;  %v18404_v55 = vld [vmem:[#allocation7 + $0x188] sm:$0xff]   ;;  %v2192_v49 = vrot.slane %v1098_v38, 2  ;;  %v24547_v38 = vpack.c.bf16 %v19630_v59, %v19658_v15  ;;  %v19809_v15 = vld [vmem:[#allocation2 + $0x90] sm:$0xff] }
 0x2ee   :  { %15495 = vmatprep.subr.bf16.mxu1 %v18390_v62  ;;  %v18412_v59 = vld [vmem:[#allocation7 + $0x1c8] sm:$0xff]  }
 0x2f1   :  { %15496 = vmatpush3.bf16.msra.mxu1 %v18390_v62  ;;  %v2191_v62 = vrot.slane %v19729_v10, 2 }
 0x2f2   :  { %15497 = vmatprep.subr.bf16.mxu1 %v18391_v60 }
 0x2f4   :  { %15482 = vmatmul.mubr.bf16.gmra.mrb[24].mxu1 %v24532_v41  ;;  %v19787_v41 = vsel %vm24319_vm3, %v2191_v62, %v2192_v49 }
 0x2f5   :  { %15485 = vmatprep.mubr.bf16.mxu1 %v24533_v21  ;;  %15498 = vmatpush3.bf16.msra.mxu1 %v18391_v60  ;;  %v24541_v60 = vld [vmem:[#allocation18_spill] sm:$0xff]  ;;  %v24544_v21 = vld [vmem:[#allocation21_spill] sm:$0xff] }
 0x2f6   :  { %15499 = vmatprep.subr.bf16.mxu1 %v18392_v28 }
 0x2f9   :  { %15500 = vmatpush3.bf16.msra.mxu1 %v18392_v28  ;;  %v24542_v28 = vpack.c.bf16 %v19488_v45, %v24541_v60  ;;  %v24545_v45 = vpack.c.bf16 %v19579_v46, %v19653_v50  ;;  %v18409_v46 = vld [vmem:[#allocation7 + $0x1b0] sm:$0xff]  }
 0x2fa   :  { %15501 = vmatprep.subr.bf16.mxu1 %v18393_v39 }
 0x2fc   :  { %15486 = vmatmul.mubr.bf16.gmra.mrb[28].mxu1 %v1814_v18  ;;  %v18406_v18 = vld [vmem:[#allocation7 + $0x198] sm:$0xff]  }
 0x2fd   :  { %15502 = vmatpush3.bf16.msra.mxu1 %v18393_v39  ;;  %15505 = vmatprep.mubr.bf16.mxu1 %v24534_v11  ;;  %v2202_v39 = vpack.c.bf16 %v19787_v41, %v24544_v21  ;;  %v2195_v11 = vrot.slane %v1118_v17, 2  ;;  %v24550_v17 = vld [vmem:[#allocation20_spill] sm:$0xff] }
 0x2fe   :  { %15503 = vmatprep.subr.bf16.mxu1 %v18394_v44 }
 0x301   :  { %15504 = vmatpush3.bf16.msra.mxu1 %v18394_v44  ;;  %v2194_v44 = vrot.slane %v19742_v6, 2 }
 0x302   :  { %15521 = vmatprep.subr.bf16.mxu1 %v18395_v2 }
 0x303   :  { %v19802_v50 = vsel %vm24319_vm3, %v2194_v44, %v2195_v11 }
 0x304   :  { %15506 = vmatmul.mubr.bf16.vlgmr.msra.gmra.mrb[16].mxu1 %v24535_v61  ;;  %v19816_v61 = vld [vmem:[#allocation2 + $0x130] sm:$0xff] }
 0x305   :  { %15509 = vmatprep.mubr.bf16.mxu1 %v24536_v31  ;;  %15522 = vmatpush3.bf16.msra.mxu1 %v18395_v2  ;;  %v24546_v2 = vpack.c.bf16 %v19633_v14, %v19590_v20  ;;  %v18411_v20 = vld [vmem:[#allocation7 + $0x1c0] sm:$0xff]   ;;  %v18413_v14 = vld [vmem:[#allocation7 + $0x1d0] sm:$0xff]  }
 0x306   :  { %15523 = vmatprep.subr.bf16.mxu1 %v18396_v58  ;;  %v24548_v31 = vld [vmem:[#allocation16_spill] sm:$0xff] }
 0x309   :  { %15524 = vmatpush3.bf16.msra.mxu1 %v18396_v58  ;;  %v2206_v58 = vpack.c.bf16 %v19802_v50, %v19636_v27  ;;  %v2385_v27 = vpack.c.bf16 %v19809_v15, %v19729_v10  ;;  %v2386_v10 = vpack.c.bf16 %v19816_v61, %v19742_v6  ;;  %v18421_v6 = vld [vmem:[#allocation7 + $0x210] sm:$0xff]  }
 0x30a   :  { %15525 = vmatprep.subr.bf16.mxu1 %v18397_v4 }
 0x30c   :  { %15510 = vmatmul.mubr.bf16.gmra.mrb[20].mxu1 %v2008_v42  ;;  %v2569_v42 = vrot.slane %v19809_v15, 1 }
 0x30d   :  { %15513 = vmatprep.mubr.bf16.mxu1 %v2009_v36  ;;  %15526 = vmatpush3.bf16.msra.mxu1 %v18397_v4  ;;  %v2012_v36 = vpack.c.bf16 %v19772_v63, %v19619_v8  ;;  %v24543_v8 = vpack.c.bf16 %v19526_v7, %v19644_v33  ;;  %v18407_v33 = vld [vmem:[#allocation7 + $0x1a0] sm:$0xff]   ;;  %v18408_v7 = vld [vmem:[#allocation7 + $0x1a8] sm:$0xff]  }
 0x30e   :  { %15527 = vmatprep.subr.bf16.mxu1 %v18398_v29  ;;  %v18419_v4 = vld [vmem:[#allocation7 + $0x200] sm:$0xff]  }
 0x311   :  { %15528 = vmatpush3.bf16.msra.mxu1 %v18398_v29 }
 0x312   :  { %15529 = vmatprep.subr.bf16.mxu1 %v18399_v3 }
 0x314   :  { %15514 = vmatmul.mubr.bf16.gmra.mrb[24].mxu1 %v24537_v57  ;;  %v24551_v57 = vld [vmem:[#allocation22_spill] sm:$0xff] }
 0x315   :  { %15517 = vmatprep.mubr.bf16.mxu1 %v24538_v16  ;;  %15530 = vmatpush3.bf16.msra.mxu1 %v18399_v3  ;;  %v24549_v3 = vld [vmem:[#allocation19_spill] sm:$0xff]  ;;  %v18423_v16 = vld [vmem:[#allocation7 + $0x220] sm:$0xff]  }
 0x316   :  { %15531 = vmatprep.subr.bf16.mxu1 %v18400_v35 }
 0x319   :  { %15532 = vmatpush3.bf16.msra.mxu1 %v18400_v35 }
 0x31a   :  { %15533 = vmatprep.subr.bf16.mxu1 %v18401_v25 }
 0x31c   :  { %15518 = vmatmul.mubr.bf16.gmra.mrb[28].mxu1 %v2012_v36  ;;  %v18424_v36 = vld [vmem:[#allocation7 + $0x228] sm:$0xff]  }
 0x31d   :  { %15534 = vmatpush3.bf16.msra.mxu1 %v18401_v25  ;;  %15537 = vmatprep.mubr.bf16.mxu1 %v24540_v53  ;;  %v1120_v25 = vld [vmem:[#allocation2 + $0x138] sm:$0x3] }
 0x31e   :  { %15535 = vmatprep.subr.bf16.mxu1 %v18402_v52  ;;  %v2573_v5 = vrot.slane %v1120_v25, 1  ;;  %v2761_v60 = vrot.slane %v1120_v25, 2 }
 0x321   :  { %15536 = vmatpush3.bf16.msra.mxu1 %v18402_v52  ;;  %v2572_v52 = vrot.slane %v19816_v61, 1 }
 0x322   :  { %15553 = vmatprep.subr.bf16.mxu1 %v18403_v1 }
 0x323   :  { %v2574_v53 = vsel %vm24320_vm4, %v2572_v52, %v2573_v5 }
 0x324   :  { %15538 = vmatmul.mubr.bf16.vlgmr.msra.gmra.mrb[16].mxu1 %v24542_v28 }
 0x325   :  { %15541 = vmatprep.mubr.bf16.mxu1 %v24543_v8  ;;  %15554 = vmatpush3.bf16.msra.mxu1 %v18403_v1  ;;  %v2578_v1 = vpack.c.bf16 %v2574_v53, %v19772_v63  ;;  %v2760_v63 = vrot.slane %v19816_v61, 2 }
 0x326   :  { %15555 = vmatprep.subr.bf16.mxu1 %v18404_v55 }
 0x329   :  { %15556 = vmatpush3.bf16.msra.mxu1 %v18404_v55  ;;  %v18426_v55 = vld [vmem:[#allocation7 + $0x238] sm:$0xff]  }
 0x32a   :  { %15557 = vmatprep.subr.bf16.mxu1 %v18405_v13 }
 0x32c   :  { %15542 = vmatmul.mubr.bf16.gmra.mrb[20].mxu1 %v2202_v39 }
 0x32d   :  { %15545 = vmatprep.mubr.bf16.mxu1 %v24545_v45  ;;  %15558 = vmatpush3.bf16.msra.mxu1 %v18405_v13 }
 0x32e   :  { %15559 = vmatprep.subr.bf16.mxu1 %v18406_v18 }
 0x331   :  { %15560 = vmatpush3.bf16.msra.mxu1 %v18406_v18 }
 0x332   :  { %15561 = vmatprep.subr.bf16.mxu1 %v18407_v33 }
 0x334   :  { %15546 = vmatmul.mubr.bf16.gmra.mrb[24].mxu1 %v24546_v2 }
 0x335   :  { %15549 = vmatprep.mubr.bf16.mxu1 %v24547_v38  ;;  %15562 = vmatpush3.bf16.msra.mxu1 %v18407_v33 }
 0x336   :  { %15563 = vmatprep.subr.bf16.mxu1 %v18408_v7 }
 0x339   :  { %15564 = vmatpush3.bf16.msra.mxu1 %v18408_v7 }
 0x33a   :  { %15565 = vmatprep.subr.bf16.mxu1 %v18409_v46 }
 0x33c   :  { %15550 = vmatmul.mubr.bf16.gmra.mrb[28].mxu1 %v2206_v58 }
 0x33d   :  { %15566 = vmatpush3.bf16.msra.mxu1 %v18409_v46  ;;  %15569 = vmatprep.mubr.bf16.mxu1 %v19668_v48  ;;  %v18414_v48 = vld [vmem:[#allocation7 + $0x1d8] sm:$0xff]  }
 0x33e   :  { %15567 = vmatprep.subr.bf16.mxu1 %v18410_v30 }
 0x341   :  { %15568 = vmatpush3.bf16.msra.mxu1 %v18410_v30 }
 0x342   :  { %15585 = vmatprep.subr.bf16.mxu1 %v18411_v20 }
 0x344   :  { %15570 = vmatmul.mubr.bf16.vlgmr.msra.gmra.mrb[16].mxu1 %v19672_v9  ;;  %v18416_v9 = vld [vmem:[#allocation7 + $0x1e8] sm:$0xff]  }
 0x345   :  { %15573 = vmatprep.mubr.bf16.mxu1 %v19678_v19  ;;  %15586 = vmatpush3.bf16.msra.mxu1 %v18411_v20  ;;  %v18417_v19 = vld [vmem:[#allocation7 + $0x1f0] sm:$0xff]  }
 0x346   :  { %15587 = vmatprep.subr.bf16.mxu1 %v18412_v59 }
 0x349   :  { %15588 = vmatpush3.bf16.msra.mxu1 %v18412_v59 }
 0x34a   :  { %15589 = vmatprep.subr.bf16.mxu1 %v18413_v14 }
 0x34c   :  { %15574 = vmatmul.mubr.bf16.gmra.mrb[20].mxu1 %v2385_v27 }
 0x34d   :  { %15577 = vmatprep.mubr.bf16.mxu1 %v19685_v47  ;;  %15590 = vmatpush3.bf16.msra.mxu1 %v18413_v14  ;;  %v18418_v47 = vld [vmem:[#allocation7 + $0x1f8] sm:$0xff]  }
 0x34e   :  { %15591 = vmatprep.subr.bf16.mxu1 %v18414_v48 }
 0x351   :  { %15592 = vmatpush3.bf16.msra.mxu1 %v18414_v48 }
 0x352   :  { %15593 = vmatprep.subr.bf16.mxu1 %v18415_v32 }
 0x354   :  { %15578 = vmatmul.mubr.bf16.gmra.mrb[24].mxu1 %v19689_v22  ;;  %v1100_v22 = vld [vmem:[#allocation2 + $0x98] sm:$0x3] }
 0x355   :  { %15581 = vmatprep.mubr.bf16.mxu1 %v19698_v26  ;;  %15594 = vmatpush3.bf16.msra.mxu1 %v18415_v32  ;;  %v18420_v26 = vld [vmem:[#allocation7 + $0x208] sm:$0xff]   ;;  %v2570_v29 = vrot.slane %v1100_v22, 1  ;;  %v2758_v62 = vrot.slane %v1100_v22, 2 }
 0x356   :  { %15595 = vmatprep.subr.bf16.mxu1 %v18416_v9 }
 0x357   :  { %v2571_v35 = vsel %vm24320_vm4, %v2569_v42, %v2570_v29 }
 0x358   :  { %v2577_v56 = vpack.c.bf16 %v2571_v35, %v19757_v43  ;;  %v18425_v43 = vld [vmem:[#allocation7 + $0x230] sm:$0xff]  }
 0x359   :  { %15596 = vmatpush3.bf16.msra.mxu1 %v18416_v9 }
 0x35a   :  { %15597 = vmatprep.subr.bf16.mxu1 %v18417_v19 }
 0x35c   :  { %15582 = vmatmul.mubr.bf16.gmra.mrb[28].mxu1 %v2386_v10 }
 0x35d   :  { %15598 = vmatpush3.bf16.msra.mxu1 %v18417_v19  ;;  %15601 = vmatprep.mubr.bf16.mxu1 %v24548_v31 }
 0x35e   :  { %15599 = vmatprep.subr.bf16.mxu1 %v18418_v47 }
 0x361   :  { %15600 = vmatpush3.bf16.msra.mxu1 %v18418_v47 }
 0x362   :  { %15617 = vmatprep.subr.bf16.mxu1 %v18419_v4 }
 0x364   :  { %15602 = vmatmul.mubr.bf16.vlgmr.msra.gmra.mrb[16].mxu1 %v24549_v3 }
 0x365   :  { %15605 = vmatprep.mubr.bf16.mxu1 %v24550_v17  ;;  %15618 = vmatpush3.bf16.msra.mxu1 %v18419_v4 }
 0x366   :  { %15619 = vmatprep.subr.bf16.mxu1 %v18420_v26 }
 0x369   :  { %15620 = vmatpush3.bf16.msra.mxu1 %v18420_v26 }
 0x36a   :  { %15621 = vmatprep.subr.bf16.mxu1 %v18421_v6 }
 0x36c   :  { %15606 = vmatmul.mubr.bf16.gmra.mrb[20].mxu1 %v2577_v56 }
 0x36d   :  { %15609 = vmatprep.mubr.bf16.mxu1 %v24551_v57  ;;  %15622 = vmatpush3.bf16.msra.mxu1 %v18421_v6 }
 0x36e   :  { %15623 = vmatprep.subr.bf16.mxu1 %v18422_v54 }
 0x371   :  { %15624 = vmatpush3.bf16.msra.mxu1 %v18422_v54 }
 0x372   :  { %15625 = vmatprep.subr.bf16.mxu1 %v18423_v16 }
 0x374   :  { %15610 = vmatmul.mubr.bf16.gmra.mrb[24].mxu1 %v19611_v34  ;;  %v2757_v34 = vrot.slane %v19809_v15, 2  ;;  %v18427_v15 = vld [vmem:[#allocation9] sm:$0xff]  }
 0x375   :  { %15613 = vmatprep.mubr.bf16.mxu1 %v19626_v23  ;;  %15626 = vmatpush3.bf16.msra.mxu1 %v18423_v16 }
 0x376   :  { %15627 = vmatprep.subr.bf16.mxu1 %v18424_v36  ;;  %v2759_v23 = vsel %vm24319_vm3, %v2757_v34, %v2758_v62  ;;  %15665 = vmatprep.mubr.bf16.mxu0 %v18427_v15 }
 0x377   :  { %v2765_v49 = vpack.c.bf16 %v2759_v23, %v19787_v41 }
 0x379   :  { %15628 = vmatpush3.bf16.msra.mxu1 %v18424_v36 }
 0x37a   :  { %15629 = vmatprep.subr.bf16.mxu1 %v18425_v43 }
 0x37c   :  { %15614 = vmatmul.mubr.bf16.gmra.mrb[28].mxu1 %v2578_v1 }
 0x37d   :  { %15630 = vmatpush3.bf16.msra.mxu1 %v18425_v43  ;;  %15633 = vmatprep.mubr.bf16.mxu1 %v19481_v24  ;;  %v2762_v24 = vsel %vm24319_vm3, %v2760_v63, %v2761_v60 }
 0x37e   :  { %15631 = vmatprep.subr.bf16.mxu1 %v18426_v55 }
 0x381   :  { %15632 = vmatpush3.bf16.msra.mxu1 %v18426_v55 }
 0x384   :  { %15634 = vmatmul.mubr.bf16.vlgmr.msra.gmra.mrb[16].mxu1 %v19704_v12  ;;  %v2766_v12 = vpack.c.bf16 %v2762_v24, %v19802_v50 }
 0x385   :  { %15637 = vmatprep.mubr.bf16.mxu1 %v19550_v40 }
 0x38c   :  { %15638 = vmatmul.mubr.bf16.gmra.mrb[20].mxu1 %v2765_v49 }
 0x38d   :  { %15641 = vmatprep.mubr.bf16.mxu1 %v19595_v51 }
 0x394   :  { %15642 = vmatmul.mubr.bf16.gmra.mrb[24].mxu1 %v19715_v37 }
 0x395   :  { %15645 = vmatprep.mubr.bf16.mxu1 %v19648_v0 }
 0x39c   :  { %15646 = vmatmul.mubr.bf16.gmra.mrb[28].mxu1 %v2766_v12 }
 0x457   :  { %v15635_v40 = vpop.f32.mrb[16].mxu1 }
 0x458   :  { %v2866_v28 = vpop.f32.mrb[17].mxu1 }
 0x459   :  { %v15636_v8 = vpop.f32.mrb[18].mxu1 }
 0x45a   :  { %v2869_v13 = vpop.f32.mrb[19].mxu1 }
 0x45b   :  { %v2947_v41 = vadd.f32 %v2869_v13, %v2866_v28 }
 0x45d   :  { %v2948_v21 = vadd.f32 %v15635_v40, %v2947_v41 }
 0x45f   :  { %v15639_v39 = vpop.f32.mrb[20].mxu1  ;;  %v2949_v51 = vadd.f32 %v15636_v8, %v2948_v21 }
 0x460   :  { %v2882_v18 = vpop.f32.mrb[21].mxu1 }
 0x461   :  { %v2950_v45 = vadd.f32 %v2949_v51, %v2882_v18  ;;  %v15640_v33 = vpop.f32.mrb[22].mxu1 }
 0x462   :  { %v2885_v7 = vpop.f32.mrb[23].mxu1 }
 0x463   :  { %v2951_v37 = vadd.f32 %v2950_v45, %v2885_v7 }
 0x465   :  { %v2952_v44 = vadd.f32 %v15639_v39, %v2951_v37 }
 0x467   :  { %v15643_v0 = vpop.f32.mrb[24].mxu1  ;;  %v2953_v11 = vadd.f32 %v15640_v33, %v2952_v44 }
 0x468   :  { %v2898_v2 = vpop.f32.mrb[25].mxu1 }
 0x469   :  { %v2954_v38 = vadd.f32 %v2953_v11, %v2898_v2  ;;  %v15644_v46 = vpop.f32.mrb[26].mxu1 }
 0x46a   :  { %v2901_v50 = vpop.f32.mrb[27].mxu1 }
 0x46b   :  { %v2955_v58 = vadd.f32 %v2954_v38, %v2901_v50 }
 0x46d   :  { %v2956_v30 = vadd.f32 %v15643_v0, %v2955_v58 }
 0x46f   :  { %v15647_v20 = vpop.f32.mrb[28].mxu1  ;;  %v2957_v59 = vadd.f32 %v15644_v46, %v2956_v30 }
 0x470   :  { %v2914_v14 = vpop.f32.mrb[29].mxu1 }
 0x471   :  { %v2958_v27 = vadd.f32 %v2957_v59, %v2914_v14  ;;  %v15648_v48 = vpop.f32.mrb[30].mxu1 }
 0x472   :  { %v2917_v32 = vpop.f32.mrb[31].mxu1 }
 0x473   :  { %v2959_v9 = vadd.f32 %v2958_v27, %v2917_v32 }
 0x475   :  { %v2960_v19 = vadd.f32 %v15647_v20, %v2959_v9 }
 0x477   :  { %v2961_v61 = vadd.f32 %v15648_v48, %v2960_v19 }
 0x479   :  { %v2962_v10 = vrot.slane %v2961_v61, 4 }
 0x47b   :  { %v2963_v47 = vadd.f32 %v2962_v10, %v2961_v61  ;;  %v19881_v61 = vld [vmem:[%s24141_s7] ss:$0 sm:$0xff] }
 0x47d   :  { %v2964_v31 = vrot.slane %v2963_v47, 2 }
 0x47f   :  { %v2965_v4 = vadd.f32 %v2964_v31, %v2963_v47 }
 0x481   :  { %v2966_v22 = vrot.slane %v2965_v4, 1 }
 0x483   :  { %v2967_v26 = vadd.f32 %v2966_v22, %v2965_v4  ;;  %v19890_v22 = vld [vmem:[%s24142_s8] ss:$0 sm:$0xff] }
 0x485   :  { %v2968_v42 = vmul.f32 0.0078125, %v2967_v26 }
 0x487   :  { %v2969_v29 = vsub.f32 %v2866_v28, %v2968_v42  ;;  %v2970_v3 = vsub.f32 %v2869_v13, %v2968_v42  ;;  %v2971_v17 = vsub.f32 %v15635_v40, %v2968_v42  ;;  %v2972_v6 = vsub.f32 %v15636_v8, %v2968_v42 }
 0x488   :  { %v2973_v35 = vsub.f32 %v2882_v18, %v2968_v42  ;;  %v2974_v56 = vsub.f32 %v2885_v7, %v2968_v42  ;;  %v2975_v54 = vsub.f32 %v15639_v39, %v2968_v42  ;;  %v19844_v57 = vsub.f32 %v15640_v33, %v2968_v42 }
 0x489   :  { %v19846_v16 = vsub.f32 %v2898_v2, %v2968_v42  ;;  %v19848_v25 = vsub.f32 %v2901_v50, %v2968_v42  ;;  %v19850_v36 = vsub.f32 %v15643_v0, %v2968_v42  ;;  %v19852_v52 = vsub.f32 %v15644_v46, %v2968_v42 }
 0x48a   :  { %v19854_v5 = vsub.f32 %v2914_v14, %v2968_v42  ;;  %v2982_v43 = vsub.f32 %v2917_v32, %v2968_v42  ;;  %v19856_v53 = vsub.f32 %v15647_v20, %v2968_v42  ;;  %v19858_v1 = vsub.f32 %v15648_v48, %v2968_v42 }
 0x48b   :  { %v2985_v55 = vmul.f32 %v2969_v29, %v2969_v29  ;;  %v2986_v34 = vmul.f32 %v2970_v3, %v2970_v3  ;;  %v2987_v62 = vmul.f32 %v2971_v17, %v2971_v17  ;;  %v2988_v49 = vmul.f32 %v2972_v6, %v2972_v6 }
 0x48c   :  { %v2989_v60 = vmul.f32 %v2973_v35, %v2973_v35  ;;  %v2990_v12 = vmul.f32 %v2974_v56, %v2974_v56  ;;  %v2991_v28 = vmul.f32 %v2975_v54, %v2975_v54  ;;  %v2992_v13 = vmul.f32 %v19844_v57, %v19844_v57 }
 0x48d   :  { %v3001_v23 = vadd.f32 %v2986_v34, %v2985_v55  ;;  %v2993_v21 = vmul.f32 %v19846_v16, %v19846_v16  ;;  %v2994_v51 = vmul.f32 %v19848_v25, %v19848_v25  ;;  %v2995_v45 = vmul.f32 %v19850_v36, %v19850_v36 }
 0x48e   :  { %v2996_v7 = vmul.f32 %v19852_v52, %v19852_v52  ;;  %v2997_v44 = vmul.f32 %v19854_v5, %v19854_v5  ;;  %v2998_v11 = vmul.f32 %v2982_v43, %v2982_v43  ;;  %v2999_v38 = vmul.f32 %v19856_v53, %v19856_v53 }
 0x48f   :  { %v3002_v63 = vadd.f32 %v3001_v23, %v2987_v62  ;;  %v3000_v50 = vmul.f32 %v19858_v1, %v19858_v1 }
 0x491   :  { %v3003_v24 = vadd.f32 %v3002_v63, %v2988_v49 }
 0x493   :  { %v3004_v40 = vadd.f32 %v3003_v24, %v2989_v60 }
 0x495   :  { %v3005_v8 = vadd.f32 %v3004_v40, %v2990_v12 }
 0x497   :  { %v3006_v41 = vadd.f32 %v3005_v8, %v2991_v28 }
 0x499   :  { %v3007_v39 = vadd.f32 %v3006_v41, %v2992_v13 }
 0x49b   :  { %v3008_v18 = vadd.f32 %v3007_v39, %v2993_v21 }
 0x49d   :  { %v3009_v33 = vadd.f32 %v3008_v18, %v2994_v51 }
 0x49f   :  { %v3010_v37 = vadd.f32 %v3009_v33, %v2995_v45 }
 0x4a1   :  { %v3011_v0 = vadd.f32 %v3010_v37, %v2996_v7 }
 0x4a3   :  { %v3012_v2 = vadd.f32 %v3011_v0, %v2997_v44 }
 0x4a5   :  { %v3013_v46 = vadd.f32 %v3012_v2, %v2998_v11 }
 0x4a7   :  { %v3014_v58 = vadd.f32 %v3013_v46, %v2999_v38 }
 0x4a9   :  { %v3015_v30 = vadd.f32 %v3014_v58, %v3000_v50 }
 0x4ab   :  { %v3016_v20 = vrot.slane %v3015_v30, 4 }
 0x4ad   :  { %v3017_v59 = vadd.f32 %v3016_v20, %v3015_v30 }
 0x4af   :  { %v3018_v14 = vrot.slane %v3017_v59, 2 }
 0x4b1   :  { %v3019_v15 = vadd.f32 %v3018_v14, %v3017_v59 }
 0x4b3   :  { %v3020_v27 = vrot.slane %v3019_v15, 1 }
 0x4b5   :  { %v3021_v48 = vadd.f32 %v3020_v27, %v3019_v15 }
 0x4b7   :  { %v3022_v32 = vmul.f32 0.0078125, %v3021_v48 }
 0x4b9   :  { %v3023_v9 = vadd.f32 0.8, %v3022_v32 }
 0x4bb   :  { %18605 = vrsqrt.f32 %v3023_v9 }
 0x4c5   :  { %v19876_v19 = vpop.eup %18605 }
 0x4c6   :  { %v3038_v10 = vmul.f32 %v19876_v19, %v2982_v43  ;;  %v3025_v47 = vmul.f32 %v19876_v19, %v2969_v29  ;;  %v3026_v31 = vmul.f32 %v19876_v19, %v2970_v3  ;;  %v3027_v4 = vmul.f32 %v19876_v19, %v2971_v17 }
 0x4c7   :  { %v3028_v26 = vmul.f32 %v19876_v19, %v2972_v6  ;;  %v3029_v42 = vmul.f32 %v19876_v19, %v2973_v35  ;;  %v3030_v55 = vmul.f32 %v19876_v19, %v2974_v56  ;;  %v3031_v34 = vmul.f32 %v19876_v19, %v2975_v54 }
 0x4c8   :  { %v3060_v43 = vmul.f32 %v19881_v61, %v3038_v10  ;;  %v3047_v29 = vmul.f32 %v19881_v61, %v3025_v47  ;;  %v3048_v3 = vmul.f32 %v19881_v61, %v3026_v31  ;;  %v3049_v17 = vmul.f32 %v19881_v61, %v3027_v4 }
 0x4c9   :  { %v3050_v62 = vmul.f32 %v19881_v61, %v3028_v26  ;;  %v3051_v23 = vmul.f32 %v19881_v61, %v3029_v42  ;;  %v3052_v6 = vmul.f32 %v19881_v61, %v3030_v55  ;;  %v3032_v35 = vmul.f32 %v19876_v19, %v19844_v57 }
 0x4ca   :  { %v19906_v56 = vadd.f32 %v19890_v22, %v3060_v43  ;;  %v3069_v54 = vadd.f32 %v19890_v22, %v3047_v29  ;;  %v3070_v49 = vadd.f32 %v19890_v22, %v3048_v3  ;;  %v3071_v63 = vadd.f32 %v19890_v22, %v3049_v17 }
 0x4cb   :  { %v3072_v60 = vadd.f32 %v19890_v22, %v3050_v62  ;;  %v3073_v24 = vadd.f32 %v19890_v22, %v3051_v23  ;;  %v3074_v12 = vadd.f32 %v19890_v22, %v3052_v6  ;;  %v3053_v40 = vmul.f32 %v19881_v61, %v3031_v34 }
 0x4cc   :  { %vm3085_vm5 = vcmp.ge.f32.partialorder %v3069_v54, 0.0  ;;  %vm3086_vm6 = vcmp.ge.f32.partialorder %v3070_v49, 0.0  ;;  %v3101_v57 = vmul.f32 0.2, %v3069_v54  ;;  %v3102_v28 = vmul.f32 0.2, %v3070_v49 }
 0x4cd   :  { %vm3087_vm7 = vcmp.ge.f32.partialorder %v3071_v63, 0.0  ;;  %vm3088_vm8 = vcmp.ge.f32.partialorder %v3072_v60, 0.0  ;;  %v3103_v8 = vmul.f32 0.2, %v3071_v63  ;;  %v3104_v13 = vmul.f32 0.2, %v3072_v60 }
 0x4ce   :  { %v3117_v41 = vsel %vm3085_vm5, %v3069_v54, %v3101_v57  ;;  %v3118_v21 = vsel %vm3086_vm6, %v3070_v49, %v3102_v28  ;;  %vm3089_vm9 = vcmp.ge.f32.partialorder %v3073_v24, 0.0  ;;  %vm3090_vm10 = vcmp.ge.f32.partialorder %v3074_v12, 0.0 }
 0x4cf   :  { %v3197_v39 = vpack.c.bf16 %v3118_v21, %v3117_v41  ;;  %v3119_v51 = vsel %vm3087_vm7, %v3071_v63, %v3103_v8  ;;  %v3120_v18 = vsel %vm3088_vm8, %v3072_v60, %v3104_v13  ;;  %v3105_v45 = vmul.f32 0.2, %v3073_v24  ;;  %v18428_v8 = vld [vmem:[#allocation9 + $0x8] sm:$0xff]   ;;  %v18429_v13 = vld [vmem:[#allocation9 + $0x10] sm:$0xff]   ;;  %v18430_v21 = vld [vmem:[#allocation9 + $0x18] sm:$0xff]  }
 0x4d0   :  { %v3198_v33 = vpack.c.bf16 %v3120_v18, %v3119_v51  ;;  %v3106_v7 = vmul.f32 0.2, %v3074_v12  ;;  %v3054_v37 = vmul.f32 %v19881_v61, %v3032_v35  ;;  %v3075_v44 = vadd.f32 %v19890_v22, %v3053_v40  ;;  %v18461_v41 = vld [vmem:[#allocation10 + $0x50] sm:$0xff]   ;;  %v18462_v51 = vld [vmem:[#allocation10 + $0x58] sm:$0xff]   ;;  %v18463_v18 = vld [vmem:[#allocation10 + $0x60] sm:$0xff]  }
 0x4d1   :  { %15649 = vmatprep.subr.bf16.mxu0 %v3197_v39  ;;  %v3121_v0 = vsel %vm3089_vm9, %v3073_v24, %v3105_v45  ;;  %v3033_v11 = vmul.f32 %v19876_v19, %v19846_v16  ;;  %v3034_v2 = vmul.f32 %v19876_v19, %v19848_v25  ;;  %v3035_v38 = vmul.f32 %v19876_v19, %v19850_v36  ;;  %v18432_v45 = vld [vmem:[#allocation9 + $0x28] sm:$0xff]  }
 0x4d2   :  { %15650 = vmatpush3.bf16.msra.mxu0 %v3197_v39  ;;  %v3122_v46 = vsel %vm3090_vm10, %v3074_v12, %v3106_v7  ;;  %v3076_v50 = vadd.f32 %v19890_v22, %v3054_v37  ;;  %vm3091_vm11 = vcmp.ge.f32.partialorder %v3075_v44, 0.0  ;;  %v3107_v58 = vmul.f32 0.2, %v3075_v44  ;;  %v18431_v39 = vld [vmem:[#allocation9 + $0x20] sm:$0xff]   ;;  %v18464_v7 = vld [vmem:[#allocation10 + $0x68] sm:$0xff]   ;;  %v18465_v37 = vld [vmem:[#allocation10 + $0x70] sm:$0xff]  }
 0x4d3   :  { %15651 = vmatprep.subr.bf16.mxu0 %v3198_v33  ;;  %v3199_v30 = vpack.c.bf16 %v3122_v46, %v3121_v0  ;;  %v3055_v20 = vmul.f32 %v19881_v61, %v3033_v11  ;;  %v3056_v59 = vmul.f32 %v19881_v61, %v3034_v2  ;;  %v3036_v16 = vmul.f32 %v19876_v19, %v19852_v52  ;;  %v18435_v0 = vld [vmem:[#allocation9 + $0x40] sm:$0xff]   ;;  %v18436_v11 = vld [vmem:[#allocation9 + $0x48] sm:$0xff]   ;;  %v18437_v2 = vld [vmem:[#allocation9 + $0x50] sm:$0xff]  }
 0x4d4   :  { %vm3092_vm12 = vcmp.ge.f32.partialorder %v3076_v50, 0.0  ;;  %v3108_v25 = vmul.f32 0.2, %v3076_v50  ;;  %v3123_v14 = vsel %vm3091_vm11, %v3075_v44, %v3107_v58  ;;  %v3057_v36 = vmul.f32 %v19881_v61, %v3035_v38  ;;  %v18434_v44 = vld [vmem:[#allocation9 + $0x38] sm:$0xff]   ;;  %v18439_v46 = vld [vmem:[#allocation9 + $0x60] sm:$0xff]   ;;  %v18441_v58 = vld [vmem:[#allocation9 + $0x70] sm:$0xff]  }
 0x4d5   :  { %v3077_v15 = vadd.f32 %v19890_v22, %v3055_v20  ;;  %v3078_v27 = vadd.f32 %v19890_v22, %v3056_v59  ;;  %v3058_v48 = vmul.f32 %v19881_v61, %v3036_v16  ;;  %v3037_v32 = vmul.f32 %v19876_v19, %v19854_v5  ;;  %v18438_v38 = vld [vmem:[#allocation9 + $0x58] sm:$0xff]   ;;  %v18443_v20 = vld [vmem:[#allocation9 + $0x80] sm:$0xff]   ;;  %v18444_v59 = vld [vmem:[#allocation9 + $0x88] sm:$0xff]  }
 0x4d6   :  { %15652 = vmatpush3.bf16.msra.mxu0 %v3198_v33  ;;  %v3124_v9 = vsel %vm3092_vm12, %v3076_v50, %v3108_v25  ;;  %v3079_v10 = vadd.f32 %v19890_v22, %v3057_v36  ;;  %v3114_v52 = vmul.f32 0.2, %v19906_v56  ;;  %vm3098_vm0 = vcmp.ge.f32.partialorder %v19906_v56, 0.0  ;;  %v18433_v33 = vld [vmem:[#allocation9 + $0x30] sm:$0xff]   ;;  %v18440_v50 = vld [vmem:[#allocation9 + $0x68] sm:$0xff]   ;;  %v18446_v25 = vld [vmem:[#allocation9 + $0x98] sm:$0xff]  }
 0x4d7   :  { %15653 = vmatprep.subr.bf16.mxu0 %v3199_v30  ;;  %v3200_v47 = vpack.c.bf16 %v3124_v9, %v3123_v14  ;;  %vm3093_vm13 = vcmp.ge.f32.partialorder %v3077_v15, 0.0  ;;  %vm3094_vm14 = vcmp.ge.f32.partialorder %v3078_v27, 0.0  ;;  %v3109_v31 = vmul.f32 0.2, %v3077_v15  ;;  %v18445_v16 = vld [vmem:[#allocation9 + $0x90] sm:$0xff]   ;;  %v18447_v14 = vld [vmem:[#allocation9 + $0xa0] sm:$0xff]  }
 0x4d8   :  { %v3110_v4 = vmul.f32 0.2, %v3078_v27  ;;  %v3080_v26 = vadd.f32 %v19890_v22, %v3058_v48  ;;  %vm3095_vm15 = vcmp.ge.f32.partialorder %v3079_v10, 0.0  ;;  %v3111_v42 = vmul.f32 0.2, %v3079_v10  ;;  %v18448_v36 = vld [vmem:[#allocation9 + $0xa8] sm:$0xff]  }
 0x4d9   :  { %v3125_v55 = vsel %vm3093_vm13, %v3077_v15, %v3109_v31  ;;  %v3059_v34 = vmul.f32 %v19881_v61, %v3037_v32  ;;  %v3039_v5 = vmul.f32 %v19876_v19, %v19856_v53  ;;  %v3040_v23 = vmul.f32 %v19876_v19, %v19858_v1  ;;  %v18449_v15 = vld [vmem:[#allocation9 + $0xb0] sm:$0xff]   ;;  %v18451_v48 = vld [vmem:[#allocation9 + $0xc0] sm:$0xff]   ;;  %v18466_v32 = vld [vmem:[#allocation10 + $0x78] sm:$0xff]  }
 0x4da   :  { %15654 = vmatpush3.bf16.msra.mxu0 %v3199_v30  ;;  %v3126_v43 = vsel %vm3094_vm14, %v3078_v27, %v3110_v4  ;;  %vm3096_vm1 = vcmp.ge.f32.partialorder %v3080_v26, 0.0  ;;  %v3112_v29 = vmul.f32 0.2, %v3080_v26  ;;  %v3127_v3 = vsel %vm3095_vm15, %v3079_v10, %v3111_v42  ;;  %v18442_v30 = vld [vmem:[#allocation9 + $0x78] sm:$0xff]   ;;  %v18452_v9 = vld [vmem:[#allocation9 + $0xc8] sm:$0xff]   ;;  %v18454_v10 = vld [vmem:[#allocation9 + $0xd0] sm:$0xff]  }
 0x4db   :  { %15655 = vmatprep.subr.bf16.mxu0 %v3200_v47  ;;  %v3201_v17 = vpack.c.bf16 %v3126_v43, %v3125_v55  ;;  %v3081_v62 = vadd.f32 %v19890_v22, %v3059_v34  ;;  %v3061_v6 = vmul.f32 %v19881_v61, %v3039_v5  ;;  %v3130_v54 = vsel %vm3098_vm0, %v19906_v56, %v3114_v52  ;;  %v18450_v27 = vld [vmem:[#allocation9 + $0xb8] sm:$0xff]   ;;  %v19949_v31 = vld [vmem:[#allocation10] sm:$0xff]   ;;  %v18457_v42 = vld [vmem:[#allocation9 + $0xe8] sm:$0xff]  }
 0x4dc   :  { %v3128_v35 = vsel %vm3096_vm1, %v3080_v26, %v3112_v29  ;;  %v3062_v63 = vmul.f32 %v19881_v61, %v3040_v23  ;;  %v18453_v61 = vld [vmem:[#allocation10 + $0x40] sm:$0xff]   ;;  %v18455_v52 = vld [vmem:[#allocation9 + $0xd8] sm:$0xff]   ;;  %v3838_v26 = vld [vmem:[#allocation3 + $0x10] sm:$0x3] }
 0x4dd   :  { %v3202_v49 = vpack.c.bf16 %v3128_v35, %v3127_v3  ;;  %vm3097_vm2 = vcmp.ge.f32.partialorder %v3081_v62, 0.0  ;;  %v3113_v53 = vmul.f32 0.2, %v3081_v62  ;;  %v3083_v60 = vadd.f32 %v19890_v22, %v3061_v6  ;;  %v3836_v4 = vld [vmem:[#allocation3] sm:$0xff]  ;;  %v18459_v55 = vld [vmem:[#allocation9 + $0xf0] sm:$0xff]   ;;  %v18739_v5 = vld [vmem:[#allocation3 + $0x8] sm:$0xff] }
 0x4de   :  { %15656 = vmatpush3.bf16.msra.mxu0 %v3200_v47  ;;  %v3084_v12 = vadd.f32 %v19890_v22, %v3062_v63  ;;  %v18458_v22 = vld [vmem:[#allocation10 + $0x48] sm:$0xff]   ;;  %v18456_v47 = vld [vmem:[#allocation9 + $0xe0] sm:$0xff]   ;;  %v4088_v34 = vrot.slane %v3836_v4, 1  ;;  %v19952_v43 = vrot.slane %v18739_v5, 1  ;;  %v4091_v29 = vrot.slane %v3838_v26, 1 }
 0x4df   :  { %15657 = vmatprep.subr.bf16.mxu0 %v3201_v17  ;;  %v3129_v24 = vsel %vm3097_vm2, %v3081_v62, %v3113_v53  ;;  %vm3099_vm5 = vcmp.ge.f32.partialorder %v3083_v60, 0.0  ;;  %v3115_v1 = vmul.f32 0.2, %v3083_v60  ;;  %v18460_v62 = vld [vmem:[#allocation9 + $0xf8] sm:$0xff]  }
 0x4e0   :  { %v3203_v40 = vpack.c.bf16 %v3130_v54, %v3129_v24  ;;  %vm3100_vm6 = vcmp.ge.f32.partialorder %v3084_v12, 0.0  ;;  %v3116_v19 = vmul.f32 0.2, %v3084_v12  ;;  %v4090_v3 = vsel %vm24320_vm4, %v4088_v34, %v19952_v43 }
 0x4e1   :  { %v3131_v57 = vsel %vm3099_vm5, %v3083_v60, %v3115_v1 }
 0x4e2   :  { %15658 = vmatpush3.bf16.msra.mxu0 %v3201_v17  ;;  %v3132_v56 = vsel %vm3100_vm6, %v3084_v12, %v3116_v19  ;;  %v4092_v17 = vsel %vm24320_vm4, %v19952_v43, %v4091_v29 }
 0x4e3   :  { %15659 = vmatprep.subr.bf16.mxu0 %v3202_v49  ;;  %v3204_v28 = vpack.c.bf16 %v3132_v56, %v3131_v57  ;;  %v4312_v23 = vpack.c.bf16 %v4092_v17, %v4090_v3 }
 0x4e6   :  { %15660 = vmatpush3.bf16.msra.mxu0 %v3202_v49 }
 0x4e7   :  { %15661 = vmatprep.subr.bf16.mxu0 %v3203_v40 }
 0x4ea   :  { %15662 = vmatpush3.bf16.msra.mxu0 %v3203_v40 }
 0x4eb   :  { %15663 = vmatprep.subr.bf16.mxu0 %v3204_v28 }
 0x4ee   :  { %15664 = vmatpush3.bf16.msra.mxu0 %v3204_v28 }
 0x4ef   :  { %15729 = vmatprep.subr.bf16.mxu0 %v18453_v61 }
 0x4f1   :  { %15666 = vmatmul.mubr.bf16.vlgmr.msra.gmra.mrb[32].mxu0 %v18428_v8 }
 0x4f2   :  { %15669 = vmatprep.mubr.bf16.mxu0 %v18429_v13  ;;  %15730 = vmatpush3.bf16.msra.mxu0 %v18453_v61 }
 0x4f3   :  { %15731 = vmatprep.subr.bf16.mxu0 %v18458_v22 }
 0x4f6   :  { %15732 = vmatpush3.bf16.msra.mxu0 %v18458_v22 }
 0x4f7   :  { %15733 = vmatprep.subr.bf16.mxu0 %v18461_v41 }
 0x4f9   :  { %15670 = vmatmul.mubr.bf16.gmra.mrb[36].mxu0 %v18430_v21 }
 0x4fa   :  { %15673 = vmatprep.mubr.bf16.mxu0 %v18431_v39  ;;  %15734 = vmatpush3.bf16.msra.mxu0 %v18461_v41 }
 0x4fb   :  { %15735 = vmatprep.subr.bf16.mxu0 %v18462_v51 }
 0x4fe   :  { %15736 = vmatpush3.bf16.msra.mxu0 %v18462_v51 }
 0x4ff   :  { %15737 = vmatprep.subr.bf16.mxu0 %v18463_v18 }
 0x501   :  { %15674 = vmatmul.mubr.bf16.gmra.mrb[40].mxu0 %v18432_v45 }
 0x502   :  { %15677 = vmatprep.mubr.bf16.mxu0 %v18433_v33  ;;  %15738 = vmatpush3.bf16.msra.mxu0 %v18463_v18 }
 0x503   :  { %15739 = vmatprep.subr.bf16.mxu0 %v18464_v7 }
 0x506   :  { %15740 = vmatpush3.bf16.msra.mxu0 %v18464_v7 }
 0x507   :  { %15741 = vmatprep.subr.bf16.mxu0 %v18465_v37 }
 0x509   :  { %15678 = vmatmul.mubr.bf16.gmra.mrb[44].mxu0 %v18434_v44 }
 0x50a   :  { %15681 = vmatprep.mubr.bf16.mxu0 %v18435_v0  ;;  %15742 = vmatpush3.bf16.msra.mxu0 %v18465_v37 }
 0x50b   :  { %15743 = vmatprep.subr.bf16.mxu0 %v18466_v32 }
 0x50e   :  { %15744 = vmatpush3.bf16.msra.mxu0 %v18466_v32 }
 0x50f   :  { %15809 = vmatprep.subr.bf16.mxu0 %v19949_v31 }
 0x511   :  { %15682 = vmatmul.mubr.bf16.gmra.mrb[48].mxu0 %v18436_v11 }
 0x512   :  { %15685 = vmatprep.mubr.bf16.mxu0 %v18437_v2 }
 0x519   :  { %15686 = vmatmul.mubr.bf16.gmra.mrb[52].mxu0 %v18438_v38 }
 0x51a   :  { %15689 = vmatprep.mubr.bf16.mxu0 %v18439_v46  ;;  %v18468_v46 = vld [vmem:[#allocation10 + $0x8] sm:$0xff]  }
 0x521   :  { %15690 = vmatmul.mubr.bf16.gmra.mrb[56].mxu0 %v18440_v50 }
 0x522   :  { %15693 = vmatprep.mubr.bf16.mxu0 %v18441_v58 }
 0x529   :  { %15694 = vmatmul.mubr.bf16.gmra.mrb[60].mxu0 %v18442_v30 }
 0x52a   :  { %15697 = vmatprep.mubr.bf16.mxu0 %v18443_v20 }
 0x531   :  { %15698 = vmatmul.mubr.bf16.gmra.mrb[64].mxu0 %v18444_v59 }
 0x532   :  { %15701 = vmatprep.mubr.bf16.mxu0 %v18445_v16 }
 0x539   :  { %15702 = vmatmul.mubr.bf16.gmra.mrb[68].mxu0 %v18446_v25 }
 0x53a   :  { %15705 = vmatprep.mubr.bf16.mxu0 %v18447_v14 }
 0x541   :  { %15706 = vmatmul.mubr.bf16.gmra.mrb[72].mxu0 %v18448_v36 }
 0x542   :  { %15709 = vmatprep.mubr.bf16.mxu0 %v18449_v15 }
 0x549   :  { %15710 = vmatmul.mubr.bf16.gmra.mrb[76].mxu0 %v18450_v27  ;;  %v18469_v27 = vld [vmem:[#allocation10 + $0x10] sm:$0xff]  }
 0x54a   :  { %15713 = vmatprep.mubr.bf16.mxu0 %v18451_v48 }
 0x551   :  { %15714 = vmatmul.mubr.bf16.gmra.mrb[80].mxu0 %v18452_v9 }
 0x552   :  { %15717 = vmatprep.mubr.bf16.mxu0 %v18454_v10 }
 0x559   :  { %15718 = vmatmul.mubr.bf16.gmra.mrb[84].mxu0 %v18455_v52 }
 0x55a   :  { %15721 = vmatprep.mubr.bf16.mxu0 %v18456_v47 }
 0x561   :  { %15722 = vmatmul.mubr.bf16.gmra.mrb[88].mxu0 %v18457_v42 }
 0x562   :  { %15725 = vmatprep.mubr.bf16.mxu0 %v18459_v55 }
 0x569   :  { %15726 = vmatmul.mubr.bf16.gmra.mrb[92].mxu0 %v18460_v62 }
 0x56a   :  { %15745 = vmatprep.mubr.bf16.mxu0 %v4312_v23 }
 0x5c4   :  { %v15667_v6 = vpop.f32.mrb[32].mxu0 }
 0x5c5   :  { %3689 = vst [vmem:[#allocation3 + $0x31] sm:$0xff] %v15667_v6  ;;  %v3431_v35 = vpop.f32.mrb[33].mxu0 }
 0x5c6   :  { %3687 = vst [vmem:[#allocation3 + $0x19] sm:$0xff] %v3431_v35  ;;  %v15668_v54 = vpop.f32.mrb[34].mxu0 }
 0x5c7   :  { %3690 = vst [vmem:[#allocation3 + $0x39] sm:$0xff] %v15668_v54  ;;  %v3434_v49 = vpop.f32.mrb[35].mxu0 }
 0x5c8   :  { %3688 = vst [vmem:[#allocation3 + $0x21] sm:$0xff] %v3434_v49 }
 0x5cc   :  { %v15671_v53 = vpop.f32.mrb[36].mxu0  ;;  %v3842_v63 = vld [vmem:[#allocation3 + $0x30] sm:$0xff] }
 0x5cd   :  { %3693 = vst [vmem:[#allocation3 + $0x61] sm:$0xff] %v15671_v53  ;;  %v3447_v60 = vpop.f32.mrb[37].mxu0  ;;  %v3839_v24 = vld [vmem:[#allocation3 + $0x18] sm:$0xff]  ;;  %v4098_v12 = vrot.slane %v3842_v63, 1  ;;  %v5045_v40 = vrot.slane %v3842_v63, 2 }
 0x5ce   :  { %3691 = vst [vmem:[#allocation3 + $0x49] sm:$0xff] %v3447_v60  ;;  %v15672_v1 = vpop.f32.mrb[38].mxu0  ;;  %v4093_v19 = vrot.slane %v3839_v24, 1  ;;  %v3843_v57 = vld [vmem:[#allocation3 + $0x38] sm:$0xff]  ;;  %v3844_v56 = vld [vmem:[#allocation3 + $0x40] sm:$0x3] }
 0x5cf   :  { %v5040_v28 = vrot.slane %v3839_v24, 2  ;;  %3694 = vst [vmem:[#allocation3 + $0x69] sm:$0xff] %v15672_v1  ;;  %v3450_v61 = vpop.f32.mrb[39].mxu0  ;;  %v3840_v8 = vld [vmem:[#allocation3 + $0x20] sm:$0xff]  ;;  %v3841_v13 = vld [vmem:[#allocation3 + $0x28] sm:$0x3]  ;;  %v19958_v21 = vpack.c.bf16 %v3843_v57, %v3842_v63 }
 0x5d0   :  { %v4099_v22 = vrot.slane %v3843_v57, 1  ;;  %v4101_v41 = vrot.slane %v3844_v56, 1  ;;  %3692 = vst [vmem:[#allocation3 + $0x51] sm:$0xff] %v3450_v61  ;;  %v4094_v39 = vrot.slane %v3840_v8, 1  ;;  %v4096_v51 = vrot.slane %v3841_v13, 1 }
 0x5d1   :  { %v19960_v18 = vpack.c.bf16 %v3840_v8, %v3839_v24  ;;  %v5041_v45 = vrot.slane %v3840_v8, 2  ;;  %v5043_v37 = vrot.slane %v3841_v13, 2  ;;  %v5046_v44 = vrot.slane %v3843_v57, 2 }
 0x5d2   :  { %v4100_v33 = vsel %vm24320_vm4, %v4098_v12, %v4099_v22  ;;  %v4102_v7 = vsel %vm24320_vm4, %v4099_v22, %v4101_v41  ;;  %v4095_v0 = vsel %vm24320_vm4, %v4093_v19, %v4094_v39  ;;  %v4097_v11 = vsel %vm24320_vm4, %v4094_v39, %v4096_v51  ;;  %v18470_v12 = vld [vmem:[#allocation10 + $0x18] sm:$0xff]   ;;  %v18471_v41 = vld [vmem:[#allocation10 + $0x20] sm:$0xff]  }
 0x5d3   :  { %v5042_v2 = vsel %vm24319_vm3, %v5040_v28, %v5041_v45  ;;  %v19967_v38 = vpack.c.bf16 %v4097_v11, %v4095_v0  ;;  %v5044_v50 = vsel %vm24319_vm3, %v5041_v45, %v5043_v37  ;;  %v5047_v58 = vsel %vm24319_vm3, %v5045_v40, %v5046_v44 }
 0x5d4   :  { %v5048_v30 = vrot.slane %v3844_v56, 2  ;;  %v15675_v20 = vpop.f32.mrb[40].mxu0  ;;  %v19971_v59 = vpack.c.bf16 %v4102_v7, %v4100_v33  ;;  %v3848_v16 = vld [vmem:[#allocation3 + $0x60] sm:$0xff]  ;;  %v19973_v25 = vpack.c.bf16 %v5044_v50, %v5042_v2 }
 0x5d5   :  { %24552 = vst [vmem:[#allocation17_spill] sm:$0xff] %v19967_v38  ;;  %3697 = vst [vmem:[#allocation3 + $0x91] sm:$0xff] %v15675_v20  ;;  %v3463_v14 = vpop.f32.mrb[41].mxu0  ;;  %15746 = vmatmul.mubr.bf16.vlgmr.msra.gmra.mrb[96].mxu0 %v19967_v38  ;;  %v3845_v36 = vld [vmem:[#allocation3 + $0x48] sm:$0xff]  ;;  %v4108_v15 = vrot.slane %v3848_v16, 1  ;;  %v5055_v32 = vrot.slane %v3848_v16, 2 }
 0x5d6   :  { %24553 = vst [vmem:[#allocation18_spill] sm:$0xff] %v19971_v59  ;;  %v5049_v48 = vsel %vm24319_vm3, %v5046_v44, %v5048_v30  ;;  %3695 = vst [vmem:[#allocation3 + $0x79] sm:$0xff] %v3463_v14  ;;  %v15676_v9 = vpop.f32.mrb[42].mxu0  ;;  %15749 = vmatprep.mubr.bf16.mxu0 %v19971_v59  ;;  %15810 = vmatpush3.bf16.msra.mxu0 %v19949_v31  ;;  %v4103_v10 = vrot.slane %v3845_v36, 1  ;;  %v3849_v52 = vld [vmem:[#allocation3 + $0x68] sm:$0xff]  ;;  %v5050_v26 = vrot.slane %v3845_v36, 2 }
 0x5d7   :  { %v3850_v47 = vld [vmem:[#allocation3 + $0x70] sm:$0x3]  ;;  %v19979_v4 = vpack.c.bf16 %v5049_v48, %v5047_v58  ;;  %3698 = vst [vmem:[#allocation3 + $0x99] sm:$0xff] %v15676_v9  ;;  %v3466_v42 = vpop.f32.mrb[43].mxu0  ;;  %v3847_v34 = vld [vmem:[#allocation3 + $0x58] sm:$0x3]  ;;  %15811 = vmatprep.subr.bf16.mxu0 %v18468_v46  ;;  %v19981_v3 = vpack.c.bf16 %v3849_v52, %v3848_v16 }
 0x5d8   :  { %v3846_v55 = vld [vmem:[#allocation3 + $0x50] sm:$0xff]  ;;  %v4109_v5 = vrot.slane %v3849_v52, 1  ;;  %v4111_v29 = vrot.slane %v3850_v47, 1  ;;  %3696 = vst [vmem:[#allocation3 + $0x81] sm:$0xff] %v3466_v42  ;;  %v4106_v62 = vrot.slane %v3847_v34, 1  ;;  %v5053_v54 = vrot.slane %v3847_v34, 2 }
 0x5d9   :  { %v4104_v17 = vrot.slane %v3846_v55, 1  ;;  %v19983_v23 = vpack.c.bf16 %v3846_v55, %v3845_v36  ;;  %v5051_v31 = vrot.slane %v3846_v55, 2  ;;  %v5056_v49 = vrot.slane %v3849_v52, 2 }
 0x5da   :  { %v4110_v6 = vsel %vm24320_vm4, %v4108_v15, %v4109_v5  ;;  %v4112_v35 = vsel %vm24320_vm4, %v4109_v5, %v4111_v29  ;;  %15812 = vmatpush3.bf16.msra.mxu0 %v18468_v46  ;;  %v5058_v19 = vrot.slane %v3850_v47, 2 }
 0x5db   :  { %v4105_v53 = vsel %vm24320_vm4, %v4103_v10, %v4104_v17  ;;  %v4107_v63 = vsel %vm24320_vm4, %v4104_v17, %v4106_v62  ;;  %v5052_v60 = vsel %vm24319_vm3, %v5050_v26, %v5051_v31  ;;  %15813 = vmatprep.subr.bf16.mxu0 %v18469_v27  ;;  %v5054_v40 = vsel %vm24319_vm3, %v5051_v31, %v5053_v54  ;;  %v18472_v26 = vld [vmem:[#allocation10 + $0x28] sm:$0xff]   ;;  %v18473_v54 = vld [vmem:[#allocation10 + $0x30] sm:$0xff]  }
 0x5dc   :  { %v19990_v24 = vpack.c.bf16 %v4107_v63, %v4105_v53  ;;  %v5057_v1 = vsel %vm24319_vm3, %v5055_v32, %v5056_v49  ;;  %v15679_v57 = vpop.f32.mrb[44].mxu0  ;;  %v19994_v56 = vpack.c.bf16 %v4112_v35, %v4110_v6  ;;  %v3854_v28 = vld [vmem:[#allocation3 + $0x90] sm:$0xff]  ;;  %v19996_v61 = vpack.c.bf16 %v5054_v40, %v5052_v60 }
 0x5dd   :  { %3701 = vst [vmem:[#allocation3 + $0xc1] sm:$0xff] %v15679_v57  ;;  %v3479_v8 = vpop.f32.mrb[45].mxu0  ;;  %v3851_v13 = vld [vmem:[#allocation3 + $0x78] sm:$0xff]  ;;  %v4118_v22 = vrot.slane %v3854_v28, 1  ;;  %v5059_v39 = vsel %vm24319_vm3, %v5056_v49, %v5058_v19  ;;  %v5065_v51 = vrot.slane %v3854_v28, 2 }
 0x5de   :  { %24554 = vst [vmem:[#allocation21_spill] sm:$0xff] %v19990_v24  ;;  %24555 = vst [vmem:[#allocation16_spill] sm:$0xff] %v19994_v56  ;;  %15750 = vmatmul.mubr.bf16.gmra.mrb[100].mxu0 %v19990_v24  ;;  %v15680_v45 = vpop.f32.mrb[46].mxu0  ;;  %v4113_v33 = vrot.slane %v3851_v13, 1  ;;  %v3855_v7 = vld [vmem:[#allocation3 + $0x98] sm:$0xff]  ;;  %v20001_v44 = vpack.c.bf16 %v5059_v39, %v5057_v1  ;;  %v5060_v0 = vrot.slane %v3851_v13, 2 }
 0x5df   :  { %3699 = vst [vmem:[#allocation3 + $0xa9] sm:$0xff] %v3479_v8  ;;  %15753 = vmatprep.mubr.bf16.mxu0 %v19994_v56  ;;  %v3856_v37 = vld [vmem:[#allocation3 + $0xa0] sm:$0x3]  ;;  %15814 = vmatpush3.bf16.msra.mxu0 %v18469_v27  ;;  %3702 = vst [vmem:[#allocation3 + $0xc9] sm:$0xff] %v15680_v45  ;;  %v3482_v11 = vpop.f32.mrb[47].mxu0  ;;  %v4119_v50 = vrot.slane %v3855_v7, 1  ;;  %v20003_v30 = vpack.c.bf16 %v3855_v7, %v3854_v28 }
 0x5e0   :  { %v3852_v2 = vld [vmem:[#allocation3 + $0x80] sm:$0xff]  ;;  %v3853_v46 = vld [vmem:[#allocation3 + $0x88] sm:$0x3]  ;;  %v4121_v58 = vrot.slane %v3856_v37, 1  ;;  %15815 = vmatprep.subr.bf16.mxu0 %v18470_v12  ;;  %3700 = vst [vmem:[#allocation3 + $0xb1] sm:$0xff] %v3482_v11  ;;  %v5066_v32 = vrot.slane %v3855_v7, 2 }
 0x5e1   :  { %v4114_v20 = vrot.slane %v3852_v2, 1  ;;  %v4116_v16 = vrot.slane %v3853_v46, 1  ;;  %v20005_v14 = vpack.c.bf16 %v3852_v2, %v3851_v13  ;;  %v5061_v36 = vrot.slane %v3852_v2, 2 }
 0x5e2   :  { %v4120_v15 = vsel %vm24320_vm4, %v4118_v22, %v4119_v50  ;;  %v4122_v27 = vsel %vm24320_vm4, %v4119_v50, %v4121_v58  ;;  %v5063_v48 = vrot.slane %v3853_v46, 2  ;;  %v5067_v55 = vsel %vm24319_vm3, %v5065_v51, %v5066_v32 }
 0x5e3   :  { %v4115_v9 = vsel %vm24320_vm4, %v4113_v33, %v4114_v20  ;;  %v4117_v10 = vsel %vm24320_vm4, %v4114_v20, %v4116_v16  ;;  %15816 = vmatpush3.bf16.msra.mxu0 %v18470_v12  ;;  %v5062_v52 = vsel %vm24319_vm3, %v5060_v0, %v5061_v36  ;;  %v5068_v34 = vrot.slane %v3856_v37, 2  ;;  %v18474_v20 = vld [vmem:[#allocation10 + $0x38] sm:$0xff]  }
 0x5e4   :  { %v20012_v47 = vpack.c.bf16 %v4117_v10, %v4115_v9  ;;  %15817 = vmatprep.subr.bf16.mxu0 %v18471_v41  ;;  %v5064_v42 = vsel %vm24319_vm3, %v5061_v36, %v5063_v48  ;;  %v15683_v5 = vpop.f32.mrb[48].mxu0  ;;  %v20016_v29 = vpack.c.bf16 %v4122_v27, %v4120_v15  ;;  %v3860_v17 = vld [vmem:[#allocation3 + $0xc0] sm:$0xff] }
 0x5e5   :  { %v20018_v62 = vpack.c.bf16 %v5064_v42, %v5062_v52  ;;  %3705 = vst [vmem:[#allocation3 + $0xf1] sm:$0xff] %v15683_v5  ;;  %v3495_v31 = vpop.f32.mrb[49].mxu0  ;;  %v4128_v35 = vrot.slane %v3860_v17, 1  ;;  %v5069_v49 = vsel %vm24319_vm3, %v5066_v32, %v5068_v34  ;;  %v5075_v53 = vrot.slane %v3860_v17, 2  ;;  %v20043_v42 = vld [vmem:[#allocation10 + $0x80] sm:$0xff]  }
 0x5e6   :  { %24556 = vst [vmem:[#allocation19_spill] sm:$0xff] %v20012_v47  ;;  %24557 = vst [vmem:[#allocation20_spill] sm:$0xff] %v20016_v29  ;;  %15754 = vmatmul.mubr.bf16.gmra.mrb[104].mxu0 %v20012_v47  ;;  %v3857_v6 = vld [vmem:[#allocation3 + $0xa8] sm:$0xff]  ;;  %v15684_v63 = vpop.f32.mrb[50].mxu0  ;;  %v3862_v40 = vld [vmem:[#allocation3 + $0xd0] sm:$0x3]  ;;  %v20023_v1 = vpack.c.bf16 %v5069_v49, %v5067_v55 }
 0x5e7   :  { %3703 = vst [vmem:[#allocation3 + $0xd9] sm:$0xff] %v3495_v31  ;;  %15757 = vmatprep.mubr.bf16.mxu0 %v20016_v29  ;;  %v4123_v60 = vrot.slane %v3857_v6, 1  ;;  %v3861_v12 = vld [vmem:[#allocation3 + $0xc8] sm:$0xff]  ;;  %15818 = vmatpush3.bf16.msra.mxu0 %v18471_v41  ;;  %v5070_v19 = vrot.slane %v3857_v6, 2  ;;  %3706 = vst [vmem:[#allocation3 + $0xf9] sm:$0xff] %v15684_v63  ;;  %v3498_v57 = vpop.f32.mrb[51].mxu0 }
 0x5e8   :  { %v3858_v28 = vld [vmem:[#allocation3 + $0xb0] sm:$0xff]  ;;  %v3859_v8 = vld [vmem:[#allocation3 + $0xb8] sm:$0x3]  ;;  %v4129_v13 = vrot.slane %v3861_v12, 1  ;;  %v4131_v22 = vrot.slane %v3862_v40, 1  ;;  %15819 = vmatprep.subr.bf16.mxu0 %v18472_v26  ;;  %v20025_v39 = vpack.c.bf16 %v3861_v12, %v3860_v17  ;;  %3704 = vst [vmem:[#allocation3 + $0xe1] sm:$0xff] %v3498_v57 }
 0x5e9   :  { %v4124_v51 = vrot.slane %v3858_v28, 1  ;;  %v4126_v45 = vrot.slane %v3859_v8, 1  ;;  %v20027_v33 = vpack.c.bf16 %v3858_v28, %v3857_v6  ;;  %v5071_v7 = vrot.slane %v3858_v28, 2 }
 0x5ea   :  { %v4130_v41 = vsel %vm24320_vm4, %v4128_v35, %v4129_v13  ;;  %v4132_v37 = vsel %vm24320_vm4, %v4129_v13, %v4131_v22  ;;  %v5073_v0 = vrot.slane %v3859_v8, 2  ;;  %v5076_v11 = vrot.slane %v3861_v12, 2 }
 0x5eb   :  { %v4125_v2 = vsel %vm24320_vm4, %v4123_v60, %v4124_v51  ;;  %v4127_v46 = vsel %vm24320_vm4, %v4124_v51, %v4126_v45  ;;  %15820 = vmatpush3.bf16.msra.mxu0 %v18472_v26  ;;  %v5072_v50 = vsel %vm24319_vm3, %v5070_v19, %v5071_v7  ;;  %v5078_v15 = vrot.slane %v3862_v40, 2 }
 0x5ec   :  { %v20034_v58 = vpack.c.bf16 %v4127_v46, %v4125_v2  ;;  %15821 = vmatprep.subr.bf16.mxu0 %v18473_v54  ;;  %v5074_v16 = vsel %vm24319_vm3, %v5071_v7, %v5073_v0  ;;  %v5077_v36 = vsel %vm24319_vm3, %v5075_v53, %v5076_v11  ;;  %v15687_v27 = vpop.f32.mrb[52].mxu0  ;;  %v20038_v48 = vpack.c.bf16 %v4132_v37, %v4130_v41  ;;  %v3866_v32 = vld [vmem:[#allocation3 + $0xf0] sm:$0xff] }
 0x5ed   :  { %v20040_v9 = vpack.c.bf16 %v5074_v16, %v5072_v50  ;;  %3709 = vst [vmem:[#allocation3 + $0x121] sm:$0xff] %v15687_v27  ;;  %v3511_v10 = vpop.f32.mrb[53].mxu0  ;;  %v4138_v26 = vrot.slane %v3866_v32, 1  ;;  %v5079_v55 = vsel %vm24319_vm3, %v5076_v11, %v5078_v15  ;;  %v5085_v34 = vrot.slane %v3866_v32, 2 }
 0x5ee   :  { %24558 = vst [vmem:[#allocation22_spill] sm:$0xff] %v20034_v58  ;;  %24559 = vst [vmem:[#allocation23_spill] sm:$0xff] %v20038_v48  ;;  %15758 = vmatmul.mubr.bf16.gmra.mrb[108].mxu0 %v20034_v58  ;;  %v3863_v52 = vld [vmem:[#allocation3 + $0xd8] sm:$0xff]  ;;  %v15688_v5 = vpop.f32.mrb[54].mxu0  ;;  %v3868_v6 = vld [vmem:[#allocation3 + $0x100] sm:$0x3]  ;;  %v20047_v35 = vpack.c.bf16 %v5079_v55, %v5077_v36 }
 0x5ef   :  { %24560 = vst [vmem:[#allocation24_spill] sm:$0xff] %v20040_v9  ;;  %3707 = vst [vmem:[#allocation3 + $0x109] sm:$0xff] %v3511_v10  ;;  %15761 = vmatprep.mubr.bf16.mxu0 %v20038_v48  ;;  %v4133_v17 = vrot.slane %v3863_v52, 1  ;;  %v3867_v31 = vld [vmem:[#allocation3 + $0xf8] sm:$0xff]  ;;  %15822 = vmatpush3.bf16.msra.mxu0 %v18473_v54  ;;  %v5080_v49 = vrot.slane %v3863_v52, 2  ;;  %v3514_v53 = vpop.f32.mrb[55].mxu0 }
 0x5f0   :  { %24561 = vst [vmem:[#allocation25_spill] sm:$0xff] %v20047_v35  ;;  %3710 = vst [vmem:[#allocation3 + $0x129] sm:$0xff] %v15688_v5  ;;  %v3864_v63 = vld [vmem:[#allocation3 + $0xe0] sm:$0xff]  ;;  %v3865_v60 = vld [vmem:[#allocation3 + $0xe8] sm:$0x3]  ;;  %v4139_v12 = vrot.slane %v3867_v31, 1  ;;  %15823 = vmatprep.subr.bf16.mxu0 %v18474_v20  ;;  %v20049_v19 = vpack.c.bf16 %v3867_v31, %v3866_v32 }
 0x5f1   :  { %v4141_v40 = vrot.slane %v3868_v6, 1  ;;  %3708 = vst [vmem:[#allocation3 + $0x111] sm:$0xff] %v3514_v53  ;;  %v4134_v57 = vrot.slane %v3864_v63, 1  ;;  %v4136_v28 = vrot.slane %v3865_v60, 1  ;;  %v20051_v8 = vpack.c.bf16 %v3864_v63, %v3863_v52 }
 0x5f2   :  { %v5081_v13 = vrot.slane %v3864_v63, 2  ;;  %v4140_v54 = vsel %vm24320_vm4, %v4138_v26, %v4139_v12  ;;  %v5083_v51 = vrot.slane %v3865_v60, 2  ;;  %v5086_v45 = vrot.slane %v3867_v31, 2 }
 0x5f3   :  { %v4142_v22 = vsel %vm24320_vm4, %v4139_v12, %v4141_v40  ;;  %v4135_v7 = vsel %vm24320_vm4, %v4133_v17, %v4134_v57  ;;  %v4137_v41 = vsel %vm24320_vm4, %v4134_v57, %v4136_v28  ;;  %15824 = vmatpush3.bf16.msra.mxu0 %v18474_v20  ;;  %v5088_v46 = vrot.slane %v3868_v6, 2 }
 0x5f4   :  { %v5082_v37 = vsel %vm24319_vm3, %v5080_v49, %v5081_v13  ;;  %v20058_v0 = vpack.c.bf16 %v4137_v41, %v4135_v7  ;;  %15889 = vmatprep.subr.bf16.mxu0 %v20043_v42  ;;  %v5084_v11 = vsel %vm24319_vm3, %v5081_v13, %v5083_v51  ;;  %v5087_v2 = vsel %vm24319_vm3, %v5085_v34, %v5086_v45  ;;  %v15691_v50 = vpop.f32.mrb[56].mxu0  ;;  %v3872_v36 = vld [vmem:[#allocation3 + $0x120] sm:$0xff]  ;;  %v20078_v51 = vld [vmem:[#allocation3 + $0x1b0] sm:$0xff] }
 0x5f5   :  { %v20063_v16 = vpack.c.bf16 %v4142_v22, %v4140_v54  ;;  %v20065_v15 = vpack.c.bf16 %v5084_v11, %v5082_v37  ;;  %3713 = vst [vmem:[#allocation3 + $0x151] sm:$0xff] %v15691_v50  ;;  %v3527_v27 = vpop.f32.mrb[57].mxu0  ;;  %v4148_v32 = vrot.slane %v3872_v36, 1  ;;  %v5089_v10 = vsel %vm24319_vm3, %v5086_v45, %v5088_v46  ;;  %v3892_v11 = vld [vmem:[#allocation3 + $0x1c0] sm:$0x3] }
 0x5f6   :  { %24562 = vst [vmem:[#allocation26_spill] sm:$0xff] %v20058_v0  ;;  %15762 = vmatmul.mubr.bf16.gmra.mrb[112].mxu0 %v20058_v0  ;;  %v3869_v20 = vld [vmem:[#allocation3 + $0x108] sm:$0xff]  ;;  %v5095_v52 = vrot.slane %v3872_v36, 2  ;;  %3711 = vst [vmem:[#allocation3 + $0x139] sm:$0xff] %v3527_v27  ;;  %v15692_v26 = vpop.f32.mrb[58].mxu0  ;;  %v20070_v17 = vpack.c.bf16 %v5089_v10, %v5087_v2 }
 0x5f7   :  { %24563 = vst [vmem:[#allocation27_spill] sm:$0xff] %v20063_v16  ;;  %24564 = vst [vmem:[#allocation28_spill] sm:$0xff] %v20065_v15  ;;  %15765 = vmatprep.mubr.bf16.mxu0 %v20063_v16  ;;  %v4143_v55 = vrot.slane %v3869_v20, 1  ;;  %v3873_v34 = vld [vmem:[#allocation3 + $0x128] sm:$0xff]  ;;  %v3874_v5 = vld [vmem:[#allocation3 + $0x130] sm:$0x3] }
 0x5f8   :  { %24565 = vst [vmem:[#allocation29_spill] sm:$0xff] %v20070_v17  ;;  %v5090_v31 = vrot.slane %v3869_v20, 2  ;;  %3714 = vst [vmem:[#allocation3 + $0x159] sm:$0xff] %v15692_v26  ;;  %v3530_v6 = vpop.f32.mrb[59].mxu0  ;;  %v3870_v49 = vld [vmem:[#allocation3 + $0x110] sm:$0xff]  ;;  %v4149_v63 = vrot.slane %v3873_v34, 1  ;;  %v20072_v12 = vpack.c.bf16 %v3873_v34, %v3872_v36 }
 0x5f9   :  { %v3871_v53 = vld [vmem:[#allocation3 + $0x118] sm:$0x3]  ;;  %v4151_v60 = vrot.slane %v3874_v5, 1  ;;  %3712 = vst [vmem:[#allocation3 + $0x141] sm:$0xff] %v3530_v6  ;;  %v4144_v40 = vrot.slane %v3870_v49, 1  ;;  %v20074_v28 = vpack.c.bf16 %v3870_v49, %v3869_v20  ;;  %v5091_v13 = vrot.slane %v3870_v49, 2 }
 0x5fa   :  { %v4146_v57 = vrot.slane %v3871_v53, 1  ;;  %v4150_v54 = vsel %vm24320_vm4, %v4148_v32, %v4149_v63  ;;  %v5093_v45 = vrot.slane %v3871_v53, 2  ;;  %v5096_v7 = vrot.slane %v3873_v34, 2 }
 0x5fb   :  { %v4152_v22 = vsel %vm24320_vm4, %v4149_v63, %v4151_v60  ;;  %v4145_v41 = vsel %vm24320_vm4, %v4143_v55, %v4144_v40  ;;  %v5092_v2 = vsel %vm24319_vm3, %v5090_v31, %v5091_v13  ;;  %v5098_v27 = vrot.slane %v3874_v5, 2 }
 0x5fc   :  { %v4147_v37 = vsel %vm24320_vm4, %v4144_v40, %v4146_v57  ;;  %v5094_v50 = vsel %vm24319_vm3, %v5091_v13, %v5093_v45  ;;  %v5097_v36 = vsel %vm24319_vm3, %v5095_v52, %v5096_v7  ;;  %v15695_v20 = vpop.f32.mrb[60].mxu0  ;;  %v20087_v32 = vpack.c.bf16 %v4152_v22, %v4150_v54  ;;  %v3878_v10 = vld [vmem:[#allocation3 + $0x150] sm:$0xff] }
 0x5fd   :  { %v20083_v46 = vpack.c.bf16 %v4147_v37, %v4145_v41  ;;  %v4168_v26 = vrot.slane %v20078_v51, 1  ;;  %v20090_v34 = vpack.c.bf16 %v5094_v50, %v5092_v2  ;;  %3717 = vst [vmem:[#allocation3 + $0x181] sm:$0xff] %v15695_v20  ;;  %v3543_v55 = vpop.f32.mrb[61].mxu0  ;;  %v3875_v31 = vld [vmem:[#allocation3 + $0x138] sm:$0xff]  ;;  %v4158_v6 = vrot.slane %v3878_v10, 1 }
 0x5fe   :  { %24567 = vst [vmem:[#allocation31_spill] sm:$0xff] %v20087_v32  ;;  %v4171_v49 = vrot.slane %v3892_v11, 1  ;;  %v5099_v53 = vsel %vm24319_vm3, %v5096_v7, %v5098_v27  ;;  %v5105_v63 = vrot.slane %v3878_v10, 2  ;;  %3715 = vst [vmem:[#allocation3 + $0x169] sm:$0xff] %v3543_v55  ;;  %v15696_v52 = vpop.f32.mrb[62].mxu0  ;;  %v4153_v5 = vrot.slane %v3875_v31, 1 }
 0x5ff   :  { %24566 = vst [vmem:[#allocation30_spill] sm:$0xff] %v20083_v46  ;;  %24568 = vst [vmem:[#allocation32_spill] sm:$0xff] %v20090_v34  ;;  %15766 = vmatmul.mubr.bf16.gmra.mrb[116].mxu0 %v20083_v46  ;;  %v3879_v60 = vld [vmem:[#allocation3 + $0x158] sm:$0xff]  ;;  %v3880_v40 = vld [vmem:[#allocation3 + $0x160] sm:$0x3]  ;;  %v20095_v57 = vpack.c.bf16 %v5099_v53, %v5097_v36  ;;  %v5100_v13 = vrot.slane %v3875_v31, 2 }
 0x600   :  { %15769 = vmatprep.mubr.bf16.mxu0 %v20087_v32  ;;  %3718 = vst [vmem:[#allocation3 + $0x189] sm:$0xff] %v15696_v52  ;;  %v3546_v54 = vpop.f32.mrb[63].mxu0  ;;  %v3876_v22 = vld [vmem:[#allocation3 + $0x140] sm:$0xff]  ;;  %v3877_v45 = vld [vmem:[#allocation3 + $0x148] sm:$0x3]  ;;  %v4159_v41 = vrot.slane %v3879_v60, 1  ;;  %v20097_v11 = vpack.c.bf16 %v3879_v60, %v3878_v10 }
 0x601   :  { %24569 = vst [vmem:[#allocation33_spill] sm:$0xff] %v20095_v57  ;;  %v4161_v37 = vrot.slane %v3880_v40, 1  ;;  %3716 = vst [vmem:[#allocation3 + $0x171] sm:$0xff] %v3546_v54  ;;  %v4154_v7 = vrot.slane %v3876_v22, 1  ;;  %v4156_v2 = vrot.slane %v3877_v45, 1  ;;  %v20099_v50 = vpack.c.bf16 %v3876_v22, %v3875_v31 }
 0x602   :  { %v5101_v27 = vrot.slane %v3876_v22, 2  ;;  %v4160_v20 = vsel %vm24320_vm4, %v4158_v6, %v4159_v41  ;;  %v5103_v55 = vrot.slane %v3877_v45, 2  ;;  %v5106_v53 = vrot.slane %v3879_v60, 2 }
 0x603   :  { %v4162_v36 = vsel %vm24320_vm4, %v4159_v41, %v4161_v37  ;;  %v4155_v52 = vsel %vm24320_vm4, %v4153_v5, %v4154_v7  ;;  %v4157_v32 = vsel %vm24320_vm4, %v4154_v7, %v4156_v2  ;;  %v5108_v16 = vrot.slane %v3880_v40, 2 }
 0x604   :  { %v5102_v46 = vsel %vm24319_vm3, %v5100_v13, %v5101_v27  ;;  %v20106_v10 = vpack.c.bf16 %v4157_v32, %v4155_v52  ;;  %v5104_v54 = vsel %vm24319_vm3, %v5101_v27, %v5103_v55  ;;  %v5107_v31 = vsel %vm24319_vm3, %v5105_v63, %v5106_v53  ;;  %v15699_v22 = vpop.f32.mrb[64].mxu0  ;;  %v3884_v45 = vld [vmem:[#allocation3 + $0x180] sm:$0xff] }
 0x605   :  { %v20110_v0 = vpack.c.bf16 %v4162_v36, %v4160_v20  ;;  %v4170_v6 = vsel %vm24320_vm4, %v4168_v26, %v19952_v43  ;;  %v4172_v5 = vsel %vm24320_vm4, %v19952_v43, %v4171_v49  ;;  %v20116_v60 = vpack.c.bf16 %v5104_v54, %v5102_v46  ;;  %3721 = vst [vmem:[#allocation3 + $0x1e1] sm:$0xff] %v15699_v22  ;;  %v3559_v32 = vpop.f32.mrb[65].mxu0  ;;  %v3881_v13 = vld [vmem:[#allocation3 + $0x168] sm:$0xff] }
 0x606   :  { %24570 = vst [vmem:[#allocation34_spill] sm:$0xff] %v20106_v10  ;;  %v5109_v63 = vsel %vm24319_vm3, %v5106_v53, %v5108_v16  ;;  %v6135_v40 = vrot.slane %v3884_v45, 1  ;;  %v6569_v41 = vrot.slane %v3884_v45, 2  ;;  %3719 = vst [vmem:[#allocation3 + $0x1c9] sm:$0xff] %v3559_v32  ;;  %v15700_v37 = vpop.f32.mrb[66].mxu0  ;;  %v4163_v26 = vrot.slane %v3881_v13, 1 }
 0x607   :  { %24571 = vst [vmem:[#allocation35_spill] sm:$0xff] %v20110_v0  ;;  %24572 = vst [vmem:[#allocation36_spill] sm:$0xff] %v20116_v60  ;;  %15770 = vmatmul.mubr.bf16.gmra.mrb[120].mxu0 %v20106_v10  ;;  %v20121_v7 = vpack.c.bf16 %v5109_v63, %v5107_v31  ;;  %v5110_v43 = vrot.slane %v3881_v13, 2  ;;  %v3885_v46 = vld [vmem:[#allocation3 + $0x188] sm:$0xff]  ;;  %v3886_v49 = vld [vmem:[#allocation3 + $0x190] sm:$0x3]  ;;  %v4328_v36 = vpack.c.bf16 %v4172_v5, %v4170_v6 }
 0x608   :  { %15773 = vmatprep.mubr.bf16.mxu0 %v20110_v0  ;;  %3722 = vst [vmem:[#allocation3 + $0x1e9] sm:$0xff] %v15700_v37  ;;  %v3562_v2 = vpop.f32.mrb[67].mxu0  ;;  %v3882_v27 = vld [vmem:[#allocation3 + $0x170] sm:$0xff]  ;;  %v3883_v20 = vld [vmem:[#allocation3 + $0x178] sm:$0x3]  ;;  %v6136_v55 = vrot.slane %v3885_v46, 1 }
 0x609   :  { %24573 = vst [vmem:[#allocation37_spill] sm:$0xff] %v20121_v7  ;;  %v6570_v52 = vrot.slane %v3885_v46, 2  ;;  %3720 = vst [vmem:[#allocation3 + $0x1d1] sm:$0xff] %v3562_v2  ;;  %v4164_v16 = vrot.slane %v3882_v27, 1  ;;  %v4166_v53 = vrot.slane %v3883_v20, 1  ;;  %v20123_v54 = vpack.c.bf16 %v3882_v27, %v3881_v13 }
 0x60a   :  { %v5111_v22 = vrot.slane %v3882_v27, 2  ;;  %v5113_v45 = vrot.slane %v3883_v20, 2  ;;  %v6137_v31 = vsel %vm24320_vm4, %v6135_v40, %v6136_v55  ;;  %v6138_v32 = vrot.slane %v3886_v49, 1 }
 0x60b   :  { %v6571_v63 = vsel %vm24319_vm3, %v6569_v41, %v6570_v52  ;;  %v4165_v37 = vsel %vm24320_vm4, %v4163_v26, %v4164_v16  ;;  %v4167_v0 = vsel %vm24320_vm4, %v4164_v16, %v4166_v53  ;;  %v6572_v5 = vrot.slane %v3886_v49, 2 }
 0x60c   :  { %v5112_v6 = vsel %vm24319_vm3, %v5110_v43, %v5111_v22  ;;  %v20130_v46 = vpack.c.bf16 %v4167_v0, %v4165_v37  ;;  %v5114_v2 = vsel %vm24319_vm3, %v5111_v22, %v5113_v45  ;;  %v6139_v13 = vsel %vm24320_vm4, %v6136_v55, %v6138_v32  ;;  %v15703_v27 = vpop.f32.mrb[68].mxu0  ;;  %v3896_v20 = vld [vmem:[#allocation3 + $0x1e0] sm:$0xff] }
 0x60d   :  { %v20134_v10 = vpack.c.bf16 %v5114_v2, %v5112_v6  ;;  %v20136_v40 = vpack.c.bf16 %v6139_v13, %v6137_v31  ;;  %v6573_v41 = vsel %vm24319_vm3, %v6570_v52, %v6572_v5  ;;  %3725 = vst [vmem:[#allocation3 + $0x211] sm:$0xff] %v15703_v27  ;;  %v3575_v26 = vpop.f32.mrb[69].mxu0  ;;  %v3893_v43 = vld [vmem:[#allocation3 + $0x1c8] sm:$0xff]  ;;  %v4178_v49 = vrot.slane %v3896_v20, 1 }
 0x60e   :  { %24574 = vst [vmem:[#allocation38_spill] sm:$0xff] %v20130_v46  ;;  %v5125_v0 = vrot.slane %v3896_v20, 2  ;;  %v20140_v16 = vpack.c.bf16 %v6573_v41, %v6571_v63  ;;  %3723 = vst [vmem:[#allocation3 + $0x1f9] sm:$0xff] %v3575_v26  ;;  %v15704_v53 = vpop.f32.mrb[70].mxu0  ;;  %v4173_v55 = vrot.slane %v3893_v43, 1  ;;  %v5120_v32 = vrot.slane %v3893_v43, 2 }
 0x60f   :  { %24575 = vst [vmem:[#allocation39_spill] sm:$0xff] %v20134_v10  ;;  %24576 = vst [vmem:[#allocation40_spill] sm:$0xff] %v20136_v40  ;;  %15774 = vmatmul.mubr.bf16.gmra.mrb[124].mxu0 %v20130_v46  ;;  %v3897_v22 = vld [vmem:[#allocation3 + $0x1e8] sm:$0xff]  ;;  %v3898_v45 = vld [vmem:[#allocation3 + $0x1f0] sm:$0x3]  ;;  %v3578_v31 = vpop.f32.mrb[71].mxu0 }
 0x610   :  { %24577 = vst [vmem:[#allocation41_spill] sm:$0xff] %v20140_v16  ;;  %15777 = vmatprep.mubr.bf16.mxu0 %v4328_v36  ;;  %3726 = vst [vmem:[#allocation3 + $0x219] sm:$0xff] %v15704_v53  ;;  %v3894_v37 = vld [vmem:[#allocation3 + $0x1d0] sm:$0xff]  ;;  %v3895_v52 = vld [vmem:[#allocation3 + $0x1d8] sm:$0x3]  ;;  %v4179_v6 = vrot.slane %v3897_v22, 1  ;;  %v20142_v2 = vpack.c.bf16 %v3897_v22, %v3896_v20 }
 0x611   :  { %v4181_v5 = vrot.slane %v3898_v45, 1  ;;  %3724 = vst [vmem:[#allocation3 + $0x201] sm:$0xff] %v3578_v31  ;;  %v4174_v13 = vrot.slane %v3894_v37, 1  ;;  %v4176_v27 = vrot.slane %v3895_v52, 1  ;;  %v20144_v63 = vpack.c.bf16 %v3894_v37, %v3893_v43 }
 0x612   :  { %v5121_v41 = vrot.slane %v3894_v37, 2  ;;  %v4180_v36 = vsel %vm24320_vm4, %v4178_v49, %v4179_v6  ;;  %v5123_v16 = vrot.slane %v3895_v52, 2  ;;  %v5126_v40 = vrot.slane %v3897_v22, 2 }
 0x613   :  { %v4182_v26 = vsel %vm24320_vm4, %v4179_v6, %v4181_v5  ;;  %v4175_v53 = vsel %vm24320_vm4, %v4173_v55, %v4174_v13  ;;  %v4177_v46 = vsel %vm24320_vm4, %v4174_v13, %v4176_v27  ;;  %v5128_v58 = vrot.slane %v3898_v45, 2 }
 0x614   :  { %v5122_v48 = vsel %vm24319_vm3, %v5120_v32, %v5121_v41  ;;  %v20151_v20 = vpack.c.bf16 %v4177_v46, %v4175_v53  ;;  %v5124_v31 = vsel %vm24319_vm3, %v5121_v41, %v5123_v16  ;;  %v5127_v43 = vsel %vm24319_vm3, %v5125_v0, %v5126_v40  ;;  %v15707_v37 = vpop.f32.mrb[72].mxu0  ;;  %v3902_v49 = vld [vmem:[#allocation3 + $0x210] sm:$0xff] }
 0x615   :  { %v20155_v29 = vpack.c.bf16 %v4182_v26, %v4180_v36  ;;  %v20157_v6 = vpack.c.bf16 %v5124_v31, %v5122_v48  ;;  %3729 = vst [vmem:[#allocation3 + $0x241] sm:$0xff] %v15707_v37  ;;  %v3591_v22 = vpop.f32.mrb[73].mxu0  ;;  %v3899_v55 = vld [vmem:[#allocation3 + $0x1f8] sm:$0xff]  ;;  %v4188_v52 = vrot.slane %v3902_v49, 1  ;;  %v5129_v46 = vsel %vm24319_vm3, %v5126_v40, %v5128_v58 }
 0x616   :  { %24578 = vst [vmem:[#allocation42_spill] sm:$0xff] %v20151_v20  ;;  %v5135_v32 = vrot.slane %v3902_v49, 2  ;;  %3727 = vst [vmem:[#allocation3 + $0x229] sm:$0xff] %v3591_v22  ;;  %v15708_v16 = vpop.f32.mrb[74].mxu0  ;;  %v4183_v0 = vrot.slane %v3899_v55, 1  ;;  %v20162_v13 = vpack.c.bf16 %v5129_v46, %v5127_v43  ;;  %v5130_v48 = vrot.slane %v3899_v55, 2 }
 0x617   :  { %24579 = vst [vmem:[#allocation43_spill] sm:$0xff] %v20155_v29  ;;  %24580 = vst [vmem:[#allocation44_spill] sm:$0xff] %v20157_v6  ;;  %15778 = vmatmul.mubr.bf16.gmra.mrb[128].mxu0 %v20151_v20  ;;  %v3903_v45 = vld [vmem:[#allocation3 + $0x218] sm:$0xff]  ;;  %v3904_v5 = vld [vmem:[#allocation3 + $0x220] sm:$0x3]  ;;  %v3594_v27 = vpop.f32.mrb[75].mxu0 }
 0x618   :  { %15781 = vmatprep.mubr.bf16.mxu0 %v20155_v29  ;;  %24581 = vst [vmem:[#allocation45_spill] sm:$0xff] %v20162_v13  ;;  %3730 = vst [vmem:[#allocation3 + $0x249] sm:$0xff] %v15708_v16  ;;  %v3900_v41 = vld [vmem:[#allocation3 + $0x200] sm:$0xff]  ;;  %v3901_v36 = vld [vmem:[#allocation3 + $0x208] sm:$0x3]  ;;  %v4189_v26 = vrot.slane %v3903_v45, 1  ;;  %v20164_v31 = vpack.c.bf16 %v3903_v45, %v3902_v49 }
 0x619   :  { %v4191_v53 = vrot.slane %v3904_v5, 1  ;;  %3728 = vst [vmem:[#allocation3 + $0x231] sm:$0xff] %v3594_v27  ;;  %v4184_v58 = vrot.slane %v3900_v41, 1  ;;  %v4186_v40 = vrot.slane %v3901_v36, 1  ;;  %v20166_v37 = vpack.c.bf16 %v3900_v41, %v3899_v55 }
 0x61a   :  { %v5131_v22 = vrot.slane %v3900_v41, 2  ;;  %v4190_v29 = vsel %vm24320_vm4, %v4188_v52, %v4189_v26  ;;  %v5133_v46 = vrot.slane %v3901_v36, 2  ;;  %v5136_v20 = vrot.slane %v3903_v45, 2 }
 0x61b   :  { %v4192_v43 = vsel %vm24320_vm4, %v4189_v26, %v4191_v53  ;;  %v4185_v16 = vsel %vm24320_vm4, %v4183_v0, %v4184_v58  ;;  %v4187_v47 = vsel %vm24320_vm4, %v4184_v58, %v4186_v40  ;;  %v5138_v24 = vrot.slane %v3904_v5, 2 }
 0x61c   :  { %v5132_v56 = vsel %vm24319_vm3, %v5130_v48, %v5131_v22  ;;  %v20173_v49 = vpack.c.bf16 %v4187_v47, %v4185_v16  ;;  %v5134_v27 = vsel %vm24319_vm3, %v5131_v22, %v5133_v46  ;;  %v5137_v55 = vsel %vm24319_vm3, %v5135_v32, %v5136_v20  ;;  %v15711_v41 = vpop.f32.mrb[76].mxu0  ;;  %v3908_v52 = vld [vmem:[#allocation3 + $0x240] sm:$0xff] }
 0x61d   :  { %v20177_v59 = vpack.c.bf16 %v4192_v43, %v4190_v29  ;;  %v20179_v26 = vpack.c.bf16 %v5134_v27, %v5132_v56  ;;  %3733 = vst [vmem:[#allocation3 + $0x271] sm:$0xff] %v15711_v41  ;;  %v3607_v45 = vpop.f32.mrb[77].mxu0  ;;  %v3905_v0 = vld [vmem:[#allocation3 + $0x228] sm:$0xff]  ;;  %v4198_v36 = vrot.slane %v3908_v52, 1  ;;  %v5139_v47 = vsel %vm24319_vm3, %v5136_v20, %v5138_v24 }
 0x61e   :  { %24582 = vst [vmem:[#allocation46_spill] sm:$0xff] %v20173_v49  ;;  %v5145_v48 = vrot.slane %v3908_v52, 2  ;;  %3731 = vst [vmem:[#allocation3 + $0x259] sm:$0xff] %v3607_v45  ;;  %v15712_v53 = vpop.f32.mrb[78].mxu0  ;;  %v4193_v32 = vrot.slane %v3905_v0, 1  ;;  %v20184_v58 = vpack.c.bf16 %v5139_v47, %v5137_v55  ;;  %v5140_v56 = vrot.slane %v3905_v0, 2 }
 0x61f   :  { %24583 = vst [vmem:[#allocation47_spill] sm:$0xff] %v20177_v59  ;;  %24584 = vst [vmem:[#allocation48_spill] sm:$0xff] %v20179_v26  ;;  %15782 = vmatmul.mubr.bf16.gmra.mrb[132].mxu0 %v20173_v49  ;;  %v3909_v5 = vld [vmem:[#allocation3 + $0x248] sm:$0xff]  ;;  %v3910_v29 = vld [vmem:[#allocation3 + $0x250] sm:$0x3]  ;;  %v3610_v40 = vpop.f32.mrb[79].mxu0 }
 0x620   :  { %15785 = vmatprep.mubr.bf16.mxu0 %v20177_v59  ;;  %24585 = vst [vmem:[#allocation49_spill] sm:$0xff] %v20184_v58  ;;  %3734 = vst [vmem:[#allocation3 + $0x279] sm:$0xff] %v15712_v53  ;;  %v3906_v22 = vld [vmem:[#allocation3 + $0x230] sm:$0xff]  ;;  %v3907_v43 = vld [vmem:[#allocation3 + $0x238] sm:$0x3]  ;;  %v4199_v46 = vrot.slane %v3909_v5, 1  ;;  %v20186_v27 = vpack.c.bf16 %v3909_v5, %v3908_v52 }
 0x621   :  { %v4201_v16 = vrot.slane %v3910_v29, 1  ;;  %3732 = vst [vmem:[#allocation3 + $0x261] sm:$0xff] %v3610_v40  ;;  %v4194_v24 = vrot.slane %v3906_v22, 1  ;;  %v4196_v20 = vrot.slane %v3907_v43, 1  ;;  %v20188_v41 = vpack.c.bf16 %v3906_v22, %v3905_v0 }
 0x622   :  { %v5141_v45 = vrot.slane %v3906_v22, 2  ;;  %v4200_v59 = vsel %vm24320_vm4, %v4198_v36, %v4199_v46  ;;  %v5143_v47 = vrot.slane %v3907_v43, 2  ;;  %v5146_v49 = vrot.slane %v3909_v5, 2 }
 0x623   :  { %v4202_v55 = vsel %vm24320_vm4, %v4199_v46, %v4201_v16  ;;  %v4195_v53 = vsel %vm24320_vm4, %v4193_v32, %v4194_v24  ;;  %v4197_v38 = vsel %vm24320_vm4, %v4194_v24, %v4196_v20  ;;  %v5148_v26 = vrot.slane %v3910_v29, 2 }
 0x624   :  { %v5142_v58 = vsel %vm24319_vm3, %v5140_v56, %v5141_v45  ;;  %v20195_v52 = vpack.c.bf16 %v4197_v38, %v4195_v53  ;;  %v5144_v40 = vsel %vm24319_vm3, %v5141_v45, %v5143_v47  ;;  %v5147_v0 = vsel %vm24319_vm3, %v5145_v48, %v5146_v49  ;;  %v15715_v22 = vpop.f32.mrb[80].mxu0  ;;  %v3914_v36 = vld [vmem:[#allocation3 + $0x270] sm:$0xff] }
 0x625   :  { %v20199_v13 = vpack.c.bf16 %v4202_v55, %v4200_v59  ;;  %v20201_v46 = vpack.c.bf16 %v5144_v40, %v5142_v58  ;;  %3737 = vst [vmem:[#allocation3 + $0x2a1] sm:$0xff] %v15715_v22  ;;  %v3623_v5 = vpop.f32.mrb[81].mxu0  ;;  %v3911_v32 = vld [vmem:[#allocation3 + $0x258] sm:$0xff]  ;;  %v4208_v43 = vrot.slane %v3914_v36, 1  ;;  %v5149_v38 = vsel %vm24319_vm3, %v5146_v49, %v5148_v26 }
 0x626   :  { %24586 = vst [vmem:[#allocation50_spill] sm:$0xff] %v20195_v52  ;;  %v5155_v56 = vrot.slane %v3914_v36, 2  ;;  %3735 = vst [vmem:[#allocation3 + $0x289] sm:$0xff] %v3623_v5  ;;  %v15716_v16 = vpop.f32.mrb[82].mxu0  ;;  %v4203_v48 = vrot.slane %v3911_v32, 1  ;;  %v20206_v24 = vpack.c.bf16 %v5149_v38, %v5147_v0  ;;  %v5150_v58 = vrot.slane %v3911_v32, 2 }
 0x627   :  { %24587 = vst [vmem:[#allocation51_spill] sm:$0xff] %v20199_v13  ;;  %24588 = vst [vmem:[#allocation52_spill] sm:$0xff] %v20201_v46  ;;  %15786 = vmatmul.mubr.bf16.gmra.mrb[136].mxu0 %v20195_v52  ;;  %v3915_v29 = vld [vmem:[#allocation3 + $0x278] sm:$0xff]  ;;  %v3916_v59 = vld [vmem:[#allocation3 + $0x280] sm:$0x3]  ;;  %v3626_v20 = vpop.f32.mrb[83].mxu0 }
 0x628   :  { %15789 = vmatprep.mubr.bf16.mxu0 %v20199_v13  ;;  %24589 = vst [vmem:[#allocation53_spill] sm:$0xff] %v20206_v24  ;;  %3738 = vst [vmem:[#allocation3 + $0x2a9] sm:$0xff] %v15716_v16  ;;  %v3912_v45 = vld [vmem:[#allocation3 + $0x260] sm:$0xff]  ;;  %v3913_v55 = vld [vmem:[#allocation3 + $0x268] sm:$0x3]  ;;  %v4209_v47 = vrot.slane %v3915_v29, 1  ;;  %v20208_v40 = vpack.c.bf16 %v3915_v29, %v3914_v36 }
 0x629   :  { %v4211_v53 = vrot.slane %v3916_v59, 1  ;;  %3736 = vst [vmem:[#allocation3 + $0x291] sm:$0xff] %v3626_v20  ;;  %v4204_v49 = vrot.slane %v3912_v45, 1  ;;  %v4206_v26 = vrot.slane %v3913_v55, 1  ;;  %v20210_v22 = vpack.c.bf16 %v3912_v45, %v3911_v32 }
 0x62a   :  { %v5151_v5 = vrot.slane %v3912_v45, 2  ;;  %v4210_v13 = vsel %vm24320_vm4, %v4208_v43, %v4209_v47  ;;  %v5153_v38 = vrot.slane %v3913_v55, 2  ;;  %v5156_v52 = vrot.slane %v3915_v29, 2 }
 0x62b   :  { %v4212_v0 = vsel %vm24320_vm4, %v4209_v47, %v4211_v53  ;;  %v4205_v16 = vsel %vm24320_vm4, %v4203_v48, %v4204_v49  ;;  %v4207_v24 = vsel %vm24320_vm4, %v4204_v49, %v4206_v26  ;;  %v5158_v6 = vrot.slane %v3916_v59, 2 }
 0x62c   :  { %v5152_v46 = vsel %vm24319_vm3, %v5150_v58, %v5151_v5  ;;  %v20217_v36 = vpack.c.bf16 %v4207_v24, %v4205_v16  ;;  %v5154_v20 = vsel %vm24319_vm3, %v5151_v5, %v5153_v38  ;;  %v5157_v32 = vsel %vm24319_vm3, %v5155_v56, %v5156_v52  ;;  %v15719_v45 = vpop.f32.mrb[84].mxu0  ;;  %v3920_v43 = vld [vmem:[#allocation3 + $0x2a0] sm:$0xff] }
 0x62d   :  { %v20221_v10 = vpack.c.bf16 %v4212_v0, %v4210_v13  ;;  %v20223_v47 = vpack.c.bf16 %v5154_v20, %v5152_v46  ;;  %3741 = vst [vmem:[#allocation3 + $0x2d1] sm:$0xff] %v15719_v45  ;;  %v3639_v29 = vpop.f32.mrb[85].mxu0  ;;  %v3917_v48 = vld [vmem:[#allocation3 + $0x288] sm:$0xff]  ;;  %v4218_v55 = vrot.slane %v3920_v43, 1  ;;  %v5159_v24 = vsel %vm24319_vm3, %v5156_v52, %v5158_v6 }
 0x62e   :  { %24590 = vst [vmem:[#allocation54_spill] sm:$0xff] %v20217_v36  ;;  %v5165_v58 = vrot.slane %v3920_v43, 2  ;;  %3739 = vst [vmem:[#allocation3 + $0x2b9] sm:$0xff] %v3639_v29  ;;  %v15720_v53 = vpop.f32.mrb[86].mxu0  ;;  %v4213_v56 = vrot.slane %v3917_v48, 1  ;;  %v20228_v49 = vpack.c.bf16 %v5159_v24, %v5157_v32  ;;  %v5160_v46 = vrot.slane %v3917_v48, 2 }
 0x62f   :  { %24591 = vst [vmem:[#allocation55_spill] sm:$0xff] %v20221_v10  ;;  %24592 = vst [vmem:[#allocation56_spill] sm:$0xff] %v20223_v47  ;;  %15790 = vmatmul.mubr.bf16.gmra.mrb[140].mxu0 %v20217_v36  ;;  %v3921_v59 = vld [vmem:[#allocation3 + $0x2a8] sm:$0xff]  ;;  %v3922_v13 = vld [vmem:[#allocation3 + $0x2b0] sm:$0x3]  ;;  %v3642_v26 = vpop.f32.mrb[87].mxu0 }
 0x630   :  { %15793 = vmatprep.mubr.bf16.mxu0 %v20221_v10  ;;  %24593 = vst [vmem:[#allocation57_spill] sm:$0xff] %v20228_v49  ;;  %3742 = vst [vmem:[#allocation3 + $0x2d9] sm:$0xff] %v15720_v53  ;;  %v3918_v5 = vld [vmem:[#allocation3 + $0x290] sm:$0xff]  ;;  %v3919_v0 = vld [vmem:[#allocation3 + $0x298] sm:$0x3]  ;;  %v4219_v38 = vrot.slane %v3921_v59, 1  ;;  %v20230_v20 = vpack.c.bf16 %v3921_v59, %v3920_v43 }
 0x631   :  { %v4221_v16 = vrot.slane %v3922_v13, 1  ;;  %3740 = vst [vmem:[#allocation3 + $0x2c1] sm:$0xff] %v3642_v26  ;;  %v4214_v6 = vrot.slane %v3918_v5, 1  ;;  %v4216_v52 = vrot.slane %v3919_v0, 1  ;;  %v20232_v45 = vpack.c.bf16 %v3918_v5, %v3917_v48 }
 0x632   :  { %24594 = vst [vmem:[#allocation58_spill] sm:$0xff] %v20230_v20  ;;  %v5161_v29 = vrot.slane %v3918_v5, 2  ;;  %v4220_v10 = vsel %vm24320_vm4, %v4218_v55, %v4219_v38  ;;  %v5163_v24 = vrot.slane %v3919_v0, 2  ;;  %v5166_v36 = vrot.slane %v3921_v59, 2 }
 0x633   :  { %v4222_v32 = vsel %vm24320_vm4, %v4219_v38, %v4221_v16  ;;  %v4215_v53 = vsel %vm24320_vm4, %v4213_v56, %v4214_v6  ;;  %v4217_v49 = vsel %vm24320_vm4, %v4214_v6, %v4216_v52  ;;  %v5168_v7 = vrot.slane %v3922_v13, 2 }
 0x634   :  { %v5162_v47 = vsel %vm24319_vm3, %v5160_v46, %v5161_v29  ;;  %v20239_v43 = vpack.c.bf16 %v4217_v49, %v4215_v53  ;;  %v5164_v26 = vsel %vm24319_vm3, %v5161_v29, %v5163_v24  ;;  %v5167_v48 = vsel %vm24319_vm3, %v5165_v58, %v5166_v36  ;;  %v15723_v5 = vpop.f32.mrb[88].mxu0  ;;  %v3926_v55 = vld [vmem:[#allocation3 + $0x2d0] sm:$0xff] }
 0x635   :  { %v20243_v60 = vpack.c.bf16 %v4222_v32, %v4220_v10  ;;  %v20245_v38 = vpack.c.bf16 %v5164_v26, %v5162_v47  ;;  %3745 = vst [vmem:[#allocation3 + $0x301] sm:$0xff] %v15723_v5  ;;  %v3655_v59 = vpop.f32.mrb[89].mxu0  ;;  %v3923_v56 = vld [vmem:[#allocation3 + $0x2b8] sm:$0xff]  ;;  %v4228_v0 = vrot.slane %v3926_v55, 1  ;;  %v5169_v49 = vsel %vm24319_vm3, %v5166_v36, %v5168_v7 }
 0x636   :  { %24595 = vst [vmem:[#allocation59_spill] sm:$0xff] %v20239_v43  ;;  %v5175_v46 = vrot.slane %v3926_v55, 2  ;;  %3743 = vst [vmem:[#allocation3 + $0x2e9] sm:$0xff] %v3655_v59  ;;  %v15724_v16 = vpop.f32.mrb[90].mxu0  ;;  %v4223_v58 = vrot.slane %v3923_v56, 1  ;;  %v20250_v6 = vpack.c.bf16 %v5169_v49, %v5167_v48  ;;  %v5170_v47 = vrot.slane %v3923_v56, 2 }
 0x637   :  { %24596 = vst [vmem:[#allocation60_spill] sm:$0xff] %v20243_v60  ;;  %24597 = vst [vmem:[#allocation61_spill] sm:$0xff] %v20245_v38  ;;  %15794 = vmatmul.mubr.bf16.gmra.mrb[144].mxu0 %v20239_v43  ;;  %v3927_v13 = vld [vmem:[#allocation3 + $0x2d8] sm:$0xff]  ;;  %v3928_v10 = vld [vmem:[#allocation3 + $0x2e0] sm:$0x3]  ;;  %v3658_v52 = vpop.f32.mrb[91].mxu0 }
 0x638   :  { %15797 = vmatprep.mubr.bf16.mxu0 %v20243_v60  ;;  %24598 = vst [vmem:[#allocation62_spill] sm:$0xff] %v20250_v6  ;;  %3746 = vst [vmem:[#allocation3 + $0x309] sm:$0xff] %v15724_v16  ;;  %v3924_v29 = vld [vmem:[#allocation3 + $0x2c0] sm:$0xff]  ;;  %v3925_v32 = vld [vmem:[#allocation3 + $0x2c8] sm:$0x3]  ;;  %v4229_v24 = vrot.slane %v3927_v13, 1  ;;  %v20252_v26 = vpack.c.bf16 %v3927_v13, %v3926_v55 }
 0x639   :  { %v4231_v53 = vrot.slane %v3928_v10, 1  ;;  %3744 = vst [vmem:[#allocation3 + $0x2f1] sm:$0xff] %v3658_v52  ;;  %v4224_v7 = vrot.slane %v3924_v29, 1  ;;  %v4226_v36 = vrot.slane %v3925_v32, 1  ;;  %v20254_v5 = vpack.c.bf16 %v3924_v29, %v3923_v56 }
 0x63a   :  { %24599 = vst [vmem:[#allocation63_spill] sm:$0xff] %v20252_v26  ;;  %v5171_v59 = vrot.slane %v3924_v29, 2  ;;  %v4230_v60 = vsel %vm24320_vm4, %v4228_v0, %v4229_v24  ;;  %v5173_v49 = vrot.slane %v3925_v32, 2  ;;  %v5176_v43 = vrot.slane %v3927_v13, 2 }
 0x63b   :  { %24600 = vst [vmem:[#allocation64_spill] sm:$0xff] %v20254_v5  ;;  %v4232_v48 = vsel %vm24320_vm4, %v4229_v24, %v4231_v53  ;;  %v4225_v16 = vsel %vm24320_vm4, %v4223_v58, %v4224_v7  ;;  %v4227_v6 = vsel %vm24320_vm4, %v4224_v7, %v4226_v36  ;;  %v5178_v57 = vrot.slane %v3928_v10, 2 }
 0x63c   :  { %v5172_v38 = vsel %vm24319_vm3, %v5170_v47, %v5171_v59  ;;  %v20261_v55 = vpack.c.bf16 %v4227_v6, %v4225_v16  ;;  %v5174_v52 = vsel %vm24319_vm3, %v5171_v59, %v5173_v49  ;;  %v5177_v56 = vsel %vm24319_vm3, %v5175_v46, %v5176_v43  ;;  %v15727_v29 = vpop.f32.mrb[92].mxu0  ;;  %v3932_v0 = vld [vmem:[#allocation3 + $0x300] sm:$0xff] }
 0x63d   :  { %v20265_v34 = vpack.c.bf16 %v4232_v48, %v4230_v60  ;;  %v20267_v24 = vpack.c.bf16 %v5174_v52, %v5172_v38  ;;  %3749 = vst [vmem:[#allocation3 + $0x331] sm:$0xff] %v15727_v29  ;;  %v3671_v13 = vpop.f32.mrb[93].mxu0  ;;  %v3929_v58 = vld [vmem:[#allocation3 + $0x2e8] sm:$0xff]  ;;  %v4238_v32 = vrot.slane %v3932_v0, 1  ;;  %v5179_v6 = vsel %vm24319_vm3, %v5176_v43, %v5178_v57 }
 0x63e   :  { %24601 = vst [vmem:[#allocation65_spill] sm:$0xff] %v20261_v55  ;;  %v5185_v47 = vrot.slane %v3932_v0, 2  ;;  %3747 = vst [vmem:[#allocation3 + $0x319] sm:$0xff] %v3671_v13  ;;  %v15728_v53 = vpop.f32.mrb[94].mxu0  ;;  %v4233_v46 = vrot.slane %v3929_v58, 1  ;;  %v20272_v7 = vpack.c.bf16 %v5179_v6, %v5177_v56  ;;  %v5180_v38 = vrot.slane %v3929_v58, 2 }
 0x63f   :  { %24602 = vst [vmem:[#allocation66_spill] sm:$0xff] %v20265_v34  ;;  %24603 = vst [vmem:[#allocation67_spill] sm:$0xff] %v20267_v24  ;;  %15798 = vmatmul.mubr.bf16.gmra.mrb[148].mxu0 %v20261_v55  ;;  %v3933_v10 = vld [vmem:[#allocation3 + $0x308] sm:$0xff]  ;;  %v3934_v60 = vld [vmem:[#allocation3 + $0x310] sm:$0x3]  ;;  %v3674_v36 = vpop.f32.mrb[95].mxu0 }
 0x640   :  { %15801 = vmatprep.mubr.bf16.mxu0 %v20265_v34  ;;  %24604 = vst [vmem:[#allocation68_spill] sm:$0xff] %v20272_v7  ;;  %3750 = vst [vmem:[#allocation3 + $0x339] sm:$0xff] %v15728_v53  ;;  %v3930_v59 = vld [vmem:[#allocation3 + $0x2f0] sm:$0xff]  ;;  %v3931_v48 = vld [vmem:[#allocation3 + $0x2f8] sm:$0x3]  ;;  %v4239_v49 = vrot.slane %v3933_v10, 1  ;;  %v20274_v52 = vpack.c.bf16 %v3933_v10, %v3932_v0 }
 0x641   :  { %v4241_v16 = vrot.slane %v3934_v60, 1  ;;  %3748 = vst [vmem:[#allocation3 + $0x321] sm:$0xff] %v3674_v36  ;;  %v4234_v57 = vrot.slane %v3930_v59, 1  ;;  %v4236_v43 = vrot.slane %v3931_v48, 1  ;;  %v20276_v29 = vpack.c.bf16 %v3930_v59, %v3929_v58 }
 0x642   :  { %24605 = vst [vmem:[#allocation69_spill] sm:$0xff] %v20274_v52  ;;  %v5181_v13 = vrot.slane %v3930_v59, 2  ;;  %v4240_v34 = vsel %vm24320_vm4, %v4238_v32, %v4239_v49  ;;  %v5183_v6 = vrot.slane %v3931_v48, 2  ;;  %v5186_v55 = vrot.slane %v3933_v10, 2 }
 0x643   :  { %24606 = vst [vmem:[#allocation70_spill] sm:$0xff] %v20276_v29  ;;  %v4242_v56 = vsel %vm24320_vm4, %v4239_v49, %v4241_v16  ;;  %v4235_v53 = vsel %vm24320_vm4, %v4233_v46, %v4234_v57  ;;  %v4237_v7 = vsel %vm24320_vm4, %v4234_v57, %v4236_v43  ;;  %v5188_v17 = vrot.slane %v3934_v60, 2  ;;  %v20302_v43 = vld [vmem:[#allocation3 + $0x8] sm:$0xff] }
 0x644   :  { %v5182_v24 = vsel %vm24319_vm3, %v5180_v38, %v5181_v13  ;;  %v20283_v0 = vpack.c.bf16 %v4237_v7, %v4235_v53  ;;  %v5184_v36 = vsel %vm24319_vm3, %v5181_v13, %v5183_v6  ;;  %v5187_v58 = vsel %vm24319_vm3, %v5185_v47, %v5186_v55  ;;  %v20291_v49 = vld [vmem:[#allocation3 + $0x330] sm:$0xff]  ;;  %24613 = vst [vmem:[#allocation77_spill] sm:$0xff] %v20302_v43  ;;  %v20304_v13 = vld [vmem:[#allocation3] sm:$0xff] }
 0x645   :  { %v20287_v59 = vpack.c.bf16 %v4242_v56, %v4240_v34  ;;  %v20289_v32 = vpack.c.bf16 %v5184_v36, %v5182_v24  ;;  %24610 = vst [vmem:[#allocation74_spill] sm:$0xff] %v20291_v49  ;;  %v3935_v46 = vld [vmem:[#allocation3 + $0x318] sm:$0xff]  ;;  %v5189_v10 = vsel %vm24319_vm3, %v5186_v55, %v5188_v17  ;;  %v6140_v38 = vrot.slane %v20291_v49, 1 }
 0x646   :  { %24607 = vst [vmem:[#allocation71_spill] sm:$0xff] %v20283_v0  ;;  %v4243_v7 = vrot.slane %v3935_v46, 1  ;;  %v20297_v48 = vpack.c.bf16 %v5189_v10, %v5187_v58  ;;  %v5190_v47 = vrot.slane %v3935_v46, 2  ;;  %v6574_v34 = vrot.slane %v20291_v49, 2 }
 0x647   :  { %24608 = vst [vmem:[#allocation72_spill] sm:$0xff] %v20287_v59  ;;  %24609 = vst [vmem:[#allocation73_spill] sm:$0xff] %v20289_v32  ;;  %15802 = vmatmul.mubr.bf16.gmra.mrb[152].mxu0 %v20283_v0  ;;  %v20299_v60 = vld [vmem:[#allocation3 + $0x338] sm:$0xff]  ;;  %v3940_v24 = vld [vmem:[#allocation3 + $0x340] sm:$0x3]  ;;  %v3944_v17 = vpack.c.bf16 %v20302_v43, %v20304_v13 }
 0x648   :  { %15805 = vmatprep.mubr.bf16.mxu0 %v20287_v59  ;;  %24611 = vst [vmem:[#allocation75_spill] sm:$0xff] %v20297_v48  ;;  %24612 = vst [vmem:[#allocation76_spill] sm:$0xff] %v20299_v60  ;;  %v3936_v16 = vld [vmem:[#allocation3 + $0x320] sm:$0xff]  ;;  %v3937_v57 = vld [vmem:[#allocation3 + $0x328] sm:$0x3]  ;;  %v6141_v55 = vrot.slane %v20299_v60, 1 }
 0x649   :  { %v6575_v56 = vrot.slane %v20299_v60, 2  ;;  %v6143_v6 = vrot.slane %v3940_v24, 1  ;;  %v4244_v53 = vrot.slane %v3936_v16, 1  ;;  %v4246_v36 = vrot.slane %v3937_v57, 1 }
 0x64a   :  { %v20310_v58 = vpack.c.bf16 %v3936_v16, %v3935_v46  ;;  %v5191_v10 = vrot.slane %v3936_v16, 2  ;;  %v5193_v59 = vrot.slane %v3937_v57, 2  ;;  %v6142_v0 = vsel %vm24320_vm4, %v6140_v38, %v6141_v55 }
 0x64b   :  { %v6144_v49 = vsel %vm24320_vm4, %v6141_v55, %v6143_v6  ;;  %v6576_v48 = vsel %vm24319_vm3, %v6574_v34, %v6575_v56  ;;  %v4245_v32 = vsel %vm24320_vm4, %v4243_v7, %v4244_v53  ;;  %v4247_v15 = vsel %vm24320_vm4, %v4244_v53, %v4246_v36  ;;  %v18476_v7 = vld [vmem:[#allocation10 + $0x88] sm:$0xff]   ;;  %v18485_v53 = vld [vmem:[#allocation10 + $0xd0] sm:$0xff]   ;;  %v18486_v36 = vld [vmem:[#allocation10 + $0xd8] sm:$0xff]  }
 0x64c   :  { %24614 = vst [vmem:[#allocation78_spill] sm:$0xff] %v20310_v58  ;;  %v5192_v35 = vsel %vm24319_vm3, %v5190_v47, %v5191_v10  ;;  %v20318_v60 = vpack.c.bf16 %v6144_v49, %v6142_v0  ;;  %v20320_v9 = vpack.c.bf16 %v4247_v15, %v4245_v32  ;;  %v5194_v46 = vsel %vm24319_vm3, %v5191_v10, %v5193_v59  ;;  %v18477_v15 = vld [vmem:[#allocation10 + $0x90] sm:$0xff]   ;;  %v18479_v0 = vld [vmem:[#allocation10 + $0xa0] sm:$0xff]   ;;  %v18480_v59 = vld [vmem:[#allocation10 + $0xa8] sm:$0xff]  }
 0x64d   :  { %v6577_v16 = vrot.slane %v3940_v24, 2  ;;  %v20323_v57 = vpack.c.bf16 %v5194_v46, %v5192_v35  ;;  %v18478_v35 = vld [vmem:[#allocation10 + $0x98] sm:$0xff]   ;;  %v18483_v49 = vld [vmem:[#allocation10 + $0xc0] sm:$0xff]   ;;  %v20361_v47 = vrot.slane %v20302_v43, 2  ;;  %v18742_v24 = vld [vmem:[#allocation3 + $0x10] sm:$0x3] }
 0x64e   :  { %24615 = vst [vmem:[#allocation79_spill] sm:$0xff] %v20318_v60  ;;  %v18482_v32 = vld [vmem:[#allocation10 + $0xb8] sm:$0xff]   ;;  %v18487_v10 = vld [vmem:[#allocation10 + $0xe0] sm:$0xff]   ;;  %v18488_v46 = vld [vmem:[#allocation10 + $0xe8] sm:$0xff]  }
 0x64f   :  { %24616 = vst [vmem:[#allocation80_spill] sm:$0xff] %v20323_v57  ;;  %15806 = vmatmul.mubr.bf16.gmra.mrb[156].mxu0 %v20320_v9  ;;  %v6578_v38 = vsel %vm24319_vm3, %v6575_v56, %v6577_v16  ;;  %24618 = vst [vmem:[#allocation82_spill] sm:$0xff] %v20361_v47  ;;  %v18489_v16 = vld [vmem:[#allocation10 + $0xf0] sm:$0xff]  }
 0x650   :  { %15825 = vmatprep.mubr.bf16.mxu0 %v3944_v17  ;;  %v20327_v34 = vpack.c.bf16 %v6578_v38, %v6576_v48  ;;  %v3960_v48 = vpack.c.bf16 %v20302_v43, %v20078_v51  ;;  %v5035_v51 = vrot.slane %v20304_v13, 2  ;;  %v5038_v17 = vrot.slane %v18742_v24, 2  ;;  %v18484_v13 = vld [vmem:[#allocation10 + $0xc8] sm:$0xff]   ;;  %v18490_v38 = vld [vmem:[#allocation10 + $0xf8] sm:$0xff]  }
 0x651   :  { %v24641_v43 = vld [vmem:[#allocation75_spill] sm:$0xff] }
 0x652   :  { %24617 = vst [vmem:[#allocation81_spill] sm:$0xff] %v20327_v34  ;;  %v5037_v55 = vsel %vm24319_vm3, %v5035_v51, %v20361_v47  ;;  %v5039_v56 = vsel %vm24319_vm3, %v20361_v47, %v5038_v17  ;;  %v18744_v51 = vld [vmem:[#allocation3 + $0x1c0] sm:$0x3]  ;;  %v18492_v34 = vld [vmem:[#allocation10 + $0x108] sm:$0xff]  }
 0x653   :  { %v5259_v6 = vpack.c.bf16 %v5039_v56, %v5037_v55  ;;  %v5118_v24 = vrot.slane %v18744_v51, 2  ;;  %v24625_v17 = vld [vmem:[#allocation36_spill] sm:$0xff]  ;;  %v24626_v55 = vld [vmem:[#allocation37_spill] sm:$0xff] }
 0x654   :  { %v24635_v51 = vld [vmem:[#allocation57_spill] sm:$0xff] }
 0x657   :  { %15826 = vmatmul.mubr.bf16.vlgmr.msra.gmra.mrb[96].mxu0 %v19960_v18 }
 0x658   :  { %15829 = vmatprep.mubr.bf16.mxu0 %v19958_v21  ;;  %15890 = vmatpush3.bf16.msra.mxu0 %v20043_v42  ;;  %v18481_v42 = vld [vmem:[#allocation10 + $0xb0] sm:$0xff]  }
 0x659   :  { %15891 = vmatprep.subr.bf16.mxu0 %v18476_v7 }
 0x65c   :  { %15892 = vmatpush3.bf16.msra.mxu0 %v18476_v7  ;;  %v24619_v7 = vld [vmem:[#allocation24_spill] sm:$0xff] }
 0x65d   :  { %15893 = vmatprep.subr.bf16.mxu0 %v18477_v15 }
 0x65f   :  { %15830 = vmatmul.mubr.bf16.gmra.mrb[100].mxu0 %v19983_v23 }
 0x660   :  { %15833 = vmatprep.mubr.bf16.mxu0 %v19981_v3  ;;  %15894 = vmatpush3.bf16.msra.mxu0 %v18477_v15  ;;  %v24620_v15 = vld [vmem:[#allocation25_spill] sm:$0xff] }
 0x661   :  { %15895 = vmatprep.subr.bf16.mxu0 %v18478_v35 }
 0x664   :  { %15896 = vmatpush3.bf16.msra.mxu0 %v18478_v35  ;;  %v18491_v35 = vld [vmem:[#allocation10 + $0x100] sm:$0xff]  }
 0x665   :  { %15897 = vmatprep.subr.bf16.mxu0 %v18479_v0 }
 0x667   :  { %15834 = vmatmul.mubr.bf16.gmra.mrb[104].mxu0 %v20005_v14 }
 0x668   :  { %15837 = vmatprep.mubr.bf16.mxu0 %v20003_v30  ;;  %15898 = vmatpush3.bf16.msra.mxu0 %v18479_v0  ;;  %v24621_v0 = vld [vmem:[#allocation28_spill] sm:$0xff] }
 0x669   :  { %15899 = vmatprep.subr.bf16.mxu0 %v18480_v59 }
 0x66c   :  { %15900 = vmatpush3.bf16.msra.mxu0 %v18480_v59  ;;  %v24622_v59 = vld [vmem:[#allocation29_spill] sm:$0xff] }
 0x66d   :  { %15901 = vmatprep.subr.bf16.mxu0 %v18481_v42 }
 0x66f   :  { %15838 = vmatmul.mubr.bf16.gmra.mrb[108].mxu0 %v20027_v33 }
 0x670   :  { %15841 = vmatprep.mubr.bf16.mxu0 %v20025_v39  ;;  %15902 = vmatpush3.bf16.msra.mxu0 %v18481_v42  ;;  %v24623_v42 = vld [vmem:[#allocation32_spill] sm:$0xff] }
 0x671   :  { %15903 = vmatprep.subr.bf16.mxu0 %v18482_v32 }
 0x674   :  { %15904 = vmatpush3.bf16.msra.mxu0 %v18482_v32  ;;  %v24624_v32 = vld [vmem:[#allocation33_spill] sm:$0xff] }
 0x675   :  { %15969 = vmatprep.subr.bf16.mxu0 %v18483_v49 }
 0x677   :  { %15842 = vmatmul.mubr.bf16.gmra.mrb[112].mxu0 %v20051_v8 }
 0x678   :  { %15845 = vmatprep.mubr.bf16.mxu0 %v20049_v19 }
 0x67f   :  { %15846 = vmatmul.mubr.bf16.gmra.mrb[116].mxu0 %v20074_v28 }
 0x680   :  { %15849 = vmatprep.mubr.bf16.mxu0 %v20072_v12 }
 0x687   :  { %15850 = vmatmul.mubr.bf16.gmra.mrb[120].mxu0 %v20099_v50 }
 0x688   :  { %15853 = vmatprep.mubr.bf16.mxu0 %v20097_v11 }
 0x68f   :  { %15854 = vmatmul.mubr.bf16.gmra.mrb[124].mxu0 %v20123_v54 }
 0x690   :  { %15857 = vmatprep.mubr.bf16.mxu0 %v3960_v48 }
 0x697   :  { %15858 = vmatmul.mubr.bf16.gmra.mrb[128].mxu0 %v20144_v63 }
 0x698   :  { %15861 = vmatprep.mubr.bf16.mxu0 %v20142_v2 }
 0x69f   :  { %15862 = vmatmul.mubr.bf16.gmra.mrb[132].mxu0 %v20166_v37 }
 0x6a0   :  { %15865 = vmatprep.mubr.bf16.mxu0 %v20164_v31 }
 0x6a7   :  { %15866 = vmatmul.mubr.bf16.gmra.mrb[136].mxu0 %v20188_v41 }
 0x6a8   :  { %15869 = vmatprep.mubr.bf16.mxu0 %v20186_v27 }
 0x6af   :  { %15870 = vmatmul.mubr.bf16.gmra.mrb[140].mxu0 %v20210_v22 }
 0x6b0   :  { %15873 = vmatprep.mubr.bf16.mxu0 %v20208_v40 }
 0x6b7   :  { %15874 = vmatmul.mubr.bf16.gmra.mrb[144].mxu0 %v20232_v45 }
 0x6b8   :  { %15877 = vmatprep.mubr.bf16.mxu0 %v20230_v20 }
 0x6bf   :  { %15878 = vmatmul.mubr.bf16.gmra.mrb[148].mxu0 %v20254_v5 }
 0x6c0   :  { %15881 = vmatprep.mubr.bf16.mxu0 %v20252_v26 }
 0x6c7   :  { %15882 = vmatmul.mubr.bf16.gmra.mrb[152].mxu0 %v20276_v29 }
 0x6c8   :  { %15885 = vmatprep.mubr.bf16.mxu0 %v20274_v52 }
 0x6cf   :  { %15886 = vmatmul.mubr.bf16.gmra.mrb[156].mxu0 %v20310_v58 }
 0x6d0   :  { %15905 = vmatprep.mubr.bf16.mxu0 %v5259_v6  ;;  %v5119_v6 = vsel %vm24319_vm3, %v20361_v47, %v5118_v24  ;;  %v24636_v24 = vld [vmem:[#allocation61_spill] sm:$0xff] }
 0x6d7   :  { %15906 = vmatmul.mubr.bf16.vlgmr.msra.gmra.mrb[96].mxu0 %v19973_v25 }
 0x6d8   :  { %15909 = vmatprep.mubr.bf16.mxu0 %v19979_v4  ;;  %15970 = vmatpush3.bf16.msra.mxu0 %v18483_v49  ;;  %v18743_v49 = vld [vmem:[#allocation3 + $0x1b0] sm:$0xff] }
 0x6d9   :  { %15971 = vmatprep.subr.bf16.mxu0 %v18484_v13  ;;  %v5115_v48 = vrot.slane %v18743_v49, 2  ;;  %v24633_v49 = vld [vmem:[#allocation53_spill] sm:$0xff] }
 0x6db   :  { %v5117_v56 = vsel %vm24319_vm3, %v5115_v48, %v20361_v47  ;;  %v24634_v48 = vld [vmem:[#allocation56_spill] sm:$0xff]  ;;  %v24640_v47 = vld [vmem:[#allocation73_spill] sm:$0xff] }
 0x6dc   :  { %15972 = vmatpush3.bf16.msra.mxu0 %v18484_v13  ;;  %v5275_v13 = vpack.c.bf16 %v5119_v6, %v5117_v56  ;;  %v24637_v56 = vld [vmem:[#allocation62_spill] sm:$0xff]  ;;  %v24638_v6 = vld [vmem:[#allocation67_spill] sm:$0xff] }
 0x6dd   :  { %15973 = vmatprep.subr.bf16.mxu0 %v18485_v53 }
 0x6df   :  { %15910 = vmatmul.mubr.bf16.gmra.mrb[100].mxu0 %v19996_v61 }
 0x6e0   :  { %15913 = vmatprep.mubr.bf16.mxu0 %v20001_v44  ;;  %15974 = vmatpush3.bf16.msra.mxu0 %v18485_v53  ;;  %v24627_v53 = vld [vmem:[#allocation39_spill] sm:$0xff] }
 0x6e1   :  { %15975 = vmatprep.subr.bf16.mxu0 %v18486_v36 }
 0x6e4   :  { %15976 = vmatpush3.bf16.msra.mxu0 %v18486_v36  ;;  %v24628_v36 = vld [vmem:[#allocation44_spill] sm:$0xff] }
 0x6e5   :  { %15977 = vmatprep.subr.bf16.mxu0 %v18487_v10 }
 0x6e7   :  { %15914 = vmatmul.mubr.bf16.gmra.mrb[104].mxu0 %v20018_v62 }
 0x6e8   :  { %15917 = vmatprep.mubr.bf16.mxu0 %v20023_v1  ;;  %15978 = vmatpush3.bf16.msra.mxu0 %v18487_v10  ;;  %v24629_v10 = vld [vmem:[#allocation45_spill] sm:$0xff] }
 0x6e9   :  { %15979 = vmatprep.subr.bf16.mxu0 %v18488_v46 }
 0x6ec   :  { %15980 = vmatpush3.bf16.msra.mxu0 %v18488_v46  ;;  %v24630_v46 = vld [vmem:[#allocation48_spill] sm:$0xff] }
 0x6ed   :  { %15981 = vmatprep.subr.bf16.mxu0 %v18489_v16 }
 0x6ef   :  { %15918 = vmatmul.mubr.bf16.gmra.mrb[108].mxu0 %v24619_v7 }
 0x6f0   :  { %15921 = vmatprep.mubr.bf16.mxu0 %v24620_v15  ;;  %15982 = vmatpush3.bf16.msra.mxu0 %v18489_v16  ;;  %v24631_v16 = vld [vmem:[#allocation49_spill] sm:$0xff] }
 0x6f1   :  { %15983 = vmatprep.subr.bf16.mxu0 %v18490_v38 }
 0x6f4   :  { %15984 = vmatpush3.bf16.msra.mxu0 %v18490_v38  ;;  %v24632_v38 = vld [vmem:[#allocation52_spill] sm:$0xff] }
 0x6f5   :  { %16049 = vmatprep.subr.bf16.mxu0 %v18491_v35 }
 0x6f7   :  { %15922 = vmatmul.mubr.bf16.gmra.mrb[112].mxu0 %v24621_v0 }
 0x6f8   :  { %15925 = vmatprep.mubr.bf16.mxu0 %v24622_v59 }
 0x6ff   :  { %15926 = vmatmul.mubr.bf16.gmra.mrb[116].mxu0 %v24623_v42 }
 0x700   :  { %15929 = vmatprep.mubr.bf16.mxu0 %v24624_v32 }
 0x707   :  { %15930 = vmatmul.mubr.bf16.gmra.mrb[120].mxu0 %v24625_v17 }
 0x708   :  { %15933 = vmatprep.mubr.bf16.mxu0 %v24626_v55 }
 0x70f   :  { %15934 = vmatmul.mubr.bf16.gmra.mrb[124].mxu0 %v24627_v53 }
 0x710   :  { %15937 = vmatprep.mubr.bf16.mxu0 %v5275_v13  ;;  %v24639_v13 = vld [vmem:[#allocation68_spill] sm:$0xff] }
 0x717   :  { %15938 = vmatmul.mubr.bf16.gmra.mrb[128].mxu0 %v24628_v36 }
 0x718   :  { %15941 = vmatprep.mubr.bf16.mxu0 %v24629_v10 }
 0x71f   :  { %15942 = vmatmul.mubr.bf16.gmra.mrb[132].mxu0 %v24630_v46 }
 0x720   :  { %15945 = vmatprep.mubr.bf16.mxu0 %v24631_v16 }
 0x727   :  { %15946 = vmatmul.mubr.bf16.gmra.mrb[136].mxu0 %v24632_v38 }
 0x728   :  { %15949 = vmatprep.mubr.bf16.mxu0 %v24633_v49 }
 0x72f   :  { %15950 = vmatmul.mubr.bf16.gmra.mrb[140].mxu0 %v24634_v48 }
 0x730   :  { %15953 = vmatprep.mubr.bf16.mxu0 %v24635_v51 }
 0x737   :  { %15954 = vmatmul.mubr.bf16.gmra.mrb[144].mxu0 %v24636_v24 }
 0x738   :  { %15957 = vmatprep.mubr.bf16.mxu0 %v24637_v56  ;;  %v18493_v56 = vld [vmem:[#allocation10 + $0x110] sm:$0xff]  }
 0x73f   :  { %15958 = vmatmul.mubr.bf16.gmra.mrb[148].mxu0 %v24638_v6  ;;  %v18494_v6 = vld [vmem:[#allocation10 + $0x118] sm:$0xff]  }
 0x740   :  { %15961 = vmatprep.mubr.bf16.mxu0 %v24639_v13 }
 0x747   :  { %15962 = vmatmul.mubr.bf16.gmra.mrb[152].mxu0 %v24640_v47 }
 0x748   :  { %15965 = vmatprep.mubr.bf16.mxu0 %v24641_v43 }
 0x74f   :  { %15966 = vmatmul.mubr.bf16.gmra.mrb[156].mxu0 %v20323_v57  ;;  %v18495_v57 = vld [vmem:[#allocation10 + $0x120] sm:$0xff]  }
 0x750   :  { %15985 = vmatprep.mubr.bf16.mxu0 %v19960_v18  ;;  %v18496_v18 = vld [vmem:[#allocation10 + $0x128] sm:$0xff]  }
 0x757   :  { %15986 = vmatmul.mubr.bf16.vlgmr.msra.gmra.mrb[96].mxu0 %v19958_v21 }
 0x758   :  { %15989 = vmatprep.mubr.bf16.mxu0 %v19983_v23  ;;  %16050 = vmatpush3.bf16.msra.mxu0 %v18491_v35  ;;  %v18497_v35 = vld [vmem:[#allocation10 + $0x130] sm:$0xff]  }
 0x759   :  { %16051 = vmatprep.subr.bf16.mxu0 %v18492_v34 }
 0x75c   :  { %16052 = vmatpush3.bf16.msra.mxu0 %v18492_v34  ;;  %v18498_v34 = vld [vmem:[#allocation10 + $0x138] sm:$0xff]  }
 0x75d   :  { %16053 = vmatprep.subr.bf16.mxu0 %v18493_v56 }
 0x75f   :  { %15990 = vmatmul.mubr.bf16.gmra.mrb[100].mxu0 %v19981_v3 }
 0x760   :  { %15993 = vmatprep.mubr.bf16.mxu0 %v20005_v14  ;;  %16054 = vmatpush3.bf16.msra.mxu0 %v18493_v56  ;;  %v18499_v56 = vld [vmem:[#allocation10 + $0x140] sm:$0xff]  }
 0x761   :  { %16055 = vmatprep.subr.bf16.mxu0 %v18494_v6 }
 0x764   :  { %16056 = vmatpush3.bf16.msra.mxu0 %v18494_v6  ;;  %v18746_v6 = vld [vmem:[#allocation3 + $0x188] sm:$0xff] }
 0x765   :  { %16057 = vmatprep.subr.bf16.mxu0 %v18495_v57 }
 0x767   :  { %15994 = vmatmul.mubr.bf16.gmra.mrb[104].mxu0 %v20003_v30 }
 0x768   :  { %15997 = vmatprep.mubr.bf16.mxu0 %v20027_v33  ;;  %16058 = vmatpush3.bf16.msra.mxu0 %v18495_v57  ;;  %v18745_v57 = vld [vmem:[#allocation3 + $0x180] sm:$0xff] }
 0x769   :  { %16059 = vmatprep.subr.bf16.mxu0 %v18496_v18 }
 0x76c   :  { %16060 = vmatpush3.bf16.msra.mxu0 %v18496_v18  ;;  %v20419_v18 = vpack.c.bf16 %v18746_v6, %v18745_v57  ;;  %v24645_v57 = vld [vmem:[#allocation17_spill] sm:$0xff] }
 0x76d   :  { %16061 = vmatprep.subr.bf16.mxu0 %v18497_v35  ;;  %v18500_v6 = vld [vmem:[#allocation10 + $0x148] sm:$0xff]  }
 0x76f   :  { %15998 = vmatmul.mubr.bf16.gmra.mrb[108].mxu0 %v20025_v39 }
 0x770   :  { %16001 = vmatprep.mubr.bf16.mxu0 %v20051_v8  ;;  %16062 = vmatpush3.bf16.msra.mxu0 %v18497_v35  ;;  %v24643_v35 = vld [vmem:[#allocation76_spill] sm:$0xff] }
 0x771   :  { %16063 = vmatprep.subr.bf16.mxu0 %v18498_v34 }
 0x774   :  { %16064 = vmatpush3.bf16.msra.mxu0 %v18498_v34 }
 0x775   :  { %16129 = vmatprep.subr.bf16.mxu0 %v18499_v56 }
 0x777   :  { %16002 = vmatmul.mubr.bf16.gmra.mrb[112].mxu0 %v20049_v19 }
 0x778   :  { %16005 = vmatprep.mubr.bf16.mxu0 %v20074_v28 }
 0x77f   :  { %16006 = vmatmul.mubr.bf16.gmra.mrb[116].mxu0 %v20072_v12 }
 0x780   :  { %16009 = vmatprep.mubr.bf16.mxu0 %v20099_v50 }
 0x787   :  { %16010 = vmatmul.mubr.bf16.gmra.mrb[120].mxu0 %v20097_v11 }
 0x788   :  { %16013 = vmatprep.mubr.bf16.mxu0 %v20123_v54 }
 0x78f   :  { %16014 = vmatmul.mubr.bf16.gmra.mrb[124].mxu0 %v20419_v18 }
 0x790   :  { %16017 = vmatprep.mubr.bf16.mxu0 %v20144_v63  ;;  %v24642_v63 = vld [vmem:[#allocation74_spill] sm:$0xff] }
 0x791   :  { %v20439_v34 = vpack.c.bf16 %v24643_v35, %v24642_v63  ;;  %v18503_v63 = vld [vmem:[#allocation10 + $0x160] sm:$0xff]   ;;  %v18504_v35 = vld [vmem:[#allocation10 + $0x168] sm:$0xff]  }
 0x793   :  { %24644 = vst [vmem:[#allocation24_spill] sm:$0xff] %v20439_v34 }
 0x797   :  { %16018 = vmatmul.mubr.bf16.gmra.mrb[128].mxu0 %v20142_v2 }
 0x798   :  { %16021 = vmatprep.mubr.bf16.mxu0 %v20166_v37 }
 0x79f   :  { %16022 = vmatmul.mubr.bf16.gmra.mrb[132].mxu0 %v20164_v31 }
 0x7a0   :  { %16025 = vmatprep.mubr.bf16.mxu0 %v20188_v41 }
 0x7a7   :  { %16026 = vmatmul.mubr.bf16.gmra.mrb[136].mxu0 %v20186_v27 }
 0x7a8   :  { %16029 = vmatprep.mubr.bf16.mxu0 %v20210_v22 }
 0x7af   :  { %16030 = vmatmul.mubr.bf16.gmra.mrb[140].mxu0 %v20208_v40 }
 0x7b0   :  { %16033 = vmatprep.mubr.bf16.mxu0 %v20232_v45 }
 0x7b7   :  { %16034 = vmatmul.mubr.bf16.gmra.mrb[144].mxu0 %v20230_v20  ;;  %v24646_v20 = vld [vmem:[#allocation18_spill] sm:$0xff] }
 0x7b8   :  { %16037 = vmatprep.mubr.bf16.mxu0 %v20254_v5  ;;  %v24647_v5 = vld [vmem:[#allocation21_spill] sm:$0xff] }
 0x7bf   :  { %16038 = vmatmul.mubr.bf16.gmra.mrb[148].mxu0 %v20252_v26  ;;  %v24649_v26 = vld [vmem:[#allocation19_spill] sm:$0xff] }
 0x7c0   :  { %16041 = vmatprep.mubr.bf16.mxu0 %v20276_v29  ;;  %v18501_v29 = vld [vmem:[#allocation10 + $0x150] sm:$0xff]  }
 0x7c7   :  { %16042 = vmatmul.mubr.bf16.gmra.mrb[152].mxu0 %v20274_v52  ;;  %v18502_v52 = vld [vmem:[#allocation10 + $0x158] sm:$0xff]  }
 0x7c8   :  { %16045 = vmatprep.mubr.bf16.mxu0 %v20310_v58  ;;  %v24648_v58 = vld [vmem:[#allocation16_spill] sm:$0xff] }
 0x7cf   :  { %16046 = vmatmul.mubr.bf16.gmra.mrb[156].mxu0 %v20439_v34  ;;  %v24664_v34 = vld [vmem:[#allocation47_spill] sm:$0xff] }
 0x7d0   :  { %16065 = vmatprep.mubr.bf16.mxu0 %v24645_v57  ;;  %v24650_v57 = vld [vmem:[#allocation20_spill] sm:$0xff] }
 0x7d7   :  { %16066 = vmatmul.mubr.bf16.vlgmr.msra.gmra.mrb[96].mxu0 %v24646_v20  ;;  %v24651_v20 = vld [vmem:[#allocation22_spill] sm:$0xff] }
 0x7d8   :  { %16069 = vmatprep.mubr.bf16.mxu0 %v24647_v5  ;;  %16130 = vmatpush3.bf16.msra.mxu0 %v18499_v56  ;;  %v18505_v56 = vld [vmem:[#allocation10 + $0x170] sm:$0xff]   ;;  %v24652_v5 = vld [vmem:[#allocation23_spill] sm:$0xff] }
 0x7d9   :  { %16131 = vmatprep.subr.bf16.mxu0 %v18500_v6 }
 0x7dc   :  { %16132 = vmatpush3.bf16.msra.mxu0 %v18500_v6  ;;  %v18506_v6 = vld [vmem:[#allocation10 + $0x178] sm:$0xff]  }
 0x7dd   :  { %16133 = vmatprep.subr.bf16.mxu0 %v18501_v29 }
 0x7df   :  { %16070 = vmatmul.mubr.bf16.gmra.mrb[100].mxu0 %v24648_v58  ;;  %v24653_v58 = vld [vmem:[#allocation26_spill] sm:$0xff] }
 0x7e0   :  { %16073 = vmatprep.mubr.bf16.mxu0 %v24649_v26  ;;  %16134 = vmatpush3.bf16.msra.mxu0 %v18501_v29  ;;  %v18507_v29 = vld [vmem:[#allocation10 + $0x180] sm:$0xff]   ;;  %v24659_v26 = vld [vmem:[#allocation38_spill] sm:$0xff] }
 0x7e1   :  { %16135 = vmatprep.subr.bf16.mxu0 %v18502_v52 }
 0x7e4   :  { %16136 = vmatpush3.bf16.msra.mxu0 %v18502_v52  ;;  %v24654_v52 = vld [vmem:[#allocation27_spill] sm:$0xff] }
 0x7e5   :  { %16137 = vmatprep.subr.bf16.mxu0 %v18503_v63 }
 0x7e7   :  { %16074 = vmatmul.mubr.bf16.gmra.mrb[104].mxu0 %v24650_v57  ;;  %v24655_v57 = vld [vmem:[#allocation30_spill] sm:$0xff] }
 0x7e8   :  { %16077 = vmatprep.mubr.bf16.mxu0 %v24651_v20  ;;  %16138 = vmatpush3.bf16.msra.mxu0 %v18503_v63  ;;  %v24656_v20 = vld [vmem:[#allocation31_spill] sm:$0xff]  ;;  %v24657_v63 = vld [vmem:[#allocation34_spill] sm:$0xff] }
 0x7e9   :  { %16139 = vmatprep.subr.bf16.mxu0 %v18504_v35 }
 0x7ec   :  { %16140 = vmatpush3.bf16.msra.mxu0 %v18504_v35  ;;  %v24658_v35 = vld [vmem:[#allocation35_spill] sm:$0xff] }
 0x7ed   :  { %16141 = vmatprep.subr.bf16.mxu0 %v18505_v56 }
 0x7ef   :  { %16078 = vmatmul.mubr.bf16.gmra.mrb[108].mxu0 %v24652_v5  ;;  %v24660_v5 = vld [vmem:[#allocation40_spill] sm:$0xff] }
 0x7f0   :  { %16081 = vmatprep.mubr.bf16.mxu0 %v24653_v58  ;;  %16142 = vmatpush3.bf16.msra.mxu0 %v18505_v56  ;;  %v24661_v58 = vld [vmem:[#allocation42_spill] sm:$0xff]  ;;  %v24662_v56 = vld [vmem:[#allocation43_spill] sm:$0xff] }
 0x7f1   :  { %16143 = vmatprep.subr.bf16.mxu0 %v18506_v6 }
 0x7f4   :  { %16144 = vmatpush3.bf16.msra.mxu0 %v18506_v6  ;;  %v24663_v6 = vld [vmem:[#allocation46_spill] sm:$0xff] }
 0x7f5   :  { %16209 = vmatprep.subr.bf16.mxu0 %v18507_v29 }
 0x7f7   :  { %16082 = vmatmul.mubr.bf16.gmra.mrb[112].mxu0 %v24654_v52  ;;  %v24665_v52 = vld [vmem:[#allocation50_spill] sm:$0xff] }
 0x7f8   :  { %16085 = vmatprep.mubr.bf16.mxu0 %v24655_v57  ;;  %v24666_v57 = vld [vmem:[#allocation51_spill] sm:$0xff] }
 0x7ff   :  { %16086 = vmatmul.mubr.bf16.gmra.mrb[116].mxu0 %v24656_v20  ;;  %v24667_v20 = vld [vmem:[#allocation54_spill] sm:$0xff] }
 0x800   :  { %16089 = vmatprep.mubr.bf16.mxu0 %v24657_v63  ;;  %v24668_v63 = vld [vmem:[#allocation55_spill] sm:$0xff] }
 0x807   :  { %16090 = vmatmul.mubr.bf16.gmra.mrb[120].mxu0 %v24658_v35  ;;  %v24669_v35 = vld [vmem:[#allocation59_spill] sm:$0xff] }
 0x808   :  { %16093 = vmatprep.mubr.bf16.mxu0 %v24659_v26  ;;  %v24670_v26 = vld [vmem:[#allocation60_spill] sm:$0xff] }
 0x80f   :  { %16094 = vmatmul.mubr.bf16.gmra.mrb[124].mxu0 %v24660_v5  ;;  %v24671_v5 = vld [vmem:[#allocation65_spill] sm:$0xff] }
 0x810   :  { %16097 = vmatprep.mubr.bf16.mxu0 %v24661_v58  ;;  %v24672_v58 = vld [vmem:[#allocation66_spill] sm:$0xff] }
 0x817   :  { %16098 = vmatmul.mubr.bf16.gmra.mrb[128].mxu0 %v24662_v56  ;;  %v24673_v56 = vld [vmem:[#allocation71_spill] sm:$0xff] }
 0x818   :  { %16101 = vmatprep.mubr.bf16.mxu0 %v24663_v6  ;;  %v24674_v6 = vld [vmem:[#allocation72_spill] sm:$0xff] }
 0x81f   :  { %16102 = vmatmul.mubr.bf16.gmra.mrb[132].mxu0 %v24664_v34 }
 0x820   :  { %16105 = vmatprep.mubr.bf16.mxu0 %v24665_v52 }
 0x827   :  { %16106 = vmatmul.mubr.bf16.gmra.mrb[136].mxu0 %v24666_v57 }
 0x828   :  { %16109 = vmatprep.mubr.bf16.mxu0 %v24667_v20  ;;  %v18508_v20 = vld [vmem:[#allocation10 + $0x188] sm:$0xff]  }
 0x82f   :  { %16110 = vmatmul.mubr.bf16.gmra.mrb[140].mxu0 %v24668_v63 }
 0x830   :  { %16113 = vmatprep.mubr.bf16.mxu0 %v24669_v35 }
 0x837   :  { %16114 = vmatmul.mubr.bf16.gmra.mrb[144].mxu0 %v24670_v26 }
 0x838   :  { %16117 = vmatprep.mubr.bf16.mxu0 %v24671_v5  ;;  %v18509_v5 = vld [vmem:[#allocation10 + $0x190] sm:$0xff]  }
 0x83f   :  { %16118 = vmatmul.mubr.bf16.gmra.mrb[148].mxu0 %v24672_v58  ;;  %v18510_v58 = vld [vmem:[#allocation10 + $0x198] sm:$0xff]  }
 0x840   :  { %16121 = vmatprep.mubr.bf16.mxu0 %v24673_v56 }
 0x847   :  { %16122 = vmatmul.mubr.bf16.gmra.mrb[152].mxu0 %v24674_v6 }
 0x848   :  { %16125 = vmatprep.mubr.bf16.mxu0 %v20320_v9 }
 0x84f   :  { %16126 = vmatmul.mubr.bf16.gmra.mrb[156].mxu0 %v20318_v60  ;;  %v18511_v60 = vld [vmem:[#allocation10 + $0x1a0] sm:$0xff]  }
 0x850   :  { %16145 = vmatprep.mubr.bf16.mxu0 %v19973_v25  ;;  %v18512_v25 = vld [vmem:[#allocation10 + $0x1a8] sm:$0xff]  }
 0x857   :  { %16146 = vmatmul.mubr.bf16.vlgmr.msra.gmra.mrb[96].mxu0 %v19979_v4 }
 0x858   :  { %16149 = vmatprep.mubr.bf16.mxu0 %v19996_v61  ;;  %16210 = vmatpush3.bf16.msra.mxu0 %v18507_v29  ;;  %v18513_v29 = vld [vmem:[#allocation10 + $0x1b0] sm:$0xff]  }
 0x859   :  { %16211 = vmatprep.subr.bf16.mxu0 %v18508_v20 }
 0x85c   :  { %16212 = vmatpush3.bf16.msra.mxu0 %v18508_v20  ;;  %v18514_v20 = vld [vmem:[#allocation10 + $0x1b8] sm:$0xff]  }
 0x85d   :  { %16213 = vmatprep.subr.bf16.mxu0 %v18509_v5 }
 0x85f   :  { %16150 = vmatmul.mubr.bf16.gmra.mrb[100].mxu0 %v20001_v44 }
 0x860   :  { %16153 = vmatprep.mubr.bf16.mxu0 %v20018_v62  ;;  %16214 = vmatpush3.bf16.msra.mxu0 %v18509_v5  ;;  %v18515_v5 = vld [vmem:[#allocation10 + $0x1c0] sm:$0xff]  }
 0x861   :  { %16215 = vmatprep.subr.bf16.mxu0 %v18510_v58 }
 0x864   :  { %16216 = vmatpush3.bf16.msra.mxu0 %v18510_v58  ;;  %v24676_v58 = vld [vmem:[#allocation62_spill] sm:$0xff] }
 0x865   :  { %16217 = vmatprep.subr.bf16.mxu0 %v18511_v60 }
 0x867   :  { %16154 = vmatmul.mubr.bf16.gmra.mrb[104].mxu0 %v20023_v1 }
 0x868   :  { %16157 = vmatprep.mubr.bf16.mxu0 %v24619_v7  ;;  %16218 = vmatpush3.bf16.msra.mxu0 %v18511_v60  ;;  %v24675_v60 = vld [vmem:[#allocation41_spill] sm:$0xff] }
 0x869   :  { %16219 = vmatprep.subr.bf16.mxu0 %v18512_v25 }
 0x86c   :  { %16220 = vmatpush3.bf16.msra.mxu0 %v18512_v25  ;;  %v24677_v25 = vld [vmem:[#allocation67_spill] sm:$0xff] }
 0x86d   :  { %16221 = vmatprep.subr.bf16.mxu0 %v18513_v29 }
 0x86f   :  { %16158 = vmatmul.mubr.bf16.gmra.mrb[108].mxu0 %v24620_v15 }
 0x870   :  { %16161 = vmatprep.mubr.bf16.mxu0 %v24621_v0  ;;  %16222 = vmatpush3.bf16.msra.mxu0 %v18513_v29  ;;  %v24679_v29 = vld [vmem:[#allocation81_spill] sm:$0xff] }
 0x871   :  { %16223 = vmatprep.subr.bf16.mxu0 %v18514_v20 }
 0x874   :  { %16224 = vmatpush3.bf16.msra.mxu0 %v18514_v20  ;;  %v18516_v20 = vld [vmem:[#allocation10 + $0x1c8] sm:$0xff]  }
 0x875   :  { %16289 = vmatprep.subr.bf16.mxu0 %v18515_v5 }
 0x877   :  { %16162 = vmatmul.mubr.bf16.gmra.mrb[112].mxu0 %v24622_v59 }
 0x878   :  { %16165 = vmatprep.mubr.bf16.mxu0 %v24623_v42 }
 0x87f   :  { %16166 = vmatmul.mubr.bf16.gmra.mrb[116].mxu0 %v24624_v32 }
 0x880   :  { %16169 = vmatprep.mubr.bf16.mxu0 %v24625_v17 }
 0x887   :  { %16170 = vmatmul.mubr.bf16.gmra.mrb[120].mxu0 %v24626_v55 }
 0x888   :  { %16173 = vmatprep.mubr.bf16.mxu0 %v24627_v53 }
 0x88f   :  { %16174 = vmatmul.mubr.bf16.gmra.mrb[124].mxu0 %v24675_v60 }
 0x890   :  { %16177 = vmatprep.mubr.bf16.mxu0 %v24628_v36  ;;  %v24678_v36 = vld [vmem:[#allocation80_spill] sm:$0xff] }
 0x897   :  { %16178 = vmatmul.mubr.bf16.gmra.mrb[128].mxu0 %v24629_v10 }
 0x898   :  { %16181 = vmatprep.mubr.bf16.mxu0 %v24630_v46 }
 0x89f   :  { %16182 = vmatmul.mubr.bf16.gmra.mrb[132].mxu0 %v24631_v16 }
 0x8a0   :  { %16185 = vmatprep.mubr.bf16.mxu0 %v24632_v38 }
 0x8a7   :  { %16186 = vmatmul.mubr.bf16.gmra.mrb[136].mxu0 %v24633_v49 }
 0x8a8   :  { %16189 = vmatprep.mubr.bf16.mxu0 %v24634_v48 }
 0x8af   :  { %16190 = vmatmul.mubr.bf16.gmra.mrb[140].mxu0 %v24635_v51 }
 0x8b0   :  { %16193 = vmatprep.mubr.bf16.mxu0 %v24636_v24 }
 0x8b7   :  { %16194 = vmatmul.mubr.bf16.gmra.mrb[144].mxu0 %v24676_v58 }
 0x8b8   :  { %16197 = vmatprep.mubr.bf16.mxu0 %v24677_v25  ;;  %v18517_v25 = vld [vmem:[#allocation10 + $0x1d0] sm:$0xff]  }
 0x8bf   :  { %16198 = vmatmul.mubr.bf16.gmra.mrb[148].mxu0 %v24639_v13  ;;  %v18518_v13 = vld [vmem:[#allocation10 + $0x1d8] sm:$0xff]  }
 0x8c0   :  { %16201 = vmatprep.mubr.bf16.mxu0 %v24640_v47 }
 0x8c7   :  { %16202 = vmatmul.mubr.bf16.gmra.mrb[152].mxu0 %v24641_v43 }
 0x8c8   :  { %16205 = vmatprep.mubr.bf16.mxu0 %v24678_v36 }
 0x8cf   :  { %16206 = vmatmul.mubr.bf16.gmra.mrb[156].mxu0 %v24679_v29  ;;  %v18519_v29 = vld [vmem:[#allocation10 + $0x1e0] sm:$0xff]  }
 0x8d0   :  { %16225 = vmatprep.mubr.bf16.mxu0 %v19958_v21  ;;  %v18520_v21 = vld [vmem:[#allocation10 + $0x1e8] sm:$0xff]  }
 0x8d7   :  { %16226 = vmatmul.mubr.bf16.vlgmr.msra.gmra.mrb[96].mxu0 %v19983_v23  ;;  %v18522_v23 = vld [vmem:[#allocation10 + $0x1f8] sm:$0xff]  }
 0x8d8   :  { %16229 = vmatprep.mubr.bf16.mxu0 %v19981_v3  ;;  %16290 = vmatpush3.bf16.msra.mxu0 %v18515_v5  ;;  %v18521_v3 = vld [vmem:[#allocation10 + $0x1f0] sm:$0xff]   ;;  %v18524_v5 = vld [vmem:[#allocation10 + $0x208] sm:$0xff]  }
 0x8d9   :  { %16291 = vmatprep.subr.bf16.mxu0 %v18516_v20 }
 0x8dc   :  { %16292 = vmatpush3.bf16.msra.mxu0 %v18516_v20  ;;  %v18525_v20 = vld [vmem:[#allocation10 + $0x210] sm:$0xff]  }
 0x8dd   :  { %16293 = vmatprep.subr.bf16.mxu0 %v18517_v25 }
 0x8df   :  { %16230 = vmatmul.mubr.bf16.gmra.mrb[100].mxu0 %v20005_v14  ;;  %v20521_v14 = vld [vmem:[#allocation3 + $0x198] sm:$0xff] }
 0x8e0   :  { %16233 = vmatprep.mubr.bf16.mxu0 %v20003_v30  ;;  %16294 = vmatpush3.bf16.msra.mxu0 %v18517_v25  ;;  %v18523_v30 = vld [vmem:[#allocation10 + $0x200] sm:$0xff]   ;;  %v24689_v25 = vld [vmem:[#allocation21_spill] sm:$0xff] }
 0x8e1   :  { %16295 = vmatprep.subr.bf16.mxu0 %v18518_v13 }
 0x8e4   :  { %16296 = vmatpush3.bf16.msra.mxu0 %v18518_v13 }
 0x8e5   :  { %16297 = vmatprep.subr.bf16.mxu0 %v18519_v29 }
 0x8e7   :  { %16234 = vmatmul.mubr.bf16.gmra.mrb[104].mxu0 %v20027_v33 }
 0x8e8   :  { %16237 = vmatprep.mubr.bf16.mxu0 %v20025_v39  ;;  %16298 = vmatpush3.bf16.msra.mxu0 %v18519_v29  ;;  %v24680_v39 = vld [vmem:[#allocation77_spill] sm:$0xff]  ;;  %v24690_v29 = vld [vmem:[#allocation16_spill] sm:$0xff] }
 0x8e9   :  { %16299 = vmatprep.subr.bf16.mxu0 %v18520_v21  ;;  %v7003_v33 = vpack.c.bf16 %v24680_v39, %v20521_v14 }
 0x8ec   :  { %16300 = vmatpush3.bf16.msra.mxu0 %v18520_v21  ;;  %v18526_v21 = vld [vmem:[#allocation10 + $0x218] sm:$0xff]  }
 0x8ed   :  { %16301 = vmatprep.subr.bf16.mxu0 %v18521_v3 }
 0x8ef   :  { %16238 = vmatmul.mubr.bf16.gmra.mrb[108].mxu0 %v20051_v8  ;;  %v24682_v8 = vld [vmem:[#allocation64_spill] sm:$0xff] }
 0x8f0   :  { %16241 = vmatprep.mubr.bf16.mxu0 %v20049_v19  ;;  %16302 = vmatpush3.bf16.msra.mxu0 %v18521_v3  ;;  %v24681_v19 = vld [vmem:[#allocation58_spill] sm:$0xff]  ;;  %v24691_v3 = vld [vmem:[#allocation19_spill] sm:$0xff] }
 0x8f1   :  { %16303 = vmatprep.subr.bf16.mxu0 %v18522_v23 }
 0x8f4   :  { %16304 = vmatpush3.bf16.msra.mxu0 %v18522_v23  ;;  %v24692_v23 = vld [vmem:[#allocation20_spill] sm:$0xff] }
 0x8f5   :  { %16369 = vmatprep.subr.bf16.mxu0 %v18523_v30 }
 0x8f7   :  { %16242 = vmatmul.mubr.bf16.gmra.mrb[112].mxu0 %v20074_v28  ;;  %v24684_v28 = vld [vmem:[#allocation70_spill] sm:$0xff] }
 0x8f8   :  { %16245 = vmatprep.mubr.bf16.mxu0 %v20072_v12  ;;  %v24683_v12 = vld [vmem:[#allocation63_spill] sm:$0xff] }
 0x8ff   :  { %16246 = vmatmul.mubr.bf16.gmra.mrb[116].mxu0 %v20099_v50  ;;  %v20538_v50 = vld [vmem:[#allocation3 + $0x348] sm:$0xff] }
 0x900   :  { %16249 = vmatprep.mubr.bf16.mxu0 %v20097_v11  ;;  %v24685_v11 = vld [vmem:[#allocation69_spill] sm:$0xff] }
 0x907   :  { %16250 = vmatmul.mubr.bf16.gmra.mrb[120].mxu0 %v20123_v54  ;;  %v7434_v54 = vrot.slane %v20538_v50, 1 }
 0x908   :  { %16253 = vmatprep.mubr.bf16.mxu0 %v20419_v18  ;;  %v24688_v18 = vld [vmem:[#allocation18_spill] sm:$0xff] }
 0x90f   :  { %16254 = vmatmul.mubr.bf16.gmra.mrb[124].mxu0 %v7003_v33  ;;  %v18528_v33 = vld [vmem:[#allocation10 + $0x228] sm:$0xff]  }
 0x910   :  { %16257 = vmatprep.mubr.bf16.mxu0 %v20142_v2  ;;  %v7430_v2 = vrot.slane %v24680_v39, 1 }
 0x917   :  { %16258 = vmatmul.mubr.bf16.gmra.mrb[128].mxu0 %v20166_v37  ;;  %v24687_v37 = vld [vmem:[#allocation24_spill] sm:$0xff] }
 0x918   :  { %16261 = vmatprep.mubr.bf16.mxu0 %v20164_v31  ;;  %v24686_v31 = vld [vmem:[#allocation78_spill] sm:$0xff] }
 0x91f   :  { %16262 = vmatmul.mubr.bf16.gmra.mrb[132].mxu0 %v20188_v41  ;;  %v20547_v41 = vsel %vm24320_vm4, %v7434_v54, %v7430_v2  ;;  %v24697_v54 = vld [vmem:[#allocation30_spill] sm:$0xff] }
 0x920   :  { %16265 = vmatprep.mubr.bf16.mxu0 %v20186_v27  ;;  %v20544_v27 = vld [vmem:[#allocation3 + $0x358] sm:$0x3] }
 0x927   :  { %16266 = vmatmul.mubr.bf16.gmra.mrb[136].mxu0 %v20210_v22  ;;  %v7004_v22 = vpack.c.bf16 %v24680_v39, %v20538_v50  ;;  %v18527_v39 = vld [vmem:[#allocation10 + $0x220] sm:$0xff]  }
 0x928   :  { %16269 = vmatprep.mubr.bf16.mxu0 %v20208_v40  ;;  %v7437_v40 = vrot.slane %v20544_v27, 1 }
 0x92f   :  { %16270 = vmatmul.mubr.bf16.gmra.mrb[140].mxu0 %v20232_v45  ;;  %v20553_v45 = vsel %vm24320_vm4, %v7430_v2, %v7437_v40  ;;  %v24700_v40 = vld [vmem:[#allocation35_spill] sm:$0xff] }
 0x930   :  { %16273 = vmatprep.mubr.bf16.mxu0 %v24681_v19  ;;  %v7444_v13 = vpack.c.bf16 %v20553_v45, %v20547_v41  ;;  %v24693_v19 = vld [vmem:[#allocation22_spill] sm:$0xff] }
 0x937   :  { %16274 = vmatmul.mubr.bf16.gmra.mrb[144].mxu0 %v24682_v8  ;;  %v24694_v8 = vld [vmem:[#allocation23_spill] sm:$0xff] }
 0x938   :  { %16277 = vmatprep.mubr.bf16.mxu0 %v24683_v12  ;;  %v18530_v12 = vld [vmem:[#allocation10 + $0x238] sm:$0xff]  }
 0x93f   :  { %16278 = vmatmul.mubr.bf16.gmra.mrb[148].mxu0 %v24684_v28  ;;  %v24695_v28 = vld [vmem:[#allocation26_spill] sm:$0xff] }
 0x940   :  { %16281 = vmatprep.mubr.bf16.mxu0 %v24685_v11  ;;  %v24696_v11 = vld [vmem:[#allocation27_spill] sm:$0xff] }
 0x947   :  { %16282 = vmatmul.mubr.bf16.gmra.mrb[152].mxu0 %v24686_v31  ;;  %v24698_v31 = vld [vmem:[#allocation31_spill] sm:$0xff] }
 0x948   :  { %16285 = vmatprep.mubr.bf16.mxu0 %v24687_v37  ;;  %v24699_v37 = vld [vmem:[#allocation34_spill] sm:$0xff] }
 0x94f   :  { %16286 = vmatmul.mubr.bf16.gmra.mrb[156].mxu0 %v7004_v22  ;;  %v3889_v22 = vld [vmem:[#allocation3 + $0x1a8] sm:$0x3] }
 0x950   :  { %16305 = vmatprep.mubr.bf16.mxu0 %v24688_v18  ;;  %v7429_v18 = vrot.slane %v20521_v14, 1 }
 0x957   :  { %16306 = vmatmul.mubr.bf16.vlgmr.msra.gmra.mrb[96].mxu0 %v24689_v25  ;;  %v24701_v25 = vld [vmem:[#allocation38_spill] sm:$0xff] }
 0x958   :  { %16309 = vmatprep.mubr.bf16.mxu0 %v24690_v29  ;;  %16370 = vmatpush3.bf16.msra.mxu0 %v18523_v30  ;;  %v18529_v30 = vld [vmem:[#allocation10 + $0x230] sm:$0xff]   ;;  %v24702_v29 = vld [vmem:[#allocation40_spill] sm:$0xff] }
 0x959   :  { %16371 = vmatprep.subr.bf16.mxu0 %v18524_v5 }
 0x95c   :  { %16372 = vmatpush3.bf16.msra.mxu0 %v18524_v5  ;;  %v7432_v5 = vrot.slane %v3889_v22, 1 }
 0x95d   :  { %16373 = vmatprep.subr.bf16.mxu0 %v18525_v20 }
 0x95f   :  { %16310 = vmatmul.mubr.bf16.gmra.mrb[100].mxu0 %v24691_v3 }
 0x960   :  { %16313 = vmatprep.mubr.bf16.mxu0 %v24692_v23  ;;  %16374 = vmatpush3.bf16.msra.mxu0 %v18525_v20  ;;  %v7431_v20 = vsel %vm24320_vm4, %v7429_v18, %v7430_v2  ;;  %v24703_v23 = vld [vmem:[#allocation43_spill] sm:$0xff] }
 0x961   :  { %16375 = vmatprep.subr.bf16.mxu0 %v18526_v21 }
 0x964   :  { %16376 = vmatpush3.bf16.msra.mxu0 %v18526_v21  ;;  %v7433_v21 = vsel %vm24320_vm4, %v7430_v2, %v7432_v5  ;;  %v24706_v2 = vld [vmem:[#allocation65_spill] sm:$0xff] }
 0x965   :  { %16377 = vmatprep.subr.bf16.mxu0 %v18527_v39  ;;  %v7443_v3 = vpack.c.bf16 %v7433_v21, %v7431_v20 }
 0x967   :  { %16314 = vmatmul.mubr.bf16.gmra.mrb[104].mxu0 %v24693_v19  ;;  %v24707_v19 = vld [vmem:[#allocation66_spill] sm:$0xff] }
 0x968   :  { %16317 = vmatprep.mubr.bf16.mxu0 %v24694_v8  ;;  %16378 = vmatpush3.bf16.msra.mxu0 %v18527_v39  ;;  %v24704_v39 = vld [vmem:[#allocation46_spill] sm:$0xff] }
 0x969   :  { %16379 = vmatprep.subr.bf16.mxu0 %v18528_v33 }
 0x96c   :  { %16380 = vmatpush3.bf16.msra.mxu0 %v18528_v33  ;;  %v24705_v33 = vld [vmem:[#allocation54_spill] sm:$0xff] }
 0x96d   :  { %16381 = vmatprep.subr.bf16.mxu0 %v18529_v30 }
 0x96f   :  { %16318 = vmatmul.mubr.bf16.gmra.mrb[108].mxu0 %v24695_v28 }
 0x970   :  { %16321 = vmatprep.mubr.bf16.mxu0 %v24696_v11  ;;  %16382 = vmatpush3.bf16.msra.mxu0 %v18529_v30 }
 0x971   :  { %16383 = vmatprep.subr.bf16.mxu0 %v18530_v12 }
 0x974   :  { %16384 = vmatpush3.bf16.msra.mxu0 %v18530_v12 }
 0x977   :  { %16322 = vmatmul.mubr.bf16.gmra.mrb[112].mxu0 %v24697_v54 }
 0x978   :  { %16325 = vmatprep.mubr.bf16.mxu0 %v24698_v31 }
 0x97f   :  { %16326 = vmatmul.mubr.bf16.gmra.mrb[116].mxu0 %v24699_v37 }
 0x980   :  { %16329 = vmatprep.mubr.bf16.mxu0 %v24700_v40 }
 0x987   :  { %16330 = vmatmul.mubr.bf16.gmra.mrb[120].mxu0 %v24701_v25 }
 0x988   :  { %16333 = vmatprep.mubr.bf16.mxu0 %v24702_v29 }
 0x98f   :  { %16334 = vmatmul.mubr.bf16.gmra.mrb[124].mxu0 %v7443_v3 }
 0x990   :  { %16337 = vmatprep.mubr.bf16.mxu0 %v24703_v23 }
 0x997   :  { %16338 = vmatmul.mubr.bf16.gmra.mrb[128].mxu0 %v24704_v39 }
 0x998   :  { %16341 = vmatprep.mubr.bf16.mxu0 %v24664_v34  ;;  %v7868_v34 = vrot.slane %v20538_v50, 2 }
 0x99f   :  { %16342 = vmatmul.mubr.bf16.gmra.mrb[132].mxu0 %v24665_v52  ;;  %v24709_v52 = vld [vmem:[#allocation82_spill] sm:$0xff] }
 0x9a0   :  { %16345 = vmatprep.mubr.bf16.mxu0 %v24666_v57  ;;  %v24708_v57 = vld [vmem:[#allocation79_spill] sm:$0xff] }
 0x9a7   :  { %16346 = vmatmul.mubr.bf16.gmra.mrb[136].mxu0 %v24705_v33 }
 0x9a8   :  { %16349 = vmatprep.mubr.bf16.mxu0 %v24668_v63  ;;  %v7870_v63 = vsel %vm24319_vm3, %v7868_v34, %v24709_v52 }
 0x9af   :  { %16350 = vmatmul.mubr.bf16.gmra.mrb[140].mxu0 %v24669_v35  ;;  %v7871_v35 = vrot.slane %v20544_v27, 2 }
 0x9b0   :  { %16353 = vmatprep.mubr.bf16.mxu0 %v24670_v26 }
 0x9b1   :  { %v7872_v26 = vsel %vm24319_vm3, %v24709_v52, %v7871_v35 }
 0x9b2   :  { %v7878_v8 = vpack.c.bf16 %v7872_v26, %v7870_v63 }
 0x9b7   :  { %16354 = vmatmul.mubr.bf16.gmra.mrb[144].mxu0 %v24706_v2 }
 0x9b8   :  { %16357 = vmatprep.mubr.bf16.mxu0 %v24707_v19 }
 0x9bf   :  { %16358 = vmatmul.mubr.bf16.gmra.mrb[148].mxu0 %v24673_v56 }
 0x9c0   :  { %16361 = vmatprep.mubr.bf16.mxu0 %v24674_v6 }
 0x9c7   :  { %16362 = vmatmul.mubr.bf16.gmra.mrb[152].mxu0 %v20320_v9  ;;  %v24710_v9 = vld [vmem:[#allocation67_spill] sm:$0xff] }
 0x9c8   :  { %16365 = vmatprep.mubr.bf16.mxu0 %v24708_v57 }
 0x9cf   :  { %16366 = vmatmul.mubr.bf16.gmra.mrb[156].mxu0 %v7444_v13 }
 0x9d0   :  { %16385 = vmatprep.mubr.bf16.mxu0 %v19979_v4  ;;  %v7863_v4 = vrot.slane %v20521_v14, 2 }
 0x9d7   :  { %16386 = vmatmul.mubr.bf16.vlgmr.msra.gmra.mrb[96].mxu0 %v19996_v61  ;;  %v7866_v61 = vrot.slane %v3889_v22, 2 }
 0x9d8   :  { %16389 = vmatprep.mubr.bf16.mxu0 %v20001_v44  ;;  %v7865_v44 = vsel %vm24319_vm3, %v7863_v4, %v24709_v52 }
 0x9df   :  { %16390 = vmatmul.mubr.bf16.gmra.mrb[100].mxu0 %v20018_v62  ;;  %v7867_v62 = vsel %vm24319_vm3, %v24709_v52, %v7866_v61 }
 0x9e0   :  { %16393 = vmatprep.mubr.bf16.mxu0 %v20023_v1  ;;  %v7877_v1 = vpack.c.bf16 %v7867_v62, %v7865_v44 }
 0x9e7   :  { %16394 = vmatmul.mubr.bf16.gmra.mrb[104].mxu0 %v24619_v7  ;;  %v24711_v7 = vld [vmem:[#allocation68_spill] sm:$0xff] }
 0x9e8   :  { %16397 = vmatprep.mubr.bf16.mxu0 %v24620_v15  ;;  %v24712_v15 = vld [vmem:[#allocation81_spill] sm:$0xff] }
 0x9ef   :  { %16398 = vmatmul.mubr.bf16.gmra.mrb[108].mxu0 %v24621_v0 }
 0x9f0   :  { %16401 = vmatprep.mubr.bf16.mxu0 %v24622_v59 }
 0x9f7   :  { %16402 = vmatmul.mubr.bf16.gmra.mrb[112].mxu0 %v24623_v42 }
 0x9f8   :  { %16405 = vmatprep.mubr.bf16.mxu0 %v24624_v32 }
 0x9ff   :  { %16406 = vmatmul.mubr.bf16.gmra.mrb[116].mxu0 %v24625_v17 }
 0xa00   :  { %16409 = vmatprep.mubr.bf16.mxu0 %v24626_v55 }
 0xa07   :  { %16410 = vmatmul.mubr.bf16.gmra.mrb[120].mxu0 %v24627_v53 }
 0xa08   :  { %16413 = vmatprep.mubr.bf16.mxu0 %v24675_v60 }
 0xa0f   :  { %16414 = vmatmul.mubr.bf16.gmra.mrb[124].mxu0 %v7877_v1 }
 0xa10   :  { %16417 = vmatprep.mubr.bf16.mxu0 %v24629_v10 }
 0xa17   :  { %16418 = vmatmul.mubr.bf16.gmra.mrb[128].mxu0 %v24630_v46 }
 0xa18   :  { %16421 = vmatprep.mubr.bf16.mxu0 %v24631_v16 }
 0xa1f   :  { %16422 = vmatmul.mubr.bf16.gmra.mrb[132].mxu0 %v24632_v38 }
 0xa20   :  { %16425 = vmatprep.mubr.bf16.mxu0 %v24633_v49 }
 0xa27   :  { %16426 = vmatmul.mubr.bf16.gmra.mrb[136].mxu0 %v24634_v48 }
 0xa28   :  { %16429 = vmatprep.mubr.bf16.mxu0 %v24635_v51 }
 0xa2f   :  { %16430 = vmatmul.mubr.bf16.gmra.mrb[140].mxu0 %v24636_v24 }
 0xa30   :  { %16433 = vmatprep.mubr.bf16.mxu0 %v24676_v58 }
 0xa37   :  { %16434 = vmatmul.mubr.bf16.gmra.mrb[144].mxu0 %v24710_v9 }
 0xa38   :  { %16437 = vmatprep.mubr.bf16.mxu0 %v24711_v7 }
 0xa3f   :  { %16438 = vmatmul.mubr.bf16.gmra.mrb[148].mxu0 %v24640_v47 }
 0xa40   :  { %16441 = vmatprep.mubr.bf16.mxu0 %v24641_v43 }
 0xa47   :  { %16442 = vmatmul.mubr.bf16.gmra.mrb[152].mxu0 %v24678_v36 }
 0xa48   :  { %16445 = vmatprep.mubr.bf16.mxu0 %v24712_v15 }
 0xa4f   :  { %16446 = vmatmul.mubr.bf16.gmra.mrb[156].mxu0 %v7878_v8 }
 0xaaa   :  { %v20634_v0 = vpop.f32.mrb[96].mxu0 }
 0xaab   :  { %v20636_v59 = vpop.f32.mrb[97].mxu0 }
 0xaac   :  { %v20638_v42 = vpop.f32.mrb[98].mxu0 }
 0xaad   :  { %v20640_v32 = vpop.f32.mrb[99].mxu0 }
 0xaae   :  { %v8299_v17 = vadd.f32 %v20640_v32, %v20636_v59 }
 0xab0   :  { %v8300_v47 = vadd.f32 %v20634_v0, %v8299_v17 }
 0xab2   :  { %v20645_v55 = vpop.f32.mrb[100].mxu0  ;;  %v8301_v43 = vadd.f32 %v20638_v42, %v8300_v47 }
 0xab3   :  { %v20648_v53 = vpop.f32.mrb[101].mxu0 }
 0xab4   :  { %v8302_v10 = vadd.f32 %v8301_v43, %v20648_v53  ;;  %v20651_v46 = vpop.f32.mrb[102].mxu0 }
 0xab5   :  { %v20653_v16 = vpop.f32.mrb[103].mxu0 }
 0xab6   :  { %v8303_v38 = vadd.f32 %v8302_v10, %v20653_v16 }
 0xab8   :  { %v8304_v49 = vadd.f32 %v20645_v55, %v8303_v38 }
 0xaba   :  { %v20657_v48 = vpop.f32.mrb[104].mxu0  ;;  %v8305_v51 = vadd.f32 %v20651_v46, %v8304_v49 }
 0xabb   :  { %v20660_v24 = vpop.f32.mrb[105].mxu0 }
 0xabc   :  { %v8306_v56 = vadd.f32 %v8305_v51, %v20660_v24  ;;  %v20663_v6 = vpop.f32.mrb[106].mxu0 }
 0xabd   :  { %v20665_v60 = vpop.f32.mrb[107].mxu0 }
 0xabe   :  { %v8307_v58 = vadd.f32 %v8306_v56, %v20665_v60 }
 0xac0   :  { %v8308_v36 = vadd.f32 %v20657_v48, %v8307_v58 }
 0xac2   :  { %v20669_v14 = vpop.f32.mrb[108].mxu0  ;;  %v8309_v50 = vadd.f32 %v20663_v6, %v8308_v36 }
 0xac3   :  { %v20672_v27 = vpop.f32.mrb[109].mxu0 }
 0xac4   :  { %v8310_v41 = vadd.f32 %v8309_v50, %v20672_v27  ;;  %v20675_v45 = vpop.f32.mrb[110].mxu0 }
 0xac5   :  { %v20677_v13 = vpop.f32.mrb[111].mxu0 }
 0xac6   :  { %v8311_v30 = vadd.f32 %v8310_v41, %v20677_v13 }
 0xac8   :  { %v8312_v12 = vadd.f32 %v20669_v14, %v8311_v30 }
 0xaca   :  { %v20681_v28 = vpop.f32.mrb[112].mxu0  ;;  %v8313_v11 = vadd.f32 %v20675_v45, %v8312_v12 }
 0xacb   :  { %v20684_v54 = vpop.f32.mrb[113].mxu0 }
 0xacc   :  { %v8314_v31 = vadd.f32 %v8313_v11, %v20684_v54  ;;  %v20687_v37 = vpop.f32.mrb[114].mxu0 }
 0xacd   :  { %v20689_v40 = vpop.f32.mrb[115].mxu0 }
 0xace   :  { %v8315_v22 = vadd.f32 %v8314_v31, %v20689_v40 }
 0xad0   :  { %v8316_v18 = vadd.f32 %v20681_v28, %v8315_v22 }
 0xad2   :  { %v20693_v5 = vpop.f32.mrb[116].mxu0  ;;  %v8317_v25 = vadd.f32 %v20687_v37, %v8316_v18 }
 0xad3   :  { %v20696_v29 = vpop.f32.mrb[117].mxu0 }
 0xad4   :  { %v8318_v20 = vadd.f32 %v8317_v25, %v20696_v29  ;;  %v20699_v21 = vpop.f32.mrb[118].mxu0 }
 0xad5   :  { %v20701_v3 = vpop.f32.mrb[119].mxu0 }
 0xad6   :  { %v8319_v23 = vadd.f32 %v8318_v20, %v20701_v3 }
 0xad8   :  { %v8320_v39 = vadd.f32 %v20693_v5, %v8319_v23 }
 0xada   :  { %v20705_v33 = vpop.f32.mrb[120].mxu0  ;;  %v8321_v2 = vadd.f32 %v20699_v21, %v8320_v39 }
 0xadb   :  { %v20708_v19 = vpop.f32.mrb[121].mxu0 }
 0xadc   :  { %v8322_v34 = vadd.f32 %v8321_v2, %v20708_v19  ;;  %v20711_v57 = vpop.f32.mrb[122].mxu0 }
 0xadd   :  { %v20713_v52 = vpop.f32.mrb[123].mxu0 }
 0xade   :  { %v8323_v63 = vadd.f32 %v8322_v34, %v20713_v52 }
 0xae0   :  { %v8324_v35 = vadd.f32 %v20705_v33, %v8323_v63 }
 0xae2   :  { %v20717_v26 = vpop.f32.mrb[124].mxu0  ;;  %v8325_v8 = vadd.f32 %v20711_v57, %v8324_v35 }
 0xae3   :  { %v20720_v4 = vpop.f32.mrb[125].mxu0 }
 0xae4   :  { %v8326_v61 = vadd.f32 %v8325_v8, %v20720_v4  ;;  %v20723_v44 = vpop.f32.mrb[126].mxu0 }
 0xae5   :  { %v20725_v62 = vpop.f32.mrb[127].mxu0 }
 0xae6   :  { %v8327_v1 = vadd.f32 %v8326_v61, %v20725_v62 }
 0xae8   :  { %v8328_v9 = vadd.f32 %v20717_v26, %v8327_v1 }
 0xaea   :  { %v20729_v7 = vpop.f32.mrb[128].mxu0  ;;  %v8329_v15 = vadd.f32 %v20723_v44, %v8328_v9 }
 0xaeb   :  { %v20732_v17 = vpop.f32.mrb[129].mxu0 }
 0xaec   :  { %v8330_v47 = vadd.f32 %v8329_v15, %v20732_v17  ;;  %v20735_v43 = vpop.f32.mrb[130].mxu0 }
 0xaed   :  { %v20737_v10 = vpop.f32.mrb[131].mxu0 }
 0xaee   :  { %v8331_v38 = vadd.f32 %v8330_v47, %v20737_v10 }
 0xaf0   :  { %v8332_v49 = vadd.f32 %v20729_v7, %v8331_v38 }
 0xaf2   :  { %v20741_v51 = vpop.f32.mrb[132].mxu0  ;;  %v8333_v56 = vadd.f32 %v20735_v43, %v8332_v49 }
 0xaf3   :  { %v20744_v58 = vpop.f32.mrb[133].mxu0 }
 0xaf4   :  { %v8334_v36 = vadd.f32 %v8333_v56, %v20744_v58  ;;  %v20747_v50 = vpop.f32.mrb[134].mxu0 }
 0xaf5   :  { %v20749_v41 = vpop.f32.mrb[135].mxu0 }
 0xaf6   :  { %v8335_v30 = vadd.f32 %v8334_v36, %v20749_v41 }
 0xaf8   :  { %v8336_v12 = vadd.f32 %v20741_v51, %v8335_v30 }
 0xafa   :  { %v20753_v11 = vpop.f32.mrb[136].mxu0  ;;  %v8337_v31 = vadd.f32 %v20747_v50, %v8336_v12 }
 0xafb   :  { %v20756_v22 = vpop.f32.mrb[137].mxu0 }
 0xafc   :  { %v8338_v18 = vadd.f32 %v8337_v31, %v20756_v22  ;;  %v20759_v25 = vpop.f32.mrb[138].mxu0 }
 0xafd   :  { %v20761_v20 = vpop.f32.mrb[139].mxu0 }
 0xafe   :  { %v8339_v23 = vadd.f32 %v8338_v18, %v20761_v20 }
 0xb00   :  { %v8340_v39 = vadd.f32 %v20753_v11, %v8339_v23 }
 0xb02   :  { %v20765_v2 = vpop.f32.mrb[140].mxu0  ;;  %v8341_v34 = vadd.f32 %v20759_v25, %v8340_v39 }
 0xb03   :  { %v20768_v63 = vpop.f32.mrb[141].mxu0 }
 0xb04   :  { %v8342_v35 = vadd.f32 %v8341_v34, %v20768_v63  ;;  %v20771_v8 = vpop.f32.mrb[142].mxu0 }
 0xb05   :  { %v20773_v61 = vpop.f32.mrb[143].mxu0 }
 0xb06   :  { %v8343_v1 = vadd.f32 %v8342_v35, %v20773_v61 }
 0xb08   :  { %v8344_v9 = vadd.f32 %v20765_v2, %v8343_v1 }
 0xb0a   :  { %v20777_v15 = vpop.f32.mrb[144].mxu0  ;;  %v8345_v47 = vadd.f32 %v20771_v8, %v8344_v9 }
 0xb0b   :  { %24713 = vst [vmem:[#allocation25_spill] sm:$0xff] %v20777_v15  ;;  %v20780_v38 = vpop.f32.mrb[145].mxu0 }
 0xb0c   :  { %24714 = vst [vmem:[#allocation28_spill] sm:$0xff] %v20780_v38  ;;  %v8346_v49 = vadd.f32 %v8345_v47, %v20780_v38  ;;  %v20783_v56 = vpop.f32.mrb[146].mxu0 }
 0xb0d   :  { %24715 = vst [vmem:[#allocation29_spill] sm:$0xff] %v20783_v56  ;;  %v20785_v36 = vpop.f32.mrb[147].mxu0 }
 0xb0e   :  { %24716 = vst [vmem:[#allocation32_spill] sm:$0xff] %v20785_v36  ;;  %v8347_v30 = vadd.f32 %v8346_v49, %v20785_v36 }
 0xb10   :  { %v8348_v12 = vadd.f32 %v20777_v15, %v8347_v30 }
 0xb12   :  { %v20789_v31 = vpop.f32.mrb[148].mxu0  ;;  %v8349_v18 = vadd.f32 %v20783_v56, %v8348_v12 }
 0xb13   :  { %24717 = vst [vmem:[#allocation33_spill] sm:$0xff] %v20789_v31  ;;  %v20792_v23 = vpop.f32.mrb[149].mxu0 }
 0xb14   :  { %24718 = vst [vmem:[#allocation36_spill] sm:$0xff] %v20792_v23  ;;  %v8350_v39 = vadd.f32 %v8349_v18, %v20792_v23  ;;  %v20795_v34 = vpop.f32.mrb[150].mxu0 }
 0xb15   :  { %24719 = vst [vmem:[#allocation37_spill] sm:$0xff] %v20795_v34  ;;  %v20797_v35 = vpop.f32.mrb[151].mxu0 }
 0xb16   :  { %24720 = vst [vmem:[#allocation39_spill] sm:$0xff] %v20797_v35  ;;  %v8351_v1 = vadd.f32 %v8350_v39, %v20797_v35 }
 0xb18   :  { %v8352_v9 = vadd.f32 %v20789_v31, %v8351_v1 }
 0xb1a   :  { %v20801_v47 = vpop.f32.mrb[152].mxu0  ;;  %v8353_v49 = vadd.f32 %v20795_v34, %v8352_v9 }
 0xb1b   :  { %24721 = vst [vmem:[#allocation44_spill] sm:$0xff] %v20801_v47  ;;  %v20804_v30 = vpop.f32.mrb[153].mxu0 }
 0xb1c   :  { %24722 = vst [vmem:[#allocation45_spill] sm:$0xff] %v20804_v30  ;;  %v8354_v12 = vadd.f32 %v8353_v49, %v20804_v30  ;;  %v20807_v56 = vpop.f32.mrb[154].mxu0 }
 0xb1d   :  { %24723 = vst [vmem:[#allocation48_spill] sm:$0xff] %v20807_v56  ;;  %v20809_v15 = vpop.f32.mrb[155].mxu0 }
 0xb1e   :  { %24724 = vst [vmem:[#allocation49_spill] sm:$0xff] %v20809_v15  ;;  %v8355_v18 = vadd.f32 %v8354_v12, %v20809_v15 }
 0xb20   :  { %v8356_v23 = vadd.f32 %v20801_v47, %v8355_v18 }
 0xb22   :  { %v20813_v36 = vpop.f32.mrb[156].mxu0  ;;  %v8357_v39 = vadd.f32 %v20807_v56, %v8356_v23 }
 0xb23   :  { %v20816_v1 = vpop.f32.mrb[157].mxu0 }
 0xb24   :  { %24725 = vst [vmem:[#allocation52_spill] sm:$0xff] %v20816_v1  ;;  %v8358_v9 = vadd.f32 %v8357_v39, %v20816_v1  ;;  %v20819_v34 = vpop.f32.mrb[158].mxu0 }
 0xb25   :  { %v20821_v31 = vpop.f32.mrb[159].mxu0 }
 0xb26   :  { %v8359_v49 = vadd.f32 %v8358_v9, %v20821_v31 }
 0xb28   :  { %v8360_v30 = vadd.f32 %v20813_v36, %v8359_v49  ;;  %v24739_v49 = vld [vmem:[#allocation29_spill] sm:$0xff] }
 0xb2a   :  { %v8361_v12 = vadd.f32 %v20819_v34, %v8360_v30  ;;  %v24737_v30 = vld [vmem:[#allocation25_spill] sm:$0xff] }
 0xb2c   :  { %v8362_v15 = vrot.slane %v8361_v12, 4 }
 0xb2e   :  { %v8363_v18 = vadd.f32 %v8362_v15, %v8361_v12  ;;  %v24741_v12 = vld [vmem:[#allocation36_spill] sm:$0xff] }
 0xb30   :  { %v8364_v47 = vrot.slane %v8363_v18, 2 }
 0xb32   :  { %v8365_v35 = vadd.f32 %v8364_v47, %v8363_v18  ;;  %v24735_v47 = vld [vmem:[#allocation32_spill] sm:$0xff]  ;;  %v24743_v18 = vld [vmem:[#allocation39_spill] sm:$0xff] }
 0xb34   :  { %v8366_v38 = vrot.slane %v8365_v35, 1 }
 0xb36   :  { %v8367_v23 = vadd.f32 %v8366_v38, %v8365_v35  ;;  %v24734_v35 = vld [vmem:[#allocation28_spill] sm:$0xff] }
 0xb38   :  { %v20826_v56 = vmul.f32 0.001953125, %v8367_v23 }
 0xb3a   :  { %v20830_v39 = vsub.f32 %v20636_v59, %v20826_v56  ;;  %v20834_v1 = vsub.f32 %v20640_v32, %v20826_v56  ;;  %v20838_v9 = vsub.f32 %v20634_v0, %v20826_v56  ;;  %v20842_v15 = vsub.f32 %v20638_v42, %v20826_v56 }
 0xb3b   :  { %v20846_v38 = vsub.f32 %v20648_v53, %v20826_v56  ;;  %v20850_v59 = vsub.f32 %v20653_v16, %v20826_v56  ;;  %v20854_v32 = vsub.f32 %v20645_v55, %v20826_v56  ;;  %v20858_v0 = vsub.f32 %v20651_v46, %v20826_v56 }
 0xb3c   :  { %24726 = vst [vmem:[#allocation53_spill] sm:$0xff] %v20830_v39  ;;  %24727 = vst [vmem:[#allocation56_spill] sm:$0xff] %v20834_v1  ;;  %v20862_v42 = vsub.f32 %v20660_v24, %v20826_v56  ;;  %v20866_v53 = vsub.f32 %v20665_v60, %v20826_v56  ;;  %v20870_v16 = vsub.f32 %v20657_v48, %v20826_v56 }
 0xb3d   :  { %24728 = vst [vmem:[#allocation57_spill] sm:$0xff] %v20838_v9  ;;  %24729 = vst [vmem:[#allocation61_spill] sm:$0xff] %v20842_v15  ;;  %v20874_v55 = vsub.f32 %v20663_v6, %v20826_v56  ;;  %v20878_v46 = vsub.f32 %v20672_v27, %v20826_v56  ;;  %v20882_v24 = vsub.f32 %v20677_v13, %v20826_v56 }
 0xb3e   :  { %24730 = vst [vmem:[#allocation73_spill] sm:$0xff] %v20846_v38  ;;  %24731 = vst [vmem:[#allocation75_spill] sm:$0xff] %v20850_v59  ;;  %v20886_v60 = vsub.f32 %v20669_v14, %v20826_v56  ;;  %v20890_v48 = vsub.f32 %v20675_v45, %v20826_v56  ;;  %v20894_v6 = vsub.f32 %v20684_v54, %v20826_v56 }
 0xb3f   :  { %v20898_v27 = vsub.f32 %v20689_v40, %v20826_v56  ;;  %v20902_v13 = vsub.f32 %v20681_v28, %v20826_v56  ;;  %v20906_v14 = vsub.f32 %v20687_v37, %v20826_v56  ;;  %v20910_v45 = vsub.f32 %v20696_v29, %v20826_v56 }
 0xb40   :  { %v20914_v54 = vsub.f32 %v20701_v3, %v20826_v56  ;;  %v20918_v40 = vsub.f32 %v20693_v5, %v20826_v56  ;;  %v20922_v28 = vsub.f32 %v20699_v21, %v20826_v56  ;;  %v20926_v37 = vsub.f32 %v20708_v19, %v20826_v56 }
 0xb41   :  { %v20930_v29 = vsub.f32 %v20713_v52, %v20826_v56  ;;  %v20934_v3 = vsub.f32 %v20705_v33, %v20826_v56  ;;  %v20938_v5 = vsub.f32 %v20711_v57, %v20826_v56  ;;  %v20942_v21 = vsub.f32 %v20720_v4, %v20826_v56 }
 0xb42   :  { %v20946_v19 = vsub.f32 %v20725_v62, %v20826_v56  ;;  %v20950_v52 = vsub.f32 %v20717_v26, %v20826_v56  ;;  %v20954_v33 = vsub.f32 %v20723_v44, %v20826_v56  ;;  %v20958_v57 = vsub.f32 %v20732_v17, %v20826_v56 }
 0xb43   :  { %v20962_v4 = vsub.f32 %v20737_v10, %v20826_v56  ;;  %v20966_v62 = vsub.f32 %v20729_v7, %v20826_v56  ;;  %v20970_v26 = vsub.f32 %v20735_v43, %v20826_v56  ;;  %v20974_v44 = vsub.f32 %v20744_v58, %v20826_v56 }
 0xb44   :  { %v20978_v17 = vsub.f32 %v20749_v41, %v20826_v56  ;;  %v20982_v10 = vsub.f32 %v20741_v51, %v20826_v56  ;;  %v20986_v7 = vsub.f32 %v20747_v50, %v20826_v56  ;;  %v20990_v43 = vsub.f32 %v20756_v22, %v20826_v56 }
 0xb45   :  { %v20994_v58 = vsub.f32 %v20761_v20, %v20826_v56  ;;  %v20998_v41 = vsub.f32 %v20753_v11, %v20826_v56  ;;  %v21002_v51 = vsub.f32 %v20759_v25, %v20826_v56  ;;  %v21006_v50 = vsub.f32 %v20768_v63, %v20826_v56 }
 0xb46   :  { %v21010_v22 = vsub.f32 %v20773_v61, %v20826_v56  ;;  %v21014_v20 = vsub.f32 %v20765_v2, %v20826_v56  ;;  %v21018_v11 = vsub.f32 %v20771_v8, %v20826_v56  ;;  %v21022_v25 = vsub.f32 %v24734_v35, %v20826_v56  ;;  %v24745_v35 = vld [vmem:[#allocation33_spill] sm:$0xff] }
 0xb47   :  { %v21026_v63 = vsub.f32 %v24735_v47, %v20826_v56  ;;  %v21030_v61 = vsub.f32 %v24737_v30, %v20826_v56  ;;  %v21034_v2 = vsub.f32 %v24739_v49, %v20826_v56  ;;  %v21038_v8 = vsub.f32 %v24741_v12, %v20826_v56 }
 0xb48   :  { %24732 = vst [vmem:[#allocation74_spill] sm:$0xff] %v21014_v20  ;;  %24733 = vst [vmem:[#allocation76_spill] sm:$0xff] %v21018_v11  ;;  %v21042_v23 = vsub.f32 %v24743_v18, %v20826_v56  ;;  %v21046_v47 = vsub.f32 %v24745_v35, %v20826_v56 }
 0xb49   :  { %24736 = vst [vmem:[#allocation17_spill] sm:$0xff] %v21026_v63  ;;  %24738 = vst [vmem:[#allocation42_spill] sm:$0xff] %v21030_v61  ;;  %v24747_v63 = vld [vmem:[#allocation37_spill] sm:$0xff] }
 0xb4a   :  { %24740 = vst [vmem:[#allocation47_spill] sm:$0xff] %v21034_v2  ;;  %24742 = vst [vmem:[#allocation50_spill] sm:$0xff] %v21038_v8  ;;  %v21050_v30 = vsub.f32 %v24747_v63, %v20826_v56  ;;  %v24749_v61 = vld [vmem:[#allocation45_spill] sm:$0xff]  ;;  %v24753_v8 = vld [vmem:[#allocation44_spill] sm:$0xff] }
 0xb4b   :  { %24744 = vst [vmem:[#allocation51_spill] sm:$0xff] %v21042_v23  ;;  %24746 = vst [vmem:[#allocation55_spill] sm:$0xff] %v21046_v47  ;;  %v21054_v49 = vsub.f32 %v24749_v61, %v20826_v56  ;;  %v24751_v2 = vld [vmem:[#allocation49_spill] sm:$0xff]  ;;  %v21062_v18 = vsub.f32 %v24753_v8, %v20826_v56  ;;  %v24755_v23 = vld [vmem:[#allocation48_spill] sm:$0xff]  ;;  %v21074_v61 = vsub.f32 %v20821_v31, %v20826_v56 }
 0xb4c   :  { %24748 = vst [vmem:[#allocation59_spill] sm:$0xff] %v21050_v30  ;;  %v21058_v12 = vsub.f32 %v24751_v2, %v20826_v56  ;;  %v21066_v35 = vsub.f32 %v24755_v23, %v20826_v56  ;;  %v24757_v47 = vld [vmem:[#allocation52_spill] sm:$0xff]  ;;  %v21078_v2 = vsub.f32 %v20813_v36, %v20826_v56  ;;  %v21082_v8 = vsub.f32 %v20819_v34, %v20826_v56 }
 0xb4d   :  { %24750 = vst [vmem:[#allocation60_spill] sm:$0xff] %v21054_v49  ;;  %24754 = vst [vmem:[#allocation72_spill] sm:$0xff] %v21062_v18  ;;  %v21070_v63 = vsub.f32 %v24757_v47, %v20826_v56  ;;  %v8433_v23 = vmul.f32 %v20830_v39, %v20830_v39  ;;  %v8435_v47 = vmul.f32 %v20838_v9, %v20838_v9 }
 0xb4e   :  { %24752 = vst [vmem:[#allocation71_spill] sm:$0xff] %v21058_v12  ;;  %24756 = vst [vmem:[#allocation41_spill] sm:$0xff] %v21066_v35  ;;  %v8434_v35 = vmul.f32 %v20834_v1, %v20834_v1  ;;  %v8436_v31 = vmul.f32 %v20842_v15, %v20842_v15  ;;  %v8437_v36 = vmul.f32 %v20846_v38, %v20846_v38 }
 0xb4f   :  { %24758 = vst [vmem:[#allocation62_spill] sm:$0xff] %v21070_v63  ;;  %24759 = vst [vmem:[#allocation80_spill] sm:$0xff] %v21074_v61  ;;  %v8438_v56 = vmul.f32 %v20850_v59, %v20850_v59  ;;  %v8439_v39 = vmul.f32 %v20854_v32, %v20854_v32  ;;  %v8440_v9 = vmul.f32 %v20858_v0, %v20858_v0 }
 0xb50   :  { %24760 = vst [vmem:[#allocation77_spill] sm:$0xff] %v21078_v2  ;;  %24761 = vst [vmem:[#allocation58_spill] sm:$0xff] %v21082_v8  ;;  %v8497_v63 = vadd.f32 %v8434_v35, %v8433_v23  ;;  %v8441_v23 = vmul.f32 %v20862_v42, %v20862_v42 }
 0xb52   :  { %v8498_v61 = vadd.f32 %v8497_v63, %v8435_v47  ;;  %v8442_v47 = vmul.f32 %v20866_v53, %v20866_v53 }
 0xb54   :  { %v8499_v2 = vadd.f32 %v8498_v61, %v8436_v31  ;;  %v8443_v31 = vmul.f32 %v20870_v16, %v20870_v16 }
 0xb56   :  { %v8500_v34 = vadd.f32 %v8499_v2, %v8437_v36  ;;  %v8444_v36 = vmul.f32 %v20874_v55, %v20874_v55 }
 0xb58   :  { %v8501_v1 = vadd.f32 %v8500_v34, %v8438_v56  ;;  %v8445_v34 = vmul.f32 %v20878_v46, %v20878_v46 }
 0xb5a   :  { %v8502_v35 = vadd.f32 %v8501_v1, %v8439_v39  ;;  %v8446_v39 = vmul.f32 %v20882_v24, %v20882_v24 }
 0xb5c   :  { %v8503_v63 = vadd.f32 %v8502_v35, %v8440_v9  ;;  %v8447_v35 = vmul.f32 %v20886_v60, %v20886_v60 }
 0xb5e   :  { %v8504_v61 = vadd.f32 %v8503_v63, %v8441_v23  ;;  %v8448_v63 = vmul.f32 %v20890_v48, %v20890_v48 }
 0xb60   :  { %v8505_v2 = vadd.f32 %v8504_v61, %v8442_v47  ;;  %v8449_v61 = vmul.f32 %v20894_v6, %v20894_v6 }
 0xb62   :  { %v8506_v56 = vadd.f32 %v8505_v2, %v8443_v31  ;;  %v8450_v2 = vmul.f32 %v20898_v27, %v20898_v27 }
 0xb64   :  { %v8507_v1 = vadd.f32 %v8506_v56, %v8444_v36  ;;  %v8451_v56 = vmul.f32 %v20902_v13, %v20902_v13 }
 0xb66   :  { %v8508_v9 = vadd.f32 %v8507_v1, %v8445_v34  ;;  %v8452_v1 = vmul.f32 %v20906_v14, %v20906_v14 }
 0xb68   :  { %v8509_v23 = vadd.f32 %v8508_v9, %v8446_v39  ;;  %v8453_v9 = vmul.f32 %v20910_v45, %v20910_v45 }
 0xb6a   :  { %v8510_v47 = vadd.f32 %v8509_v23, %v8447_v35  ;;  %v8454_v23 = vmul.f32 %v20914_v54, %v20914_v54 }
 0xb6c   :  { %v8511_v31 = vadd.f32 %v8510_v47, %v8448_v63  ;;  %v8455_v47 = vmul.f32 %v20918_v40, %v20918_v40 }
 0xb6e   :  { %v8512_v36 = vadd.f32 %v8511_v31, %v8449_v61  ;;  %v8456_v31 = vmul.f32 %v20922_v28, %v20922_v28 }
 0xb70   :  { %v8513_v34 = vadd.f32 %v8512_v36, %v8450_v2  ;;  %v8457_v36 = vmul.f32 %v20926_v37, %v20926_v37 }
 0xb72   :  { %v8514_v39 = vadd.f32 %v8513_v34, %v8451_v56  ;;  %v8458_v34 = vmul.f32 %v20930_v29, %v20930_v29 }
 0xb74   :  { %v8515_v35 = vadd.f32 %v8514_v39, %v8452_v1  ;;  %v8459_v39 = vmul.f32 %v20934_v3, %v20934_v3 }
 0xb76   :  { %v8516_v63 = vadd.f32 %v8515_v35, %v8453_v9  ;;  %v8460_v35 = vmul.f32 %v20938_v5, %v20938_v5 }
 0xb78   :  { %v8517_v61 = vadd.f32 %v8516_v63, %v8454_v23  ;;  %v8461_v63 = vmul.f32 %v20942_v21, %v20942_v21 }
 0xb7a   :  { %v8518_v2 = vadd.f32 %v8517_v61, %v8455_v47  ;;  %v8462_v61 = vmul.f32 %v20946_v19, %v20946_v19 }
 0xb7c   :  { %v8519_v56 = vadd.f32 %v8518_v2, %v8456_v31  ;;  %v8463_v2 = vmul.f32 %v20950_v52, %v20950_v52 }
 0xb7e   :  { %v8520_v1 = vadd.f32 %v8519_v56, %v8457_v36  ;;  %v8464_v56 = vmul.f32 %v20954_v33, %v20954_v33 }
 0xb80   :  { %v8521_v9 = vadd.f32 %v8520_v1, %v8458_v34  ;;  %v8465_v1 = vmul.f32 %v20958_v57, %v20958_v57 }
 0xb82   :  { %v8522_v23 = vadd.f32 %v8521_v9, %v8459_v39  ;;  %v8466_v9 = vmul.f32 %v20962_v4, %v20962_v4 }
 0xb84   :  { %v8523_v47 = vadd.f32 %v8522_v23, %v8460_v35  ;;  %v8467_v23 = vmul.f32 %v20966_v62, %v20966_v62 }
 0xb86   :  { %v8524_v31 = vadd.f32 %v8523_v47, %v8461_v63  ;;  %v8468_v47 = vmul.f32 %v20970_v26, %v20970_v26 }
 0xb88   :  { %v8525_v36 = vadd.f32 %v8524_v31, %v8462_v61  ;;  %v8469_v31 = vmul.f32 %v20974_v44, %v20974_v44 }
 0xb8a   :  { %v8526_v34 = vadd.f32 %v8525_v36, %v8463_v2  ;;  %v8470_v36 = vmul.f32 %v20978_v17, %v20978_v17 }
 0xb8c   :  { %v8527_v39 = vadd.f32 %v8526_v34, %v8464_v56  ;;  %v8471_v34 = vmul.f32 %v20982_v10, %v20982_v10 }
 0xb8e   :  { %v8528_v35 = vadd.f32 %v8527_v39, %v8465_v1  ;;  %v8472_v39 = vmul.f32 %v20986_v7, %v20986_v7 }
 0xb90   :  { %v8529_v63 = vadd.f32 %v8528_v35, %v8466_v9  ;;  %v8473_v35 = vmul.f32 %v20990_v43, %v20990_v43 }
 0xb92   :  { %v8530_v61 = vadd.f32 %v8529_v63, %v8467_v23  ;;  %v8474_v63 = vmul.f32 %v20994_v58, %v20994_v58 }
 0xb94   :  { %v8531_v2 = vadd.f32 %v8530_v61, %v8468_v47  ;;  %v8475_v61 = vmul.f32 %v20998_v41, %v20998_v41 }
 0xb96   :  { %v8532_v56 = vadd.f32 %v8531_v2, %v8469_v31  ;;  %v8476_v2 = vmul.f32 %v21002_v51, %v21002_v51 }
 0xb98   :  { %v8533_v1 = vadd.f32 %v8532_v56, %v8470_v36  ;;  %v8477_v56 = vmul.f32 %v21006_v50, %v21006_v50 }
 0xb9a   :  { %v8534_v9 = vadd.f32 %v8533_v1, %v8471_v34  ;;  %v8478_v1 = vmul.f32 %v21010_v22, %v21010_v22 }
 0xb9c   :  { %v8535_v23 = vadd.f32 %v8534_v9, %v8472_v39  ;;  %v8479_v9 = vmul.f32 %v21014_v20, %v21014_v20  ;;  %v24766_v20 = vld [vmem:[#allocation51_spill] sm:$0xff] }
 0xb9e   :  { %v8536_v47 = vadd.f32 %v8535_v23, %v8473_v35  ;;  %v8480_v23 = vmul.f32 %v21018_v11, %v21018_v11 }
 0xba0   :  { %v8537_v31 = vadd.f32 %v8536_v47, %v8474_v63  ;;  %v8481_v47 = vmul.f32 %v21022_v25, %v21022_v25 }
 0xba2   :  { %v8538_v36 = vadd.f32 %v8537_v31, %v8475_v61  ;;  %v24762_v31 = vld [vmem:[#allocation17_spill] sm:$0xff] }
 0xba3   :  { %v8482_v59 = vmul.f32 %v24762_v31, %v24762_v31 }
 0xba4   :  { %v8539_v34 = vadd.f32 %v8538_v36, %v8476_v2  ;;  %v24763_v36 = vld [vmem:[#allocation42_spill] sm:$0xff] }
 0xba5   :  { %v8483_v38 = vmul.f32 %v24763_v36, %v24763_v36 }
 0xba6   :  { %v8540_v39 = vadd.f32 %v8539_v34, %v8477_v56  ;;  %v24764_v34 = vld [vmem:[#allocation47_spill] sm:$0xff] }
 0xba7   :  { %v8484_v15 = vmul.f32 %v24764_v34, %v24764_v34 }
 0xba8   :  { %v8541_v35 = vadd.f32 %v8540_v39, %v8478_v1  ;;  %v24765_v39 = vld [vmem:[#allocation50_spill] sm:$0xff] }
 0xba9   :  { %v8485_v11 = vmul.f32 %v24765_v39, %v24765_v39 }
 0xbaa   :  { %v8542_v63 = vadd.f32 %v8541_v35, %v8479_v9  ;;  %v18531_v35 = vld [vmem:[#allocation12 + $0x40] sm:$0xff]  }
 0xbab   :  { %16449 = vmatprep.subr.bf16.mxu0 %v18531_v35  ;;  %17169 = vmatprep.subr.bf16.mxu1 %v18531_v35 }
 0xbac   :  { %v8543_v61 = vadd.f32 %v8542_v63, %v8480_v23  ;;  %v8486_v23 = vmul.f32 %v24766_v20, %v24766_v20  ;;  %16450 = vmatpush3.bf16.msra.mxu0 %v18531_v35  ;;  %17177 = vmatpush3.bf16.msra.mxu1 %v18531_v35  ;;  %v8491_v35 = vmul.f32 %v21062_v18, %v21062_v18 }
 0xbae   :  { %v8544_v2 = vadd.f32 %v8543_v61, %v8481_v47  ;;  %v24767_v47 = vld [vmem:[#allocation55_spill] sm:$0xff] }
 0xbaf   :  { %v8487_v61 = vmul.f32 %v24767_v47, %v24767_v47 }
 0xbb0   :  { %v8545_v56 = vadd.f32 %v8544_v2, %v8482_v59  ;;  %v18532_v59 = vld [vmem:[#allocation12 + $0x48] sm:$0xff]  }
 0xbb1   :  { %16451 = vmatprep.subr.bf16.mxu0 %v18532_v59  ;;  %17170 = vmatprep.subr.bf16.mxu1 %v18532_v59 }
 0xbb2   :  { %v8546_v1 = vadd.f32 %v8545_v56, %v8483_v38  ;;  %v8488_v38 = vmul.f32 %v21050_v30, %v21050_v30  ;;  %16452 = vmatpush3.bf16.msra.mxu0 %v18532_v59  ;;  %17178 = vmatpush3.bf16.msra.mxu1 %v18532_v59  ;;  %v24769_v59 = vld [vmem:[#allocation62_spill] sm:$0xff] }
 0xbb4   :  { %v8547_v9 = vadd.f32 %v8546_v1, %v8484_v15  ;;  %v8489_v15 = vmul.f32 %v21054_v49, %v21054_v49  ;;  %v8490_v1 = vmul.f32 %v21058_v12, %v21058_v12 }
 0xbb6   :  { %v8548_v63 = vadd.f32 %v8547_v9, %v8485_v11  ;;  %v18533_v11 = vld [vmem:[#allocation12 + $0x50] sm:$0xff]  }
 0xbb7   :  { %16453 = vmatprep.subr.bf16.mxu0 %v18533_v11  ;;  %17171 = vmatprep.subr.bf16.mxu1 %v18533_v11 }
 0xbb8   :  { %v8549_v36 = vadd.f32 %v8548_v63, %v8486_v23  ;;  %16454 = vmatpush3.bf16.msra.mxu0 %v18533_v11  ;;  %17179 = vmatpush3.bf16.msra.mxu1 %v18533_v11  ;;  %v24768_v63 = vld [vmem:[#allocation41_spill] sm:$0xff] }
 0xbb9   :  { %v24771_v11 = vld [vmem:[#allocation77_spill] sm:$0xff] }
 0xbba   :  { %v8550_v2 = vadd.f32 %v8549_v36, %v8487_v61  ;;  %v18534_v36 = vld [vmem:[#allocation12 + $0x58] sm:$0xff]   ;;  %v8492_v61 = vmul.f32 %v24768_v63, %v24768_v63 }
 0xbbb   :  { %16455 = vmatprep.subr.bf16.mxu0 %v18534_v36  ;;  %17172 = vmatprep.subr.bf16.mxu1 %v18534_v36 }
 0xbbc   :  { %v8551_v56 = vadd.f32 %v8550_v2, %v8488_v38  ;;  %v8493_v2 = vmul.f32 %v24769_v59, %v24769_v59  ;;  %16456 = vmatpush3.bf16.msra.mxu0 %v18534_v36  ;;  %17180 = vmatpush3.bf16.msra.mxu1 %v18534_v36  ;;  %v9115_v36 = vld [vmem:[#allocation4] sm:$0xff]  ;;  %v18747_v59 = vld [vmem:[#allocation3 + $0x8] sm:$0xff] }
 0xbbd   :  { %v21212_v49 = vrot.slane %v18747_v59, 1 }
 0xbbe   :  { %v8552_v9 = vadd.f32 %v8551_v56, %v8489_v15  ;;  %v18535_v15 = vld [vmem:[#allocation12 + $0x60] sm:$0xff]  }
 0xbbf   :  { %v24770_v56 = vld [vmem:[#allocation80_spill] sm:$0xff]  ;;  %16457 = vmatprep.subr.bf16.mxu0 %v18535_v15  ;;  %17173 = vmatprep.subr.bf16.mxu1 %v18535_v15  ;;  %24772 = vst [vmem:[#allocation64_spill] sm:$0xff] %v21212_v49 }
 0xbc0   :  { %v8553_v23 = vadd.f32 %v8552_v9, %v8490_v1  ;;  %v8494_v18 = vmul.f32 %v24770_v56, %v24770_v56  ;;  %v8495_v9 = vmul.f32 %v24771_v11, %v24771_v11  ;;  %16458 = vmatpush3.bf16.msra.mxu0 %v18535_v15  ;;  %17181 = vmatpush3.bf16.msra.mxu1 %v18535_v15  ;;  %v18538_v15 = vld [vmem:[#allocation12 + $0x78] sm:$0xff]  }
 0xbc2   :  { %v8554_v38 = vadd.f32 %v8553_v23, %v8491_v35  ;;  %v18536_v35 = vld [vmem:[#allocation12 + $0x68] sm:$0xff]   ;;  %v8496_v23 = vmul.f32 %v21082_v8, %v21082_v8 }
 0xbc3   :  { %16459 = vmatprep.subr.bf16.mxu0 %v18536_v35  ;;  %17174 = vmatprep.subr.bf16.mxu1 %v18536_v35 }
 0xbc4   :  { %v8555_v12 = vadd.f32 %v8554_v38, %v8492_v61  ;;  %v18537_v38 = vld [vmem:[#allocation12 + $0x70] sm:$0xff]   ;;  %16460 = vmatpush3.bf16.msra.mxu0 %v18536_v35  ;;  %17182 = vmatpush3.bf16.msra.mxu1 %v18536_v35  ;;  %v18539_v35 = vld [vmem:[#allocation12] sm:$0xff]  }
 0xbc5   :  { %16461 = vmatprep.subr.bf16.mxu0 %v18537_v38  ;;  %17175 = vmatprep.subr.bf16.mxu1 %v18537_v38 }
 0xbc6   :  { %v8556_v1 = vadd.f32 %v8555_v12, %v8493_v2  ;;  %v9117_v12 = vld [vmem:[#allocation4 + $0x10] sm:$0x3]  ;;  %v9367_v2 = vrot.slane %v9115_v36, 1 }
 0xbc8   :  { %v8557_v63 = vadd.f32 %v8556_v1, %v8494_v18  ;;  %v9370_v18 = vrot.slane %v9117_v12, 1  ;;  %v9369_v1 = vsel %vm24320_vm4, %v9367_v2, %v21212_v49  ;;  %16462 = vmatpush3.bf16.msra.mxu0 %v18537_v38  ;;  %17183 = vmatpush3.bf16.msra.mxu1 %v18537_v38 }
 0xbc9   :  { %16463 = vmatprep.subr.bf16.mxu0 %v18538_v15  ;;  %17176 = vmatprep.subr.bf16.mxu1 %v18538_v15 }
 0xbca   :  { %v8558_v61 = vadd.f32 %v8557_v63, %v8495_v9  ;;  %v9371_v9 = vsel %vm24320_vm4, %v21212_v49, %v9370_v18  ;;  %v24784_v49 = vld [vmem:[#allocation41_spill] sm:$0xff] }
 0xbcb   :  { %v9591_v59 = vpack.c.bf16 %v9371_v9, %v9369_v1 }
 0xbcc   :  { %v8559_v30 = vadd.f32 %v8558_v61, %v8496_v23  ;;  %16464 = vmatpush3.bf16.msra.mxu0 %v18538_v15  ;;  %17184 = vmatpush3.bf16.msra.mxu1 %v18538_v15 }
 0xbcd   :  { %16465 = vmatprep.mubr.bf16.mxu0 %v9591_v59  ;;  %16529 = vmatprep.subr.bf16.mxu1 %v18539_v35 }
 0xbce   :  { %v8560_v63 = vrot.slane %v8559_v30, 4 }
 0xbd0   :  { %v8561_v8 = vadd.f32 %v8560_v63, %v8559_v30  ;;  %v21223_v30 = vld [vmem:[%s24145_s11] ss:$0 sm:$0xff] }
 0xbd1   :  { %24774 = vst [vmem:[#allocation70_spill] sm:$0xff] %v21223_v30 }
 0xbd2   :  { %v8562_v23 = vrot.slane %v8561_v8, 2 }
 0xbd4   :  { %v8563_v61 = vadd.f32 %v8562_v23, %v8561_v8  ;;  %v21230_v8 = vld [vmem:[%s24146_s12] ss:$0 sm:$0xff] }
 0xbd5   :  { %24775 = vst [vmem:[#allocation69_spill] sm:$0xff] %v21230_v8 }
 0xbd6   :  { %v8564_v36 = vrot.slane %v8563_v61, 1 }
 0xbd8   :  { %v8565_v12 = vadd.f32 %v8564_v36, %v8563_v61  ;;  %v24776_v36 = vld [vmem:[#allocation74_spill] sm:$0xff] }
 0xbda   :  { %v8566_v2 = vmul.f32 0.001953125, %v8565_v12  ;;  %v24777_v12 = vld [vmem:[#allocation76_spill] sm:$0xff] }
 0xbdc   :  { %v8567_v11 = vadd.f32 0.8, %v8566_v2  ;;  %v24778_v2 = vld [vmem:[#allocation42_spill] sm:$0xff] }
 0xbde   :  { %18607 = vrsqrt.f32 %v8567_v11 }
 0xbe8   :  { %v21218_v47 = vpop.eup %18607 }
 0xbe9   :  { %24773 = vst [vmem:[#allocation63_spill] sm:$0xff] %v21218_v47  ;;  %v8630_v38 = vmul.f32 %v21218_v47, %v24770_v56  ;;  %v8575_v11 = vmul.f32 %v21218_v47, %v20854_v32  ;;  %v8576_v15 = vmul.f32 %v21218_v47, %v20858_v0  ;;  %v8577_v63 = vmul.f32 %v21218_v47, %v20862_v42 }
 0xbea   :  { %v8578_v56 = vmul.f32 %v21218_v47, %v20866_v53  ;;  %v8579_v9 = vmul.f32 %v21218_v47, %v20870_v16  ;;  %v8580_v59 = vmul.f32 %v21218_v47, %v20874_v55  ;;  %v8581_v32 = vmul.f32 %v21218_v47, %v20878_v46 }
 0xbeb   :  { %v8700_v18 = vmul.f32 %v21223_v30, %v8630_v38  ;;  %v8582_v0 = vmul.f32 %v21218_v47, %v20882_v24  ;;  %v8583_v23 = vmul.f32 %v21218_v47, %v20886_v60  ;;  %v8584_v53 = vmul.f32 %v21218_v47, %v20890_v48  ;;  %v24786_v30 = vld [vmem:[#allocation77_spill] sm:$0xff] }
 0xbec   :  { %v8585_v16 = vmul.f32 %v21218_v47, %v20894_v6  ;;  %v8586_v55 = vmul.f32 %v21218_v47, %v20898_v27  ;;  %v8587_v46 = vmul.f32 %v21218_v47, %v20902_v13  ;;  %v8588_v24 = vmul.f32 %v21218_v47, %v20906_v14 }
 0xbed   :  { %v8770_v1 = vadd.f32 %v21230_v8, %v8700_v18  ;;  %v8589_v60 = vmul.f32 %v21218_v47, %v20910_v45  ;;  %v8590_v61 = vmul.f32 %v21218_v47, %v20914_v54  ;;  %v8591_v48 = vmul.f32 %v21218_v47, %v20918_v40  ;;  %v24779_v18 = vld [vmem:[#allocation55_spill] sm:$0xff]  ;;  %v24785_v8 = vld [vmem:[#allocation62_spill] sm:$0xff] }
 0xbee   :  { %v8592_v6 = vmul.f32 %v21218_v47, %v20922_v28  ;;  %v8593_v27 = vmul.f32 %v21218_v47, %v20926_v37  ;;  %v8594_v13 = vmul.f32 %v21218_v47, %v20930_v29  ;;  %v8595_v14 = vmul.f32 %v21218_v47, %v20934_v3 }
 0xbef   :  { %vm8834_vm7 = vcmp.ge.f32.partialorder %v8770_v1, 0.0  ;;  %v8898_v42 = vmul.f32 0.2, %v8770_v1  ;;  %v8596_v45 = vmul.f32 %v21218_v47, %v20938_v5  ;;  %v8597_v54 = vmul.f32 %v21218_v47, %v20942_v21 }
 0xbf0   :  { %v8598_v40 = vmul.f32 %v21218_v47, %v20946_v19  ;;  %v8599_v28 = vmul.f32 %v21218_v47, %v20950_v52  ;;  %v8600_v37 = vmul.f32 %v21218_v47, %v20954_v33  ;;  %v8601_v29 = vmul.f32 %v21218_v47, %v20958_v57 }
 0xbf1   :  { %v8962_v35 = vsel %vm8834_vm7, %v8770_v1, %v8898_v42  ;;  %v8602_v3 = vmul.f32 %v21218_v47, %v20962_v4  ;;  %v8603_v5 = vmul.f32 %v21218_v47, %v20966_v62  ;;  %v8604_v21 = vmul.f32 %v21218_v47, %v20970_v26  ;;  %v24780_v42 = vld [vmem:[#allocation59_spill] sm:$0xff] }
 0xbf2   :  { %9027 = vst [vmem:[#allocation4 + $0x321] sm:$0xff] %v8962_v35  ;;  %v8605_v19 = vmul.f32 %v21218_v47, %v20974_v44  ;;  %v8606_v52 = vmul.f32 %v21218_v47, %v20978_v17  ;;  %v8607_v33 = vmul.f32 %v21218_v47, %v20982_v10  ;;  %v8608_v57 = vmul.f32 %v21218_v47, %v20986_v7  ;;  %v24781_v35 = vld [vmem:[#allocation60_spill] sm:$0xff] }
 0xbf3   :  { %v8609_v4 = vmul.f32 %v21218_v47, %v20990_v43  ;;  %v8610_v62 = vmul.f32 %v21218_v47, %v20994_v58  ;;  %v8611_v26 = vmul.f32 %v21218_v47, %v20998_v41  ;;  %v8612_v44 = vmul.f32 %v21218_v47, %v21002_v51 }
 0xbf4   :  { %v8613_v17 = vmul.f32 %v21218_v47, %v21006_v50  ;;  %v8614_v10 = vmul.f32 %v21218_v47, %v21010_v22  ;;  %v8615_v7 = vmul.f32 %v21218_v47, %v24776_v36  ;;  %v8616_v43 = vmul.f32 %v21218_v47, %v24777_v12  ;;  %v24782_v36 = vld [vmem:[#allocation71_spill] sm:$0xff] }
 0xbf5   :  { %v8617_v58 = vmul.f32 %v21218_v47, %v21022_v25  ;;  %v8618_v41 = vmul.f32 %v21218_v47, %v24762_v31  ;;  %v8619_v51 = vmul.f32 %v21218_v47, %v24778_v2  ;;  %v8620_v50 = vmul.f32 %v21218_v47, %v24764_v34  ;;  %v24783_v2 = vld [vmem:[#allocation72_spill] sm:$0xff] }
 0xbf6   :  { %v8621_v22 = vmul.f32 %v21218_v47, %v24765_v39  ;;  %v8622_v38 = vmul.f32 %v21218_v47, %v24766_v20  ;;  %v8623_v1 = vmul.f32 %v21218_v47, %v24779_v18  ;;  %v8624_v25 = vmul.f32 %v21218_v47, %v24780_v42  ;;  %v24787_v42 = vld [vmem:[#allocation58_spill] sm:$0xff] }
 0xbf7   :  { %v8625_v31 = vmul.f32 %v21218_v47, %v24781_v35  ;;  %v8626_v12 = vmul.f32 %v21218_v47, %v24782_v36  ;;  %v8627_v34 = vmul.f32 %v21218_v47, %v24783_v2  ;;  %v8628_v39 = vmul.f32 %v21218_v47, %v24784_v49  ;;  %v24788_v36 = vld [vmem:[#allocation70_spill] sm:$0xff] }
 0xbf8   :  { %v8629_v20 = vmul.f32 %v21218_v47, %v24785_v8  ;;  %v8631_v18 = vmul.f32 %v21218_v47, %v24786_v30  ;;  %v8632_v35 = vmul.f32 %v21218_v47, %v24787_v42  ;;  %v8645_v2 = vmul.f32 %v24788_v36, %v8575_v11 }
 0xbf9   :  { %v8646_v49 = vmul.f32 %v24788_v36, %v8576_v15  ;;  %v8647_v8 = vmul.f32 %v24788_v36, %v8577_v63  ;;  %v8648_v30 = vmul.f32 %v24788_v36, %v8578_v56  ;;  %v8649_v42 = vmul.f32 %v24788_v36, %v8579_v9 }
 0xbfa   :  { %v8650_v47 = vmul.f32 %v24788_v36, %v8580_v59  ;;  %v8651_v11 = vmul.f32 %v24788_v36, %v8581_v32  ;;  %v8652_v15 = vmul.f32 %v24788_v36, %v8582_v0  ;;  %v8653_v63 = vmul.f32 %v24788_v36, %v8583_v23 }
 0xbfb   :  { %v8654_v56 = vmul.f32 %v24788_v36, %v8584_v53  ;;  %v8655_v9 = vmul.f32 %v24788_v36, %v8585_v16  ;;  %v8656_v59 = vmul.f32 %v24788_v36, %v8586_v55  ;;  %v8657_v32 = vmul.f32 %v24788_v36, %v8587_v46 }
 0xbfc   :  { %v8658_v0 = vmul.f32 %v24788_v36, %v8588_v24  ;;  %v8659_v23 = vmul.f32 %v24788_v36, %v8589_v60  ;;  %v8660_v53 = vmul.f32 %v24788_v36, %v8590_v61  ;;  %v8661_v16 = vmul.f32 %v24788_v36, %v8591_v48 }
 0xbfd   :  { %v8662_v55 = vmul.f32 %v24788_v36, %v8592_v6  ;;  %v8663_v46 = vmul.f32 %v24788_v36, %v8593_v27  ;;  %v8664_v24 = vmul.f32 %v24788_v36, %v8594_v13  ;;  %v8665_v60 = vmul.f32 %v24788_v36, %v8595_v14 }
 0xbfe   :  { %v8666_v61 = vmul.f32 %v24788_v36, %v8596_v45  ;;  %v8667_v48 = vmul.f32 %v24788_v36, %v8597_v54  ;;  %v8668_v6 = vmul.f32 %v24788_v36, %v8598_v40  ;;  %v8669_v27 = vmul.f32 %v24788_v36, %v8599_v28 }
 0xbff   :  { %v8670_v13 = vmul.f32 %v24788_v36, %v8600_v37  ;;  %v8671_v14 = vmul.f32 %v24788_v36, %v8601_v29  ;;  %v8672_v45 = vmul.f32 %v24788_v36, %v8602_v3  ;;  %v8673_v54 = vmul.f32 %v24788_v36, %v8603_v5 }
 0xc00   :  { %v8674_v40 = vmul.f32 %v24788_v36, %v8604_v21  ;;  %v8675_v28 = vmul.f32 %v24788_v36, %v8605_v19  ;;  %v8676_v37 = vmul.f32 %v24788_v36, %v8606_v52  ;;  %v8677_v29 = vmul.f32 %v24788_v36, %v8607_v33 }
 0xc01   :  { %v8678_v3 = vmul.f32 %v24788_v36, %v8608_v57  ;;  %v8679_v5 = vmul.f32 %v24788_v36, %v8609_v4  ;;  %v8680_v21 = vmul.f32 %v24788_v36, %v8610_v62  ;;  %v8681_v19 = vmul.f32 %v24788_v36, %v8611_v26 }
 0xc02   :  { %v8682_v52 = vmul.f32 %v24788_v36, %v8612_v44  ;;  %v8683_v33 = vmul.f32 %v24788_v36, %v8613_v17  ;;  %v8684_v57 = vmul.f32 %v24788_v36, %v8614_v10  ;;  %v8685_v4 = vmul.f32 %v24788_v36, %v8615_v7 }
 0xc03   :  { %v8686_v62 = vmul.f32 %v24788_v36, %v8616_v43  ;;  %v8687_v26 = vmul.f32 %v24788_v36, %v8617_v58  ;;  %v8688_v44 = vmul.f32 %v24788_v36, %v8618_v41  ;;  %v8689_v17 = vmul.f32 %v24788_v36, %v8619_v51 }
 0xc04   :  { %v8690_v10 = vmul.f32 %v24788_v36, %v8620_v50  ;;  %v8691_v7 = vmul.f32 %v24788_v36, %v8621_v22  ;;  %v8692_v43 = vmul.f32 %v24788_v36, %v8622_v38  ;;  %v8693_v58 = vmul.f32 %v24788_v36, %v8623_v1 }
 0xc05   :  { %v8694_v41 = vmul.f32 %v24788_v36, %v8624_v25  ;;  %v8695_v51 = vmul.f32 %v24788_v36, %v8625_v31  ;;  %v8696_v50 = vmul.f32 %v24788_v36, %v8626_v12  ;;  %v8697_v22 = vmul.f32 %v24788_v36, %v8627_v34  ;;  %v24789_v12 = vld [vmem:[#allocation69_spill] sm:$0xff] }
 0xc06   :  { %v8698_v38 = vmul.f32 %v24788_v36, %v8628_v39  ;;  %v8699_v1 = vmul.f32 %v24788_v36, %v8629_v20  ;;  %v8701_v25 = vmul.f32 %v24788_v36, %v8631_v18  ;;  %v8702_v31 = vmul.f32 %v24788_v36, %v8632_v35 }
 0xc07   :  { %v21406_v34 = vadd.f32 %v24789_v12, %v8645_v2  ;;  %v21409_v39 = vadd.f32 %v24789_v12, %v8646_v49  ;;  %v21412_v20 = vadd.f32 %v24789_v12, %v8647_v8  ;;  %v21415_v18 = vadd.f32 %v24789_v12, %v8648_v30 }
 0xc08   :  { %v21418_v35 = vadd.f32 %v24789_v12, %v8649_v42  ;;  %v21421_v36 = vadd.f32 %v24789_v12, %v8650_v47  ;;  %v21424_v2 = vadd.f32 %v24789_v12, %v8651_v11  ;;  %v21430_v49 = vadd.f32 %v24789_v12, %v8653_v63 }
 0xc09   :  { %24790 = vst [vmem:[#allocation78_spill] sm:$0xff] %v21406_v34  ;;  %v21427_v34 = vadd.f32 %v24789_v12, %v8652_v15  ;;  %v21433_v8 = vadd.f32 %v24789_v12, %v8654_v56  ;;  %v21436_v30 = vadd.f32 %v24789_v12, %v8655_v9  ;;  %v21439_v42 = vadd.f32 %v24789_v12, %v8656_v59 }
 0xc0a   :  { %v21442_v47 = vadd.f32 %v24789_v12, %v8657_v32  ;;  %v21445_v11 = vadd.f32 %v24789_v12, %v8658_v0  ;;  %v21448_v15 = vadd.f32 %v24789_v12, %v8659_v23  ;;  %v21451_v63 = vadd.f32 %v24789_v12, %v8660_v53 }
 0xc0b   :  { %v21454_v56 = vadd.f32 %v24789_v12, %v8661_v16  ;;  %v21457_v9 = vadd.f32 %v24789_v12, %v8662_v55  ;;  %v21460_v59 = vadd.f32 %v24789_v12, %v8663_v46  ;;  %v21463_v32 = vadd.f32 %v24789_v12, %v8664_v24 }
 0xc0c   :  { %v21466_v0 = vadd.f32 %v24789_v12, %v8665_v60  ;;  %v21469_v23 = vadd.f32 %v24789_v12, %v8666_v61  ;;  %v21472_v53 = vadd.f32 %v24789_v12, %v8667_v48  ;;  %v21475_v16 = vadd.f32 %v24789_v12, %v8668_v6 }
 0xc0d   :  { %v21478_v55 = vadd.f32 %v24789_v12, %v8669_v27  ;;  %v21481_v46 = vadd.f32 %v24789_v12, %v8670_v13  ;;  %v21484_v24 = vadd.f32 %v24789_v12, %v8671_v14  ;;  %v21487_v60 = vadd.f32 %v24789_v12, %v8672_v45 }
 0xc0e   :  { %v21490_v61 = vadd.f32 %v24789_v12, %v8673_v54  ;;  %v21493_v48 = vadd.f32 %v24789_v12, %v8674_v40  ;;  %v21496_v6 = vadd.f32 %v24789_v12, %v8675_v28  ;;  %v21499_v27 = vadd.f32 %v24789_v12, %v8676_v37 }
 0xc0f   :  { %v21502_v13 = vadd.f32 %v24789_v12, %v8677_v29  ;;  %v21505_v14 = vadd.f32 %v24789_v12, %v8678_v3  ;;  %v21508_v45 = vadd.f32 %v24789_v12, %v8679_v5  ;;  %v21511_v54 = vadd.f32 %v24789_v12, %v8680_v21 }
 0xc10   :  { %v21514_v40 = vadd.f32 %v24789_v12, %v8681_v19  ;;  %v21517_v28 = vadd.f32 %v24789_v12, %v8682_v52  ;;  %v21520_v37 = vadd.f32 %v24789_v12, %v8683_v33  ;;  %v21523_v29 = vadd.f32 %v24789_v12, %v8684_v57 }
 0xc11   :  { %v21526_v3 = vadd.f32 %v24789_v12, %v8685_v4  ;;  %v21529_v5 = vadd.f32 %v24789_v12, %v8686_v62  ;;  %v21532_v21 = vadd.f32 %v24789_v12, %v8687_v26  ;;  %v21535_v19 = vadd.f32 %v24789_v12, %v8688_v44 }
 0xc12   :  { %24791 = vst [vmem:[#allocation24_spill] sm:$0xff] %v21523_v29  ;;  %v21538_v52 = vadd.f32 %v24789_v12, %v8689_v17  ;;  %v21541_v33 = vadd.f32 %v24789_v12, %v8690_v10  ;;  %v21544_v57 = vadd.f32 %v24789_v12, %v8691_v7  ;;  %v21547_v4 = vadd.f32 %v24789_v12, %v8692_v43 }
 0xc13   :  { %24792 = vst [vmem:[#allocation18_spill] sm:$0xff] %v21529_v5  ;;  %24793 = vst [vmem:[#allocation21_spill] sm:$0xff] %v21532_v21  ;;  %v21550_v62 = vadd.f32 %v24789_v12, %v8693_v58  ;;  %v21553_v26 = vadd.f32 %v24789_v12, %v8694_v41  ;;  %v21556_v44 = vadd.f32 %v24789_v12, %v8695_v51  ;;  %v24808_v51 = vld [vmem:[#allocation53_spill] sm:$0xff]  ;;  %vm8780_vm15 = vcmp.ge.f32.partialorder %v21409_v39, 0.0 }
 0xc14   :  { %24794 = vst [vmem:[#allocation16_spill] sm:$0xff] %v21535_v19  ;;  %24795 = vst [vmem:[#allocation19_spill] sm:$0xff] %v21538_v52  ;;  %v21559_v17 = vadd.f32 %v24789_v12, %v8696_v50  ;;  %v21562_v10 = vadd.f32 %v24789_v12, %v8697_v22  ;;  %v21565_v7 = vadd.f32 %v24789_v12, %v8698_v38  ;;  %v24810_v50 = vld [vmem:[#allocation56_spill] sm:$0xff]  ;;  %v24811_v22 = vld [vmem:[#allocation57_spill] sm:$0xff]  ;;  %vm8781_vm0 = vcmp.ge.f32.partialorder %v21412_v20, 0.0 }
 0xc15   :  { %24796 = vst [vmem:[#allocation20_spill] sm:$0xff] %v21541_v33  ;;  %24797 = vst [vmem:[#allocation22_spill] sm:$0xff] %v21544_v57  ;;  %v21568_v43 = vadd.f32 %v24789_v12, %v8699_v1  ;;  %v21571_v58 = vadd.f32 %v24789_v12, %v8701_v25  ;;  %v21574_v41 = vadd.f32 %v24789_v12, %v8702_v31  ;;  %v24812_v38 = vld [vmem:[#allocation61_spill] sm:$0xff]  ;;  %v24814_v25 = vld [vmem:[#allocation75_spill] sm:$0xff]  ;;  %vm8782_vm1 = vcmp.ge.f32.partialorder %v21415_v18, 0.0 }
 0xc16   :  { %24798 = vst [vmem:[#allocation23_spill] sm:$0xff] %v21547_v4  ;;  %24799 = vst [vmem:[#allocation26_spill] sm:$0xff] %v21550_v62  ;;  %v24813_v1 = vld [vmem:[#allocation73_spill] sm:$0xff]  ;;  %v24815_v31 = vld [vmem:[#allocation70_spill] sm:$0xff]  ;;  %vm8783_vm2 = vcmp.ge.f32.partialorder %v21418_v35, 0.0  ;;  %vm8784_vm5 = vcmp.ge.f32.partialorder %v21421_v36, 0.0 }
 0xc17   :  { %24800 = vst [vmem:[#allocation27_spill] sm:$0xff] %v21553_v26  ;;  %24801 = vst [vmem:[#allocation30_spill] sm:$0xff] %v21556_v44  ;;  %v24809_v44 = vld [vmem:[#allocation63_spill] sm:$0xff]  ;;  %vm8785_vm6 = vcmp.ge.f32.partialorder %v21424_v2, 0.0  ;;  %vm8786_vm7 = vcmp.ge.f32.partialorder %v21427_v34, 0.0 }
 0xc18   :  { %24802 = vst [vmem:[#allocation31_spill] sm:$0xff] %v21559_v17  ;;  %24803 = vst [vmem:[#allocation34_spill] sm:$0xff] %v21562_v10  ;;  %v8569_v26 = vmul.f32 %v24809_v44, %v24808_v51  ;;  %v8570_v17 = vmul.f32 %v24809_v44, %v24810_v50  ;;  %v8571_v10 = vmul.f32 %v24809_v44, %v24811_v22  ;;  %v21618_v52 = vmul.f32 0.2, %v21421_v36 }
 0xc19   :  { %24804 = vst [vmem:[#allocation35_spill] sm:$0xff] %v21565_v7  ;;  %24805 = vst [vmem:[#allocation38_spill] sm:$0xff] %v21568_v43  ;;  %v8572_v7 = vmul.f32 %v24809_v44, %v24812_v38  ;;  %v8573_v43 = vmul.f32 %v24809_v44, %v24813_v1  ;;  %v21621_v19 = vmul.f32 0.2, %v21424_v2  ;;  %v21629_v21 = vmul.f32 0.2, %v21430_v49 }
 0xc1a   :  { %24806 = vst [vmem:[#allocation40_spill] sm:$0xff] %v21571_v58  ;;  %24807 = vst [vmem:[#allocation43_spill] sm:$0xff] %v21574_v41  ;;  %v8574_v58 = vmul.f32 %v24809_v44, %v24814_v25  ;;  %v8639_v41 = vmul.f32 %v24815_v31, %v8569_v26  ;;  %v8640_v62 = vmul.f32 %v24815_v31, %v8570_v17  ;;  %v8844_v25 = vmul.f32 0.2, %v21409_v39 }
 0xc1b   :  { %v8641_v51 = vmul.f32 %v24815_v31, %v8571_v10  ;;  %v8642_v50 = vmul.f32 %v24815_v31, %v8572_v7  ;;  %v8643_v4 = vmul.f32 %v24815_v31, %v8573_v43  ;;  %v24816_v10 = vld [vmem:[#allocation78_spill] sm:$0xff]  ;;  %v21640_v5 = vmul.f32 0.2, %v21439_v42 }
 0xc1c   :  { %v8644_v22 = vmul.f32 %v24815_v31, %v8574_v58  ;;  %v8709_v38 = vadd.f32 %v24789_v12, %v8639_v41  ;;  %v8710_v57 = vadd.f32 %v24789_v12, %v8640_v62  ;;  %vm8779_vm14 = vcmp.ge.f32.partialorder %v24816_v10, 0.0 }
 0xc1d   :  { %v8711_v1 = vadd.f32 %v24789_v12, %v8641_v51  ;;  %v8712_v44 = vadd.f32 %v24789_v12, %v8642_v50  ;;  %v8713_v26 = vadd.f32 %v24789_v12, %v8643_v4  ;;  %v8843_v41 = vmul.f32 0.2, %v24816_v10 }
 0xc1e   :  { %v8714_v17 = vadd.f32 %v24789_v12, %v8644_v22  ;;  %vm8773_vm8 = vcmp.ge.f32.partialorder %v8709_v38, 0.0  ;;  %vm8774_vm9 = vcmp.ge.f32.partialorder %v8710_v57, 0.0  ;;  %v8837_v62 = vmul.f32 0.2, %v8709_v38 }
 0xc1f   :  { %vm8775_vm10 = vcmp.ge.f32.partialorder %v8711_v1, 0.0  ;;  %vm8776_vm11 = vcmp.ge.f32.partialorder %v8712_v44, 0.0  ;;  %vm8777_vm12 = vcmp.ge.f32.partialorder %v8713_v26, 0.0  ;;  %v8838_v7 = vmul.f32 0.2, %v8710_v57 }
 0xc20   :  { %vm8778_vm13 = vcmp.ge.f32.partialorder %v8714_v17, 0.0  ;;  %v8839_v4 = vmul.f32 0.2, %v8711_v1  ;;  %v8840_v12 = vmul.f32 0.2, %v8712_v44  ;;  %v8901_v31 = vsel %vm8773_vm8, %v8709_v38, %v8837_v62 }
 0xc21   :  { %v8841_v43 = vmul.f32 0.2, %v8713_v26  ;;  %v8842_v58 = vmul.f32 0.2, %v8714_v17  ;;  %v8845_v51 = vmul.f32 0.2, %v21412_v20  ;;  %v8902_v33 = vsel %vm8774_vm9, %v8710_v57, %v8838_v7 }
 0xc22   :  { %v8846_v50 = vmul.f32 0.2, %v21415_v18  ;;  %v21613_v22 = vmul.f32 0.2, %v21418_v35  ;;  %8966 = vst [vmem:[#allocation4 + $0x19] sm:$0xff] %v8901_v31  ;;  %v8903_v62 = vsel %vm8775_vm10, %v8711_v1, %v8839_v4  ;;  %8967 = vst [vmem:[#allocation4 + $0x21] sm:$0xff] %v8902_v33  ;;  %v8904_v31 = vsel %vm8776_vm11, %v8712_v44, %v8840_v12 }
 0xc23   :  { %v21624_v38 = vmul.f32 0.2, %v21427_v34  ;;  %vm8787_vm8 = vcmp.ge.f32.partialorder %v21430_v49, 0.0  ;;  %v21632_v57 = vmul.f32 0.2, %v21433_v8  ;;  %8968 = vst [vmem:[#allocation4 + $0x31] sm:$0xff] %v8903_v62  ;;  %v8905_v4 = vsel %vm8777_vm12, %v8713_v26, %v8841_v43 }
 0xc24   :  { %v21635_v7 = vmul.f32 0.2, %v21436_v30  ;;  %vm8788_vm9 = vcmp.ge.f32.partialorder %v21433_v8, 0.0  ;;  %v21643_v33 = vmul.f32 0.2, %v21442_v47  ;;  %8969 = vst [vmem:[#allocation4 + $0x39] sm:$0xff] %v8904_v31  ;;  %v8906_v62 = vsel %vm8778_vm13, %v8714_v17, %v8842_v58 }
 0xc25   :  { %v21646_v1 = vmul.f32 0.2, %v21445_v11  ;;  %vm8789_vm10 = vcmp.ge.f32.partialorder %v21436_v30, 0.0  ;;  %v21654_v44 = vmul.f32 0.2, %v21451_v63  ;;  %8970 = vst [vmem:[#allocation4 + $0x49] sm:$0xff] %v8905_v4  ;;  %v8907_v31 = vsel %vm8779_vm14, %v24816_v10, %v8843_v41 }
 0xc26   :  { %24817 = vst [vmem:[#allocation46_spill] sm:$0xff] %v21635_v7  ;;  %v21651_v7 = vmul.f32 0.2, %v21448_v15  ;;  %v21657_v12 = vmul.f32 0.2, %v21454_v56  ;;  %vm8790_vm11 = vcmp.ge.f32.partialorder %v21439_v42, 0.0 }
 0xc27   :  { %24818 = vst [vmem:[#allocation54_spill] sm:$0xff] %v21646_v1  ;;  %v21662_v1 = vmul.f32 0.2, %v21457_v9  ;;  %v21665_v26 = vmul.f32 0.2, %v21460_v59  ;;  %8971 = vst [vmem:[#allocation4 + $0x51] sm:$0xff] %v8906_v62 }
 0xc28   :  { %v21668_v43 = vmul.f32 0.2, %v21463_v32  ;;  %vm8791_vm12 = vcmp.ge.f32.partialorder %v21442_v47, 0.0  ;;  %v21675_v17 = vmul.f32 0.2, %v21466_v0  ;;  %8972 = vst [vmem:[#allocation4 + $0x61] sm:$0xff] %v8907_v31 }
 0xc29   :  { %v21678_v58 = vmul.f32 0.2, %v21469_v23  ;;  %v21681_v4 = vmul.f32 0.2, %v21472_v53  ;;  %vm8792_vm13 = vcmp.ge.f32.partialorder %v21445_v11, 0.0  ;;  %vm24858_vm14 = vcmp.ge.f32.partialorder %v21448_v15, 0.0 }
 0xc2a   :  { %24819 = vst [vmem:[#allocation65_spill] sm:$0xff] %v21668_v43  ;;  %v8908_v43 = vsel %vm8780_vm15, %v21409_v39, %v8844_v25  ;;  %v21690_v10 = vmul.f32 0.2, %v21475_v16  ;;  %v21693_v41 = vmul.f32 0.2, %v21478_v55  ;;  %v8909_v39 = vsel %vm8781_vm0, %v21412_v20, %v8845_v51 }
 0xc2b   :  { %v21696_v62 = vmul.f32 0.2, %v21481_v46  ;;  %8973 = vst [vmem:[#allocation4 + $0x69] sm:$0xff] %v8908_v43  ;;  %vm8795_vm15 = vcmp.ge.f32.partialorder %v21454_v56, 0.0  ;;  %v21706_v25 = vmul.f32 0.2, %v21484_v24  ;;  %v8910_v20 = vsel %vm8782_vm1, %v21415_v18, %v8846_v50 }
 0xc2c   :  { %v21709_v31 = vmul.f32 0.2, %v21487_v60  ;;  %8974 = vst [vmem:[#allocation4 + $0x79] sm:$0xff] %v8909_v39  ;;  %vm8799_vm0 = vcmp.ge.f32.partialorder %v21466_v0, 0.0  ;;  %v21722_v51 = vmul.f32 0.2, %v21493_v48  ;;  %v8911_v18 = vsel %vm8783_vm2, %v21418_v35, %v21613_v22 }
 0xc2d   :  { %24820 = vst [vmem:[#allocation66_spill] sm:$0xff] %v21696_v62  ;;  %v21712_v62 = vmul.f32 0.2, %v21490_v61  ;;  %v21725_v43 = vmul.f32 0.2, %v21496_v6  ;;  %8975 = vst [vmem:[#allocation4 + $0x81] sm:$0xff] %v8910_v20  ;;  %v8912_v35 = vsel %vm8784_vm5, %v21421_v36, %v21618_v52  ;;  %v8913_v36 = vsel %vm8785_vm6, %v21424_v2, %v21621_v19 }
 0xc2e   :  { %vm8803_vm1 = vcmp.ge.f32.partialorder %v21478_v55, 0.0  ;;  %v21739_v50 = vmul.f32 0.2, %v21502_v13  ;;  %v21742_v39 = vmul.f32 0.2, %v21505_v14  ;;  %8976 = vst [vmem:[#allocation4 + $0x91] sm:$0xff] %v8911_v18  ;;  %v8914_v2 = vsel %vm8786_vm7, %v21427_v34, %v21624_v38 }
 0xc2f   :  { %24821 = vst [vmem:[#allocation79_spill] sm:$0xff] %v21712_v62  ;;  %v21728_v62 = vmul.f32 0.2, %v21499_v27  ;;  %vm8807_vm2 = vcmp.ge.f32.partialorder %v21490_v61, 0.0  ;;  %v21756_v22 = vmul.f32 0.2, %v21511_v54  ;;  %v8915_v34 = vsel %vm8787_vm8, %v21430_v49, %v21629_v21 }
 0xc30   :  { %v21759_v20 = vmul.f32 0.2, %v21514_v40  ;;  %8977 = vst [vmem:[#allocation4 + $0x99] sm:$0xff] %v8912_v35  ;;  %vm8811_vm5 = vcmp.ge.f32.partialorder %v21502_v13, 0.0  ;;  %v21773_v52 = vmul.f32 0.2, %v21520_v37  ;;  %v8916_v49 = vsel %vm8788_vm9, %v21433_v8, %v21632_v57 }
 0xc31   :  { %24822 = vst [vmem:[#allocation82_spill] sm:$0xff] %v21728_v62  ;;  %v21745_v62 = vmul.f32 0.2, %v21508_v45  ;;  %v21776_v18 = vmul.f32 0.2, %v21523_v29  ;;  %8978 = vst [vmem:[#allocation4 + $0xa9] sm:$0xff] %v8913_v36 }
 0xc32   :  { %24824 = vst [vmem:[#allocation68_spill] sm:$0xff] %v21759_v20  ;;  %24826 = vst [vmem:[#allocation28_spill] sm:$0xff] %v21773_v52  ;;  %vm8815_vm6 = vcmp.ge.f32.partialorder %v21514_v40, 0.0  ;;  %v24829_v19 = vld [vmem:[#allocation18_spill] sm:$0xff]  ;;  %vm8819_vm7 = vcmp.ge.f32.partialorder %v21526_v3, 0.0  ;;  %v24835_v38 = vld [vmem:[#allocation19_spill] sm:$0xff] }
 0xc33   :  { %24823 = vst [vmem:[#allocation67_spill] sm:$0xff] %v21745_v62  ;;  %v21762_v62 = vmul.f32 0.2, %v21517_v28  ;;  %24827 = vst [vmem:[#allocation32_spill] sm:$0xff] %v21776_v18  ;;  %v21790_v35 = vmul.f32 0.2, %v24829_v19 }
 0xc34   :  { %v24831_v18 = vld [vmem:[#allocation21_spill] sm:$0xff]  ;;  %8979 = vst [vmem:[#allocation4 + $0xb1] sm:$0xff] %v8914_v2  ;;  %v21807_v36 = vmul.f32 0.2, %v24835_v38  ;;  %8980 = vst [vmem:[#allocation4 + $0xc1] sm:$0xff] %v8915_v34  ;;  %vm8823_vm8 = vcmp.ge.f32.partialorder %v24835_v38, 0.0 }
 0xc35   :  { %24825 = vst [vmem:[#allocation81_spill] sm:$0xff] %v21762_v62  ;;  %v21779_v62 = vmul.f32 0.2, %v21526_v3  ;;  %24830 = vst [vmem:[#allocation29_spill] sm:$0xff] %v21790_v35  ;;  %v21793_v52 = vmul.f32 0.2, %v24831_v18 }
 0xc36   :  { %24836 = vst [vmem:[#allocation33_spill] sm:$0xff] %v21807_v36  ;;  %v24841_v21 = vld [vmem:[#allocation23_spill] sm:$0xff]  ;;  %v24847_v18 = vld [vmem:[#allocation46_spill] sm:$0xff]  ;;  %8981 = vst [vmem:[#allocation4 + $0xc9] sm:$0xff] %v8916_v49 }
 0xc37   :  { %24828 = vst [vmem:[#allocation25_spill] sm:$0xff] %v21779_v62  ;;  %24832 = vst [vmem:[#allocation36_spill] sm:$0xff] %v21793_v52  ;;  %v24833_v62 = vld [vmem:[#allocation16_spill] sm:$0xff]  ;;  %v21824_v2 = vmul.f32 0.2, %v24841_v21  ;;  %v8917_v8 = vsel %vm8789_vm10, %v21436_v30, %v24847_v18  ;;  %v24848_v57 = vld [vmem:[#allocation30_spill] sm:$0xff]  ;;  %v8918_v30 = vsel %vm8790_vm11, %v21439_v42, %v21640_v5  ;;  %v8919_v42 = vsel %vm8791_vm12, %v21442_v47, %v21643_v33 }
 0xc38   :  { %v21796_v20 = vmul.f32 0.2, %v24833_v62  ;;  %v24837_v52 = vld [vmem:[#allocation20_spill] sm:$0xff]  ;;  %v24849_v34 = vld [vmem:[#allocation31_spill] sm:$0xff]  ;;  %v21841_v21 = vmul.f32 0.2, %v24848_v57  ;;  %v8923_v33 = vsel %vm8795_vm15, %v21454_v56, %v21657_v12  ;;  %v8927_v56 = vsel %vm8799_vm0, %v21466_v0, %v21675_v17 }
 0xc39   :  { %v21810_v35 = vmul.f32 0.2, %v24837_v52  ;;  %24842 = vst [vmem:[#allocation49_spill] sm:$0xff] %v21824_v2  ;;  %8982 = vst [vmem:[#allocation4 + $0xd9] sm:$0xff] %v8917_v8  ;;  %v24853_v18 = vld [vmem:[#allocation35_spill] sm:$0xff]  ;;  %v24854_v49 = vld [vmem:[#allocation38_spill] sm:$0xff]  ;;  %v8931_v0 = vsel %vm8803_vm1, %v21478_v55, %v21693_v41 }
 0xc3a   :  { %24834 = vst [vmem:[#allocation39_spill] sm:$0xff] %v21796_v20  ;;  %v24839_v20 = vld [vmem:[#allocation22_spill] sm:$0xff]  ;;  %vm8832_vm4 = vcmp.ge.f32.partialorder %v24853_v18, 0.0  ;;  %vm8833_vm3 = vcmp.ge.f32.partialorder %v24854_v49, 0.0  ;;  %v24855_v57 = vld [vmem:[#allocation40_spill] sm:$0xff]  ;;  %8983 = vst [vmem:[#allocation4 + $0xe1] sm:$0xff] %v8918_v30 }
 0xc3b   :  { %24838 = vst [vmem:[#allocation37_spill] sm:$0xff] %v21810_v35  ;;  %v21813_v29 = vmul.f32 0.2, %v24839_v20  ;;  %v24843_v35 = vld [vmem:[#allocation26_spill] sm:$0xff]  ;;  %v24856_v5 = vld [vmem:[#allocation43_spill] sm:$0xff]  ;;  %vm24859_vm12 = vcmp.ge.f32.partialorder %v21451_v63, 0.0 }
 0xc3c   :  { %v21827_v36 = vmul.f32 0.2, %v24843_v35  ;;  %vm8827_vm9 = vcmp.ge.f32.partialorder %v24843_v35, 0.0  ;;  %vm8836_vm11 = vcmp.ge.f32.partialorder %v24856_v5, 0.0  ;;  %v21872_v8 = vmul.f32 0.2, %v24856_v5 }
 0xc3d   :  { %24840 = vst [vmem:[#allocation45_spill] sm:$0xff] %v21813_v29  ;;  %v24845_v29 = vld [vmem:[#allocation27_spill] sm:$0xff]  ;;  %v8922_v47 = vsel %vm24859_vm12, %v21451_v63, %v21654_v44  ;;  %8984 = vst [vmem:[#allocation4 + $0xf1] sm:$0xff] %v8919_v42  ;;  %vm24863_vm12 = vcmp.ge.f32.partialorder %v21463_v32, 0.0  ;;  %vm24864_vm15 = vcmp.ge.f32.partialorder %v21469_v23, 0.0  ;;  %vm24868_vm0 = vcmp.ge.f32.partialorder %v21481_v46, 0.0 }
 0xc3e   :  { %24844 = vst [vmem:[#allocation44_spill] sm:$0xff] %v21827_v36  ;;  %v21830_v62 = vmul.f32 0.2, %v24845_v29  ;;  %v21844_v36 = vmul.f32 0.2, %v24849_v34  ;;  %8987 = vst [vmem:[#allocation4 + $0x111] sm:$0xff] %v8922_v47 }
 0xc3f   :  { %v21858_v34 = vmul.f32 0.2, %v24853_v18  ;;  %8988 = vst [vmem:[#allocation4 + $0x121] sm:$0xff] %v8923_v33  ;;  %8992 = vst [vmem:[#allocation4 + $0x151] sm:$0xff] %v8927_v56  ;;  %v24871_v55 = vld [vmem:[#allocation79_spill] sm:$0xff]  ;;  %vm24872_vm1 = vcmp.ge.f32.partialorder %v21493_v48, 0.0 }
 0xc40   :  { %24846 = vst [vmem:[#allocation48_spill] sm:$0xff] %v21830_v62  ;;  %24850 = vst [vmem:[#allocation52_spill] sm:$0xff] %v21844_v36  ;;  %v24851_v62 = vld [vmem:[#allocation34_spill] sm:$0xff]  ;;  %v21861_v36 = vmul.f32 0.2, %v24854_v49  ;;  %v8935_v44 = vsel %vm8807_vm2, %v21490_v61, %v24871_v55  ;;  %v8939_v61 = vsel %vm8811_vm5, %v21502_v13, %v21739_v50  ;;  %vm24876_vm2 = vcmp.ge.f32.partialorder %v21505_v14, 0.0 }
 0xc41   :  { %v21847_v2 = vmul.f32 0.2, %v24851_v62  ;;  %vm8831_vm10 = vcmp.ge.f32.partialorder %v24851_v62, 0.0  ;;  %v24857_v62 = vld [vmem:[#allocation54_spill] sm:$0xff]  ;;  %8996 = vst [vmem:[#allocation4 + $0x181] sm:$0xff] %v8931_v0  ;;  %9000 = vst [vmem:[#allocation4 + $0x1e1] sm:$0xff] %v8935_v44 }
 0xc42   :  { %v8920_v49 = vsel %vm8792_vm13, %v21445_v11, %v24857_v62  ;;  %vm24860_vm13 = vcmp.ge.f32.partialorder %v21457_v9, 0.0  ;;  %v24880_v13 = vld [vmem:[#allocation68_spill] sm:$0xff]  ;;  %vm24882_vm5 = vcmp.ge.f32.partialorder %v21517_v28, 0.0  ;;  %9004 = vst [vmem:[#allocation4 + $0x211] sm:$0xff] %v8939_v61  ;;  %v24902_v42 = vld [vmem:[#allocation49_spill] sm:$0xff]  ;;  %v24903_v47 = vld [vmem:[#allocation23_spill] sm:$0xff] }
 0xc43   :  { %24852 = vst [vmem:[#allocation17_spill] sm:$0xff] %v21847_v2  ;;  %v21864_v2 = vmul.f32 0.2, %v24855_v57  ;;  %v8921_v57 = vsel %vm24858_vm14, %v21448_v15, %v21651_v7  ;;  %v8924_v11 = vsel %vm24860_vm13, %v21457_v9, %v21662_v1  ;;  %vm24861_vm14 = vcmp.ge.f32.partialorder %v21460_v59, 0.0  ;;  %v24862_v7 = vld [vmem:[#allocation65_spill] sm:$0xff]  ;;  %8985 = vst [vmem:[#allocation4 + $0xf9] sm:$0xff] %v8920_v49 }
 0xc44   :  { %v8925_v15 = vsel %vm24861_vm14, %v21460_v59, %v21665_v26  ;;  %v8926_v63 = vsel %vm24863_vm12, %v21463_v32, %v24862_v7  ;;  %8986 = vst [vmem:[#allocation4 + $0x109] sm:$0xff] %v8921_v57  ;;  %v8928_v9 = vsel %vm24864_vm15, %v21469_v23, %v21678_v58  ;;  %vm24865_vm13 = vcmp.ge.f32.partialorder %v21472_v53, 0.0  ;;  %8989 = vst [vmem:[#allocation4 + $0x129] sm:$0xff] %v8924_v11  ;;  %v24867_v23 = vld [vmem:[#allocation66_spill] sm:$0xff]  ;;  %v24895_v50 = vld [vmem:[#allocation16_spill] sm:$0xff] }
 0xc45   :  { %v8929_v59 = vsel %vm24865_vm13, %v21472_v53, %v21681_v4  ;;  %vm24866_vm14 = vcmp.ge.f32.partialorder %v21475_v16, 0.0  ;;  %8990 = vst [vmem:[#allocation4 + $0x139] sm:$0xff] %v8925_v15  ;;  %8991 = vst [vmem:[#allocation4 + $0x141] sm:$0xff] %v8926_v63  ;;  %v8932_v1 = vsel %vm24868_vm0, %v21481_v46, %v24867_v23  ;;  %vm24869_vm12 = vcmp.ge.f32.partialorder %v21484_v24, 0.0  ;;  %v24900_v30 = vld [vmem:[#allocation45_spill] sm:$0xff]  ;;  %v22016_v11 = vld [vmem:[#allocation4 + $0x20] sm:$0xff] }
 0xc46   :  { %v8930_v32 = vsel %vm24866_vm14, %v21475_v16, %v21690_v10  ;;  %v8933_v53 = vsel %vm24869_vm12, %v21484_v24, %v21706_v25  ;;  %vm24870_vm15 = vcmp.ge.f32.partialorder %v21487_v60, 0.0  ;;  %8993 = vst [vmem:[#allocation4 + $0x159] sm:$0xff] %v8928_v9  ;;  %8994 = vst [vmem:[#allocation4 + $0x169] sm:$0xff] %v8929_v59  ;;  %v8936_v46 = vsel %vm24872_vm1, %v21493_v48, %v21722_v51  ;;  %v24886_v10 = vld [vmem:[#allocation24_spill] sm:$0xff]  ;;  %v22018_v15 = vld [vmem:[#allocation4 + $0x28] sm:$0x3] }
 0xc47   :  { %v8934_v16 = vsel %vm24870_vm15, %v21487_v60, %v21709_v31  ;;  %8995 = vst [vmem:[#allocation4 + $0x171] sm:$0xff] %v8930_v32  ;;  %vm24873_vm13 = vcmp.ge.f32.partialorder %v21496_v6, 0.0  ;;  %v24874_v60 = vld [vmem:[#allocation82_spill] sm:$0xff]  ;;  %vm24875_vm14 = vcmp.ge.f32.partialorder %v21499_v27, 0.0  ;;  %8997 = vst [vmem:[#allocation4 + $0x189] sm:$0xff] %v8932_v1  ;;  %v8940_v48 = vsel %vm24876_vm2, %v21505_v14, %v21742_v39  ;;  %v24881_v14 = vld [vmem:[#allocation81_spill] sm:$0xff] }
 0xc48   :  { %v8937_v24 = vsel %vm24873_vm13, %v21496_v6, %v21725_v43  ;;  %v8938_v12 = vsel %vm24875_vm14, %v21499_v27, %v24874_v60  ;;  %8998 = vst [vmem:[#allocation4 + $0x1c9] sm:$0xff] %v8933_v53  ;;  %8999 = vst [vmem:[#allocation4 + $0x1d1] sm:$0xff] %v8934_v16  ;;  %v24877_v6 = vld [vmem:[#allocation67_spill] sm:$0xff]  ;;  %vm24878_vm0 = vcmp.ge.f32.partialorder %v21508_v45, 0.0  ;;  %vm24879_vm12 = vcmp.ge.f32.partialorder %v21511_v54, 0.0  ;;  %v24892_v31 = vld [vmem:[#allocation21_spill] sm:$0xff] }
 0xc49   :  { %v8941_v26 = vsel %vm24878_vm0, %v21508_v45, %v24877_v6  ;;  %v8942_v27 = vsel %vm24879_vm12, %v21511_v54, %v21756_v22  ;;  %9001 = vst [vmem:[#allocation4 + $0x1e9] sm:$0xff] %v8936_v46  ;;  %9002 = vst [vmem:[#allocation4 + $0x1f9] sm:$0xff] %v8937_v24  ;;  %v8943_v17 = vsel %vm8815_vm6, %v21514_v40, %v24880_v13  ;;  %v24883_v45 = vld [vmem:[#allocation28_spill] sm:$0xff]  ;;  %vm24884_vm15 = vcmp.ge.f32.partialorder %v21520_v37, 0.0  ;;  %v24888_v40 = vld [vmem:[#allocation25_spill] sm:$0xff] }
 0xc4a   :  { %9003 = vst [vmem:[#allocation4 + $0x201] sm:$0xff] %v8938_v12  ;;  %v8944_v58 = vsel %vm24882_vm5, %v21517_v28, %v24881_v14  ;;  %v8945_v4 = vsel %vm24884_vm15, %v21520_v37, %v24883_v45  ;;  %v24885_v54 = vld [vmem:[#allocation32_spill] sm:$0xff]  ;;  %vm24887_vm1 = vcmp.ge.f32.partialorder %v24886_v10, 0.0  ;;  %9005 = vst [vmem:[#allocation4 + $0x219] sm:$0xff] %v8940_v48  ;;  %v8947_v62 = vsel %vm8819_vm7, %v21526_v3, %v24888_v40  ;;  %v24889_v28 = vld [vmem:[#allocation29_spill] sm:$0xff] }
 0xc4b   :  { %v8946_v41 = vsel %vm24887_vm1, %v24886_v10, %v24885_v54  ;;  %9006 = vst [vmem:[#allocation4 + $0x229] sm:$0xff] %v8941_v26  ;;  %9007 = vst [vmem:[#allocation4 + $0x231] sm:$0xff] %v8942_v27  ;;  %vm24890_vm6 = vcmp.ge.f32.partialorder %v24829_v19, 0.0  ;;  %v24891_v37 = vld [vmem:[#allocation36_spill] sm:$0xff]  ;;  %vm24893_vm13 = vcmp.ge.f32.partialorder %v24892_v31, 0.0  ;;  %v24894_v43 = vld [vmem:[#allocation39_spill] sm:$0xff]  ;;  %v8964_v24 = vsel %vm8836_vm11, %v24856_v5, %v21872_v8 }
 0xc4c   :  { %v8948_v25 = vsel %vm24890_vm6, %v24829_v19, %v24889_v28  ;;  %v8949_v51 = vsel %vm24893_vm13, %v24892_v31, %v24891_v37  ;;  %vm24896_vm14 = vcmp.ge.f32.partialorder %v24895_v50, 0.0  ;;  %9008 = vst [vmem:[#allocation4 + $0x241] sm:$0xff] %v8943_v17  ;;  %9009 = vst [vmem:[#allocation4 + $0x249] sm:$0xff] %v8944_v58  ;;  %v24897_v3 = vld [vmem:[#allocation33_spill] sm:$0xff]  ;;  %vm24899_vm7 = vcmp.ge.f32.partialorder %v24837_v52, 0.0  ;;  %v24906_v7 = vld [vmem:[#allocation48_spill] sm:$0xff] }
 0xc4d   :  { %v8950_v39 = vsel %vm24896_vm14, %v24895_v50, %v24894_v43  ;;  %9010 = vst [vmem:[#allocation4 + $0x259] sm:$0xff] %v8945_v4  ;;  %9011 = vst [vmem:[#allocation4 + $0x261] sm:$0xff] %v8946_v41  ;;  %v8951_v22 = vsel %vm8823_vm8, %v24835_v38, %v24897_v3  ;;  %v24898_v19 = vld [vmem:[#allocation37_spill] sm:$0xff]  ;;  %vm24901_vm2 = vcmp.ge.f32.partialorder %v24839_v20, 0.0  ;;  %vm24904_vm0 = vcmp.ge.f32.partialorder %v24903_v47, 0.0  ;;  %v22014_v38 = vld [vmem:[#allocation4 + $0x18] sm:$0xff] }
 0xc4e   :  { %v8952_v57 = vsel %vm24899_vm7, %v24837_v52, %v24898_v19  ;;  %v8953_v49 = vsel %vm24901_vm2, %v24839_v20, %v24900_v30  ;;  %v8954_v33 = vsel %vm24904_vm0, %v24903_v47, %v24902_v42  ;;  %9012 = vst [vmem:[#allocation4 + $0x271] sm:$0xff] %v8947_v62  ;;  %9013 = vst [vmem:[#allocation4 + $0x279] sm:$0xff] %v8948_v25  ;;  %v24905_v52 = vld [vmem:[#allocation44_spill] sm:$0xff]  ;;  %vm24907_vm8 = vcmp.ge.f32.partialorder %v24845_v29, 0.0  ;;  %v24908_v56 = vld [vmem:[#allocation30_spill] sm:$0xff] }
 0xc4f   :  { %9014 = vst [vmem:[#allocation4 + $0x289] sm:$0xff] %v8949_v51  ;;  %9015 = vst [vmem:[#allocation4 + $0x291] sm:$0xff] %v8950_v39  ;;  %v8955_v20 = vsel %vm8827_vm9, %v24843_v35, %v24905_v52  ;;  %v8956_v63 = vsel %vm24907_vm8, %v24845_v29, %v24906_v7  ;;  %vm24909_vm12 = vcmp.ge.f32.partialorder %v24908_v56, 0.0  ;;  %v24910_v59 = vld [vmem:[#allocation52_spill] sm:$0xff]  ;;  %v24911_v32 = vld [vmem:[#allocation31_spill] sm:$0xff] }
 0xc50   :  { %v8957_v9 = vsel %vm24909_vm12, %v24908_v56, %v21841_v21  ;;  %vm24912_vm5 = vcmp.ge.f32.partialorder %v24911_v32, 0.0  ;;  %9016 = vst [vmem:[#allocation4 + $0x2a1] sm:$0xff] %v8951_v22  ;;  %9017 = vst [vmem:[#allocation4 + $0x2a9] sm:$0xff] %v8952_v57  ;;  %v22036_v35 = vld [vmem:[#allocation4 + $0x30] sm:$0xff]  ;;  %v22038_v23 = vld [vmem:[#allocation4 + $0x38] sm:$0xff]  ;;  %v8960_v21 = vsel %vm8832_vm4, %v24853_v18, %v21858_v34  ;;  %v9373_v34 = vrot.slane %v22016_v11, 1 }
 0xc51   :  { %v8958_v0 = vsel %vm24912_vm5, %v24911_v32, %v24910_v59  ;;  %9018 = vst [vmem:[#allocation4 + $0x2b9] sm:$0xff] %v8953_v49  ;;  %9019 = vst [vmem:[#allocation4 + $0x2c1] sm:$0xff] %v8954_v33  ;;  %v24913_v1 = vld [vmem:[#allocation17_spill] sm:$0xff]  ;;  %v24914_v29 = vld [vmem:[#allocation34_spill] sm:$0xff]  ;;  %v9375_v18 = vrot.slane %v22018_v15, 1  ;;  %v9377_v48 = vrot.slane %v22036_v35, 1 }
 0xc52   :  { %v8959_v53 = vsel %vm8831_vm10, %v24914_v29, %v24913_v1  ;;  %v24915_v16 = vld [vmem:[#allocation38_spill] sm:$0xff]  ;;  %v24916_v44 = vld [vmem:[#allocation40_spill] sm:$0xff]  ;;  %9020 = vst [vmem:[#allocation4 + $0x2d1] sm:$0xff] %v8955_v20  ;;  %9021 = vst [vmem:[#allocation4 + $0x2d9] sm:$0xff] %v8956_v63  ;;  %v9378_v5 = vrot.slane %v22038_v23, 1 }
 0xc53   :  { %v8961_v55 = vsel %vm8833_vm3, %v24915_v16, %v21861_v36  ;;  %vm24917_vm9 = vcmp.ge.f32.partialorder %v24916_v44, 0.0  ;;  %9022 = vst [vmem:[#allocation4 + $0x2e9] sm:$0xff] %v8957_v9  ;;  %9023 = vst [vmem:[#allocation4 + $0x2f1] sm:$0xff] %v8958_v0  ;;  %v9372_v36 = vrot.slane %v22014_v38, 1  ;;  %v9175_v60 = vld [vmem:[#allocation4 + $0x1e0] sm:$0xff]  ;;  %v9176_v12 = vld [vmem:[#allocation4 + $0x1e8] sm:$0xff] }
 0xc54   :  { %v8963_v46 = vsel %vm24917_vm9, %v24916_v44, %v21864_v2  ;;  %9024 = vst [vmem:[#allocation4 + $0x301] sm:$0xff] %v8959_v53  ;;  %9025 = vst [vmem:[#allocation4 + $0x309] sm:$0xff] %v8960_v21  ;;  %v22063_v2 = vld [vmem:[#allocation4 + $0x40] sm:$0x3]  ;;  %v9177_v61 = vld [vmem:[#allocation4 + $0x1f0] sm:$0x3] }
 0xc55   :  { %9026 = vst [vmem:[#allocation4 + $0x319] sm:$0xff] %v8961_v55  ;;  %9028 = vst [vmem:[#allocation4 + $0x331] sm:$0xff] %v8963_v46  ;;  %vm24918_vm3 = vcmask 1046528   ;;  %v9457_v26 = vrot.slane %v9175_v60, 1  ;;  %v9458_v27 = vrot.slane %v9176_v12, 1  ;;  %v9178_v13 = vld [vmem:[#allocation4 + $0x1f8] sm:$0xff] }
 0xc56   :  { %9029 = vst [vmem:[#allocation4 + $0x339] sm:$0xff] %v8964_v24  ;;  %v9374_v8 = vsel %vm24918_vm3, %v9372_v36, %v9373_v34  ;;  %vm24919_vm4 = vmmov %vm24918_vm3  ;;  %v9179_v17 = vld [vmem:[#allocation4 + $0x200] sm:$0xff]  ;;  %v9180_v14 = vld [vmem:[#allocation4 + $0x208] sm:$0x3]  ;;  %v9460_v45 = vrot.slane %v9177_v61, 1  ;;  %v9380_v54 = vrot.slane %v22063_v2, 1 }
 0xc57   :  { %v9376_v6 = vsel %vm24919_vm4, %v9373_v34, %v9375_v18  ;;  %vm24921_vm10 = vmmov %vm24918_vm3  ;;  %v9181_v10 = vld [vmem:[#allocation4 + $0x210] sm:$0xff]  ;;  %v9182_v41 = vld [vmem:[#allocation4 + $0x218] sm:$0xff]  ;;  %v9462_v28 = vrot.slane %v9178_v13, 1  ;;  %v9463_v25 = vrot.slane %v9179_v17, 1  ;;  %v9465_v37 = vrot.slane %v9180_v14, 1 }
 0xc58   :  { %v22069_v58 = vpack.c.bf16 %v9376_v6, %v9374_v8  ;;  %v9379_v4 = vsel %vm24921_vm10, %v9377_v48, %v9378_v5  ;;  %v22073_v40 = vld [vmem:[#allocation4 + $0x48] sm:$0xff]  ;;  %vm24922_vm11 = vmmov %vm24918_vm3  ;;  %v9183_v31 = vld [vmem:[#allocation4 + $0x220] sm:$0x3]  ;;  %v9467_v39 = vrot.slane %v9181_v10, 1  ;;  %v9468_v3 = vrot.slane %v9182_v41, 1 }
 0xc59   :  { %v9459_v62 = vsel %vm24922_vm11, %v9457_v26, %v9458_v27  ;;  %v22076_v51 = vld [vmem:[#allocation4 + $0x50] sm:$0xff]  ;;  %vm24923_vm15 = vmmov %vm24918_vm3  ;;  %v22081_v22 = vld [vmem:[#allocation4 + $0x58] sm:$0x3]  ;;  %v9470_v56 = vrot.slane %v9183_v31, 1  ;;  %v9382_v9 = vrot.slane %v22073_v40, 1 }
 0xc5a   :  { %24920 = vst [vmem:[#allocation47_spill] sm:$0xff] %v22069_v58  ;;  %16466 = vmatmul.mubr.bf16.vlgmr.msra.gmra.mrb[160].mxu0 %v22069_v58  ;;  %v9461_v43 = vsel %vm24923_vm15, %v9458_v27, %v9460_v45  ;;  %vm24924_vm1 = vmmov %vm24918_vm3  ;;  %v22083_v19 = vld [vmem:[#allocation4 + $0x60] sm:$0xff]  ;;  %v22085_v57 = vld [vmem:[#allocation4 + $0x68] sm:$0xff]  ;;  %v9383_v0 = vrot.slane %v22076_v51, 1  ;;  %v9385_v1 = vrot.slane %v22081_v22, 1 }
 0xc5b   :  { %v9381_v50 = vsel %vm24924_vm1, %v9378_v5, %v9380_v54  ;;  %v22087_v30 = vpack.c.bf16 %v9461_v43, %v9459_v62  ;;  %vm24927_vm6 = vmmov %vm24924_vm1  ;;  %v22093_v33 = vld [vmem:[#allocation4 + $0x70] sm:$0x3]  ;;  %v22095_v52 = vld [vmem:[#allocation4 + $0x228] sm:$0xff]  ;;  %v9387_v29 = vrot.slane %v22083_v19, 1  ;;  %v9388_v53 = vrot.slane %v22085_v57, 1 }
 0xc5c   :  { %v22089_v49 = vpack.c.bf16 %v9381_v50, %v9379_v4  ;;  %v9464_v42 = vsel %vm24927_vm6, %v9462_v28, %v9463_v25  ;;  %vm24928_vm13 = vmmov %vm24924_vm1  ;;  %24929 = vst [vmem:[#allocation80_spill] sm:$0xff] %v22095_v52  ;;  %v22097_v20 = vld [vmem:[#allocation4 + $0x230] sm:$0xff]  ;;  %v18540_v59 = vld [vmem:[#allocation12 + $0x8] sm:$0xff]   ;;  %v9390_v55 = vrot.slane %v22093_v33, 1  ;;  %v9472_v44 = vrot.slane %v22095_v52, 1 }
 0xc5d   :  { %24925 = vst [vmem:[#allocation50_spill] sm:$0xff] %v22087_v30  ;;  %v9466_v47 = vsel %vm24928_vm13, %v9463_v25, %v9465_v37  ;;  %24930 = vst [vmem:[#allocation74_spill] sm:$0xff] %v22097_v20  ;;  %v22103_v32 = vld [vmem:[#allocation4 + $0x240] sm:$0xff]  ;;  %16501 = vmatprep.mubr.bf16.mxu1 %v22087_v30  ;;  %v9186_v21 = vld [vmem:[#allocation4 + $0x238] sm:$0x3]  ;;  %v9473_v46 = vrot.slane %v22097_v20, 1 }
 0xc5e   :  { %24926 = vst [vmem:[#allocation51_spill] sm:$0xff] %v22089_v49  ;;  %v22099_v7 = vpack.c.bf16 %v9466_v47, %v9464_v42  ;;  %vm24932_vm14 = vmmov %vm24924_vm1  ;;  %16469 = vmatprep.mubr.bf16.mxu0 %v22089_v49  ;;  %v22116_v24 = vld [vmem:[#allocation4 + $0x248] sm:$0xff]  ;;  %v9189_v36 = vld [vmem:[#allocation4 + $0x250] sm:$0x3]  ;;  %v9475_v13 = vrot.slane %v9186_v21, 1  ;;  %v9477_v4 = vrot.slane %v22103_v32, 1 }
 0xc5f   :  { %v9469_v63 = vsel %vm24932_vm14, %v9467_v39, %v9468_v3  ;;  %24933 = vst [vmem:[#allocation42_spill] sm:$0xff] %v22103_v32  ;;  %vm24934_vm7 = vmmov %vm24924_vm1  ;;  %v18748_v18 = vld [vmem:[#allocation12] sm:$0xff]   ;;  %v22123_v48 = vld [vmem:[#allocation4 + $0x78] sm:$0xff]  ;;  %v9478_v54 = vrot.slane %v22116_v24, 1  ;;  %v9480_v10 = vrot.slane %v9189_v36, 1 }
 0xc60   :  { %24931 = vst [vmem:[#allocation76_spill] sm:$0xff] %v22099_v7  ;;  %16502 = vmatmul.mubr.bf16.vlgmr.msra.gmra.mrb[32].mxu1 %v22099_v7  ;;  %v9471_v16 = vsel %vm24934_vm7, %v9468_v3, %v9470_v56  ;;  %24935 = vst [vmem:[#allocation55_spill] sm:$0xff] %v22116_v24  ;;  %v22125_v5 = vld [vmem:[#allocation4 + $0x80] sm:$0xff]  ;;  %v22127_v8 = vld [vmem:[#allocation4 + $0x88] sm:$0x3]  ;;  %v9392_v25 = vrot.slane %v22123_v48, 1 }
 0xc61   :  { %v22118_v34 = vpack.c.bf16 %v9471_v16, %v9469_v63  ;;  %16530 = vmatpush3.bf16.msra.mxu1 %v18748_v18  ;;  %vm24937_vm2 = vmmov %vm24924_vm1  ;;  %v18541_v17 = vld [vmem:[#allocation12 + $0x10] sm:$0xff]   ;;  %v22140_v41 = vld [vmem:[#allocation4 + $0x98] sm:$0xff]  ;;  %v9393_v37 = vrot.slane %v22125_v5, 1  ;;  %v9395_v31 = vrot.slane %v22127_v8, 1 }
 0xc62   :  { %v9384_v60 = vsel %vm24937_vm2, %v9382_v9, %v9383_v0  ;;  %vm24938_vm0 = vmmov %vm24924_vm1  ;;  %16531 = vmatprep.subr.bf16.mxu1 %v18540_v59  ;;  %v22133_v14 = vld [vmem:[#allocation4 + $0x90] sm:$0xff]  ;;  %v22142_v62 = vld [vmem:[#allocation4 + $0xa0] sm:$0x3] }
 0xc63   :  { %24936 = vst [vmem:[#allocation59_spill] sm:$0xff] %v22118_v34  ;;  %v9386_v12 = vsel %vm24938_vm0, %v9383_v0, %v9385_v1  ;;  %vm24939_vm8 = vmmov %vm24938_vm0  ;;  %16505 = vmatprep.mubr.bf16.mxu1 %v22118_v34  ;;  %v22149_v43 = vld [vmem:[#allocation4 + $0x258] sm:$0xff]  ;;  %v22151_v50 = vld [vmem:[#allocation4 + $0x260] sm:$0xff]  ;;  %v9397_v42 = vrot.slane %v22133_v14, 1  ;;  %v9400_v16 = vrot.slane %v22142_v62, 1 }
 0xc64   :  { %v9389_v61 = vsel %vm24939_vm8, %v9387_v29, %v9388_v53  ;;  %v22129_v6 = vpack.c.bf16 %v9386_v12, %v9384_v60  ;;  %vm24941_vm12 = vmmov %vm24938_vm0  ;;  %24945 = vst [vmem:[#allocation72_spill] sm:$0xff] %v22149_v43  ;;  %v9192_v47 = vld [vmem:[#allocation4 + $0x268] sm:$0x3]  ;;  %v22157_v63 = vld [vmem:[#allocation4 + $0x270] sm:$0xff] }
 0xc65   :  { %v9391_v26 = vsel %vm24941_vm12, %v9388_v53, %v9390_v55  ;;  %vm24942_vm5 = vmmov %vm24938_vm0  ;;  %24946 = vst [vmem:[#allocation41_spill] sm:$0xff] %v22151_v50  ;;  %16532 = vmatpush3.bf16.msra.mxu1 %v18540_v59  ;;  %v22159_v56 = vld [vmem:[#allocation4 + $0x278] sm:$0xff]  ;;  %v9398_v59 = vrot.slane %v22140_v41, 1  ;;  %v9195_v29 = vld [vmem:[#allocation4 + $0x280] sm:$0x3]  ;;  %v9482_v55 = vrot.slane %v22149_v43, 1 }
 0xc66   :  { %24940 = vst [vmem:[#allocation60_spill] sm:$0xff] %v22129_v6  ;;  %v9474_v27 = vsel %vm24942_vm5, %v9472_v44, %v9473_v46  ;;  %v22136_v45 = vpack.c.bf16 %v9391_v26, %v9389_v61  ;;  %16470 = vmatmul.mubr.bf16.gmra.mrb[164].mxu0 %v22129_v6  ;;  %vm24944_vm9 = vmmov %vm24938_vm0  ;;  %16533 = vmatprep.subr.bf16.mxu1 %v18541_v17  ;;  %v18542_v53 = vld [vmem:[#allocation12 + $0x18] sm:$0xff]   ;;  %v9483_v44 = vrot.slane %v22151_v50, 1  ;;  %v22173_v36 = vld [vmem:[#allocation4 + $0xb0] sm:$0xff]  ;;  %v9485_v60 = vrot.slane %v9192_v47, 1 }
 0xc67   :  { %v9476_v28 = vsel %vm24944_vm9, %v9473_v46, %v9475_v13  ;;  %vm24947_vm3 = vmmov %vm24938_vm0  ;;  %24949 = vst [vmem:[#allocation62_spill] sm:$0xff] %v22157_v63  ;;  %v22171_v46 = vld [vmem:[#allocation4 + $0xa8] sm:$0xff]  ;;  %v9487_v12 = vrot.slane %v22157_v63, 1  ;;  %v9488_v61 = vrot.slane %v22159_v56, 1  ;;  %v22179_v26 = vld [vmem:[#allocation4 + $0xb8] sm:$0x3] }
 0xc68   :  { %24943 = vst [vmem:[#allocation71_spill] sm:$0xff] %v22136_v45  ;;  %16473 = vmatprep.mubr.bf16.mxu0 %v22136_v45  ;;  %v9479_v39 = vsel %vm24947_vm3, %v9477_v4, %v9478_v54  ;;  %vm24948_vm4 = vmmov %vm24938_vm0  ;;  %v22161_v9 = vpack.c.bf16 %v9476_v28, %v9474_v27  ;;  %v22181_v27 = vld [vmem:[#allocation4 + $0xc0] sm:$0xff]  ;;  %v22188_v28 = vld [vmem:[#allocation4 + $0xc8] sm:$0xff] }
 0xc69   :  { %v9481_v3 = vsel %vm24948_vm4, %v9478_v54, %v9480_v10  ;;  %24950 = vst [vmem:[#allocation77_spill] sm:$0xff] %v22159_v56  ;;  %vm24952_vm10 = vmmov %vm24938_vm0  ;;  %16534 = vmatpush3.bf16.msra.mxu1 %v18541_v17  ;;  %v9490_v10 = vrot.slane %v9195_v29, 1  ;;  %v22203_v29 = vld [vmem:[#allocation4 + $0x290] sm:$0xff]  ;;  %v22234_v45 = vld [vmem:[#allocation4 + $0x100] sm:$0x3] }
 0xc6a   :  { %24951 = vst [vmem:[#allocation58_spill] sm:$0xff] %v22161_v9  ;;  %v9394_v0 = vsel %vm24952_vm10, %v9392_v25, %v9393_v37  ;;  %vm24953_vm11 = vmmov %vm24938_vm0  ;;  %v22166_v21 = vpack.c.bf16 %v9481_v3, %v9479_v39  ;;  %16506 = vmatmul.mubr.bf16.gmra.mrb[36].mxu1 %v22161_v9  ;;  %v22190_v25 = vld [vmem:[#allocation4 + $0xd0] sm:$0x3]  ;;  %16535 = vmatprep.subr.bf16.mxu1 %v18542_v53  ;;  %v9402_v39 = vrot.slane %v22171_v46, 1  ;;  %v9403_v3 = vrot.slane %v22173_v36, 1  ;;  %v22219_v9 = vld [vmem:[#allocation4 + $0xe0] sm:$0xff] }
 0xc6b   :  { %v9396_v1 = vsel %vm24953_vm11, %v9393_v37, %v9395_v31  ;;  %vm24955_vm15 = vmmov %vm24938_vm0  ;;  %24964 = vst [vmem:[#allocation57_spill] sm:$0xff] %v22203_v29  ;;  %v9413_v49 = vrot.slane %v22219_v9, 1  ;;  %v22258_v56 = vld [vmem:[#allocation4 + $0x2d0] sm:$0xff]  ;;  %v22298_v24 = vld [vmem:[#allocation4 + $0x2e8] sm:$0xff] }
 0xc6c   :  { %24954 = vst [vmem:[#allocation69_spill] sm:$0xff] %v22166_v21  ;;  %v9399_v18 = vsel %vm24955_vm15, %v9397_v42, %v9398_v59  ;;  %16509 = vmatprep.mubr.bf16.mxu1 %v22166_v21  ;;  %v22184_v13 = vpack.c.bf16 %v9396_v1, %v9394_v0  ;;  %vm24957_vm1 = vmmov %vm24938_vm0  ;;  %v18543_v42 = vld [vmem:[#allocation12 + $0x20] sm:$0xff]   ;;  %v9405_v0 = vrot.slane %v22179_v26, 1  ;;  %v9407_v1 = vrot.slane %v22181_v27, 1  ;;  %v22217_v21 = vld [vmem:[#allocation4 + $0xd8] sm:$0xff] }
 0xc6d   :  { %v9401_v4 = vsel %vm24957_vm1, %v9398_v59, %v9400_v16  ;;  %vm24958_vm6 = vmmov %vm24938_vm0  ;;  %v22201_v59 = vld [vmem:[#allocation4 + $0x288] sm:$0xff]  ;;  %v9408_v16 = vrot.slane %v22188_v28, 1  ;;  %16536 = vmatpush3.bf16.msra.mxu1 %v18542_v53  ;;  %24973 = vst [vmem:[#allocation19_spill] sm:$0xff] %v22234_v45  ;;  %v9412_v6 = vrot.slane %v22217_v21, 1  ;;  %v22291_v43 = vld [vmem:[#allocation4 + $0x130] sm:$0x3] }
 0xc6e   :  { %24956 = vst [vmem:[#allocation53_spill] sm:$0xff] %v22184_v13  ;;  %v9484_v54 = vsel %vm24958_vm6, %v9482_v55, %v9483_v44  ;;  %vm24959_vm13 = vmmov %vm24938_vm0  ;;  %v22196_v17 = vpack.c.bf16 %v9401_v4, %v9399_v18  ;;  %16474 = vmatmul.mubr.bf16.gmra.mrb[168].mxu0 %v22184_v13  ;;  %v9410_v55 = vrot.slane %v22190_v25, 1  ;;  %v22210_v18 = vld [vmem:[#allocation4 + $0x2a8] sm:$0xff]  ;;  %v9406_v7 = vsel %vm24938_vm0, %v9403_v3, %v9405_v0  ;;  %v22300_v32 = vld [vmem:[#allocation4 + $0x2f0] sm:$0xff] }
 0xc6f   :  { %v9486_v37 = vsel %vm24959_vm13, %v9483_v44, %v9485_v60  ;;  %vm24960_vm14 = vmmov %vm24938_vm0  ;;  %24963 = vst [vmem:[#allocation56_spill] sm:$0xff] %v22201_v59  ;;  %v9198_v44 = vld [vmem:[#allocation4 + $0x298] sm:$0x3]  ;;  %v22208_v60 = vld [vmem:[#allocation4 + $0x2a0] sm:$0xff]  ;;  %v9492_v30 = vrot.slane %v22201_v59, 1  ;;  %v9493_v13 = vrot.slane %v22203_v29, 1  ;;  %16537 = vmatprep.subr.bf16.mxu1 %v18543_v42 }
 0xc70   :  { %v9489_v31 = vsel %vm24960_vm14, %v9487_v12, %v9488_v61  ;;  %24961 = vst [vmem:[#allocation63_spill] sm:$0xff] %v22196_v17  ;;  %vm24962_vm7 = vmmov %vm24938_vm0  ;;  %v18544_v12 = vld [vmem:[#allocation12 + $0x28] sm:$0xff]   ;;  %16477 = vmatprep.mubr.bf16.mxu0 %v22196_v17  ;;  %v22302_v20 = vld [vmem:[#allocation4 + $0x2f8] sm:$0x3] }
 0xc71   :  { %v9491_v47 = vsel %vm24962_vm7, %v9488_v61, %v9490_v10  ;;  %24965 = vst [vmem:[#allocation61_spill] sm:$0xff] %v22208_v60  ;;  %24966 = vst [vmem:[#allocation73_spill] sm:$0xff] %v22210_v18  ;;  %v22213_v61 = vpack.c.bf16 %v9486_v37, %v9484_v54  ;;  %v9201_v10 = vld [vmem:[#allocation4 + $0x2b0] sm:$0x3]  ;;  %v22225_v17 = vld [vmem:[#allocation4 + $0xe8] sm:$0x3]  ;;  %16538 = vmatpush3.bf16.msra.mxu1 %v18543_v42 }
 0xc72   :  { %v22215_v4 = vpack.c.bf16 %v9491_v47, %v9489_v31  ;;  %vm24969_vm2 = vmmov %vm24938_vm0  ;;  %v22227_v54 = vld [vmem:[#allocation4 + $0xf0] sm:$0xff]  ;;  %v22229_v37 = vld [vmem:[#allocation4 + $0xf8] sm:$0xff]  ;;  %v9495_v31 = vrot.slane %v9198_v44, 1  ;;  %v9497_v47 = vrot.slane %v22208_v60, 1  ;;  %v9500_v0 = vrot.slane %v9201_v10, 1  ;;  %16539 = vmatprep.subr.bf16.mxu1 %v18544_v12  ;;  %24996 = vst [vmem:[#allocation68_spill] sm:$0xff] %v22291_v43 }
 0xc73   :  { %24967 = vst [vmem:[#allocation75_spill] sm:$0xff] %v22213_v61  ;;  %v9404_v34 = vsel %vm24969_vm2, %v9402_v39, %v9403_v3  ;;  %24970 = vst [vmem:[#allocation78_spill] sm:$0xff] %v22227_v54  ;;  %v9498_v39 = vrot.slane %v22210_v18, 1  ;;  %16510 = vmatmul.mubr.bf16.gmra.mrb[40].mxu1 %v22213_v61  ;;  %v9417_v44 = vrot.slane %v22227_v54, 1  ;;  %v9418_v58 = vrot.slane %v22229_v37, 1  ;;  %v22244_v18 = vld [vmem:[#allocation4 + $0x2b8] sm:$0xff] }
 0xc74   :  { %24968 = vst [vmem:[#allocation70_spill] sm:$0xff] %v22215_v4  ;;  %24971 = vst [vmem:[#allocation18_spill] sm:$0xff] %v22229_v37  ;;  %16513 = vmatprep.mubr.bf16.mxu1 %v22215_v4  ;;  %v22246_v60 = vpack.c.bf16 %v9406_v7, %v9404_v34  ;;  %v22251_v10 = vld [vmem:[#allocation4 + $0x2c8] sm:$0x3]  ;;  %v18545_v61 = vld [vmem:[#allocation12 + $0x30] sm:$0xff]  }
 0xc75   :  { %vm24972_vm8 = vmmov %vm24938_vm0  ;;  %24975 = vst [vmem:[#allocation20_spill] sm:$0xff] %v22244_v18  ;;  %v22260_v7 = vld [vmem:[#allocation4 + $0x2d8] sm:$0xff]  ;;  %v22262_v34 = vld [vmem:[#allocation4 + $0x2e0] sm:$0x3]  ;;  %16540 = vmatpush3.bf16.msra.mxu1 %v18544_v12 }
 0xc76   :  { %v9409_v53 = vsel %vm24972_vm8, %v9407_v1, %v9408_v16  ;;  %vm24974_vm12 = vmmov %vm24938_vm0  ;;  %v9415_v1 = vrot.slane %v22225_v17, 1  ;;  %24976 = vst [vmem:[#allocation22_spill] sm:$0xff] %v22246_v60  ;;  %16478 = vmatmul.mubr.bf16.gmra.mrb[172].mxu0 %v22246_v60  ;;  %v22274_v60 = vld [vmem:[#allocation4 + $0x108] sm:$0xff]  ;;  %16541 = vmatprep.subr.bf16.mxu1 %v18545_v61 }
 0xc77   :  { %v9411_v3 = vsel %vm24974_vm12, %v9408_v16, %v9410_v55  ;;  %v9420_v16 = vrot.slane %v22234_v45, 1  ;;  %v22249_v55 = vld [vmem:[#allocation4 + $0x2c0] sm:$0xff]  ;;  %24978 = vst [vmem:[#allocation27_spill] sm:$0xff] %v22251_v10  ;;  %vm24980_vm5 = vmmov %vm24938_vm0  ;;  %v22289_v12 = vld [vmem:[#allocation4 + $0x128] sm:$0xff]  ;;  %v9422_v52 = vrot.slane %v22274_v60, 1 }
 0xc78   :  { %24977 = vst [vmem:[#allocation26_spill] sm:$0xff] %v22249_v55  ;;  %v22253_v4 = vpack.c.bf16 %v9411_v3, %v9409_v53  ;;  %v9494_v42 = vsel %vm24980_vm5, %v9492_v30, %v9493_v13  ;;  %vm24981_vm9 = vmmov %vm24938_vm0  ;;  %v9502_v30 = vrot.slane %v22244_v18, 1  ;;  %v9505_v3 = vrot.slane %v22251_v10, 1  ;;  %v22347_v45 = vld [vmem:[#allocation4 + $0x160] sm:$0x3] }
 0xc79   :  { %v9496_v29 = vsel %vm24981_vm9, %v9493_v13, %v9495_v31  ;;  %vm24982_vm3 = vmmov %vm24938_vm0  ;;  %24983 = vst [vmem:[#allocation35_spill] sm:$0xff] %v22262_v34  ;;  %16542 = vmatpush3.bf16.msra.mxu1 %v18545_v61  ;;  %v9430_v10 = vrot.slane %v22291_v43, 1  ;;  %v9513_v18 = vrot.slane %v22300_v32, 1  ;;  %v9515_v61 = vrot.slane %v22302_v20, 1  ;;  %v22335_v43 = vld [vmem:[#allocation4 + $0x148] sm:$0x3] }
 0xc7a   :  { %24979 = vst [vmem:[#allocation46_spill] sm:$0xff] %v22253_v4  ;;  %v9499_v59 = vsel %vm24982_vm3, %v9497_v47, %v9498_v39  ;;  %vm24984_vm4 = vmmov %vm24938_vm0  ;;  %16481 = vmatprep.mubr.bf16.mxu0 %v22253_v4  ;;  %v9503_v47 = vrot.slane %v22249_v55, 1  ;;  %v22281_v4 = vld [vmem:[#allocation4 + $0x110] sm:$0xff]  ;;  %v9512_v55 = vrot.slane %v22298_v24, 1  ;;  %v9440_v37 = vrot.slane %v22347_v45, 1 }
 0xc7b   :  { %v9501_v63 = vsel %vm24984_vm4, %v9498_v39, %v9500_v0  ;;  %vm24985_vm10 = vmmov %vm24938_vm0  ;;  %24989 = vst [vmem:[#allocation43_spill] sm:$0xff] %v22274_v60  ;;  %v18546_v39 = vld [vmem:[#allocation12 + $0x38] sm:$0xff]   ;;  %v22276_v0 = vpack.c.bf16 %v9496_v29, %v9494_v42  ;;  %v22343_v60 = vld [vmem:[#allocation4 + $0x150] sm:$0xff] }
 0xc7c   :  { %v9414_v50 = vsel %vm24985_vm10, %v9412_v6, %v9413_v49  ;;  %vm24986_vm11 = vmmov %vm24938_vm0  ;;  %v9508_v6 = vrot.slane %v22260_v7, 1  ;;  %24991 = vst [vmem:[#allocation65_spill] sm:$0xff] %v22281_v4  ;;  %16543 = vmatprep.subr.bf16.mxu1 %v18546_v39 }
 0xc7d   :  { %v9416_v53 = vsel %vm24986_vm11, %v9413_v49, %v9415_v1  ;;  %vm24987_vm15 = vmmov %vm24938_vm0  ;;  %24990 = vst [vmem:[#allocation54_spill] sm:$0xff] %v22276_v0  ;;  %v9507_v49 = vrot.slane %v22258_v56, 1  ;;  %v9510_v1 = vrot.slane %v22262_v34, 1  ;;  %16514 = vmatmul.mubr.bf16.gmra.mrb[44].mxu1 %v22276_v0  ;;  %v9423_v0 = vrot.slane %v22281_v4, 1 }
 0xc7e   :  { %v9419_v13 = vsel %vm24987_vm15, %v9417_v44, %v9418_v58  ;;  %vm24988_vm1 = vmmov %vm24938_vm0  ;;  %v22283_v44 = vld [vmem:[#allocation4 + $0x118] sm:$0x3]  ;;  %24995 = vst [vmem:[#allocation67_spill] sm:$0xff] %v22289_v12  ;;  %v22294_v29 = vpack.c.bf16 %v9416_v53, %v9414_v50  ;;  %v22309_v50 = vld [vmem:[#allocation4 + $0x300] sm:$0xff]  ;;  %16544 = vmatpush3.bf16.msra.mxu1 %v18546_v39 }
 0xc7f   :  { %v9421_v31 = vsel %vm24988_vm1, %v9418_v58, %v9420_v16  ;;  %24992 = vst [vmem:[#allocation66_spill] sm:$0xff] %v22283_v44  ;;  %v22285_v58 = vpack.c.bf16 %v9501_v63, %v9499_v59  ;;  %v22287_v16 = vld [vmem:[#allocation4 + $0x120] sm:$0xff]  ;;  %24999 = vst [vmem:[#allocation32_spill] sm:$0xff] %v22302_v20  ;;  %v22311_v53 = vld [vmem:[#allocation4 + $0x308] sm:$0xff] }
 0xc80   :  { %24994 = vst [vmem:[#allocation82_spill] sm:$0xff] %v22287_v16  ;;  %24997 = vst [vmem:[#allocation81_spill] sm:$0xff] %v22294_v29  ;;  %v22296_v42 = vpack.c.bf16 %v9421_v31, %v9419_v13  ;;  %v22313_v13 = vld [vmem:[#allocation4 + $0x310] sm:$0x3]  ;;  %16482 = vmatmul.mubr.bf16.gmra.mrb[176].mxu0 %v22294_v29 }
 0xc81   :  { %24993 = vst [vmem:[#allocation79_spill] sm:$0xff] %v22285_v58  ;;  %16517 = vmatprep.mubr.bf16.mxu1 %v22285_v58  ;;  %vm25000_vm6 = vmmov %vm24938_vm0  ;;  %v9425_v58 = vrot.slane %v22283_v44, 1 }
 0xc82   :  { %24998 = vst [vmem:[#allocation28_spill] sm:$0xff] %v22296_v42  ;;  %v9504_v63 = vsel %vm25000_vm6, %v9502_v30, %v9503_v47  ;;  %vm25001_vm13 = vmmov %vm24938_vm0  ;;  %v9427_v30 = vrot.slane %v22287_v16, 1  ;;  %v22330_v16 = vld [vmem:[#allocation4 + $0x138] sm:$0xff]  ;;  %16485 = vmatprep.mubr.bf16.mxu0 %v22296_v42 }
 0xc83   :  { %v9506_v59 = vsel %vm25001_vm13, %v9503_v47, %v9505_v3  ;;  %25002 = vst [vmem:[#allocation24_spill] sm:$0xff] %v22313_v13  ;;  %vm25003_vm14 = vmmov %vm24938_vm0  ;;  %v22319_v47 = vld [vmem:[#allocation12 + $0x80] sm:$0xff]   ;;  %v9428_v3 = vrot.slane %v22289_v12, 1  ;;  %v9426_v4 = vsel %vm24938_vm0, %v9423_v0, %v9425_v58 }
 0xc84   :  { %v9509_v31 = vsel %vm25003_vm14, %v9507_v49, %v9508_v6  ;;  %vm25004_vm7 = vmmov %vm24938_vm0  ;;  %v9517_v49 = vrot.slane %v22309_v50, 1  ;;  %25005 = vst [vmem:[#allocation25_spill] sm:$0xff] %v22330_v16  ;;  %v22333_v12 = vld [vmem:[#allocation4 + $0x140] sm:$0xff]  ;;  %v22337_v44 = vpack.c.bf16 %v9506_v59, %v9504_v63  ;;  %16609 = vmatprep.subr.bf16.mxu1 %v22319_v47  ;;  %v22354_v59 = vld [vmem:[#allocation4 + $0x318] sm:$0xff] }
 0xc85   :  { %v9511_v34 = vsel %vm25004_vm7, %v9508_v6, %v9510_v1  ;;  %v9518_v6 = vrot.slane %v22311_v53, 1  ;;  %v9520_v1 = vrot.slane %v22313_v13, 1  ;;  %25006 = vst [vmem:[#allocation29_spill] sm:$0xff] %v22333_v12  ;;  %25007 = vst [vmem:[#allocation36_spill] sm:$0xff] %v22335_v43  ;;  %v22345_v13 = vld [vmem:[#allocation4 + $0x158] sm:$0xff] }
 0xc86   :  { %25008 = vst [vmem:[#allocation21_spill] sm:$0xff] %v22337_v44  ;;  %v22339_v29 = vpack.c.bf16 %v9511_v34, %v9509_v31  ;;  %vm25010_vm2 = vmmov %vm24938_vm0  ;;  %v9432_v34 = vrot.slane %v22330_v16, 1  ;;  %16518 = vmatmul.mubr.bf16.gmra.mrb[48].mxu1 %v22337_v44  ;;  %v9438_v16 = vrot.slane %v22345_v13, 1  ;;  %v22381_v44 = vld [vmem:[#allocation4 + $0x178] sm:$0x3] }
 0xc87   :  { %v9424_v20 = vsel %vm25010_vm2, %v9422_v52, %v9423_v0  ;;  %25011 = vst [vmem:[#allocation16_spill] sm:$0xff] %v22343_v60  ;;  %25012 = vst [vmem:[#allocation33_spill] sm:$0xff] %v22345_v13  ;;  %v22356_v52 = vld [vmem:[#allocation4 + $0x320] sm:$0xff]  ;;  %v22358_v0 = vld [vmem:[#allocation4 + $0x328] sm:$0x3] }
 0xc88   :  { %25009 = vst [vmem:[#allocation39_spill] sm:$0xff] %v22339_v29  ;;  %25013 = vst [vmem:[#allocation37_spill] sm:$0xff] %v22347_v45  ;;  %16521 = vmatprep.mubr.bf16.mxu1 %v22339_v29  ;;  %v22370_v54 = vpack.c.bf16 %v9426_v4, %v9424_v20  ;;  %v22379_v29 = vld [vmem:[#allocation4 + $0x170] sm:$0xff]  ;;  %v22391_v13 = vld [vmem:[#allocation4 + $0x1c0] sm:$0x3] }
 0xc89   :  { %vm25014_vm8 = vmmov %vm24938_vm0  ;;  %25017 = vst [vmem:[#allocation45_spill] sm:$0xff] %v22358_v0 }
 0xc8a   :  { %v9429_v42 = vsel %vm25014_vm8, %v9427_v30, %v9428_v3  ;;  %vm25015_vm12 = vmmov %vm24938_vm0  ;;  %25021 = vst [vmem:[#allocation49_spill] sm:$0xff] %v22370_v54  ;;  %16486 = vmatmul.mubr.bf16.gmra.mrb[180].mxu0 %v22370_v54 }
 0xc8b   :  { %v9431_v39 = vsel %vm25015_vm12, %v9428_v3, %v9430_v10  ;;  %vm25016_vm5 = vmmov %vm24938_vm0  ;;  %v9433_v10 = vrot.slane %v22333_v12, 1  ;;  %v9437_v3 = vrot.slane %v22343_v60, 1  ;;  %v22383_v60 = vld [vmem:[#allocation4 + $0x1b0] sm:$0xff]  ;;  %25027 = vst [vmem:[#allocation52_spill] sm:$0xff] %v22391_v13  ;;  %v9445_v12 = vrot.slane %v22381_v44, 1 }
 0xc8c   :  { %v9514_v63 = vsel %vm25016_vm5, %v9512_v55, %v9513_v18  ;;  %vm25018_vm9 = vmmov %vm24938_vm0  ;;  %v9435_v55 = vrot.slane %v22335_v43, 1  ;;  %25023 = vst [vmem:[#allocation44_spill] sm:$0xff] %v22383_v60  ;;  %vm25048_vm5 = vcmask 1045504  }
 0xc8d   :  { %v9516_v58 = vsel %vm25018_vm9, %v9513_v18, %v9515_v61  ;;  %vm25019_vm3 = vmmov %vm24938_vm0  ;;  %v9522_v18 = vrot.slane %v22354_v59, 1  ;;  %v9523_v61 = vrot.slane %v22356_v52, 1 }
 0xc8e   :  { %v9519_v31 = vsel %vm25019_vm3, %v9517_v49, %v9518_v6  ;;  %vm25020_vm4 = vmmov %vm24938_vm0  ;;  %v9525_v49 = vrot.slane %v22358_v0, 1  ;;  %v22386_v20 = vpack.c.bf16 %v9516_v58, %v9514_v63  ;;  %v22393_v0 = vld [vmem:[#allocation4 + $0x1c8] sm:$0xff]  ;;  %v22402_v58 = vld [vmem:[#allocation4 + $0x1d8] sm:$0x3] }
 0xc8f   :  { %v9521_v30 = vsel %vm25020_vm4, %v9518_v6, %v9520_v1  ;;  %v22375_v6 = vld [vmem:[#allocation4 + $0x168] sm:$0xff]  ;;  %v22377_v1 = vpack.c.bf16 %v9431_v39, %v9429_v42  ;;  %vm25026_vm10 = vmmov %vm24938_vm0  ;;  %25028 = vst [vmem:[#allocation31_spill] sm:$0xff] %v22393_v0  ;;  %v22395_v42 = vld [vmem:[#allocation4 + $0x1d0] sm:$0xff] }
 0xc90   :  { %25024 = vst [vmem:[#allocation48_spill] sm:$0xff] %v22386_v20  ;;  %v22388_v4 = vpack.c.bf16 %v9521_v30, %v9519_v31  ;;  %v9434_v45 = vsel %vm25026_vm10, %v9432_v34, %v9433_v10  ;;  %25029 = vst [vmem:[#allocation17_spill] sm:$0xff] %v22395_v42  ;;  %v9442_v63 = vrot.slane %v22375_v6, 1  ;;  %v9443_v30 = vrot.slane %v22379_v29, 1  ;;  %16522 = vmatmul.mubr.bf16.gmra.mrb[52].mxu1 %v22386_v20 }
 0xc91   :  { %25022 = vst [vmem:[#allocation23_spill] sm:$0xff] %v22377_v1  ;;  %16489 = vmatprep.mubr.bf16.mxu0 %v22377_v1  ;;  %vm25030_vm11 = vmmov %vm24938_vm0  ;;  %v9447_v1 = vrot.slane %v22383_v60, 1 }
 0xc92   :  { %25025 = vst [vmem:[#allocation30_spill] sm:$0xff] %v22388_v4  ;;  %v9436_v39 = vsel %vm25030_vm11, %v9433_v10, %v9435_v55  ;;  %vm25031_vm15 = vmmov %vm24938_vm0  ;;  %v9450_v10 = vrot.slane %v22391_v13, 1  ;;  %v9452_v55 = vrot.slane %v22393_v0, 1  ;;  %16525 = vmatprep.mubr.bf16.mxu1 %v22388_v4 }
 0xc93   :  { %v9439_v43 = vsel %vm25031_vm15, %v9437_v3, %v9438_v16  ;;  %vm25032_vm1 = vmmov %vm24938_vm0  ;;  %25033 = vst [vmem:[#allocation34_spill] sm:$0xff] %v22402_v58  ;;  %v22415_v3 = vld [vmem:[#allocation3 + $0x8] sm:$0xff]  ;;  %v22425_v13 = vpack.c.bf16 %v9436_v39, %v9434_v45  ;;  %v10320_v39 = vrot.slane %v22016_v11, 2 }
 0xc94   :  { %v9441_v54 = vsel %vm25032_vm1, %v9438_v16, %v9440_v37  ;;  %vm25034_vm6 = vmmov %vm24938_vm0  ;;  %v9453_v37 = vrot.slane %v22395_v42, 1  ;;  %v9455_v16 = vrot.slane %v22402_v58, 1  ;;  %25036 = vst [vmem:[#allocation38_spill] sm:$0xff] %v22415_v3  ;;  %v25044_v42 = vld [vmem:[#allocation64_spill] sm:$0xff] }
 0xc95   :  { %v9524_v34 = vsel %vm25034_vm6, %v9522_v18, %v9523_v61  ;;  %vm25035_vm13 = vmmov %vm24938_vm0  ;;  %v22417_v18 = vld [vmem:[#allocation4] sm:$0xff]  ;;  %25039 = vst [vmem:[#allocation84_spill] sm:$0xff] %v22425_v13  ;;  %v22427_v60 = vpack.c.bf16 %v9441_v54, %v9439_v43  ;;  %16490 = vmatmul.mubr.bf16.gmra.mrb[184].mxu0 %v22425_v13  ;;  %v22442_v43 = vpack.c.bf16 %v22260_v7, %v22258_v56  ;;  %v25097_v13 = vld [vmem:[#allocation29_spill] sm:$0xff] }
 0xc96   :  { %v9526_v31 = vsel %vm25035_vm13, %v9523_v61, %v9525_v49  ;;  %25037 = vst [vmem:[#allocation40_spill] sm:$0xff] %v22417_v18  ;;  %v9223_v61 = vpack.c.bf16 %v22415_v3, %v22417_v18  ;;  %v22423_v49 = vpack.c.bf16 %v22016_v11, %v22014_v38  ;;  %vm25042_vm14 = vmmov %vm24938_vm0  ;;  %v9451_v18 = vsel %vm24938_vm0, %v25044_v42, %v9450_v10 }
 0xc97   :  { %25040 = vst [vmem:[#allocation85_spill] sm:$0xff] %v22427_v60  ;;  %v22429_v20 = vpack.c.bf16 %v9526_v31, %v9524_v34  ;;  %v9444_v58 = vsel %vm25042_vm14, %v9442_v63, %v9443_v30  ;;  %vm25043_vm7 = vmmov %vm24938_vm0  ;;  %v22446_v54 = vpack.c.bf16 %v22300_v32, %v22298_v24  ;;  %16493 = vmatprep.mubr.bf16.mxu0 %v22427_v60  ;;  %v10322_v63 = vrot.slane %v22018_v15, 2 }
 0xc98   :  { %25038 = vst [vmem:[#allocation83_spill] sm:$0xff] %v22423_v49  ;;  %v9446_v4 = vsel %vm25043_vm7, %v9443_v30, %v9445_v12  ;;  %vm25045_vm2 = vmmov %vm24938_vm0  ;;  %v22450_v12 = vpack.c.bf16 %v22311_v53, %v22309_v50  ;;  %v10324_v34 = vrot.slane %v22036_v35, 2  ;;  %v10325_v31 = vrot.slane %v22038_v23, 2 }
 0xc99   :  { %25041 = vst [vmem:[#allocation86_spill] sm:$0xff] %v22429_v20  ;;  %v9449_v0 = vsel %vm25045_vm2, %v9447_v1, %v25044_v42  ;;  %vm25046_vm8 = vmmov %vm24938_vm0  ;;  %v22455_v1 = vpack.c.bf16 %v22356_v52, %v22354_v59  ;;  %v10319_v42 = vrot.slane %v22014_v38, 2  ;;  %v10327_v30 = vrot.slane %v22063_v2, 2  ;;  %16526 = vmatmul.mubr.bf16.gmra.mrb[56].mxu1 %v22429_v20 }
 0xc9a   :  { %v9454_v3 = vsel %vm25046_vm8, %v9452_v55, %v9453_v37  ;;  %vm25047_vm12 = vmmov %vm24938_vm0  ;;  %v10329_v10 = vrot.slane %v22073_v40, 2  ;;  %v10332_v38 = vrot.slane %v22081_v22, 2  ;;  %v22471_v11 = vpack.c.bf16 %v22038_v23, %v22036_v35  ;;  %16545 = vmatprep.mubr.bf16.mxu1 %v9223_v61 }
 0xc9b   :  { %v9456_v45 = vsel %vm25047_vm12, %v9453_v37, %v9455_v16  ;;  %v10321_v55 = vsel %vm25048_vm5, %v10319_v42, %v10320_v39  ;;  %vm25049_vm9 = vmmov %vm25048_vm5  ;;  %v10330_v16 = vrot.slane %v22076_v51, 2  ;;  %v9607_v15 = vpack.c.bf16 %v9451_v18, %v9449_v0 }
 0xc9c   :  { %v10323_v37 = vsel %vm25049_vm9, %v10320_v39, %v10322_v63  ;;  %25050 = vst [vmem:[#allocation64_spill] sm:$0xff] %v22471_v11  ;;  %v22475_v2 = vpack.c.bf16 %v22076_v51, %v22073_v40  ;;  %vm25052_vm3 = vmmov %vm25048_vm5  ;;  %v22483_v20 = vpack.c.bf16 %v9446_v4, %v9444_v58  ;;  %v22485_v35 = vpack.c.bf16 %v9456_v45, %v9454_v3 }
 0xc9d   :  { %v22477_v60 = vpack.c.bf16 %v10323_v37, %v10321_v55  ;;  %v10326_v42 = vsel %vm25052_vm3, %v10324_v34, %v10325_v31  ;;  %vm25053_vm4 = vmmov %vm25052_vm3  ;;  %v22493_v40 = vpack.c.bf16 %v22085_v57, %v22083_v19  ;;  %v10334_v51 = vrot.slane %v22083_v19, 2 }
 0xc9e   :  { %25051 = vst [vmem:[#allocation87_spill] sm:$0xff] %v22475_v2  ;;  %v10328_v39 = vsel %vm25053_vm4, %v10325_v31, %v10327_v30  ;;  %vm25054_vm10 = vmmov %vm25052_vm3  ;;  %v10335_v18 = vrot.slane %v22085_v57, 2  ;;  %v10337_v61 = vrot.slane %v22093_v33, 2  ;;  %16494 = vmatmul.mubr.bf16.gmra.mrb[188].mxu0 %v22483_v20  ;;  %v10339_v4 = vrot.slane %v22123_v48, 2  ;;  %v18548_v33 = vld [vmem:[#allocation12 + $0x88] sm:$0xff]  }
 0xc9f   :  { %v10331_v22 = vsel %vm25054_vm10, %v10329_v10, %v10330_v16  ;;  %vm25055_vm11 = vmmov %vm25052_vm3  ;;  %25056 = vst [vmem:[#allocation88_spill] sm:$0xff] %v22483_v20  ;;  %v22487_v23 = vpack.c.bf16 %v10328_v39, %v10326_v42  ;;  %v10340_v58 = vrot.slane %v22125_v5, 2  ;;  %v10342_v3 = vrot.slane %v22127_v8, 2  ;;  %16497 = vmatprep.mubr.bf16.mxu0 %v9607_v15 }
 0xca0   :  { %v10333_v63 = vsel %vm25055_vm11, %v10330_v16, %v10332_v38  ;;  %25057 = vst [vmem:[#allocation89_spill] sm:$0xff] %v22485_v35  ;;  %25060 = vst [vmem:[#allocation92_spill] sm:$0xff] %v22493_v40  ;;  %v10344_v45 = vrot.slane %v22133_v14, 2  ;;  %v10345_v19 = vrot.slane %v22140_v41, 2  ;;  %v10347_v57 = vrot.slane %v22142_v62, 2 }
 0xca1   :  { %25058 = vst [vmem:[#allocation90_spill] sm:$0xff] %v22487_v23  ;;  %v22489_v0 = vpack.c.bf16 %v10333_v63, %v10331_v22  ;;  %vm25061_vm15 = vmmov %vm25052_vm3  ;;  %v10349_v8 = vrot.slane %v22171_v46, 2  ;;  %v10350_v15 = vrot.slane %v22173_v36, 2  ;;  %16546 = vmatmul.mubr.bf16.vlgmr.msra.gmra.mrb[60].mxu1 %v22423_v49  ;;  %v10352_v42 = vrot.slane %v22179_v26, 2 }
 0xca2   :  { %v10336_v34 = vsel %vm25061_vm15, %v10334_v51, %v10335_v18  ;;  %vm25062_vm1 = vmmov %vm25052_vm3  ;;  %v10354_v39 = vrot.slane %v22181_v27, 2  ;;  %v10355_v22 = vrot.slane %v22188_v28, 2  ;;  %16549 = vmatprep.mubr.bf16.mxu1 %v22471_v11  ;;  %16610 = vmatpush3.bf16.msra.mxu1 %v22319_v47  ;;  %v10357_v51 = vrot.slane %v22190_v25, 2 }
 0xca3   :  { %25059 = vst [vmem:[#allocation91_spill] sm:$0xff] %v22489_v0  ;;  %v10338_v31 = vsel %vm25062_vm1, %v10335_v18, %v10337_v61  ;;  %vm25064_vm6 = vmmov %vm25062_vm1  ;;  %v10359_v18 = vrot.slane %v22217_v21, 2  ;;  %v10360_v61 = vrot.slane %v22219_v9, 2  ;;  %16611 = vmatprep.subr.bf16.mxu1 %v18548_v33  ;;  %v10380_v11 = vrot.slane %v25097_v13, 2 }
 0xca4   :  { %v22507_v30 = vpack.c.bf16 %v10338_v31, %v10336_v34  ;;  %v10341_v10 = vsel %vm25064_vm6, %v10339_v4, %v10340_v58  ;;  %vm25065_vm13 = vmmov %vm25062_vm1  ;;  %v18549_v4 = vld [vmem:[#allocation12 + $0x90] sm:$0xff]  }
 0xca5   :  { %v10343_v55 = vsel %vm25065_vm13, %v10340_v58, %v10342_v3  ;;  %vm25067_vm14 = vmmov %vm25062_vm1  ;;  %v10362_v3 = vrot.slane %v22225_v17, 2 }
 0xca6   :  { %25063 = vst [vmem:[#allocation93_spill] sm:$0xff] %v22507_v30  ;;  %v22512_v37 = vpack.c.bf16 %v10343_v55, %v10341_v10  ;;  %v10346_v16 = vsel %vm25067_vm14, %v10344_v45, %v10345_v19  ;;  %vm25068_vm7 = vmmov %vm25062_vm1  ;;  %v25073_v45 = vld [vmem:[#allocation78_spill] sm:$0xff]  ;;  %16498 = vmatmul.mubr.bf16.gmra.mrb[192].mxu0 %v22485_v35  ;;  %16612 = vmatpush3.bf16.msra.mxu1 %v18548_v33 }
 0xca7   :  { %v10348_v38 = vsel %vm25068_vm7, %v10345_v19, %v10347_v57  ;;  %vm25070_vm2 = vmmov %vm25062_vm1  ;;  %v10364_v34 = vrot.slane %v25073_v45, 2  ;;  %v25077_v19 = vld [vmem:[#allocation18_spill] sm:$0xff]  ;;  %16613 = vmatprep.subr.bf16.mxu1 %v18549_v4 }
 0xca8   :  { %25066 = vst [vmem:[#allocation94_spill] sm:$0xff] %v22512_v37  ;;  %v22518_v62 = vpack.c.bf16 %v10348_v38, %v10346_v16  ;;  %v10351_v63 = vsel %vm25070_vm2, %v10349_v8, %v10350_v15  ;;  %vm25071_vm0 = vmmov %vm25062_vm1  ;;  %v10365_v57 = vrot.slane %v25077_v19, 2  ;;  %v25080_v8 = vld [vmem:[#allocation19_spill] sm:$0xff] }
 0xca9   :  { %v10353_v26 = vsel %vm25071_vm0, %v10350_v15, %v10352_v42  ;;  %vm25072_vm8 = vmmov %vm25071_vm0  ;;  %v10367_v16 = vrot.slane %v25080_v8, 2  ;;  %v25081_v38 = vld [vmem:[#allocation43_spill] sm:$0xff]  ;;  %v25089_v8 = vld [vmem:[#allocation68_spill] sm:$0xff]  ;;  %16550 = vmatmul.mubr.bf16.gmra.mrb[64].mxu1 %v22475_v2 }
 0xcaa   :  { %25069 = vst [vmem:[#allocation95_spill] sm:$0xff] %v22518_v62  ;;  %v10356_v58 = vsel %vm25072_vm8, %v10354_v39, %v10355_v22  ;;  %v22533_v31 = vpack.c.bf16 %v10353_v26, %v10351_v63  ;;  %vm25075_vm12 = vmmov %vm25071_vm0  ;;  %v10369_v17 = vrot.slane %v25081_v38, 2  ;;  %v25084_v39 = vld [vmem:[#allocation65_spill] sm:$0xff]  ;;  %v25085_v63 = vld [vmem:[#allocation66_spill] sm:$0xff]  ;;  %v10377_v35 = vrot.slane %v25089_v8, 2  ;;  %16553 = vmatprep.mubr.bf16.mxu1 %v22493_v40  ;;  %16614 = vmatpush3.bf16.msra.mxu1 %v18549_v4 }
 0xcab   :  { %v10358_v47 = vsel %vm25075_vm12, %v10355_v22, %v10357_v51  ;;  %vm25076_vm5 = vmmov %vm25071_vm0  ;;  %v10370_v22 = vrot.slane %v25084_v39, 2  ;;  %v10372_v51 = vrot.slane %v25085_v63, 2  ;;  %v25101_v8 = vld [vmem:[#allocation33_spill] sm:$0xff] }
 0xcac   :  { %25074 = vst [vmem:[#allocation78_spill] sm:$0xff] %v22533_v31  ;;  %v10361_v25 = vsel %vm25076_vm5, %v10359_v18, %v10360_v61  ;;  %v22539_v10 = vpack.c.bf16 %v10358_v47, %v10356_v58  ;;  %vm25079_vm9 = vmmov %vm25071_vm0  ;;  %v18550_v18 = vld [vmem:[#allocation12 + $0x98] sm:$0xff]   ;;  %v25087_v58 = vld [vmem:[#allocation82_spill] sm:$0xff]  ;;  %v10385_v49 = vrot.slane %v25101_v8, 2 }
 0xcad   :  { %v10363_v55 = vsel %vm25079_vm9, %v10360_v61, %v10362_v3  ;;  %vm25083_vm3 = vmmov %vm25071_vm0  ;;  %v10374_v47 = vrot.slane %v25087_v58, 2  ;;  %v25088_v61 = vld [vmem:[#allocation67_spill] sm:$0xff]  ;;  %16615 = vmatprep.subr.bf16.mxu1 %v18550_v18 }
 0xcae   :  { %25078 = vst [vmem:[#allocation18_spill] sm:$0xff] %v22539_v10  ;;  %v22544_v15 = vpack.c.bf16 %v10363_v55, %v10361_v25  ;;  %v10366_v42 = vsel %vm25083_vm3, %v10364_v34, %v10365_v57  ;;  %vm25086_vm4 = vmmov %vm25071_vm0  ;;  %v10375_v3 = vrot.slane %v25088_v61, 2  ;;  %v25093_v25 = vld [vmem:[#allocation25_spill] sm:$0xff]  ;;  %16616 = vmatpush3.bf16.msra.mxu1 %v18550_v18 }
 0xcaf   :  { %v10368_v26 = vsel %vm25086_vm4, %v10365_v57, %v10367_v16  ;;  %vm25091_vm10 = vmmov %vm25071_vm0  ;;  %v10379_v55 = vrot.slane %v25093_v25, 2 }
 0xcb0   :  { %25082 = vst [vmem:[#allocation19_spill] sm:$0xff] %v22544_v15  ;;  %v22553_v20 = vpack.c.bf16 %v10368_v26, %v10366_v42  ;;  %v10371_v33 = vsel %vm25091_vm10, %v10369_v17, %v10370_v22  ;;  %vm25092_vm11 = vmmov %vm25071_vm0  ;;  %v25099_v17 = vld [vmem:[#allocation36_spill] sm:$0xff] }
 0xcb1   :  { %v10373_v34 = vsel %vm25092_vm11, %v10370_v22, %v10372_v51  ;;  %vm25095_vm15 = vmmov %vm25071_vm0  ;;  %v10382_v26 = vrot.slane %v25099_v17, 2  ;;  %v25100_v22 = vld [vmem:[#allocation16_spill] sm:$0xff]  ;;  %v25106_v17 = vld [vmem:[#allocation31_spill] sm:$0xff] }
 0xcb2   :  { %25090 = vst [vmem:[#allocation43_spill] sm:$0xff] %v22553_v20  ;;  %v22559_v63 = vpack.c.bf16 %v10373_v34, %v10371_v33  ;;  %v10376_v57 = vsel %vm25095_vm15, %v10374_v47, %v10375_v3  ;;  %vm25096_vm1 = vmmov %vm25071_vm0  ;;  %v10384_v51 = vrot.slane %v25100_v22, 2  ;;  %v18551_v33 = vld [vmem:[#allocation12 + $0xa0] sm:$0xff]   ;;  %v25103_v47 = vld [vmem:[#allocation37_spill] sm:$0xff]  ;;  %v10399_v40 = vrot.slane %v25106_v17, 2 }
 0xcb3   :  { %v10378_v16 = vsel %vm25096_vm1, %v10375_v3, %v10377_v35  ;;  %vm25102_vm6 = vmmov %vm25071_vm0  ;;  %v10387_v2 = vrot.slane %v25103_v47, 2  ;;  %v10389_v35 = vrot.slane %v22375_v6, 2  ;;  %v10390_v3 = vrot.slane %v22379_v29, 2  ;;  %v25109_v20 = vld [vmem:[#allocation17_spill] sm:$0xff]  ;;  %16617 = vmatprep.subr.bf16.mxu1 %v18551_v33 }
 0xcb4   :  { %25094 = vst [vmem:[#allocation65_spill] sm:$0xff] %v22559_v63  ;;  %v22565_v42 = vpack.c.bf16 %v10378_v16, %v10376_v57  ;;  %v10381_v34 = vsel %vm25102_vm6, %v10379_v55, %v10380_v11  ;;  %vm25104_vm13 = vmmov %vm25071_vm0  ;;  %v10392_v16 = vrot.slane %v22381_v44, 2  ;;  %v10400_v47 = vrot.slane %v25109_v20, 2  ;;  %16618 = vmatpush3.bf16.msra.mxu1 %v18551_v33 }
 0xcb5   :  { %v10383_v4 = vsel %vm25104_vm13, %v10380_v11, %v10382_v26  ;;  %vm25105_vm14 = vmmov %vm25071_vm0  ;;  %v25111_v11 = vld [vmem:[#allocation34_spill] sm:$0xff]  ;;  %v22589_v44 = vpack.c.bf16 %v22125_v5, %v22123_v48  ;;  %v22605_v5 = vpack.c.bf16 %v22173_v36, %v22171_v46  ;;  %v25116_v46 = vld [vmem:[#allocation27_spill] sm:$0xff] }
 0xcb6   :  { %25098 = vst [vmem:[#allocation66_spill] sm:$0xff] %v22565_v42  ;;  %v10386_v57 = vsel %vm25105_vm14, %v10384_v51, %v10385_v49  ;;  %v22578_v42 = vpack.c.bf16 %v10383_v4, %v10381_v34  ;;  %vm25107_vm7 = vmmov %vm25071_vm0  ;;  %v10393_v10 = vsel %vm25071_vm0, %v10390_v3, %v10392_v16  ;;  %v10402_v26 = vrot.slane %v25111_v11, 2  ;;  %v18552_v51 = vld [vmem:[#allocation12 + $0xa8] sm:$0xff]   ;;  %v18553_v48 = vld [vmem:[#allocation12 + $0xb0] sm:$0xff]  }
 0xcb7   :  { %v10388_v63 = vsel %vm25107_vm7, %v10385_v49, %v10387_v2  ;;  %vm25108_vm2 = vmmov %vm25071_vm0  ;;  %v22596_v2 = vpack.c.bf16 %v22140_v41, %v22133_v14  ;;  %16554 = vmatmul.mubr.bf16.gmra.mrb[68].mxu1 %v22589_v44  ;;  %16619 = vmatprep.subr.bf16.mxu1 %v18552_v51  ;;  %v22609_v14 = vpack.c.bf16 %v22188_v28, %v22181_v27  ;;  %v22613_v41 = vld [vmem:[#allocation12 + $0xc0] sm:$0xff]   ;;  %v10452_v36 = vrot.slane %v25116_v46, 2  ;;  %v25118_v16 = vld [vmem:[#allocation35_spill] sm:$0xff] }
 0xcb8   :  { %v10391_v55 = vsel %vm25108_vm2, %v10389_v35, %v10390_v3  ;;  %v22583_v15 = vpack.c.bf16 %v10388_v63, %v10386_v57  ;;  %vm25112_vm8 = vmmov %vm25071_vm0  ;;  %16620 = vmatpush3.bf16.msra.mxu1 %v18552_v51  ;;  %v25115_v35 = vld [vmem:[#allocation26_spill] sm:$0xff]  ;;  %v10454_v4 = vrot.slane %v22258_v56, 2  ;;  %v10455_v57 = vrot.slane %v22260_v7, 2  ;;  %v25123_v51 = vld [vmem:[#allocation32_spill] sm:$0xff] }
 0xcb9   :  { %v22591_v34 = vpack.c.bf16 %v10393_v10, %v10391_v55  ;;  %v10401_v49 = vsel %vm25112_vm8, %v10399_v40, %v10400_v47  ;;  %vm25113_vm12 = vmmov %vm25071_vm0  ;;  %16557 = vmatprep.mubr.bf16.mxu1 %v22596_v2  ;;  %16621 = vmatprep.subr.bf16.mxu1 %v18553_v48  ;;  %v18554_v40 = vld [vmem:[#allocation12 + $0xb8] sm:$0xff]   ;;  %v25114_v10 = vld [vmem:[#allocation20_spill] sm:$0xff]  ;;  %v10450_v3 = vrot.slane %v25115_v35, 2  ;;  %v22622_v27 = vpack.c.bf16 %v22219_v9, %v22217_v21 }
 0xcba   :  { %25110 = vst [vmem:[#allocation82_spill] sm:$0xff] %v22583_v15  ;;  %v10403_v18 = vsel %vm25113_vm12, %v10400_v47, %v10402_v26  ;;  %v10449_v33 = vrot.slane %v25114_v10, 2  ;;  %vm25117_vm5 = vmmov %vm25071_vm0  ;;  %v10457_v55 = vrot.slane %v25118_v16, 2  ;;  %v10459_v47 = vrot.slane %v22298_v24, 2  ;;  %v25128_v46 = vld [vmem:[#allocation45_spill] sm:$0xff] }
 0xcbb   :  { %v22600_v63 = vpack.c.bf16 %v10403_v18, %v10401_v49  ;;  %v22629_v11 = vpack.c.bf16 %v25077_v19, %v25073_v45  ;;  %vm25119_vm9 = vmmov %vm25071_vm0  ;;  %v10460_v9 = vrot.slane %v22300_v32, 2  ;;  %v10462_v49 = vrot.slane %v25123_v51, 2 }
 0xcbc   :  { %16622 = vmatpush3.bf16.msra.mxu1 %v18553_v48  ;;  %v10451_v28 = vsel %vm25117_vm5, %v10449_v33, %v10450_v3  ;;  %v10453_v56 = vsel %vm25119_vm9, %v10450_v3, %v10452_v36  ;;  %vm25120_vm3 = vmmov %vm25071_vm0  ;;  %v10464_v24 = vrot.slane %v22309_v50, 2  ;;  %v10465_v18 = vrot.slane %v22311_v53, 2  ;;  %v25126_v48 = vld [vmem:[#allocation24_spill] sm:$0xff] }
 0xcbd   :  { %16623 = vmatprep.subr.bf16.mxu1 %v18554_v40  ;;  %v10456_v7 = vsel %vm25120_vm3, %v10454_v4, %v10455_v57  ;;  %v22635_v21 = vpack.c.bf16 %v10453_v56, %v10451_v28  ;;  %vm25122_vm4 = vmmov %vm25071_vm0  ;;  %v22646_v33 = vld [vmem:[#allocation4 + $0x180] sm:$0xff]  ;;  %v10469_v3 = vrot.slane %v22354_v59, 2  ;;  %v10470_v50 = vrot.slane %v22356_v52, 2  ;;  %v22653_v4 = vld [vmem:[#allocation4 + $0x188] sm:$0xff] }
 0xcbe   :  { %v10458_v26 = vsel %vm25122_vm4, %v10455_v57, %v10457_v55  ;;  %vm25125_vm10 = vmmov %vm25071_vm0  ;;  %v10472_v36 = vrot.slane %v25128_v46, 2  ;;  %v22657_v57 = vpack.c.bf16 %v25084_v39, %v25081_v38  ;;  %v22663_v55 = vld [vmem:[#allocation4 + $0x330] sm:$0xff]  ;;  %v9219_v39 = vld [vmem:[#allocation4 + $0x340] sm:$0x3]  ;;  %v11848_v51 = vrot.slane %v22646_v33, 2 }
 0xcbf   :  { %16558 = vmatmul.mubr.bf16.gmra.mrb[72].mxu1 %v22605_v5  ;;  %25121 = vst [vmem:[#allocation67_spill] sm:$0xff] %v22635_v21  ;;  %v22641_v45 = vpack.c.bf16 %v10458_v26, %v10456_v7  ;;  %v10461_v19 = vsel %vm25125_vm10, %v10459_v47, %v10460_v9  ;;  %vm25127_vm11 = vmmov %vm25071_vm0  ;;  %v22665_v47 = vld [vmem:[#allocation4 + $0x338] sm:$0xff]  ;;  %v11414_v7 = vrot.slane %v22646_v33, 1  ;;  %v9165_v38 = vld [vmem:[#allocation4 + $0x190] sm:$0x3]  ;;  %v11415_v26 = vrot.slane %v22653_v4, 1 }
 0xcc0   :  { %16561 = vmatprep.mubr.bf16.mxu1 %v22609_v14  ;;  %16624 = vmatpush3.bf16.msra.mxu1 %v18554_v40  ;;  %v10467_v40 = vrot.slane %v25126_v48, 2  ;;  %v10463_v32 = vsel %vm25127_vm11, %v10460_v9, %v10462_v49  ;;  %vm25129_vm15 = vmmov %vm25071_vm0  ;;  %v11849_v49 = vrot.slane %v22653_v4, 2  ;;  %v11853_v48 = vrot.slane %v22663_v55, 2 }
 0xcc1   :  { %16689 = vmatprep.subr.bf16.mxu1 %v22613_v41  ;;  %25124 = vst [vmem:[#allocation68_spill] sm:$0xff] %v22641_v45  ;;  %v22659_v53 = vpack.c.bf16 %v10463_v32, %v10461_v19  ;;  %v10466_v28 = vsel %vm25129_vm15, %v10464_v24, %v10465_v18  ;;  %vm25130_vm1 = vmmov %vm25071_vm0  ;;  %v22679_v24 = vpack.c.bf16 %v25088_v61, %v25087_v58  ;;  %v11419_v19 = vrot.slane %v22663_v55, 1 }
 0xcc2   :  { %v10468_v16 = vsel %vm25130_vm1, %v10465_v18, %v10467_v40  ;;  %vm25131_vm6 = vmmov %vm25071_vm0  ;;  %v11420_v18 = vrot.slane %v22665_v47, 1  ;;  %v11854_v40 = vrot.slane %v22665_v47, 2  ;;  %vm25133_vm14 = vcmask 1046528  }
 0xcc3   :  { %v22667_v59 = vpack.c.bf16 %v10468_v16, %v10466_v28  ;;  %v10471_v52 = vsel %vm25131_vm6, %v10469_v3, %v10470_v50  ;;  %vm25132_vm13 = vmmov %vm25071_vm0  ;;  %v11416_v32 = vsel %vm25133_vm14, %v11414_v7, %v11415_v26  ;;  %v11417_v3 = vrot.slane %v9165_v38, 1 }
 0xcc4   :  { %v10473_v56 = vsel %vm25132_vm13, %v10470_v50, %v10472_v36  ;;  %v11422_v50 = vrot.slane %v9219_v39, 1  ;;  %vm25134_vm7 = vmmov %vm25133_vm14  ;;  %v11851_v28 = vrot.slane %v9165_v38, 2  ;;  %v11856_v16 = vrot.slane %v9219_v39, 2 }
 0xcc5   :  { %v22672_v9 = vpack.c.bf16 %v10473_v56, %v10471_v52  ;;  %v11421_v46 = vsel %vm25134_vm7, %v11419_v19, %v11420_v18  ;;  %vm25135_vm2 = vmmov %vm25071_vm0 }
 0xcc6   :  { %v11850_v36 = vsel %vm25135_vm2, %v11848_v51, %v11849_v49  ;;  %vm25136_vm0 = vmmov %vm25134_vm7 }
 0xcc7   :  { %16562 = vmatmul.mubr.bf16.gmra.mrb[76].mxu1 %v22622_v27  ;;  %v11418_v58 = vsel %vm25136_vm0, %v11415_v26, %v11417_v3  ;;  %vm25137_vm8 = vmmov %vm25136_vm0  ;;  %v22705_v26 = vpack.c.bf16 %v25097_v13, %v25093_v25  ;;  %v22722_v13 = vpack.c.bf16 %v25109_v20, %v25106_v17  ;;  %v22724_v25 = vld [vmem:[#allocation4 + $0x1e0] sm:$0xff]  ;;  %v22742_v17 = vld [vmem:[#allocation4 + $0x210] sm:$0xff] }
 0xcc8   :  { %16565 = vmatprep.mubr.bf16.mxu1 %v22629_v11  ;;  %v11423_v61 = vsel %vm25137_vm8, %v11420_v18, %v11422_v50  ;;  %vm25138_vm12 = vmmov %vm25130_vm1  ;;  %v22693_v56 = vpack.c.bf16 %v11418_v58, %v11416_v32  ;;  %v22709_v18 = vpack.c.bf16 %v25101_v8, %v25100_v22  ;;  %v22726_v22 = vld [vmem:[#allocation4 + $0x1e8] sm:$0xff]  ;;  %v22744_v3 = vld [vmem:[#allocation4 + $0x218] sm:$0xff] }
 0xcc9   :  { %v11855_v52 = vsel %vm25138_vm12, %v11853_v48, %v11854_v40  ;;  %v22695_v7 = vpack.c.bf16 %v11423_v61, %v11421_v46  ;;  %vm25141_vm5 = vmmov %vm25130_vm1  ;;  %v25145_v48 = vld [vmem:[#allocation44_spill] sm:$0xff]  ;;  %v22730_v8 = vpack.c.bf16 %v22726_v22, %v22724_v25  ;;  %v22748_v50 = vpack.c.bf16 %v22744_v3, %v22742_v17  ;;  %v25150_v58 = vld [vmem:[#allocation55_spill] sm:$0xff] }
 0xcca   :  { %25139 = vst [vmem:[#allocation25_spill] sm:$0xff] %v22693_v56  ;;  %v11852_v19 = vsel %vm25141_vm5, %v11849_v49, %v11851_v28  ;;  %vm25142_vm9 = vmmov %vm25130_vm1  ;;  %v25146_v49 = vld [vmem:[#allocation38_spill] sm:$0xff]  ;;  %v25147_v46 = vld [vmem:[#allocation80_spill] sm:$0xff] }
 0xccb   :  { %25140 = vst [vmem:[#allocation29_spill] sm:$0xff] %v22695_v7  ;;  %v11857_v51 = vsel %vm25142_vm9, %v11854_v40, %v11856_v16  ;;  %v22699_v38 = vpack.c.bf16 %v11852_v19, %v11850_v36  ;;  %v9239_v32 = vpack.c.bf16 %v25146_v49, %v25145_v48  ;;  %v22717_v40 = vpack.c.bf16 %v22379_v29, %v22375_v6  ;;  %v22734_v29 = vld [vmem:[#allocation4 + $0x1f8] sm:$0xff]  ;;  %v22736_v6 = vld [vmem:[#allocation4 + $0x200] sm:$0xff]  ;;  %v25148_v36 = vld [vmem:[#allocation74_spill] sm:$0xff] }
 0xccc   :  { %v22701_v39 = vpack.c.bf16 %v11857_v51, %v11855_v52  ;;  %v22740_v20 = vpack.c.bf16 %v22736_v6, %v22734_v29  ;;  %v22754_v28 = vpack.c.bf16 %v25148_v36, %v25147_v46  ;;  %v25149_v16 = vld [vmem:[#allocation42_spill] sm:$0xff]  ;;  %v25151_v52 = vld [vmem:[#allocation72_spill] sm:$0xff]  ;;  %v25152_v19 = vld [vmem:[#allocation41_spill] sm:$0xff] }
 0xccd   :  { %25143 = vst [vmem:[#allocation36_spill] sm:$0xff] %v22699_v38  ;;  %v22758_v61 = vpack.c.bf16 %v25150_v58, %v25149_v16  ;;  %v22764_v51 = vpack.c.bf16 %v25152_v19, %v25151_v52  ;;  %v25155_v46 = vld [vmem:[#allocation56_spill] sm:$0xff]  ;;  %v25156_v36 = vld [vmem:[#allocation57_spill] sm:$0xff]  ;;  %vm25160_vm3 = vmmov %vm25130_vm1 }
 0xcce   :  { %25144 = vst [vmem:[#allocation16_spill] sm:$0xff] %v22701_v39  ;;  %v25154_v39 = vld [vmem:[#allocation77_spill] sm:$0xff]  ;;  %v22774_v16 = vpack.c.bf16 %v25156_v36, %v25155_v46  ;;  %v25159_v52 = vld [vmem:[#allocation40_spill] sm:$0xff]  ;;  %v18757_v46 = vld [vmem:[#allocation4 + $0x10] sm:$0x3] }
 0xccf   :  { %16566 = vmatmul.mubr.bf16.gmra.mrb[80].mxu1 %v22657_v57  ;;  %v25157_v58 = vld [vmem:[#allocation61_spill] sm:$0xff]  ;;  %v10314_v19 = vrot.slane %v25159_v52, 2  ;;  %vm25161_vm4 = vmmov %vm25130_vm1  ;;  %v18558_v52 = vld [vmem:[#allocation12 + $0xd8] sm:$0xff]  }
 0xcd0   :  { %16569 = vmatprep.mubr.bf16.mxu1 %v22679_v24  ;;  %v25158_v7 = vld [vmem:[#allocation73_spill] sm:$0xff]  ;;  %vm25184_vm10 = vmmov %vm25130_vm1 }
 0xcd1   :  { %v22778_v56 = vpack.c.bf16 %v25158_v7, %v25157_v58  ;;  %v10317_v7 = vrot.slane %v18757_v46, 2  ;;  %v18556_v58 = vld [vmem:[#allocation12 + $0xc8] sm:$0xff]   ;;  %vm25185_vm11 = vmmov %vm25130_vm1 }
 0xcd2   :  { %v18560_v46 = vld [vmem:[#allocation12 + $0xe8] sm:$0xff]   ;;  %vm25190_vm15 = vmmov %vm25130_vm1 }
 0xcd3   :  { %vm25196_vm6 = vmmov %vm25130_vm1 }
 0xcd4   :  { %vm25197_vm13 = vmmov %vm25130_vm1 }
 0xcd5   :  { %vm25198_vm14 = vmmov %vm25130_vm1 }
 0xcd6   :  { %vm25199_vm7 = vmmov %vm25130_vm1 }
 0xcd7   :  { %16570 = vmatmul.mubr.bf16.gmra.mrb[84].mxu1 %v22705_v26  ;;  %vm25206_vm2 = vmmov %vm25130_vm1 }
 0xcd8   :  { %16573 = vmatprep.mubr.bf16.mxu1 %v22709_v18  ;;  %vm25207_vm0 = vmmov %vm25130_vm1 }
 0xcd9   :  { %vm25208_vm8 = vmmov %vm25207_vm0 }
 0xcda   :  { %vm25209_vm12 = vmmov %vm25207_vm0 }
 0xcdb   :  { %vm25216_vm5 = vmmov %vm25207_vm0 }
 0xcdc   :  { %vm25217_vm9 = vmmov %vm25207_vm0 }
 0xcdf   :  { %16574 = vmatmul.mubr.bf16.gmra.mrb[88].mxu1 %v22717_v40 }
 0xce0   :  { %16577 = vmatprep.mubr.bf16.mxu1 %v9239_v32  ;;  %v25153_v32 = vld [vmem:[#allocation62_spill] sm:$0xff] }
 0xce1   :  { %v22768_v38 = vpack.c.bf16 %v25154_v39, %v25153_v32  ;;  %v22784_v39 = vpack.c.bf16 %v25115_v35, %v25114_v10  ;;  %v22790_v32 = vrot.slane %v25146_v49, 2  ;;  %v18557_v49 = vld [vmem:[#allocation12 + $0xd0] sm:$0xff]  }
 0xce3   :  { %v10316_v36 = vsel %vm25160_vm3, %v10314_v19, %v22790_v32  ;;  %v10318_v10 = vsel %vm25161_vm4, %v22790_v32, %v10317_v7  ;;  %v18559_v19 = vld [vmem:[#allocation12 + $0xe0] sm:$0xff]   ;;  %v18562_v7 = vld [vmem:[#allocation12 + $0xf8] sm:$0xff]   ;;  %vm25218_vm3 = vmmov %vm25207_vm0 }
 0xce4   :  { %v10538_v35 = vpack.c.bf16 %v10318_v10, %v10316_v36  ;;  %vm25219_vm4 = vmmov %vm25207_vm0 }
 0xce7   :  { %16578 = vmatmul.mubr.bf16.gmra.mrb[92].mxu1 %v22722_v13 }
 0xce8   :  { %16581 = vmatprep.mubr.bf16.mxu1 %v22730_v8 }
 0xcef   :  { %16582 = vmatmul.mubr.bf16.gmra.mrb[32].mxu1 %v22740_v20 }
 0xcf0   :  { %16585 = vmatprep.mubr.bf16.mxu1 %v22748_v50 }
 0xcf7   :  { %16586 = vmatmul.mubr.bf16.gmra.mrb[36].mxu1 %v22754_v28 }
 0xcf8   :  { %16589 = vmatprep.mubr.bf16.mxu1 %v22758_v61 }
 0xcff   :  { %16590 = vmatmul.mubr.bf16.gmra.mrb[40].mxu1 %v22764_v51 }
 0xd00   :  { %16593 = vmatprep.mubr.bf16.mxu1 %v22768_v38 }
 0xd07   :  { %16594 = vmatmul.mubr.bf16.gmra.mrb[44].mxu1 %v22774_v16 }
 0xd08   :  { %16597 = vmatprep.mubr.bf16.mxu1 %v22778_v56 }
 0xd0f   :  { %16598 = vmatmul.mubr.bf16.gmra.mrb[48].mxu1 %v22784_v39 }
 0xd10   :  { %16601 = vmatprep.mubr.bf16.mxu1 %v22442_v43 }
 0xd17   :  { %16602 = vmatmul.mubr.bf16.gmra.mrb[52].mxu1 %v22446_v54 }
 0xd18   :  { %16605 = vmatprep.mubr.bf16.mxu1 %v22450_v12 }
 0xd1f   :  { %16606 = vmatmul.mubr.bf16.gmra.mrb[56].mxu1 %v22455_v1 }
 0xd20   :  { %16625 = vmatprep.mubr.bf16.mxu1 %v10538_v35  ;;  %v25164_v35 = vld [vmem:[#allocation18_spill] sm:$0xff] }
 0xd27   :  { %16626 = vmatmul.mubr.bf16.vlgmr.msra.gmra.mrb[60].mxu1 %v22477_v60 }
 0xd28   :  { %16629 = vmatprep.mubr.bf16.mxu1 %v22487_v23  ;;  %16690 = vmatpush3.bf16.msra.mxu1 %v22613_v41  ;;  %v18561_v41 = vld [vmem:[#allocation12 + $0xf0] sm:$0xff]  }
 0xd29   :  { %16691 = vmatprep.subr.bf16.mxu1 %v18556_v58 }
 0xd2c   :  { %16692 = vmatpush3.bf16.msra.mxu1 %v18556_v58 }
 0xd2d   :  { %16693 = vmatprep.subr.bf16.mxu1 %v18557_v49  ;;  %v22806_v36 = vpop.f32.mrb[160].mxu0 }
 0xd2e   :  { %25162 = vst [vmem:[#allocation33_spill] sm:$0xff] %v22806_v36  ;;  %v22809_v10 = vpop.f32.mrb[161].mxu0 }
 0xd2f   :  { %16630 = vmatmul.mubr.bf16.gmra.mrb[64].mxu1 %v22489_v0  ;;  %25163 = vst [vmem:[#allocation37_spill] sm:$0xff] %v22809_v10  ;;  %v22812_v58 = vpop.f32.mrb[162].mxu0  ;;  %v25170_v10 = vld [vmem:[#allocation43_spill] sm:$0xff] }
 0xd30   :  { %16633 = vmatprep.mubr.bf16.mxu1 %v22507_v30  ;;  %16694 = vmatpush3.bf16.msra.mxu1 %v18557_v49  ;;  %25165 = vst [vmem:[#allocation31_spill] sm:$0xff] %v22812_v58  ;;  %v22814_v49 = vpop.f32.mrb[163].mxu0 }
 0xd31   :  { %16695 = vmatprep.subr.bf16.mxu1 %v18558_v52  ;;  %25166 = vst [vmem:[#allocation17_spill] sm:$0xff] %v22814_v49  ;;  %v25174_v49 = vld [vmem:[#allocation65_spill] sm:$0xff] }
 0xd34   :  { %16696 = vmatpush3.bf16.msra.mxu1 %v18558_v52  ;;  %v22816_v52 = vld [vmem:[#allocation12 + $0x100] sm:$0xff]  }
 0xd35   :  { %16697 = vmatprep.subr.bf16.mxu1 %v18559_v19 }
 0xd37   :  { %16634 = vmatmul.mubr.bf16.gmra.mrb[68].mxu1 %v22512_v37 }
 0xd38   :  { %16637 = vmatprep.mubr.bf16.mxu1 %v22518_v62  ;;  %16698 = vmatpush3.bf16.msra.mxu1 %v18559_v19 }
 0xd39   :  { %16699 = vmatprep.subr.bf16.mxu1 %v18560_v46  ;;  %v22819_v19 = vpop.f32.mrb[164].mxu0 }
 0xd3a   :  { %25167 = vst [vmem:[#allocation34_spill] sm:$0xff] %v22819_v19  ;;  %v22822_v36 = vpop.f32.mrb[165].mxu0 }
 0xd3b   :  { %25169 = vst [vmem:[#allocation20_spill] sm:$0xff] %v22822_v36  ;;  %v10394_v36 = vrot.slane %v25145_v48, 2 }
 0xd3c   :  { %16700 = vmatpush3.bf16.msra.mxu1 %v18560_v46  ;;  %v25168_v46 = vld [vmem:[#allocation19_spill] sm:$0xff] }
 0xd3d   :  { %16701 = vmatprep.subr.bf16.mxu1 %v18561_v41 }
 0xd3f   :  { %16638 = vmatmul.mubr.bf16.gmra.mrb[72].mxu1 %v22533_v31 }
 0xd40   :  { %16641 = vmatprep.mubr.bf16.mxu1 %v25164_v35  ;;  %16702 = vmatpush3.bf16.msra.mxu1 %v18561_v41  ;;  %v22825_v35 = vpop.f32.mrb[166].mxu0 }
 0xd41   :  { %16703 = vmatprep.subr.bf16.mxu1 %v18562_v7  ;;  %25171 = vst [vmem:[#allocation26_spill] sm:$0xff] %v22825_v35  ;;  %v22827_v58 = vpop.f32.mrb[167].mxu0  ;;  %v10405_v35 = vrot.slane %v22726_v22, 2  ;;  %v18759_v22 = vld [vmem:[#allocation4 + $0x208] sm:$0x3] }
 0xd42   :  { %25172 = vst [vmem:[#allocation27_spill] sm:$0xff] %v22827_v58  ;;  %v22829_v41 = vpop.f32.mrb[168].mxu0 }
 0xd43   :  { %25173 = vst [vmem:[#allocation35_spill] sm:$0xff] %v22829_v41  ;;  %v22832_v31 = vpop.f32.mrb[169].mxu0 }
 0xd44   :  { %16704 = vmatpush3.bf16.msra.mxu1 %v18562_v7  ;;  %25175 = vst [vmem:[#allocation32_spill] sm:$0xff] %v22832_v31  ;;  %v25176_v7 = vld [vmem:[#allocation66_spill] sm:$0xff]  ;;  %v22835_v62 = vpop.f32.mrb[170].mxu0 }
 0xd45   :  { %16769 = vmatprep.subr.bf16.mxu1 %v22816_v52  ;;  %25177 = vst [vmem:[#allocation24_spill] sm:$0xff] %v22835_v62  ;;  %v22837_v19 = vpop.f32.mrb[171].mxu0  ;;  %v10396_v62 = vsel %vm25184_vm10, %v10394_v36, %v22790_v32  ;;  %vm25225_vm10 = vmmov %vm25207_vm0 }
 0xd46   :  { %25178 = vst [vmem:[#allocation45_spill] sm:$0xff] %v22837_v19 }
 0xd47   :  { %16642 = vmatmul.mubr.bf16.gmra.mrb[76].mxu1 %v25168_v46  ;;  %v25179_v46 = vld [vmem:[#allocation52_spill] sm:$0xff] }
 0xd48   :  { %16645 = vmatprep.mubr.bf16.mxu1 %v25170_v10  ;;  %v10397_v10 = vrot.slane %v25179_v46, 2 }
 0xd49   :  { %v22841_v37 = vpop.f32.mrb[172].mxu0 }
 0xd4a   :  { %25180 = vst [vmem:[#allocation44_spill] sm:$0xff] %v22841_v37  ;;  %v22844_v58 = vpop.f32.mrb[173].mxu0  ;;  %v10398_v48 = vsel %vm25185_vm11, %v22790_v32, %v10397_v10  ;;  %vm25226_vm11 = vmmov %vm25207_vm0 }
 0xd4b   :  { %25181 = vst [vmem:[#allocation38_spill] sm:$0xff] %v22844_v58  ;;  %v22847_v41 = vpop.f32.mrb[174].mxu0  ;;  %v10554_v19 = vpack.c.bf16 %v10398_v48, %v10396_v62  ;;  %v10404_v58 = vrot.slane %v22724_v25, 2  ;;  %v10410_v25 = vrot.slane %v22736_v6, 2 }
 0xd4c   :  { %25182 = vst [vmem:[#allocation80_spill] sm:$0xff] %v22847_v41  ;;  %v22849_v31 = vpop.f32.mrb[175].mxu0  ;;  %v18758_v41 = vld [vmem:[#allocation4 + $0x1f0] sm:$0x3] }
 0xd4d   :  { %25183 = vst [vmem:[#allocation74_spill] sm:$0xff] %v22849_v31  ;;  %v10406_v32 = vsel %vm25190_vm15, %v10404_v58, %v10405_v35  ;;  %v10415_v58 = vrot.slane %v22744_v3, 2  ;;  %vm25227_vm15 = vmmov %vm25207_vm0 }
 0xd4f   :  { %16646 = vmatmul.mubr.bf16.gmra.mrb[80].mxu1 %v25174_v49 }
 0xd50   :  { %16649 = vmatprep.mubr.bf16.mxu1 %v25176_v7 }
 0xd53   :  { %v22855_v46 = vpop.f32.mrb[176].mxu0 }
 0xd54   :  { %25186 = vst [vmem:[#allocation42_spill] sm:$0xff] %v22855_v46  ;;  %v22858_v37 = vpop.f32.mrb[177].mxu0  ;;  %v10412_v46 = vrot.slane %v18759_v22, 2 }
 0xd55   :  { %25187 = vst [vmem:[#allocation55_spill] sm:$0xff] %v22858_v37  ;;  %v22862_v31 = vpop.f32.mrb[178].mxu0  ;;  %v10409_v37 = vrot.slane %v22734_v29, 2 }
 0xd56   :  { %25188 = vst [vmem:[#allocation72_spill] sm:$0xff] %v22862_v31  ;;  %v22864_v36 = vpop.f32.mrb[179].mxu0  ;;  %v10413_v6 = vsel %vm25197_vm13, %v10410_v25, %v10412_v46  ;;  %v18762_v31 = vld [vmem:[#allocation4 + $0x230] sm:$0xff]  ;;  %v18764_v46 = vld [vmem:[#allocation4 + $0x240] sm:$0xff] }
 0xd57   :  { %16650 = vmatmul.mubr.bf16.gmra.mrb[84].mxu1 %v22578_v42  ;;  %25189 = vst [vmem:[#allocation41_spill] sm:$0xff] %v22864_v36  ;;  %v18760_v36 = vld [vmem:[#allocation4 + $0x220] sm:$0x3]  ;;  %v10411_v29 = vsel %vm25196_vm6, %v10409_v37, %v10410_v25  ;;  %v10424_v25 = vrot.slane %v18764_v46, 2  ;;  %vm25279_vm6 = vcmask 1046528  }
 0xd58   :  { %16653 = vmatprep.mubr.bf16.mxu1 %v22583_v15  ;;  %v10407_v15 = vrot.slane %v18758_v41, 2  ;;  %vm25280_vm13 = vmmov %vm25279_vm6 }
 0xd5a   :  { %v10408_v62 = vsel %vm25130_vm1, %v10405_v35, %v10407_v15  ;;  %v10417_v15 = vrot.slane %v18760_v36, 2  ;;  %v18761_v36 = vld [vmem:[#allocation4 + $0x228] sm:$0xff]  ;;  %vm25228_vm1 = vmmov %vm25207_vm0 }
 0xd5b   :  { %v22868_v10 = vpack.c.bf16 %v10408_v62, %v10406_v32 }
 0xd5c   :  { %v10418_v22 = vsel %vm25199_vm7, %v10415_v58, %v10417_v15  ;;  %v18766_v15 = vld [vmem:[#allocation4 + $0x250] sm:$0x3]  ;;  %vm25293_vm7 = vmmov %vm25279_vm6 }
 0xd5d   :  { %25191 = vst [vmem:[#allocation62_spill] sm:$0xff] %v22868_v10  ;;  %v22870_v48 = vpop.f32.mrb[180].mxu0 }
 0xd5e   :  { %25192 = vst [vmem:[#allocation77_spill] sm:$0xff] %v22870_v48  ;;  %v22875_v41 = vpop.f32.mrb[181].mxu0  ;;  %v10419_v48 = vrot.slane %v18761_v36, 2 }
 0xd5f   :  { %16654 = vmatmul.mubr.bf16.gmra.mrb[88].mxu1 %v22591_v34  ;;  %25193 = vst [vmem:[#allocation56_spill] sm:$0xff] %v22875_v41  ;;  %v22880_v35 = vpop.f32.mrb[182].mxu0  ;;  %v22888_v41 = vpack.c.bf16 %v10413_v6, %v10411_v29  ;;  %v10427_v29 = vrot.slane %v18766_v15, 2  ;;  %v18767_v15 = vld [vmem:[#allocation4 + $0x258] sm:$0xff] }
 0xd60   :  { %16657 = vmatprep.mubr.bf16.mxu1 %v10554_v19  ;;  %v10414_v19 = vrot.slane %v22742_v17, 2  ;;  %25194 = vst [vmem:[#allocation57_spill] sm:$0xff] %v22880_v35  ;;  %v22882_v32 = vpop.f32.mrb[183].mxu0  ;;  %v10420_v35 = vrot.slane %v18762_v31, 2 }
 0xd61   :  { %25195 = vst [vmem:[#allocation61_spill] sm:$0xff] %v22882_v32  ;;  %25200 = vst [vmem:[#allocation73_spill] sm:$0xff] %v22888_v41 }
 0xd62   :  { %v10416_v62 = vsel %vm25198_vm14, %v10414_v19, %v10415_v58  ;;  %v18765_v19 = vld [vmem:[#allocation4 + $0x248] sm:$0xff]  ;;  %v10421_v31 = vsel %vm25206_vm2, %v10419_v48, %v10420_v35  ;;  %vm25292_vm14 = vmmov %vm25279_vm6 }
 0xd63   :  { %v22890_v17 = vpack.c.bf16 %v10418_v22, %v10416_v62  ;;  %v10425_v58 = vrot.slane %v18765_v19, 2  ;;  %vm25304_vm2 = vmmov %vm25207_vm0 }
 0xd65   :  { %25201 = vst [vmem:[#allocation40_spill] sm:$0xff] %v22890_v17  ;;  %v10426_v22 = vsel %vm25208_vm8, %v10424_v25, %v10425_v58  ;;  %v10428_v36 = vsel %vm25209_vm12, %v10425_v58, %v10427_v29  ;;  %v18771_v25 = vld [vmem:[#allocation4 + $0x278] sm:$0xff]  ;;  %v18772_v29 = vld [vmem:[#allocation4 + $0x280] sm:$0x3]  ;;  %vm25311_vm8 = vmmov %vm25207_vm0 }
 0xd66   :  { %v22908_v46 = vpack.c.bf16 %v10428_v36, %v10426_v22  ;;  %v10435_v58 = vrot.slane %v18771_v25, 2  ;;  %vm25312_vm12 = vmmov %vm25207_vm0 }
 0xd67   :  { %16658 = vmatmul.mubr.bf16.gmra.mrb[92].mxu1 %v22600_v63 }
 0xd68   :  { %16661 = vmatprep.mubr.bf16.mxu1 %v22868_v10  ;;  %v22892_v3 = vpop.f32.mrb[184].mxu0  ;;  %v18763_v10 = vld [vmem:[#allocation4 + $0x238] sm:$0x3]  ;;  %25211 = vst [vmem:[#allocation99_spill] sm:$0xff] %v22908_v46 }
 0xd69   :  { %25202 = vst [vmem:[#allocation66_spill] sm:$0xff] %v22892_v3  ;;  %v10422_v32 = vrot.slane %v18763_v10, 2  ;;  %v22895_v37 = vpop.f32.mrb[185].mxu0  ;;  %v10429_v3 = vrot.slane %v18767_v15, 2 }
 0xd6a   :  { %25203 = vst [vmem:[#allocation52_spill] sm:$0xff] %v22895_v37  ;;  %v22898_v6 = vpop.f32.mrb[186].mxu0 }
 0xd6b   :  { %25204 = vst [vmem:[#allocation96_spill] sm:$0xff] %v22898_v6  ;;  %v22900_v62 = vpop.f32.mrb[187].mxu0  ;;  %v10423_v10 = vsel %vm25207_vm0, %v10420_v35, %v10422_v32  ;;  %v18770_v35 = vld [vmem:[#allocation4 + $0x270] sm:$0xff] }
 0xd6c   :  { %25205 = vst [vmem:[#allocation97_spill] sm:$0xff] %v22900_v62  ;;  %v22906_v37 = vpack.c.bf16 %v10423_v10, %v10421_v31  ;;  %v10434_v32 = vrot.slane %v18770_v35, 2  ;;  %v10437_v31 = vrot.slane %v18772_v29, 2  ;;  %v18773_v29 = vld [vmem:[#allocation4 + $0x288] sm:$0xff] }
 0xd6e   :  { %25210 = vst [vmem:[#allocation98_spill] sm:$0xff] %v22906_v37  ;;  %v10436_v36 = vsel %vm25218_vm3, %v10434_v32, %v10435_v58  ;;  %v10438_v15 = vsel %vm25219_vm4, %v10435_v58, %v10437_v31  ;;  %v18777_v32 = vld [vmem:[#allocation4 + $0x2a8] sm:$0xff]  ;;  %v18778_v31 = vld [vmem:[#allocation4 + $0x2b0] sm:$0x3] }
 0xd6f   :  { %16662 = vmatmul.mubr.bf16.gmra.mrb[32].mxu1 %v22888_v41  ;;  %v18769_v41 = vld [vmem:[#allocation4 + $0x268] sm:$0x3]  ;;  %v22926_v35 = vpack.c.bf16 %v10438_v15, %v10436_v36  ;;  %v10445_v58 = vrot.slane %v18777_v32, 2  ;;  %v18565_v32 = vld [vmem:[#allocation12 + $0x110] sm:$0xff]  }
 0xd70   :  { %16665 = vmatprep.mubr.bf16.mxu1 %v22890_v17  ;;  %v18768_v17 = vld [vmem:[#allocation4 + $0x260] sm:$0xff]  ;;  %v10432_v62 = vrot.slane %v18769_v41, 2 }
 0xd71   :  { %v22910_v19 = vpop.f32.mrb[188].mxu0  ;;  %v10430_v6 = vrot.slane %v18768_v17, 2 }
 0xd72   :  { %25212 = vst [vmem:[#allocation100_spill] sm:$0xff] %v22910_v19  ;;  %v22913_v48 = vpop.f32.mrb[189].mxu0  ;;  %v10439_v19 = vrot.slane %v18773_v29, 2 }
 0xd73   :  { %25213 = vst [vmem:[#allocation101_spill] sm:$0xff] %v22913_v48  ;;  %v22916_v10 = vpop.f32.mrb[190].mxu0  ;;  %v10431_v17 = vsel %vm25216_vm5, %v10429_v3, %v10430_v6  ;;  %v10433_v41 = vsel %vm25217_vm9, %v10430_v6, %v10432_v62  ;;  %v18776_v6 = vld [vmem:[#allocation4 + $0x2a0] sm:$0xff] }
 0xd74   :  { %25214 = vst [vmem:[#allocation102_spill] sm:$0xff] %v22916_v10  ;;  %v22918_v22 = vpop.f32.mrb[191].mxu0  ;;  %v22924_v48 = vpack.c.bf16 %v10433_v41, %v10431_v17  ;;  %v10444_v62 = vrot.slane %v18776_v6, 2  ;;  %v10447_v17 = vrot.slane %v18778_v31, 2  ;;  %v25232_v31 = vld [vmem:[#allocation92_spill] sm:$0xff] }
 0xd75   :  { %25215 = vst [vmem:[#allocation103_spill] sm:$0xff] %v22918_v22 }
 0xd76   :  { %25220 = vst [vmem:[#allocation104_spill] sm:$0xff] %v22924_v48  ;;  %v10446_v15 = vsel %vm25227_vm15, %v10444_v62, %v10445_v58  ;;  %v10448_v29 = vsel %vm25228_vm1, %v10445_v58, %v10447_v17  ;;  %v25231_v62 = vld [vmem:[#allocation87_spill] sm:$0xff]  ;;  %v18567_v17 = vld [vmem:[#allocation12 + $0x120] sm:$0xff]  }
 0xd77   :  { %16666 = vmatmul.mubr.bf16.gmra.mrb[36].mxu1 %v22906_v37  ;;  %v18775_v37 = vld [vmem:[#allocation4 + $0x298] sm:$0x3]  ;;  %v22944_v6 = vpack.c.bf16 %v10448_v29, %v10446_v15  ;;  %v18571_v15 = vld [vmem:[#allocation12 + $0x140] sm:$0xff]   ;;  %v22971_v29 = vpack.c.bf16 %v22653_v4, %v22646_v33  ;;  %v22991_v33 = vpack.c.bf16 %v22665_v47, %v22663_v55  ;;  %v18576_v47 = vld [vmem:[#allocation12 + $0x168] sm:$0xff]  }
 0xd78   :  { %16669 = vmatprep.mubr.bf16.mxu1 %v22908_v46  ;;  %v18774_v46 = vld [vmem:[#allocation4 + $0x290] sm:$0xff]  ;;  %v10442_v22 = vrot.slane %v18775_v37, 2  ;;  %v18566_v58 = vld [vmem:[#allocation12 + $0x118] sm:$0xff]   ;;  %v18575_v55 = vld [vmem:[#allocation12 + $0x160] sm:$0xff]  }
 0xd79   :  { %v22928_v25 = vpop.f32.mrb[192].mxu0  ;;  %v10440_v10 = vrot.slane %v18774_v46, 2  ;;  %v25233_v4 = vld [vmem:[#allocation47_spill] sm:$0xff] }
 0xd7a   :  { %25221 = vst [vmem:[#allocation105_spill] sm:$0xff] %v22928_v25  ;;  %v22931_v3 = vpop.f32.mrb[193].mxu0  ;;  %v25244_v25 = vld [vmem:[#allocation23_spill] sm:$0xff] }
 0xd7b   :  { %25222 = vst [vmem:[#allocation106_spill] sm:$0xff] %v22931_v3  ;;  %v22934_v41 = vpop.f32.mrb[194].mxu0  ;;  %v10441_v46 = vsel %vm25225_vm10, %v10439_v19, %v10440_v10  ;;  %v10443_v37 = vsel %vm25226_vm11, %v10440_v10, %v10442_v22  ;;  %v25229_v19 = vld [vmem:[#allocation83_spill] sm:$0xff]  ;;  %v18564_v10 = vld [vmem:[#allocation12 + $0x108] sm:$0xff]   ;;  %v25230_v22 = vld [vmem:[#allocation64_spill] sm:$0xff] }
 0xd7c   :  { %25223 = vst [vmem:[#allocation107_spill] sm:$0xff] %v22934_v41  ;;  %v22936_v36 = vpop.f32.mrb[195].mxu0  ;;  %v22942_v3 = vpack.c.bf16 %v10443_v37, %v10441_v46  ;;  %v18568_v46 = vld [vmem:[#allocation12 + $0x128] sm:$0xff]   ;;  %v18570_v37 = vld [vmem:[#allocation12 + $0x138] sm:$0xff]  }
 0xd7d   :  { %25224 = vst [vmem:[#allocation108_spill] sm:$0xff] %v22936_v36  ;;  %v25241_v36 = vld [vmem:[#allocation81_spill] sm:$0xff] }
 0xd7e   :  { %v25243_v41 = vld [vmem:[#allocation49_spill] sm:$0xff] }
 0xd7f   :  { %16670 = vmatmul.mubr.bf16.gmra.mrb[40].mxu1 %v22924_v48 }
 0xd80   :  { %16673 = vmatprep.mubr.bf16.mxu1 %v22926_v35 }
 0xd87   :  { %16674 = vmatmul.mubr.bf16.gmra.mrb[44].mxu1 %v22942_v3 }
 0xd88   :  { %16677 = vmatprep.mubr.bf16.mxu1 %v22944_v6 }
 0xd8f   :  { %16678 = vmatmul.mubr.bf16.gmra.mrb[48].mxu1 %v22635_v21 }
 0xd90   :  { %16681 = vmatprep.mubr.bf16.mxu1 %v22641_v45 }
 0xd97   :  { %16682 = vmatmul.mubr.bf16.gmra.mrb[52].mxu1 %v22659_v53 }
 0xd98   :  { %16685 = vmatprep.mubr.bf16.mxu1 %v22667_v59 }
 0xd9f   :  { %16686 = vmatmul.mubr.bf16.gmra.mrb[56].mxu1 %v22672_v9 }
 0xda0   :  { %16705 = vmatprep.mubr.bf16.mxu1 %v25229_v19  ;;  %v25234_v19 = vld [vmem:[#allocation51_spill] sm:$0xff] }
 0xda7   :  { %16706 = vmatmul.mubr.bf16.vlgmr.msra.gmra.mrb[60].mxu1 %v25230_v22 }
 0xda8   :  { %16709 = vmatprep.mubr.bf16.mxu1 %v25231_v62  ;;  %16770 = vmatpush3.bf16.msra.mxu1 %v22816_v52  ;;  %v18569_v52 = vld [vmem:[#allocation12 + $0x130] sm:$0xff]  }
 0xda9   :  { %16771 = vmatprep.subr.bf16.mxu1 %v18564_v10 }
 0xdac   :  { %16772 = vmatpush3.bf16.msra.mxu1 %v18564_v10  ;;  %v25235_v10 = vld [vmem:[#allocation60_spill] sm:$0xff] }
 0xdad   :  { %16773 = vmatprep.subr.bf16.mxu1 %v18565_v32 }
 0xdaf   :  { %16710 = vmatmul.mubr.bf16.gmra.mrb[64].mxu1 %v25232_v31 }
 0xdb0   :  { %16713 = vmatprep.mubr.bf16.mxu1 %v22589_v44  ;;  %16774 = vmatpush3.bf16.msra.mxu1 %v18565_v32  ;;  %v18573_v32 = vld [vmem:[#allocation12 + $0x150] sm:$0xff]  }
 0xdb1   :  { %16775 = vmatprep.subr.bf16.mxu1 %v18566_v58 }
 0xdb4   :  { %16776 = vmatpush3.bf16.msra.mxu1 %v18566_v58  ;;  %v18574_v58 = vld [vmem:[#allocation12 + $0x158] sm:$0xff]  }
 0xdb5   :  { %16777 = vmatprep.subr.bf16.mxu1 %v18567_v17 }
 0xdb7   :  { %16714 = vmatmul.mubr.bf16.gmra.mrb[68].mxu1 %v22596_v2 }
 0xdb8   :  { %16717 = vmatprep.mubr.bf16.mxu1 %v22605_v5  ;;  %16778 = vmatpush3.bf16.msra.mxu1 %v18567_v17  ;;  %v25236_v17 = vld [vmem:[#allocation71_spill] sm:$0xff] }
 0xdb9   :  { %16779 = vmatprep.subr.bf16.mxu1 %v18568_v46 }
 0xdbc   :  { %16780 = vmatpush3.bf16.msra.mxu1 %v18568_v46  ;;  %v25237_v46 = vld [vmem:[#allocation53_spill] sm:$0xff] }
 0xdbd   :  { %16781 = vmatprep.subr.bf16.mxu1 %v18569_v52 }
 0xdbf   :  { %16718 = vmatmul.mubr.bf16.gmra.mrb[72].mxu1 %v22609_v14 }
 0xdc0   :  { %16721 = vmatprep.mubr.bf16.mxu1 %v22622_v27  ;;  %16782 = vmatpush3.bf16.msra.mxu1 %v18569_v52  ;;  %v25238_v52 = vld [vmem:[#allocation63_spill] sm:$0xff] }
 0xdc1   :  { %16783 = vmatprep.subr.bf16.mxu1 %v18570_v37 }
 0xdc4   :  { %16784 = vmatpush3.bf16.msra.mxu1 %v18570_v37  ;;  %v25239_v37 = vld [vmem:[#allocation22_spill] sm:$0xff] }
 0xdc5   :  { %16849 = vmatprep.subr.bf16.mxu1 %v18571_v15 }
 0xdc7   :  { %16722 = vmatmul.mubr.bf16.gmra.mrb[76].mxu1 %v22629_v11 }
 0xdc8   :  { %16725 = vmatprep.mubr.bf16.mxu1 %v22657_v57 }
 0xdcf   :  { %16726 = vmatmul.mubr.bf16.gmra.mrb[80].mxu1 %v22679_v24 }
 0xdd0   :  { %16729 = vmatprep.mubr.bf16.mxu1 %v22705_v26 }
 0xdd7   :  { %16730 = vmatmul.mubr.bf16.gmra.mrb[84].mxu1 %v22709_v18 }
 0xdd8   :  { %16733 = vmatprep.mubr.bf16.mxu1 %v22717_v40 }
 0xddf   :  { %16734 = vmatmul.mubr.bf16.gmra.mrb[88].mxu1 %v22971_v29 }
 0xde0   :  { %16737 = vmatprep.mubr.bf16.mxu1 %v22722_v13  ;;  %v18572_v13 = vld [vmem:[#allocation12 + $0x148] sm:$0xff]  }
 0xde7   :  { %16738 = vmatmul.mubr.bf16.gmra.mrb[92].mxu1 %v22730_v8 }
 0xde8   :  { %16741 = vmatprep.mubr.bf16.mxu1 %v22740_v20 }
 0xdef   :  { %16742 = vmatmul.mubr.bf16.gmra.mrb[32].mxu1 %v22748_v50 }
 0xdf0   :  { %16745 = vmatprep.mubr.bf16.mxu1 %v22754_v28 }
 0xdf7   :  { %16746 = vmatmul.mubr.bf16.gmra.mrb[36].mxu1 %v22758_v61 }
 0xdf8   :  { %16749 = vmatprep.mubr.bf16.mxu1 %v22764_v51 }
 0xdff   :  { %16750 = vmatmul.mubr.bf16.gmra.mrb[40].mxu1 %v22768_v38 }
 0xe00   :  { %16753 = vmatprep.mubr.bf16.mxu1 %v22774_v16 }
 0xe07   :  { %16754 = vmatmul.mubr.bf16.gmra.mrb[44].mxu1 %v22778_v56 }
 0xe08   :  { %16757 = vmatprep.mubr.bf16.mxu1 %v22784_v39 }
 0xe0f   :  { %16758 = vmatmul.mubr.bf16.gmra.mrb[48].mxu1 %v22442_v43 }
 0xe10   :  { %16761 = vmatprep.mubr.bf16.mxu1 %v22446_v54 }
 0xe17   :  { %16762 = vmatmul.mubr.bf16.gmra.mrb[52].mxu1 %v22450_v12 }
 0xe18   :  { %16765 = vmatprep.mubr.bf16.mxu1 %v22455_v1 }
 0xe1f   :  { %16766 = vmatmul.mubr.bf16.gmra.mrb[56].mxu1 %v22991_v33 }
 0xe20   :  { %16785 = vmatprep.mubr.bf16.mxu1 %v25233_v4  ;;  %v18578_v4 = vld [vmem:[#allocation12 + $0x178] sm:$0xff]  }
 0xe27   :  { %16786 = vmatmul.mubr.bf16.vlgmr.msra.gmra.mrb[60].mxu1 %v25234_v19 }
 0xe28   :  { %16789 = vmatprep.mubr.bf16.mxu1 %v25235_v10  ;;  %16850 = vmatpush3.bf16.msra.mxu1 %v18571_v15  ;;  %v18577_v15 = vld [vmem:[#allocation12 + $0x170] sm:$0xff]  }
 0xe29   :  { %16851 = vmatprep.subr.bf16.mxu1 %v18572_v13 }
 0xe2c   :  { %16852 = vmatpush3.bf16.msra.mxu1 %v18572_v13  ;;  %v25240_v13 = vld [vmem:[#allocation46_spill] sm:$0xff] }
 0xe2d   :  { %16853 = vmatprep.subr.bf16.mxu1 %v18573_v32 }
 0xe2f   :  { %16790 = vmatmul.mubr.bf16.gmra.mrb[64].mxu1 %v25236_v17 }
 0xe30   :  { %16793 = vmatprep.mubr.bf16.mxu1 %v25237_v46  ;;  %16854 = vmatpush3.bf16.msra.mxu1 %v18573_v32  ;;  %v18579_v32 = vld [vmem:[#allocation12 + $0x180] sm:$0xff]  }
 0xe31   :  { %16855 = vmatprep.subr.bf16.mxu1 %v18574_v58 }
 0xe34   :  { %16856 = vmatpush3.bf16.msra.mxu1 %v18574_v58  ;;  %v25242_v58 = vld [vmem:[#allocation28_spill] sm:$0xff] }
 0xe35   :  { %16857 = vmatprep.subr.bf16.mxu1 %v18575_v55 }
 0xe37   :  { %16794 = vmatmul.mubr.bf16.gmra.mrb[68].mxu1 %v25238_v52  ;;  %v25252_v52 = vld [vmem:[#allocation59_spill] sm:$0xff] }
 0xe38   :  { %16797 = vmatprep.mubr.bf16.mxu1 %v25239_v37  ;;  %16858 = vmatpush3.bf16.msra.mxu1 %v18575_v55  ;;  %v25245_v55 = vld [vmem:[#allocation84_spill] sm:$0xff] }
 0xe39   :  { %16859 = vmatprep.subr.bf16.mxu1 %v18576_v47  ;;  %v25247_v37 = vld [vmem:[#allocation88_spill] sm:$0xff] }
 0xe3c   :  { %16860 = vmatpush3.bf16.msra.mxu1 %v18576_v47  ;;  %v25246_v47 = vld [vmem:[#allocation85_spill] sm:$0xff] }
 0xe3d   :  { %16861 = vmatprep.subr.bf16.mxu1 %v18577_v15 }
 0xe3f   :  { %16798 = vmatmul.mubr.bf16.gmra.mrb[72].mxu1 %v25240_v13  ;;  %v25248_v13 = vld [vmem:[#allocation25_spill] sm:$0xff] }
 0xe40   :  { %16801 = vmatprep.mubr.bf16.mxu1 %v25241_v36  ;;  %16862 = vmatpush3.bf16.msra.mxu1 %v18577_v15  ;;  %v25249_v36 = vld [vmem:[#allocation89_spill] sm:$0xff]  ;;  %v25250_v15 = vld [vmem:[#allocation50_spill] sm:$0xff] }
 0xe41   :  { %16863 = vmatprep.subr.bf16.mxu1 %v18578_v4 }
 0xe44   :  { %16864 = vmatpush3.bf16.msra.mxu1 %v18578_v4  ;;  %v25251_v4 = vld [vmem:[#allocation76_spill] sm:$0xff] }
 0xe45   :  { %16929 = vmatprep.subr.bf16.mxu1 %v18579_v32 }
 0xe47   :  { %16802 = vmatmul.mubr.bf16.gmra.mrb[76].mxu1 %v25242_v58  ;;  %v25253_v58 = vld [vmem:[#allocation58_spill] sm:$0xff] }
 0xe48   :  { %16805 = vmatprep.mubr.bf16.mxu1 %v25243_v41  ;;  %v25254_v41 = vld [vmem:[#allocation69_spill] sm:$0xff] }
 0xe4f   :  { %16806 = vmatmul.mubr.bf16.gmra.mrb[80].mxu1 %v25244_v25  ;;  %v25255_v25 = vld [vmem:[#allocation75_spill] sm:$0xff] }
 0xe50   :  { %16809 = vmatprep.mubr.bf16.mxu1 %v25245_v55  ;;  %v25256_v55 = vld [vmem:[#allocation70_spill] sm:$0xff] }
 0xe57   :  { %16810 = vmatmul.mubr.bf16.gmra.mrb[84].mxu1 %v25246_v47  ;;  %v25257_v47 = vld [vmem:[#allocation54_spill] sm:$0xff] }
 0xe58   :  { %16813 = vmatprep.mubr.bf16.mxu1 %v25247_v37  ;;  %v25258_v37 = vld [vmem:[#allocation79_spill] sm:$0xff] }
 0xe5f   :  { %16814 = vmatmul.mubr.bf16.gmra.mrb[88].mxu1 %v25248_v13  ;;  %v25259_v13 = vld [vmem:[#allocation21_spill] sm:$0xff] }
 0xe60   :  { %16817 = vmatprep.mubr.bf16.mxu1 %v25249_v36  ;;  %v25260_v36 = vld [vmem:[#allocation39_spill] sm:$0xff] }
 0xe67   :  { %16818 = vmatmul.mubr.bf16.gmra.mrb[92].mxu1 %v25250_v15  ;;  %v25261_v15 = vld [vmem:[#allocation48_spill] sm:$0xff] }
 0xe68   :  { %16821 = vmatprep.mubr.bf16.mxu1 %v25251_v4  ;;  %v25262_v4 = vld [vmem:[#allocation30_spill] sm:$0xff] }
 0xe6f   :  { %16822 = vmatmul.mubr.bf16.gmra.mrb[32].mxu1 %v25252_v52  ;;  %v25263_v52 = vld [vmem:[#allocation86_spill] sm:$0xff] }
 0xe70   :  { %16825 = vmatprep.mubr.bf16.mxu1 %v25253_v58  ;;  %v25264_v58 = vld [vmem:[#allocation29_spill] sm:$0xff] }
 0xe77   :  { %16826 = vmatmul.mubr.bf16.gmra.mrb[36].mxu1 %v25254_v41 }
 0xe78   :  { %16829 = vmatprep.mubr.bf16.mxu1 %v25255_v25  ;;  %v18580_v25 = vld [vmem:[#allocation12 + $0x188] sm:$0xff]  }
 0xe7f   :  { %16830 = vmatmul.mubr.bf16.gmra.mrb[40].mxu1 %v25256_v55 }
 0xe80   :  { %16833 = vmatprep.mubr.bf16.mxu1 %v25257_v47 }
 0xe87   :  { %16834 = vmatmul.mubr.bf16.gmra.mrb[44].mxu1 %v25258_v37 }
 0xe88   :  { %16837 = vmatprep.mubr.bf16.mxu1 %v25259_v13  ;;  %v18581_v13 = vld [vmem:[#allocation12 + $0x190] sm:$0xff]  }
 0xe8f   :  { %16838 = vmatmul.mubr.bf16.gmra.mrb[48].mxu1 %v25260_v36  ;;  %v18582_v36 = vld [vmem:[#allocation12 + $0x198] sm:$0xff]  }
 0xe90   :  { %16841 = vmatprep.mubr.bf16.mxu1 %v25261_v15 }
 0xe97   :  { %16842 = vmatmul.mubr.bf16.gmra.mrb[52].mxu1 %v25262_v4  ;;  %v25265_v4 = vld [vmem:[#allocation94_spill] sm:$0xff] }
 0xe98   :  { %16845 = vmatprep.mubr.bf16.mxu1 %v25263_v52  ;;  %v25266_v52 = vld [vmem:[#allocation95_spill] sm:$0xff] }
 0xe9f   :  { %16846 = vmatmul.mubr.bf16.gmra.mrb[56].mxu1 %v25264_v58  ;;  %v18583_v58 = vld [vmem:[#allocation12 + $0x1a0] sm:$0xff]  }
 0xea0   :  { %16865 = vmatprep.mubr.bf16.mxu1 %v22477_v60  ;;  %v18584_v60 = vld [vmem:[#allocation12 + $0x1a8] sm:$0xff]  }
 0xea7   :  { %16866 = vmatmul.mubr.bf16.vlgmr.msra.gmra.mrb[60].mxu1 %v22487_v23  ;;  %v25267_v23 = vld [vmem:[#allocation78_spill] sm:$0xff] }
 0xea8   :  { %16869 = vmatprep.mubr.bf16.mxu1 %v22489_v0  ;;  %16930 = vmatpush3.bf16.msra.mxu1 %v18579_v32  ;;  %v18585_v32 = vld [vmem:[#allocation12 + $0x1b0] sm:$0xff]  }
 0xea9   :  { %16931 = vmatprep.subr.bf16.mxu1 %v18580_v25  ;;  %v25268_v0 = vld [vmem:[#allocation18_spill] sm:$0xff] }
 0xeac   :  { %16932 = vmatpush3.bf16.msra.mxu1 %v18580_v25  ;;  %v18586_v25 = vld [vmem:[#allocation12 + $0x1b8] sm:$0xff]  }
 0xead   :  { %16933 = vmatprep.subr.bf16.mxu1 %v18581_v13 }
 0xeaf   :  { %16870 = vmatmul.mubr.bf16.gmra.mrb[64].mxu1 %v22507_v30  ;;  %v25269_v30 = vld [vmem:[#allocation19_spill] sm:$0xff] }
 0xeb0   :  { %16873 = vmatprep.mubr.bf16.mxu1 %v25265_v4  ;;  %16934 = vmatpush3.bf16.msra.mxu1 %v18581_v13  ;;  %v18587_v13 = vld [vmem:[#allocation12 + $0x1c0] sm:$0xff]  }
 0xeb1   :  { %16935 = vmatprep.subr.bf16.mxu1 %v18582_v36 }
 0xeb4   :  { %16936 = vmatpush3.bf16.msra.mxu1 %v18582_v36  ;;  %v25270_v36 = vld [vmem:[#allocation43_spill] sm:$0xff] }
 0xeb5   :  { %16937 = vmatprep.subr.bf16.mxu1 %v18583_v58 }
 0xeb7   :  { %16874 = vmatmul.mubr.bf16.gmra.mrb[68].mxu1 %v25266_v52 }
 0xeb8   :  { %16877 = vmatprep.mubr.bf16.mxu1 %v25267_v23  ;;  %16938 = vmatpush3.bf16.msra.mxu1 %v18583_v58  ;;  %v25271_v58 = vld [vmem:[#allocation82_spill] sm:$0xff] }
 0xeb9   :  { %16939 = vmatprep.subr.bf16.mxu1 %v18584_v60 }
 0xebc   :  { %16940 = vmatpush3.bf16.msra.mxu1 %v18584_v60  ;;  %v25272_v60 = vld [vmem:[#allocation36_spill] sm:$0xff] }
 0xebd   :  { %16941 = vmatprep.subr.bf16.mxu1 %v18585_v32 }
 0xebf   :  { %16878 = vmatmul.mubr.bf16.gmra.mrb[72].mxu1 %v25268_v0 }
 0xec0   :  { %16881 = vmatprep.mubr.bf16.mxu1 %v25269_v30  ;;  %16942 = vmatpush3.bf16.msra.mxu1 %v18585_v32  ;;  %v25273_v32 = vld [vmem:[#allocation62_spill] sm:$0xff]  ;;  %v25275_v30 = vld [vmem:[#allocation40_spill] sm:$0xff] }
 0xec1   :  { %16943 = vmatprep.subr.bf16.mxu1 %v18586_v25 }
 0xec4   :  { %16944 = vmatpush3.bf16.msra.mxu1 %v18586_v25  ;;  %v25274_v25 = vld [vmem:[#allocation73_spill] sm:$0xff] }
 0xec5   :  { %17009 = vmatprep.subr.bf16.mxu1 %v18587_v13 }
 0xec7   :  { %16882 = vmatmul.mubr.bf16.gmra.mrb[76].mxu1 %v25270_v36  ;;  %v25276_v36 = vld [vmem:[#allocation98_spill] sm:$0xff] }
 0xec8   :  { %16885 = vmatprep.mubr.bf16.mxu1 %v25174_v49  ;;  %v25277_v49 = vld [vmem:[#allocation99_spill] sm:$0xff] }
 0xecf   :  { %16886 = vmatmul.mubr.bf16.gmra.mrb[80].mxu1 %v25176_v7 }
 0xed0   :  { %16889 = vmatprep.mubr.bf16.mxu1 %v22578_v42 }
 0xed7   :  { %16890 = vmatmul.mubr.bf16.gmra.mrb[84].mxu1 %v25271_v58 }
 0xed8   :  { %16893 = vmatprep.mubr.bf16.mxu1 %v22591_v34 }
 0xedf   :  { %16894 = vmatmul.mubr.bf16.gmra.mrb[88].mxu1 %v25272_v60 }
 0xee0   :  { %16897 = vmatprep.mubr.bf16.mxu1 %v22600_v63  ;;  %v25278_v63 = vld [vmem:[#allocation16_spill] sm:$0xff] }
 0xee7   :  { %16898 = vmatmul.mubr.bf16.gmra.mrb[92].mxu1 %v25273_v32 }
 0xee8   :  { %16901 = vmatprep.mubr.bf16.mxu1 %v25274_v25 }
 0xeef   :  { %16902 = vmatmul.mubr.bf16.gmra.mrb[32].mxu1 %v25275_v30 }
 0xef0   :  { %16905 = vmatprep.mubr.bf16.mxu1 %v25276_v36 }
 0xef7   :  { %16906 = vmatmul.mubr.bf16.gmra.mrb[36].mxu1 %v25277_v49 }
 0xef8   :  { %16909 = vmatprep.mubr.bf16.mxu1 %v22924_v48  ;;  %v18588_v48 = vld [vmem:[#allocation12 + $0x1c8] sm:$0xff]  }
 0xeff   :  { %16910 = vmatmul.mubr.bf16.gmra.mrb[40].mxu1 %v22926_v35 }
 0xf00   :  { %16913 = vmatprep.mubr.bf16.mxu1 %v22942_v3 }
 0xf07   :  { %16914 = vmatmul.mubr.bf16.gmra.mrb[44].mxu1 %v22944_v6 }
 0xf08   :  { %16917 = vmatprep.mubr.bf16.mxu1 %v22635_v21  ;;  %v18589_v21 = vld [vmem:[#allocation12 + $0x1d0] sm:$0xff]  }
 0xf0f   :  { %16918 = vmatmul.mubr.bf16.gmra.mrb[48].mxu1 %v22641_v45  ;;  %v18590_v45 = vld [vmem:[#allocation12 + $0x1d8] sm:$0xff]  }
 0xf10   :  { %16921 = vmatprep.mubr.bf16.mxu1 %v22659_v53 }
 0xf17   :  { %16922 = vmatmul.mubr.bf16.gmra.mrb[52].mxu1 %v22667_v59 }
 0xf18   :  { %16925 = vmatprep.mubr.bf16.mxu1 %v22672_v9 }
 0xf1f   :  { %16926 = vmatmul.mubr.bf16.gmra.mrb[56].mxu1 %v25278_v63  ;;  %v18591_v63 = vld [vmem:[#allocation12 + $0x1e0] sm:$0xff]  }
 0xf20   :  { %16945 = vmatprep.mubr.bf16.mxu1 %v25230_v22  ;;  %v18592_v22 = vld [vmem:[#allocation12 + $0x1e8] sm:$0xff]  }
 0xf27   :  { %16946 = vmatmul.mubr.bf16.vlgmr.msra.gmra.mrb[60].mxu1 %v25231_v62  ;;  %v18593_v62 = vld [vmem:[#allocation12 + $0x1f0] sm:$0xff]  }
 0xf28   :  { %16949 = vmatprep.mubr.bf16.mxu1 %v25232_v31  ;;  %17010 = vmatpush3.bf16.msra.mxu1 %v18587_v13  ;;  %v25288_v31 = vld [vmem:[#allocation84_spill] sm:$0xff] }
 0xf29   :  { %17011 = vmatprep.subr.bf16.mxu1 %v18588_v48 }
 0xf2c   :  { %17012 = vmatpush3.bf16.msra.mxu1 %v18588_v48  ;;  %v18594_v48 = vld [vmem:[#allocation12 + $0x1f8] sm:$0xff]  }
 0xf2d   :  { %17013 = vmatprep.subr.bf16.mxu1 %v18589_v21 }
 0xf2f   :  { %16950 = vmatmul.mubr.bf16.gmra.mrb[64].mxu1 %v22589_v44  ;;  %v18595_v44 = vld [vmem:[#allocation12 + $0x200] sm:$0xff]  }
 0xf30   :  { %16953 = vmatprep.mubr.bf16.mxu1 %v22596_v2  ;;  %17014 = vmatpush3.bf16.msra.mxu1 %v18589_v21  ;;  %v23073_v2 = vld [vmem:[#allocation4 + $0x198] sm:$0xff] }
 0xf31   :  { %17015 = vmatprep.subr.bf16.mxu1 %v18590_v45 }
 0xf34   :  { %17016 = vmatpush3.bf16.msra.mxu1 %v18590_v45  ;;  %v23098_v45 = vld [vmem:[#allocation4 + $0x358] sm:$0x3] }
 0xf35   :  { %17017 = vmatprep.subr.bf16.mxu1 %v18591_v63 }
 0xf37   :  { %16954 = vmatmul.mubr.bf16.gmra.mrb[68].mxu1 %v22605_v5  ;;  %v23075_v5 = vld [vmem:[#allocation3 + $0x8] sm:$0xff] }
 0xf38   :  { %16957 = vmatprep.mubr.bf16.mxu1 %v22609_v14  ;;  %17018 = vmatpush3.bf16.msra.mxu1 %v18591_v63  ;;  %v12282_v14 = vpack.c.bf16 %v23075_v5, %v23073_v2  ;;  %v12709_v21 = vrot.slane %v23075_v5, 1 }
 0xf39   :  { %17019 = vmatprep.subr.bf16.mxu1 %v18592_v22 }
 0xf3c   :  { %17020 = vmatpush3.bf16.msra.mxu1 %v18592_v22 }
 0xf3d   :  { %17021 = vmatprep.subr.bf16.mxu1 %v18593_v62 }
 0xf3f   :  { %16958 = vmatmul.mubr.bf16.gmra.mrb[72].mxu1 %v22622_v27  ;;  %v23092_v27 = vld [vmem:[#allocation4 + $0x348] sm:$0xff] }
 0xf40   :  { %16961 = vmatprep.mubr.bf16.mxu1 %v22629_v11  ;;  %17022 = vmatpush3.bf16.msra.mxu1 %v18593_v62  ;;  %v12713_v11 = vrot.slane %v23092_v27, 1  ;;  %v25294_v62 = vld [vmem:[#allocation50_spill] sm:$0xff] }
 0xf41   :  { %17023 = vmatprep.subr.bf16.mxu1 %v18594_v48 }
 0xf44   :  { %17024 = vmatpush3.bf16.msra.mxu1 %v18594_v48  ;;  %v25295_v48 = vld [vmem:[#allocation76_spill] sm:$0xff] }
 0xf45   :  { %17089 = vmatprep.subr.bf16.mxu1 %v18595_v44 }
 0xf47   :  { %16962 = vmatmul.mubr.bf16.gmra.mrb[76].mxu1 %v22657_v57  ;;  %v23101_v57 = vsel %vm25279_vm6, %v12713_v11, %v12709_v21  ;;  %v25298_v11 = vld [vmem:[#allocation75_spill] sm:$0xff] }
 0xf48   :  { %16965 = vmatprep.mubr.bf16.mxu1 %v22679_v24 }
 0xf4f   :  { %16966 = vmatmul.mubr.bf16.gmra.mrb[80].mxu1 %v22705_v26  ;;  %v25281_v26 = vld [vmem:[#allocation63_spill] sm:$0xff] }
 0xf50   :  { %16969 = vmatprep.mubr.bf16.mxu1 %v22709_v18  ;;  %v18599_v18 = vld [vmem:[#allocation12 + $0x220] sm:$0xff]  }
 0xf57   :  { %16970 = vmatmul.mubr.bf16.gmra.mrb[84].mxu1 %v22717_v40  ;;  %v18600_v40 = vld [vmem:[#allocation12 + $0x228] sm:$0xff]  }
 0xf58   :  { %16973 = vmatprep.mubr.bf16.mxu1 %v22971_v29  ;;  %v25289_v29 = vld [vmem:[#allocation85_spill] sm:$0xff] }
 0xf5f   :  { %16974 = vmatmul.mubr.bf16.gmra.mrb[88].mxu1 %v12282_v14  ;;  %v25297_v14 = vld [vmem:[#allocation58_spill] sm:$0xff] }
 0xf60   :  { %16977 = vmatprep.mubr.bf16.mxu1 %v22730_v8  ;;  %v25282_v8 = vld [vmem:[#allocation22_spill] sm:$0xff] }
 0xf67   :  { %16978 = vmatmul.mubr.bf16.gmra.mrb[92].mxu1 %v22740_v20  ;;  %v25283_v20 = vld [vmem:[#allocation46_spill] sm:$0xff] }
 0xf68   :  { %16981 = vmatprep.mubr.bf16.mxu1 %v22748_v50  ;;  %v18601_v50 = vld [vmem:[#allocation12 + $0x230] sm:$0xff]  }
 0xf6f   :  { %16982 = vmatmul.mubr.bf16.gmra.mrb[32].mxu1 %v22754_v28  ;;  %v18602_v28 = vld [vmem:[#allocation12 + $0x238] sm:$0xff]  }
 0xf70   :  { %16985 = vmatprep.mubr.bf16.mxu1 %v22758_v61  ;;  %v25284_v61 = vld [vmem:[#allocation81_spill] sm:$0xff] }
 0xf77   :  { %16986 = vmatmul.mubr.bf16.gmra.mrb[36].mxu1 %v22764_v51  ;;  %v25285_v51 = vld [vmem:[#allocation28_spill] sm:$0xff] }
 0xf78   :  { %16989 = vmatprep.mubr.bf16.mxu1 %v22768_v38  ;;  %v18598_v38 = vld [vmem:[#allocation12 + $0x218] sm:$0xff]  }
 0xf7f   :  { %16990 = vmatmul.mubr.bf16.gmra.mrb[40].mxu1 %v22774_v16  ;;  %v25286_v16 = vld [vmem:[#allocation49_spill] sm:$0xff] }
 0xf80   :  { %16993 = vmatprep.mubr.bf16.mxu1 %v22778_v56  ;;  %v18597_v56 = vld [vmem:[#allocation12 + $0x210] sm:$0xff]  }
 0xf87   :  { %16994 = vmatmul.mubr.bf16.gmra.mrb[44].mxu1 %v22784_v39  ;;  %v25287_v39 = vld [vmem:[#allocation23_spill] sm:$0xff] }
 0xf88   :  { %16997 = vmatprep.mubr.bf16.mxu1 %v22442_v43  ;;  %v12716_v43 = vrot.slane %v23098_v45, 1 }
 0xf8f   :  { %16998 = vmatmul.mubr.bf16.gmra.mrb[48].mxu1 %v22446_v54  ;;  %v12283_v54 = vpack.c.bf16 %v23075_v5, %v23092_v27 }
 0xf90   :  { %17001 = vmatprep.mubr.bf16.mxu1 %v22450_v12  ;;  %v23107_v12 = vsel %vm25280_vm13, %v12709_v21, %v12716_v43  ;;  %v25300_v43 = vld [vmem:[#allocation39_spill] sm:$0xff] }
 0xf91   :  { %v12723_v24 = vpack.c.bf16 %v23107_v12, %v23101_v57  ;;  %v25310_v57 = vld [vmem:[#allocation65_spill] sm:$0xff] }
 0xf97   :  { %17002 = vmatmul.mubr.bf16.gmra.mrb[52].mxu1 %v22455_v1  ;;  %v18596_v1 = vld [vmem:[#allocation12 + $0x208] sm:$0xff]  }
 0xf98   :  { %17005 = vmatprep.mubr.bf16.mxu1 %v22991_v33  ;;  %v9168_v33 = vld [vmem:[#allocation4 + $0x1a8] sm:$0x3] }
 0xf99   :  { %v13145_v12 = vrot.slane %v9168_v33, 2 }
 0xf9f   :  { %17006 = vmatmul.mubr.bf16.gmra.mrb[56].mxu1 %v12283_v54  ;;  %v25301_v54 = vld [vmem:[#allocation30_spill] sm:$0xff] }
 0xfa0   :  { %17025 = vmatprep.mubr.bf16.mxu1 %v25234_v19  ;;  %v12708_v19 = vrot.slane %v23073_v2, 1 }
 0xfa2   :  { %v12710_v13 = vsel %vm25292_vm14, %v12708_v19, %v12709_v21 }
 0xfa7   :  { %17026 = vmatmul.mubr.bf16.vlgmr.msra.gmra.mrb[60].mxu1 %v25235_v10  ;;  %v12711_v10 = vrot.slane %v9168_v33, 1 }
 0xfa8   :  { %17029 = vmatprep.mubr.bf16.mxu1 %v25236_v17  ;;  %17090 = vmatpush3.bf16.msra.mxu1 %v18595_v44  ;;  %v25290_v17 = vld [vmem:[#allocation88_spill] sm:$0xff]  ;;  %v25296_v44 = vld [vmem:[#allocation59_spill] sm:$0xff] }
 0xfa9   :  { %17091 = vmatprep.subr.bf16.mxu1 %v18596_v1  ;;  %v12712_v63 = vsel %vm25293_vm7, %v12709_v21, %v12711_v10  ;;  %v25299_v21 = vld [vmem:[#allocation21_spill] sm:$0xff] }
 0xfaa   :  { %v12722_v22 = vpack.c.bf16 %v12712_v63, %v12710_v13 }
 0xfac   :  { %17092 = vmatpush3.bf16.msra.mxu1 %v18596_v1  ;;  %v13147_v1 = vrot.slane %v23092_v27, 2  ;;  %v25306_v27 = vld [vmem:[#allocation91_spill] sm:$0xff] }
 0xfad   :  { %17093 = vmatprep.subr.bf16.mxu1 %v18597_v56 }
 0xfaf   :  { %17030 = vmatmul.mubr.bf16.gmra.mrb[64].mxu1 %v25237_v46  ;;  %v25291_v46 = vld [vmem:[#allocation25_spill] sm:$0xff] }
 0xfb0   :  { %17033 = vmatprep.mubr.bf16.mxu1 %v25281_v26  ;;  %17094 = vmatpush3.bf16.msra.mxu1 %v18597_v56  ;;  %v25302_v56 = vld [vmem:[#allocation86_spill] sm:$0xff] }
 0xfb1   :  { %17095 = vmatprep.subr.bf16.mxu1 %v18598_v38 }
 0xfb4   :  { %17096 = vmatpush3.bf16.msra.mxu1 %v18598_v38  ;;  %v25303_v38 = vld [vmem:[#allocation29_spill] sm:$0xff] }
 0xfb5   :  { %17097 = vmatprep.subr.bf16.mxu1 %v18599_v18 }
 0xfb7   :  { %17034 = vmatmul.mubr.bf16.gmra.mrb[68].mxu1 %v25282_v8 }
 0xfb8   :  { %17037 = vmatprep.mubr.bf16.mxu1 %v25283_v20  ;;  %17098 = vmatpush3.bf16.msra.mxu1 %v18599_v18  ;;  %v25309_v18 = vld [vmem:[#allocation43_spill] sm:$0xff] }
 0xfb9   :  { %17099 = vmatprep.subr.bf16.mxu1 %v18600_v40 }
 0xfbc   :  { %17100 = vmatpush3.bf16.msra.mxu1 %v18600_v40 }
 0xfbd   :  { %17101 = vmatprep.subr.bf16.mxu1 %v18601_v50 }
 0xfbf   :  { %17038 = vmatmul.mubr.bf16.gmra.mrb[72].mxu1 %v25284_v61 }
 0xfc0   :  { %17041 = vmatprep.mubr.bf16.mxu1 %v25285_v51  ;;  %17102 = vmatpush3.bf16.msra.mxu1 %v18601_v50 }
 0xfc1   :  { %17103 = vmatprep.subr.bf16.mxu1 %v18602_v28 }
 0xfc4   :  { %17104 = vmatpush3.bf16.msra.mxu1 %v18602_v28  ;;  %v25321_v28 = vld [vmem:[#allocation34_spill] sm:$0xff] }
 0xfc7   :  { %17042 = vmatmul.mubr.bf16.gmra.mrb[76].mxu1 %v25286_v16  ;;  %v25322_v16 = vld [vmem:[#allocation20_spill] sm:$0xff] }
 0xfc8   :  { %17045 = vmatprep.mubr.bf16.mxu1 %v25287_v39 }
 0xfcf   :  { %17046 = vmatmul.mubr.bf16.gmra.mrb[80].mxu1 %v25288_v31 }
 0xfd0   :  { %17049 = vmatprep.mubr.bf16.mxu1 %v25289_v29  ;;  %v25323_v29 = vld [vmem:[#allocation26_spill] sm:$0xff] }
 0xfd7   :  { %17050 = vmatmul.mubr.bf16.gmra.mrb[84].mxu1 %v25290_v17  ;;  %v25324_v17 = vld [vmem:[#allocation27_spill] sm:$0xff] }
 0xfd8   :  { %17053 = vmatprep.mubr.bf16.mxu1 %v25291_v46 }
 0xfdf   :  { %17054 = vmatmul.mubr.bf16.gmra.mrb[88].mxu1 %v12722_v22 }
 0xfe0   :  { %17057 = vmatprep.mubr.bf16.mxu1 %v25294_v62 }
 0xfe7   :  { %17058 = vmatmul.mubr.bf16.gmra.mrb[92].mxu1 %v25295_v48 }
 0xfe8   :  { %17061 = vmatprep.mubr.bf16.mxu1 %v25296_v44  ;;  %v25325_v44 = vld [vmem:[#allocation35_spill] sm:$0xff] }
 0xfef   :  { %17062 = vmatmul.mubr.bf16.gmra.mrb[32].mxu1 %v25297_v14 }
 0xff0   :  { %17065 = vmatprep.mubr.bf16.mxu1 %v25254_v41  ;;  %v13143_v41 = vrot.slane %v23075_v5, 2  ;;  %v25307_v5 = vld [vmem:[#allocation93_spill] sm:$0xff] }
 0xff7   :  { %17066 = vmatmul.mubr.bf16.gmra.mrb[36].mxu1 %v25298_v11 }
 0xff8   :  { %17069 = vmatprep.mubr.bf16.mxu1 %v25256_v55  ;;  %v13149_v55 = vsel %vm25304_vm2, %v13147_v1, %v13143_v41 }
 0xfff   :  { %17070 = vmatmul.mubr.bf16.gmra.mrb[40].mxu1 %v25257_v47 }
0x1000   :  { %17073 = vmatprep.mubr.bf16.mxu1 %v25258_v37  ;;  %v13150_v37 = vrot.slane %v23098_v45, 2  ;;  %v25308_v45 = vld [vmem:[#allocation19_spill] sm:$0xff] }
0x1002   :  { %v13151_v47 = vsel %vm25207_vm0, %v13143_v41, %v13150_v37 }
0x1003   :  { %v13157_v26 = vpack.c.bf16 %v13151_v47, %v13149_v55 }
0x1007   :  { %17074 = vmatmul.mubr.bf16.gmra.mrb[44].mxu1 %v25299_v21 }
0x1008   :  { %17077 = vmatprep.mubr.bf16.mxu1 %v25300_v43  ;;  %v25326_v43 = vld [vmem:[#allocation32_spill] sm:$0xff] }
0x100f   :  { %17078 = vmatmul.mubr.bf16.gmra.mrb[48].mxu1 %v25261_v15  ;;  %v25305_v15 = vld [vmem:[#allocation90_spill] sm:$0xff] }
0x1010   :  { %17081 = vmatprep.mubr.bf16.mxu1 %v25301_v54 }
0x1017   :  { %17082 = vmatmul.mubr.bf16.gmra.mrb[52].mxu1 %v25302_v56  ;;  %v25327_v56 = vld [vmem:[#allocation24_spill] sm:$0xff] }
0x1018   :  { %17085 = vmatprep.mubr.bf16.mxu1 %v25303_v38 }
0x101f   :  { %17086 = vmatmul.mubr.bf16.gmra.mrb[56].mxu1 %v12723_v24 }
0x1020   :  { %17105 = vmatprep.mubr.bf16.mxu1 %v25305_v15 }
0x1027   :  { %17106 = vmatmul.mubr.bf16.vlgmr.msra.gmra.mrb[60].mxu1 %v25306_v27 }
0x1028   :  { %17109 = vmatprep.mubr.bf16.mxu1 %v25307_v5 }
0x102f   :  { %17110 = vmatmul.mubr.bf16.gmra.mrb[64].mxu1 %v25265_v4  ;;  %v13142_v4 = vrot.slane %v23073_v2, 2  ;;  %v25320_v2 = vld [vmem:[#allocation17_spill] sm:$0xff] }
0x1030   :  { %17113 = vmatprep.mubr.bf16.mxu1 %v25266_v52 }
0x1037   :  { %17114 = vmatmul.mubr.bf16.gmra.mrb[68].mxu1 %v25267_v23  ;;  %v13144_v23 = vsel %vm25311_vm8, %v13142_v4, %v13143_v41 }
0x1038   :  { %17117 = vmatprep.mubr.bf16.mxu1 %v25268_v0  ;;  %v13146_v0 = vsel %vm25312_vm12, %v13143_v41, %v13145_v12 }
0x1039   :  { %v13156_v52 = vpack.c.bf16 %v13146_v0, %v13144_v23 }
0x103f   :  { %17118 = vmatmul.mubr.bf16.gmra.mrb[72].mxu1 %v25308_v45 }
0x1040   :  { %17121 = vmatprep.mubr.bf16.mxu1 %v25309_v18 }
0x1047   :  { %17122 = vmatmul.mubr.bf16.gmra.mrb[76].mxu1 %v25310_v57 }
0x1048   :  { %17125 = vmatprep.mubr.bf16.mxu1 %v25176_v7  ;;  %v25315_v7 = vld [vmem:[#allocation68_spill] sm:$0xff] }
0x104f   :  { %17126 = vmatmul.mubr.bf16.gmra.mrb[80].mxu1 %v22578_v42  ;;  %v25313_v42 = vld [vmem:[#allocation104_spill] sm:$0xff] }
0x1050   :  { %17129 = vmatprep.mubr.bf16.mxu1 %v25271_v58  ;;  %v25318_v58 = vld [vmem:[#allocation37_spill] sm:$0xff] }
0x1057   :  { %17130 = vmatmul.mubr.bf16.gmra.mrb[84].mxu1 %v22591_v34  ;;  %v25314_v34 = vld [vmem:[#allocation67_spill] sm:$0xff] }
0x1058   :  { %17133 = vmatprep.mubr.bf16.mxu1 %v25272_v60 }
0x105f   :  { %17134 = vmatmul.mubr.bf16.gmra.mrb[88].mxu1 %v13156_v52  ;;  %v25329_v52 = vld [vmem:[#allocation44_spill] sm:$0xff] }
0x1060   :  { %17137 = vmatprep.mubr.bf16.mxu1 %v25273_v32 }
0x1067   :  { %17138 = vmatmul.mubr.bf16.gmra.mrb[92].mxu1 %v25274_v25 }
0x1068   :  { %17141 = vmatprep.mubr.bf16.mxu1 %v25275_v30  ;;  %v25316_v30 = vld [vmem:[#allocation16_spill] sm:$0xff] }
0x106f   :  { %17142 = vmatmul.mubr.bf16.gmra.mrb[32].mxu1 %v25276_v36  ;;  %v25317_v36 = vld [vmem:[#allocation33_spill] sm:$0xff] }
0x1070   :  { %17145 = vmatprep.mubr.bf16.mxu1 %v25277_v49 }
0x1077   :  { %17146 = vmatmul.mubr.bf16.gmra.mrb[36].mxu1 %v25313_v42 }
0x1078   :  { %17149 = vmatprep.mubr.bf16.mxu1 %v22926_v35 }
0x107f   :  { %17150 = vmatmul.mubr.bf16.gmra.mrb[40].mxu1 %v22942_v3  ;;  %v23189_v3 = vld [vmem:[%s24148_s14] ss:$0 sm:$0xff] }
0x1080   :  { %17153 = vmatprep.mubr.bf16.mxu1 %v22944_v6 }
0x1087   :  { %17154 = vmatmul.mubr.bf16.gmra.mrb[44].mxu1 %v25314_v34 }
0x1088   :  { %17157 = vmatprep.mubr.bf16.mxu1 %v25315_v7 }
0x108f   :  { %17158 = vmatmul.mubr.bf16.gmra.mrb[48].mxu1 %v22659_v53  ;;  %v25319_v53 = vld [vmem:[#allocation31_spill] sm:$0xff] }
0x1090   :  { %17161 = vmatprep.mubr.bf16.mxu1 %v22667_v59 }
0x1097   :  { %17162 = vmatmul.mubr.bf16.gmra.mrb[52].mxu1 %v22672_v9 }
0x1098   :  { %17165 = vmatprep.mubr.bf16.mxu1 %v25316_v30  ;;  %v25330_v30 = vld [vmem:[#allocation38_spill] sm:$0xff] }
0x109f   :  { %17166 = vmatmul.mubr.bf16.gmra.mrb[56].mxu1 %v13157_v26  ;;  %v25328_v26 = vld [vmem:[#allocation45_spill] sm:$0xff] }
0x10fa   :  { %v17107_v49 = vpop.f32.mrb[60].mxu1 }
0x10fb   :  { %v17185_v35 = vadd.f32 %v17107_v49, %v25317_v36  ;;  %v13257_v6 = vpop.f32.mrb[61].mxu1 }
0x10fc   :  { %v17186_v60 = vadd.f32 %v13257_v6, %v25318_v58  ;;  %v17108_v32 = vpop.f32.mrb[62].mxu1  ;;  %v25331_v6 = vld [vmem:[#allocation80_spill] sm:$0xff] }
0x10fd   :  { %v17187_v25 = vadd.f32 %v17108_v32, %v25319_v53  ;;  %v13260_v59 = vpop.f32.mrb[63].mxu1  ;;  %v13585_v40 = vadd.f32 %v17185_v35, %v23189_v3 }
0x10fe   :  { %v13583_v9 = vadd.f32 %v17186_v60, %v23189_v3  ;;  %v17188_v24 = vadd.f32 %v13260_v59, %v25320_v2 }
0x10ff   :  { %v13586_v20 = vadd.f32 %v17187_v25, %v23189_v3  ;;  %v25332_v25 = vld [vmem:[#allocation74_spill] sm:$0xff] }
0x1100   :  { %v13584_v8 = vadd.f32 %v17188_v24, %v23189_v3  ;;  %18609 = vtanh.f32 %v13583_v9 }
0x1102   :  { %18611 = vtanh.f32 %v13584_v8  ;;  %v17111_v50 = vpop.f32.mrb[64].mxu1 }
0x1103   :  { %v17189_v61 = vadd.f32 %v17111_v50, %v25321_v28  ;;  %v13273_v51 = vpop.f32.mrb[65].mxu1  ;;  %18613 = vtanh.f32 %v13585_v40 }
0x1104   :  { %v17190_v39 = vadd.f32 %v13273_v51, %v25322_v16  ;;  %v17112_v31 = vpop.f32.mrb[66].mxu1  ;;  %18615 = vtanh.f32 %v13586_v20  ;;  %v25333_v51 = vld [vmem:[#allocation42_spill] sm:$0xff] }
0x1105   :  { %v17191_v33 = vadd.f32 %v17112_v31, %v25323_v29  ;;  %v13276_v19 = vpop.f32.mrb[67].mxu1  ;;  %v13589_v13 = vadd.f32 %v17189_v61, %v23189_v3  ;;  %v25334_v29 = vld [vmem:[#allocation55_spill] sm:$0xff] }
0x1106   :  { %v13587_v10 = vadd.f32 %v17190_v39, %v23189_v3  ;;  %v17192_v46 = vadd.f32 %v13276_v19, %v25324_v17  ;;  %v25335_v17 = vld [vmem:[#allocation72_spill] sm:$0xff] }
0x1107   :  { %v13590_v22 = vadd.f32 %v17191_v33, %v23189_v3 }
0x1108   :  { %18617 = vtanh.f32 %v13587_v10  ;;  %v13588_v63 = vadd.f32 %v17192_v46, %v23189_v3 }
0x110a   :  { %18619 = vtanh.f32 %v13588_v63  ;;  %v17115_v62 = vpop.f32.mrb[68].mxu1  ;;  %v23206_v48 = vpop.eup %18609 }
0x110b   :  { %v17193_v14 = vadd.f32 %v17115_v62, %v25325_v44  ;;  %v13289_v11 = vpop.f32.mrb[69].mxu1  ;;  %18621 = vtanh.f32 %v13589_v13  ;;  %v25336_v62 = vld [vmem:[#allocation41_spill] sm:$0xff] }
0x110c   :  { %v23209_v21 = vpop.eup %18611  ;;  %v17194_v54 = vadd.f32 %v13289_v11, %v25326_v43  ;;  %v17116_v1 = vpop.f32.mrb[70].mxu1  ;;  %18623 = vtanh.f32 %v13590_v22 }
0x110d   :  { %v13711_v41 = vadd.f32 %v23209_v21, %v23206_v48  ;;  %v17195_v38 = vadd.f32 %v17116_v1, %v25327_v56  ;;  %v13292_v55 = vpop.f32.mrb[71].mxu1  ;;  %v23215_v37 = vpop.eup %18613  ;;  %v13593_v45 = vadd.f32 %v17193_v14, %v23189_v3 }
0x110e   :  { %v13591_v47 = vadd.f32 %v17194_v54, %v23189_v3  ;;  %v17196_v15 = vadd.f32 %v13292_v55, %v25328_v26  ;;  %v23220_v5 = vpop.eup %18615 }
0x110f   :  { %v13712_v27 = vadd.f32 %v23215_v37, %v13711_v41  ;;  %v13594_v12 = vadd.f32 %v17195_v38, %v23189_v3 }
0x1110   :  { %18625 = vtanh.f32 %v13591_v47  ;;  %v13592_v18 = vadd.f32 %v17196_v15, %v23189_v3  ;;  %v25337_v47 = vld [vmem:[#allocation77_spill] sm:$0xff] }
0x1111   :  { %v13713_v57 = vadd.f32 %v23220_v5, %v13712_v27 }
0x1112   :  { %v23225_v4 = vpop.eup %18617  ;;  %18627 = vtanh.f32 %v13592_v18  ;;  %v17119_v23 = vpop.f32.mrb[72].mxu1 }
0x1113   :  { %v13714_v0 = vadd.f32 %v23225_v4, %v13713_v57  ;;  %v17197_v42 = vadd.f32 %v17119_v23, %v25329_v52  ;;  %v13305_v34 = vpop.f32.mrb[73].mxu1  ;;  %18629 = vtanh.f32 %v13593_v45  ;;  %v25338_v45 = vld [vmem:[#allocation56_spill] sm:$0xff]  ;;  %v25339_v23 = vld [vmem:[#allocation57_spill] sm:$0xff] }
0x1114   :  { %v23230_v7 = vpop.eup %18619  ;;  %v17198_v49 = vadd.f32 %v13305_v34, %v25330_v30  ;;  %v17120_v36 = vpop.f32.mrb[74].mxu1  ;;  %18631 = vtanh.f32 %v13594_v12  ;;  %v25340_v30 = vld [vmem:[#allocation61_spill] sm:$0xff] }
0x1115   :  { %v13715_v35 = vadd.f32 %v23230_v7, %v13714_v0  ;;  %v17199_v58 = vadd.f32 %v17120_v36, %v25331_v6  ;;  %v13308_v60 = vpop.f32.mrb[75].mxu1  ;;  %v23235_v32 = vpop.eup %18621  ;;  %v13597_v24 = vadd.f32 %v17197_v42, %v23189_v3 }
0x1116   :  { %v13595_v53 = vadd.f32 %v17198_v49, %v23189_v3  ;;  %v17200_v59 = vadd.f32 %v13308_v60, %v25332_v25  ;;  %v23240_v2 = vpop.eup %18623 }
0x1117   :  { %v13716_v9 = vadd.f32 %v23235_v32, %v13715_v35  ;;  %v13598_v50 = vadd.f32 %v17199_v58, %v23189_v3 }
0x1118   :  { %18633 = vtanh.f32 %v13595_v53  ;;  %v13596_v40 = vadd.f32 %v17200_v59, %v23189_v3 }
0x1119   :  { %v13717_v8 = vadd.f32 %v23240_v2, %v13716_v9 }
0x111a   :  { %v23245_v20 = vpop.eup %18625  ;;  %18635 = vtanh.f32 %v13596_v40  ;;  %v17123_v28 = vpop.f32.mrb[76].mxu1 }
0x111b   :  { %v13718_v61 = vadd.f32 %v23245_v20, %v13717_v8  ;;  %v17201_v16 = vadd.f32 %v17123_v28, %v25333_v51  ;;  %v13321_v39 = vpop.f32.mrb[77].mxu1  ;;  %18637 = vtanh.f32 %v13597_v24  ;;  %v25341_v24 = vld [vmem:[#allocation66_spill] sm:$0xff]  ;;  %v25342_v28 = vld [vmem:[#allocation52_spill] sm:$0xff] }
0x111c   :  { %v23250_v31 = vpop.eup %18627  ;;  %v17202_v33 = vadd.f32 %v13321_v39, %v25334_v29  ;;  %v17124_v19 = vpop.f32.mrb[78].mxu1  ;;  %18639 = vtanh.f32 %v13598_v50  ;;  %v25343_v39 = vld [vmem:[#allocation96_spill] sm:$0xff] }
0x111d   :  { %v13719_v10 = vadd.f32 %v23250_v31, %v13718_v61  ;;  %v17203_v46 = vadd.f32 %v17124_v19, %v25335_v17  ;;  %v13324_v13 = vpop.f32.mrb[79].mxu1  ;;  %v23255_v63 = vpop.eup %18629  ;;  %v13601_v43 = vadd.f32 %v17201_v16, %v23189_v3  ;;  %v25344_v17 = vld [vmem:[#allocation97_spill] sm:$0xff] }
0x111e   :  { %v13599_v22 = vadd.f32 %v17202_v33, %v23189_v3  ;;  %v17204_v44 = vadd.f32 %v13324_v13, %v25336_v62  ;;  %v23260_v11 = vpop.eup %18631 }
0x111f   :  { %v13720_v14 = vadd.f32 %v23255_v63, %v13719_v10  ;;  %v13602_v56 = vadd.f32 %v17203_v46, %v23189_v3 }
0x1120   :  { %18641 = vtanh.f32 %v13599_v22  ;;  %v13600_v54 = vadd.f32 %v17204_v44, %v23189_v3 }
0x1121   :  { %v13721_v1 = vadd.f32 %v23260_v11, %v13720_v14 }
0x1122   :  { %v23265_v41 = vpop.eup %18633  ;;  %18643 = vtanh.f32 %v13600_v54  ;;  %v17127_v38 = vpop.f32.mrb[80].mxu1 }
0x1123   :  { %v13722_v55 = vadd.f32 %v23265_v41, %v13721_v1  ;;  %v17205_v26 = vadd.f32 %v17127_v38, %v25337_v47  ;;  %v13337_v15 = vpop.f32.mrb[81].mxu1  ;;  %18645 = vtanh.f32 %v13601_v43  ;;  %v25345_v38 = vld [vmem:[#allocation100_spill] sm:$0xff] }
0x1124   :  { %v23270_v27 = vpop.eup %18635  ;;  %v17206_v18 = vadd.f32 %v13337_v15, %v25338_v45  ;;  %v17128_v57 = vpop.f32.mrb[82].mxu1  ;;  %18647 = vtanh.f32 %v13602_v56  ;;  %v25346_v15 = vld [vmem:[#allocation101_spill] sm:$0xff] }
0x1125   :  { %v13723_v12 = vadd.f32 %v23270_v27, %v13722_v55  ;;  %v17207_v0 = vadd.f32 %v17128_v57, %v25339_v23  ;;  %v13340_v52 = vpop.f32.mrb[83].mxu1  ;;  %v23275_v42 = vpop.eup %18637  ;;  %v13605_v6 = vadd.f32 %v17205_v26, %v23189_v3 }
0x1126   :  { %v13603_v34 = vadd.f32 %v17206_v18, %v23189_v3  ;;  %v17208_v49 = vadd.f32 %v13340_v52, %v25340_v30  ;;  %v23280_v35 = vpop.eup %18639  ;;  %v25348_v30 = vld [vmem:[#allocation103_spill] sm:$0xff] }
0x1127   :  { %v13724_v36 = vadd.f32 %v23275_v42, %v13723_v12  ;;  %v13606_v25 = vadd.f32 %v17207_v0, %v23189_v3  ;;  %v25347_v12 = vld [vmem:[#allocation102_spill] sm:$0xff] }
0x1128   :  { %18649 = vtanh.f32 %v13603_v34  ;;  %v13604_v58 = vadd.f32 %v17208_v49, %v23189_v3 }
0x1129   :  { %v13725_v60 = vadd.f32 %v23280_v35, %v13724_v36 }
0x112a   :  { %v23285_v53 = vpop.eup %18641  ;;  %18651 = vtanh.f32 %v13604_v58  ;;  %v17131_v59 = vpop.f32.mrb[84].mxu1 }
0x112b   :  { %v13726_v9 = vadd.f32 %v23285_v53, %v13725_v60  ;;  %v17209_v40 = vadd.f32 %v17131_v59, %v25341_v24  ;;  %v13353_v8 = vpop.f32.mrb[85].mxu1  ;;  %18653 = vtanh.f32 %v13605_v6 }
0x112c   :  { %v23290_v50 = vpop.eup %18643  ;;  %v17210_v61 = vadd.f32 %v13353_v8, %v25342_v28  ;;  %v17132_v51 = vpop.f32.mrb[86].mxu1  ;;  %18655 = vtanh.f32 %v13606_v25  ;;  %v25349_v8 = vld [vmem:[#allocation105_spill] sm:$0xff] }
0x112d   :  { %v13727_v16 = vadd.f32 %v23290_v50, %v13726_v9  ;;  %v17211_v29 = vadd.f32 %v17132_v51, %v25343_v39  ;;  %v13356_v33 = vpop.f32.mrb[87].mxu1  ;;  %v23295_v19 = vpop.eup %18645  ;;  %v13609_v62 = vadd.f32 %v17209_v40, %v23189_v3 }
0x112e   :  { %v13607_v10 = vadd.f32 %v17210_v61, %v23189_v3  ;;  %v17212_v46 = vadd.f32 %v13356_v33, %v25344_v17  ;;  %v23300_v22 = vpop.eup %18647 }
0x112f   :  { %v13728_v13 = vadd.f32 %v23295_v19, %v13727_v16  ;;  %v13610_v54 = vadd.f32 %v17211_v29, %v23189_v3  ;;  %v25350_v16 = vld [vmem:[#allocation106_spill] sm:$0xff] }
0x1130   :  { %18657 = vtanh.f32 %v13607_v10  ;;  %v13608_v44 = vadd.f32 %v17212_v46, %v23189_v3  ;;  %v25351_v10 = vld [vmem:[#allocation107_spill] sm:$0xff] }
0x1131   :  { %v13729_v14 = vadd.f32 %v23300_v22, %v13728_v13 }
0x1132   :  { %v23305_v43 = vpop.eup %18649  ;;  %18659 = vtanh.f32 %v13608_v44  ;;  %v17135_v1 = vpop.f32.mrb[88].mxu1  ;;  %v25352_v44 = vld [vmem:[#allocation108_spill] sm:$0xff] }
0x1133   :  { %v13730_v56 = vadd.f32 %v23305_v43, %v13729_v14  ;;  %v17213_v55 = vadd.f32 %v17135_v1, %v25345_v38  ;;  %v13369_v47 = vpop.f32.mrb[89].mxu1  ;;  %18661 = vtanh.f32 %v13609_v62 }
0x1134   :  { %v23310_v26 = vpop.eup %18651  ;;  %v17214_v45 = vadd.f32 %v13369_v47, %v25346_v15  ;;  %v17136_v18 = vpop.f32.mrb[90].mxu1  ;;  %18663 = vtanh.f32 %v13610_v54 }
0x1135   :  { %v13731_v57 = vadd.f32 %v23310_v26, %v13730_v56  ;;  %v17215_v23 = vadd.f32 %v17136_v18, %v25347_v12  ;;  %v13372_v0 = vpop.f32.mrb[91].mxu1  ;;  %v23315_v52 = vpop.eup %18653  ;;  %v13613_v58 = vadd.f32 %v17213_v55, %v23189_v3 }
0x1136   :  { %v13611_v34 = vadd.f32 %v17214_v45, %v23189_v3  ;;  %v17216_v49 = vadd.f32 %v13372_v0, %v25348_v30  ;;  %v23320_v6 = vpop.eup %18655 }
0x1137   :  { %v13732_v36 = vadd.f32 %v23315_v52, %v13731_v57  ;;  %v13614_v9 = vadd.f32 %v17215_v23, %v23189_v3 }
0x1138   :  { %18665 = vtanh.f32 %v13611_v34  ;;  %v13612_v60 = vadd.f32 %v17216_v49, %v23189_v3 }
0x1139   :  { %v13733_v25 = vadd.f32 %v23320_v6, %v13732_v36 }
0x113a   :  { %v23325_v59 = vpop.eup %18657  ;;  %18667 = vtanh.f32 %v13612_v60  ;;  %v17139_v24 = vpop.f32.mrb[92].mxu1 }
0x113b   :  { %v13734_v40 = vadd.f32 %v23325_v59, %v13733_v25  ;;  %v17217_v28 = vadd.f32 %v17139_v24, %v25349_v8  ;;  %v13385_v61 = vpop.f32.mrb[93].mxu1  ;;  %18669 = vtanh.f32 %v13613_v58 }
0x113c   :  { %v23330_v51 = vpop.eup %18659  ;;  %v17218_v39 = vadd.f32 %v13385_v61, %v25350_v16  ;;  %v17140_v29 = vpop.f32.mrb[94].mxu1  ;;  %18671 = vtanh.f32 %v13614_v9 }
0x113d   :  { %v13735_v33 = vadd.f32 %v23330_v51, %v13734_v40  ;;  %v17219_v17 = vadd.f32 %v17140_v29, %v25351_v10  ;;  %v13388_v46 = vpop.f32.mrb[95].mxu1  ;;  %v23335_v13 = vpop.eup %18661  ;;  %v13617_v56 = vadd.f32 %v17217_v28, %v23189_v3 }
0x113e   :  { %v13615_v62 = vadd.f32 %v17218_v39, %v23189_v3  ;;  %v17220_v14 = vadd.f32 %v13388_v46, %v25352_v44  ;;  %v23340_v1 = vpop.eup %18663 }
0x113f   :  { %v13736_v54 = vadd.f32 %v23335_v13, %v13735_v33  ;;  %v13618_v15 = vadd.f32 %v17219_v17, %v23189_v3 }
0x1140   :  { %18673 = vtanh.f32 %v13615_v62  ;;  %v13616_v38 = vadd.f32 %v17220_v14, %v23189_v3 }
0x1141   :  { %v13737_v55 = vadd.f32 %v23340_v1, %v13736_v54 }
0x1142   :  { %v23345_v47 = vpop.eup %18665  ;;  %18675 = vtanh.f32 %v13616_v38  ;;  %v17143_v45 = vpop.f32.mrb[32].mxu1 }
0x1143   :  { %v13738_v18 = vadd.f32 %v23345_v47, %v13737_v55  ;;  %v13401_v57 = vpop.f32.mrb[33].mxu1  ;;  %18677 = vtanh.f32 %v13617_v56  ;;  %v13621_v25 = vadd.f32 %v17143_v45, %v23189_v3 }
0x1144   :  { %v23349_v12 = vpop.eup %18667  ;;  %v13619_v23 = vadd.f32 %v23189_v3, %v13401_v57  ;;  %v17144_v0 = vpop.f32.mrb[34].mxu1  ;;  %18679 = vtanh.f32 %v13618_v15 }
0x1145   :  { %v13739_v34 = vadd.f32 %v23349_v12, %v13738_v18  ;;  %v13404_v30 = vpop.f32.mrb[35].mxu1  ;;  %v23353_v49 = vpop.eup %18669  ;;  %v13622_v40 = vadd.f32 %v17144_v0, %v23189_v3 }
0x1146   :  { %25353 = vst [vmem:[#allocation83_spill] sm:$0xff] %v23353_v49  ;;  %v13620_v36 = vadd.f32 %v23189_v3, %v13404_v30  ;;  %v23357_v60 = vpop.eup %18671  ;;  %18681 = vtanh.f32 %v13619_v23 }
0x1147   :  { %v13740_v58 = vadd.f32 %v23353_v49, %v13739_v34  ;;  %25354 = vst [vmem:[#allocation64_spill] sm:$0xff] %v23357_v60 }
0x1148   :  { %18683 = vtanh.f32 %v13620_v36 }
0x1149   :  { %v13741_v9 = vadd.f32 %v23357_v60, %v13740_v58  ;;  %18685 = vtanh.f32 %v13621_v25 }
0x114a   :  { %v23361_v24 = vpop.eup %18673  ;;  %v17147_v8 = vpop.f32.mrb[36].mxu1  ;;  %18687 = vtanh.f32 %v13622_v40 }
0x114b   :  { %25355 = vst [vmem:[#allocation87_spill] sm:$0xff] %v23361_v24  ;;  %v13742_v28 = vadd.f32 %v23361_v24, %v13741_v9  ;;  %v13417_v61 = vpop.f32.mrb[37].mxu1  ;;  %v13625_v14 = vadd.f32 %v17147_v8, %v23189_v3 }
0x114c   :  { %v23365_v16 = vpop.eup %18675  ;;  %v13623_v39 = vadd.f32 %v23189_v3, %v13417_v61  ;;  %v17148_v29 = vpop.f32.mrb[38].mxu1 }
0x114d   :  { %25356 = vst [vmem:[#allocation92_spill] sm:$0xff] %v23365_v16  ;;  %v13743_v33 = vadd.f32 %v23365_v16, %v13742_v28  ;;  %v13420_v10 = vpop.f32.mrb[39].mxu1  ;;  %v23369_v17 = vpop.eup %18677  ;;  %v13626_v38 = vadd.f32 %v17148_v29, %v23189_v3 }
0x114e   :  { %25357 = vst [vmem:[#allocation47_spill] sm:$0xff] %v23369_v17  ;;  %v13624_v46 = vadd.f32 %v23189_v3, %v13420_v10  ;;  %v23373_v44 = vpop.eup %18679  ;;  %18689 = vtanh.f32 %v13623_v39 }
0x114f   :  { %v13744_v62 = vadd.f32 %v23369_v17, %v13743_v33  ;;  %25358 = vst [vmem:[#allocation51_spill] sm:$0xff] %v23373_v44 }
0x1150   :  { %v23377_v56 = vpop.eup %18681  ;;  %18691 = vtanh.f32 %v13624_v46 }
0x1151   :  { %v13745_v54 = vadd.f32 %v23373_v44, %v13744_v62  ;;  %25359 = vst [vmem:[#allocation60_spill] sm:$0xff] %v23377_v56  ;;  %18693 = vtanh.f32 %v13625_v14 }
0x1152   :  { %v17151_v55 = vpop.f32.mrb[40].mxu1  ;;  %v23381_v18 = vpop.eup %18683  ;;  %18695 = vtanh.f32 %v13626_v38 }
0x1153   :  { %v13746_v15 = vadd.f32 %v23377_v56, %v13745_v54  ;;  %v13433_v45 = vpop.f32.mrb[41].mxu1  ;;  %25360 = vst [vmem:[#allocation71_spill] sm:$0xff] %v23381_v18  ;;  %v23385_v30 = vpop.eup %18685  ;;  %v13629_v9 = vadd.f32 %v17151_v55, %v23189_v3 }
0x1154   :  { %v13627_v57 = vadd.f32 %v23189_v3, %v13433_v45  ;;  %v17152_v23 = vpop.f32.mrb[42].mxu1  ;;  %25361 = vst [vmem:[#allocation53_spill] sm:$0xff] %v23385_v30  ;;  %v23389_v25 = vpop.eup %18687 }
0x1155   :  { %v13747_v0 = vadd.f32 %v23381_v18, %v13746_v15  ;;  %v13436_v34 = vpop.f32.mrb[43].mxu1  ;;  %25362 = vst [vmem:[#allocation89_spill] sm:$0xff] %v23389_v25  ;;  %v13630_v28 = vadd.f32 %v17152_v23, %v23189_v3 }
0x1156   :  { %v13628_v36 = vadd.f32 %v23189_v3, %v13436_v34  ;;  %18697 = vtanh.f32 %v13627_v57 }
0x1157   :  { %v13748_v58 = vadd.f32 %v23385_v30, %v13747_v0 }
0x1158   :  { %v23393_v8 = vpop.eup %18689  ;;  %18699 = vtanh.f32 %v13628_v36 }
0x1159   :  { %v13749_v40 = vadd.f32 %v23389_v25, %v13748_v58  ;;  %25363 = vst [vmem:[#allocation69_spill] sm:$0xff] %v23393_v8  ;;  %18701 = vtanh.f32 %v13629_v9 }
0x115a   :  { %v17155_v61 = vpop.f32.mrb[44].mxu1  ;;  %v23397_v33 = vpop.eup %18691  ;;  %18703 = vtanh.f32 %v13630_v28 }
0x115b   :  { %v13750_v39 = vadd.f32 %v23393_v8, %v13749_v40  ;;  %v13449_v29 = vpop.f32.mrb[45].mxu1  ;;  %25364 = vst [vmem:[#allocation70_spill] sm:$0xff] %v23397_v33  ;;  %v23401_v54 = vpop.eup %18693  ;;  %v13633_v45 = vadd.f32 %v17155_v61, %v23189_v3 }
0x115c   :  { %v13631_v10 = vadd.f32 %v23189_v3, %v13449_v29  ;;  %v17156_v46 = vpop.f32.mrb[46].mxu1  ;;  %25365 = vst [vmem:[#allocation54_spill] sm:$0xff] %v23401_v54  ;;  %v23405_v15 = vpop.eup %18695 }
0x115d   :  { %v13751_v62 = vadd.f32 %v23397_v33, %v13750_v39  ;;  %v13452_v14 = vpop.f32.mrb[47].mxu1  ;;  %25366 = vst [vmem:[#allocation79_spill] sm:$0xff] %v23405_v15  ;;  %v13634_v0 = vadd.f32 %v17156_v46, %v23189_v3 }
0x115e   :  { %v13632_v38 = vadd.f32 %v23189_v3, %v13452_v14  ;;  %18705 = vtanh.f32 %v13631_v10 }
0x115f   :  { %v13752_v55 = vadd.f32 %v23401_v54, %v13751_v62 }
0x1160   :  { %v23409_v23 = vpop.eup %18697  ;;  %18707 = vtanh.f32 %v13632_v38 }
0x1161   :  { %v13753_v57 = vadd.f32 %v23405_v15, %v13752_v55  ;;  %25367 = vst [vmem:[#allocation48_spill] sm:$0xff] %v23409_v23  ;;  %18709 = vtanh.f32 %v13633_v45 }
0x1162   :  { %v17159_v34 = vpop.f32.mrb[48].mxu1  ;;  %v23413_v9 = vpop.eup %18699  ;;  %18711 = vtanh.f32 %v13634_v0 }
0x1163   :  { %v13754_v36 = vadd.f32 %v23409_v23, %v13753_v57  ;;  %v13465_v58 = vpop.f32.mrb[49].mxu1  ;;  %v23417_v29 = vpop.eup %18701  ;;  %v13637_v14 = vadd.f32 %v17159_v34, %v23189_v3 }
0x1164   :  { %v13635_v40 = vadd.f32 %v23189_v3, %v13465_v58  ;;  %v17160_v28 = vpop.f32.mrb[50].mxu1  ;;  %v23421_v62 = vpop.eup %18703 }
0x1165   :  { %v13755_v61 = vadd.f32 %v23413_v9, %v13754_v36  ;;  %v13468_v39 = vpop.f32.mrb[51].mxu1  ;;  %v13638_v45 = vadd.f32 %v17160_v28, %v23189_v3 }
0x1166   :  { %v13636_v10 = vadd.f32 %v23189_v3, %v13468_v39  ;;  %18713 = vtanh.f32 %v13635_v40 }
0x1167   :  { %v13756_v46 = vadd.f32 %v23417_v29, %v13755_v61 }
0x1168   :  { %v23425_v55 = vpop.eup %18705  ;;  %18715 = vtanh.f32 %v13636_v10 }
0x1169   :  { %v13757_v38 = vadd.f32 %v23421_v62, %v13756_v46  ;;  %18717 = vtanh.f32 %v13637_v14 }
0x116a   :  { %v17163_v57 = vpop.f32.mrb[52].mxu1  ;;  %v23429_v58 = vpop.eup %18707  ;;  %18719 = vtanh.f32 %v13638_v45 }
0x116b   :  { %v13758_v36 = vadd.f32 %v23425_v55, %v13757_v38  ;;  %v13481_v0 = vpop.f32.mrb[53].mxu1  ;;  %v18710_v23 = vpop.eup %18709  ;;  %v13641_v10 = vadd.f32 %v17163_v57, %v23189_v3 }
0x116c   :  { %v13639_v61 = vadd.f32 %v23189_v3, %v13481_v0  ;;  %v17164_v39 = vpop.f32.mrb[54].mxu1  ;;  %v18712_v28 = vpop.eup %18711 }
0x116d   :  { %v13759_v34 = vadd.f32 %v23429_v58, %v13758_v36  ;;  %v13484_v40 = vpop.f32.mrb[55].mxu1  ;;  %v13642_v33 = vadd.f32 %v17164_v39, %v23189_v3 }
0x116e   :  { %v13640_v46 = vadd.f32 %v23189_v3, %v13484_v40  ;;  %18721 = vtanh.f32 %v13639_v61 }
0x116f   :  { %v13760_v15 = vadd.f32 %v18710_v23, %v13759_v34 }
0x1170   :  { %v18714_v54 = vpop.eup %18713  ;;  %18723 = vtanh.f32 %v13640_v46 }
0x1171   :  { %v13761_v38 = vadd.f32 %v18712_v28, %v13760_v15  ;;  %18725 = vtanh.f32 %v13641_v10 }
0x1172   :  { %v17167_v14 = vpop.f32.mrb[56].mxu1  ;;  %v18716_v25 = vpop.eup %18715  ;;  %18727 = vtanh.f32 %v13642_v33 }
0x1173   :  { %v13762_v0 = vadd.f32 %v18714_v54, %v13761_v38  ;;  %v13497_v8 = vpop.f32.mrb[57].mxu1  ;;  %v18718_v34 = vpop.eup %18717  ;;  %v13645_v18 = vadd.f32 %v17167_v14, %v23189_v3 }
0x1174   :  { %v13643_v36 = vadd.f32 %v23189_v3, %v13497_v8  ;;  %v17168_v45 = vpop.f32.mrb[58].mxu1  ;;  %v18720_v15 = vpop.eup %18719 }
0x1175   :  { %v13763_v30 = vadd.f32 %v18716_v25, %v13762_v0  ;;  %v13500_v40 = vpop.f32.mrb[59].mxu1  ;;  %v13646_v38 = vadd.f32 %v17168_v45, %v23189_v3 }
0x1176   :  { %v13644_v57 = vadd.f32 %v23189_v3, %v13500_v40  ;;  %18729 = vtanh.f32 %v13643_v36 }
0x1177   :  { %v13764_v61 = vadd.f32 %v18718_v34, %v13763_v30 }
0x1178   :  { %v18722_v46 = vpop.eup %18721  ;;  %18731 = vtanh.f32 %v13644_v57 }
0x1179   :  { %v13765_v39 = vadd.f32 %v18720_v15, %v13764_v61  ;;  %18733 = vtanh.f32 %v13645_v18 }
0x117a   :  { %v18724_v56 = vpop.eup %18723  ;;  %18735 = vtanh.f32 %v13646_v38 }
0x117b   :  { %v13766_v10 = vadd.f32 %v18722_v46, %v13765_v39  ;;  %v18726_v0 = vpop.eup %18725 }
0x117c   :  { %v18728_v33 = vpop.eup %18727 }
0x117d   :  { %v13767_v8 = vadd.f32 %v18724_v56, %v13766_v10 }
0x117f   :  { %v13768_v44 = vadd.f32 %v18726_v0, %v13767_v8 }
0x1180   :  { %v18730_v40 = vpop.eup %18729 }
0x1181   :  { %v13769_v17 = vadd.f32 %v18728_v33, %v13768_v44 }
0x1182   :  { %v18732_v16 = vpop.eup %18731 }
0x1183   :  { %v13770_v30 = vadd.f32 %v18730_v40, %v13769_v17  ;;  %v18734_v14 = vpop.eup %18733 }
0x1184   :  { %v18736_v61 = vpop.eup %18735 }
0x1185   :  { %v13771_v24 = vadd.f32 %v18732_v16, %v13770_v30 }
0x1187   :  { %v13772_v36 = vadd.f32 %v18734_v14, %v13771_v24 }
0x1189   :  { %v13773_v60 = vadd.f32 %v18736_v61, %v13772_v36 }
0x118b   :  { %v13774_v49 = vrot.slane %v13773_v60, 4 }
0x118d   :  { %v13775_v3 = vadd.f32 %v13774_v49, %v13773_v60 }
0x118f   :  { %v13776_v45 = vrot.slane %v13775_v3, 2 }
0x1191   :  { %v13777_v57 = vadd.f32 %v13776_v45, %v13775_v3 }
0x1193   :  { %v13778_v39 = vrot.slane %v13777_v57, 1 }
0x1195   :  { %v13779_v18 = vadd.f32 %v13778_v39, %v13777_v57 }
0x1197   :  { %v23440_v10 = vmul.f32 0.001953125, %v13779_v18 }
0x1199   :  { %v23444_v38 = vsub.f32 %v23413_v9, %v23440_v10  ;;  %v23448_v17 = vsub.f32 %v23417_v29, %v23440_v10  ;;  %v23452_v24 = vsub.f32 %v23421_v62, %v23440_v10  ;;  %v23456_v49 = vsub.f32 %v23425_v55, %v23440_v10 }
0x119a   :  { %v23460_v60 = vsub.f32 %v23429_v58, %v23440_v10  ;;  %v23463_v44 = vsub.f32 %v18710_v23, %v23440_v10  ;;  %v23466_v9 = vsub.f32 %v18712_v28, %v23440_v10  ;;  %v23469_v29 = vsub.f32 %v18714_v54, %v23440_v10 }
0x119b   :  { %v23472_v62 = vsub.f32 %v18716_v25, %v23440_v10  ;;  %v23475_v8 = vsub.f32 %v18718_v34, %v23440_v10  ;;  %v23478_v55 = vsub.f32 %v18720_v15, %v23440_v10  ;;  %v23481_v58 = vsub.f32 %v18722_v46, %v23440_v10 }
0x119c   :  { %v23484_v23 = vsub.f32 %v18724_v56, %v23440_v10  ;;  %v23487_v28 = vsub.f32 %v18726_v0, %v23440_v10  ;;  %v23490_v54 = vsub.f32 %v18728_v33, %v23440_v10  ;;  %v23493_v25 = vsub.f32 %v18730_v40, %v23440_v10 }
0x119d   :  { %v23496_v34 = vsub.f32 %v18732_v16, %v23440_v10  ;;  %v23499_v15 = vsub.f32 %v18734_v14, %v23440_v10  ;;  %v23502_v46 = vsub.f32 %v18736_v61, %v23440_v10  ;;  %v23506_v56 = vsub.f32 %v23206_v48, %v23440_v10 }
0x119e   :  { %25368 = vst [vmem:[#allocation94_spill] sm:$0xff] %v23484_v23  ;;  %25369 = vst [vmem:[#allocation95_spill] sm:$0xff] %v23487_v28  ;;  %v23510_v0 = vsub.f32 %v23209_v21, %v23440_v10  ;;  %v23514_v33 = vsub.f32 %v23215_v37, %v23440_v10  ;;  %v23522_v30 = vsub.f32 %v23220_v5, %v23440_v10 }
0x119f   :  { %25370 = vst [vmem:[#allocation78_spill] sm:$0xff] %v23490_v54  ;;  %25371 = vst [vmem:[#allocation18_spill] sm:$0xff] %v23493_v25  ;;  %v13845_v16 = vmul.f32 %v23506_v56, %v23506_v56  ;;  %v23526_v48 = vsub.f32 %v23225_v4, %v23440_v10  ;;  %v23532_v37 = vsub.f32 %v23230_v7, %v23440_v10 }
0x11a0   :  { %25372 = vst [vmem:[#allocation82_spill] sm:$0xff] %v23496_v34  ;;  %v13846_v40 = vmul.f32 %v23510_v0, %v23510_v0  ;;  %v13847_v21 = vmul.f32 %v23514_v33, %v23514_v33  ;;  %v13848_v36 = vmul.f32 %v23522_v30, %v23522_v30  ;;  %v23538_v5 = vsub.f32 %v23235_v32, %v23440_v10 }
0x11a1   :  { %v13849_v4 = vmul.f32 %v23526_v48, %v23526_v48  ;;  %v23544_v45 = vsub.f32 %v23240_v2, %v23440_v10  ;;  %v13850_v7 = vmul.f32 %v23532_v37, %v23532_v37  ;;  %v23550_v39 = vsub.f32 %v23245_v20, %v23440_v10 }
0x11a2   :  { %v13909_v14 = vadd.f32 %v13846_v40, %v13845_v16  ;;  %v13851_v32 = vmul.f32 %v23538_v5, %v23538_v5  ;;  %v23556_v16 = vsub.f32 %v23250_v31, %v23440_v10 }
0x11a3   :  { %v13852_v2 = vmul.f32 %v23544_v45, %v23544_v45  ;;  %v13853_v20 = vmul.f32 %v23550_v39, %v23550_v39 }
0x11a4   :  { %v13910_v61 = vadd.f32 %v13909_v14, %v13847_v21  ;;  %v23562_v21 = vsub.f32 %v23255_v63, %v23440_v10  ;;  %v13854_v31 = vmul.f32 %v23556_v16, %v23556_v16 }
0x11a6   :  { %v13911_v3 = vadd.f32 %v13910_v61, %v13848_v36  ;;  %v23568_v36 = vsub.f32 %v23260_v11, %v23440_v10  ;;  %v13855_v63 = vmul.f32 %v23562_v21, %v23562_v21 }
0x11a8   :  { %v13912_v57 = vadd.f32 %v13911_v3, %v13849_v4  ;;  %v23574_v4 = vsub.f32 %v23265_v41, %v23440_v10  ;;  %v13856_v11 = vmul.f32 %v23568_v36, %v23568_v36 }
0x11aa   :  { %v13913_v18 = vadd.f32 %v13912_v57, %v13850_v7  ;;  %v23580_v7 = vsub.f32 %v23270_v27, %v23440_v10  ;;  %v13857_v41 = vmul.f32 %v23574_v4, %v23574_v4 }
0x11ac   :  { %v13914_v40 = vadd.f32 %v13913_v18, %v13851_v32  ;;  %v23586_v32 = vsub.f32 %v23275_v42, %v23440_v10  ;;  %v13858_v27 = vmul.f32 %v23580_v7, %v23580_v7 }
0x11ae   :  { %v13915_v14 = vadd.f32 %v13914_v40, %v13852_v2  ;;  %v23592_v2 = vsub.f32 %v23280_v35, %v23440_v10  ;;  %v13859_v42 = vmul.f32 %v23586_v32, %v23586_v32 }
0x11b0   :  { %v13916_v61 = vadd.f32 %v13915_v14, %v13853_v20  ;;  %v23598_v20 = vsub.f32 %v23285_v53, %v23440_v10  ;;  %v13860_v35 = vmul.f32 %v23592_v2, %v23592_v2 }
0x11b2   :  { %v13917_v3 = vadd.f32 %v13916_v61, %v13854_v31  ;;  %v23604_v31 = vsub.f32 %v23290_v50, %v23440_v10  ;;  %v13861_v53 = vmul.f32 %v23598_v20, %v23598_v20 }
0x11b4   :  { %v13918_v57 = vadd.f32 %v13917_v3, %v13855_v63  ;;  %v23610_v63 = vsub.f32 %v23295_v19, %v23440_v10  ;;  %v13862_v50 = vmul.f32 %v23604_v31, %v23604_v31 }
0x11b6   :  { %v13919_v18 = vadd.f32 %v13918_v57, %v13856_v11  ;;  %v23616_v11 = vsub.f32 %v23300_v22, %v23440_v10  ;;  %v13863_v19 = vmul.f32 %v23610_v63, %v23610_v63 }
0x11b8   :  { %v13920_v40 = vadd.f32 %v13919_v18, %v13857_v41  ;;  %v23622_v41 = vsub.f32 %v23305_v43, %v23440_v10  ;;  %v13864_v22 = vmul.f32 %v23616_v11, %v23616_v11 }
0x11ba   :  { %v13921_v14 = vadd.f32 %v13920_v40, %v13858_v27  ;;  %v23628_v27 = vsub.f32 %v23310_v26, %v23440_v10  ;;  %v13865_v43 = vmul.f32 %v23622_v41, %v23622_v41 }
0x11bc   :  { %v13922_v61 = vadd.f32 %v13921_v14, %v13859_v42  ;;  %v23634_v42 = vsub.f32 %v23315_v52, %v23440_v10  ;;  %v13866_v26 = vmul.f32 %v23628_v27, %v23628_v27 }
0x11be   :  { %v13923_v3 = vadd.f32 %v13922_v61, %v13860_v35  ;;  %v23640_v35 = vsub.f32 %v23320_v6, %v23440_v10  ;;  %v13867_v52 = vmul.f32 %v23634_v42, %v23634_v42 }
0x11c0   :  { %v13924_v57 = vadd.f32 %v13923_v3, %v13861_v53  ;;  %v23646_v53 = vsub.f32 %v23325_v59, %v23440_v10  ;;  %v13868_v6 = vmul.f32 %v23640_v35, %v23640_v35 }
0x11c2   :  { %v13925_v18 = vadd.f32 %v13924_v57, %v13862_v50  ;;  %v23652_v50 = vsub.f32 %v23330_v51, %v23440_v10  ;;  %v13869_v59 = vmul.f32 %v23646_v53, %v23646_v53 }
0x11c4   :  { %v13926_v40 = vadd.f32 %v13925_v18, %v13863_v19  ;;  %v23658_v19 = vsub.f32 %v23335_v13, %v23440_v10  ;;  %v13870_v51 = vmul.f32 %v23652_v50, %v23652_v50 }
0x11c6   :  { %v13927_v14 = vadd.f32 %v13926_v40, %v13864_v22  ;;  %v23664_v22 = vsub.f32 %v23340_v1, %v23440_v10  ;;  %v13871_v13 = vmul.f32 %v23658_v19, %v23658_v19 }
0x11c8   :  { %v13928_v61 = vadd.f32 %v13927_v14, %v13865_v43  ;;  %v23670_v43 = vsub.f32 %v23345_v47, %v23440_v10  ;;  %v13872_v1 = vmul.f32 %v23664_v22, %v23664_v22 }
0x11ca   :  { %v13929_v3 = vadd.f32 %v13928_v61, %v13866_v26  ;;  %25373 = vst [vmem:[#allocation36_spill] sm:$0xff] %v23670_v43  ;;  %v23676_v26 = vsub.f32 %v23349_v12, %v23440_v10  ;;  %v13873_v47 = vmul.f32 %v23670_v43, %v23670_v43 }
0x11cc   :  { %v13930_v57 = vadd.f32 %v13929_v3, %v13867_v52  ;;  %25374 = vst [vmem:[#allocation62_spill] sm:$0xff] %v23676_v26  ;;  %v25375_v52 = vld [vmem:[#allocation83_spill] sm:$0xff]  ;;  %v13874_v12 = vmul.f32 %v23676_v26, %v23676_v26 }
0x11cd   :  { %v23682_v3 = vsub.f32 %v25375_v52, %v23440_v10  ;;  %v25381_v52 = vld [vmem:[#allocation92_spill] sm:$0xff] }
0x11ce   :  { %v13931_v18 = vadd.f32 %v13930_v57, %v13868_v6  ;;  %v25377_v57 = vld [vmem:[#allocation64_spill] sm:$0xff]  ;;  %v23700_v43 = vsub.f32 %v25381_v52, %v23440_v10 }
0x11cf   :  { %25376 = vst [vmem:[#allocation73_spill] sm:$0xff] %v23682_v3  ;;  %v25387_v52 = vld [vmem:[#allocation60_spill] sm:$0xff] }
0x11d0   :  { %v13932_v40 = vadd.f32 %v13931_v18, %v13869_v59  ;;  %v23688_v59 = vsub.f32 %v25377_v57, %v23440_v10  ;;  %25382 = vst [vmem:[#allocation99_spill] sm:$0xff] %v23700_v43  ;;  %v25383_v57 = vld [vmem:[#allocation47_spill] sm:$0xff] }
0x11d1   :  { %v23706_v26 = vsub.f32 %v25383_v57, %v23440_v10  ;;  %v25389_v57 = vld [vmem:[#allocation71_spill] sm:$0xff] }
0x11d2   :  { %v13933_v14 = vadd.f32 %v13932_v40, %v13870_v51  ;;  %25378 = vst [vmem:[#allocation40_spill] sm:$0xff] %v23688_v59  ;;  %v25379_v51 = vld [vmem:[#allocation87_spill] sm:$0xff] }
0x11d3   :  { %v23694_v40 = vsub.f32 %v25379_v51, %v23440_v10  ;;  %25384 = vst [vmem:[#allocation63_spill] sm:$0xff] %v23706_v26  ;;  %v25385_v51 = vld [vmem:[#allocation51_spill] sm:$0xff] }
0x11d4   :  { %v13934_v61 = vadd.f32 %v13933_v14, %v13871_v13  ;;  %v13875_v13 = vmul.f32 %v23682_v3, %v23682_v3  ;;  %v23712_v3 = vsub.f32 %v25385_v51, %v23440_v10  ;;  %v25391_v51 = vld [vmem:[#allocation53_spill] sm:$0xff] }
0x11d5   :  { %25380 = vst [vmem:[#allocation98_spill] sm:$0xff] %v23694_v40 }
0x11d6   :  { %v13935_v6 = vadd.f32 %v13934_v61, %v13872_v1  ;;  %v13876_v1 = vmul.f32 %v23688_v59, %v23688_v59  ;;  %25386 = vst [vmem:[#allocation22_spill] sm:$0xff] %v23712_v3  ;;  %v23718_v59 = vsub.f32 %v25387_v52, %v23440_v10  ;;  %v25393_v52 = vld [vmem:[#allocation89_spill] sm:$0xff] }
0x11d8   :  { %v13936_v18 = vadd.f32 %v13935_v6, %v13873_v47  ;;  %v13877_v47 = vmul.f32 %v23694_v40, %v23694_v40  ;;  %25388 = vst [vmem:[#allocation46_spill] sm:$0xff] %v23718_v59  ;;  %v23724_v40 = vsub.f32 %v25389_v57, %v23440_v10  ;;  %v25395_v57 = vld [vmem:[#allocation69_spill] sm:$0xff] }
0x11da   :  { %v13937_v14 = vadd.f32 %v13936_v18, %v13874_v12  ;;  %v13878_v12 = vmul.f32 %v23700_v43, %v23700_v43  ;;  %25390 = vst [vmem:[#allocation81_spill] sm:$0xff] %v23724_v40  ;;  %v23730_v43 = vsub.f32 %v25391_v51, %v23440_v10  ;;  %v25396_v51 = vld [vmem:[#allocation70_spill] sm:$0xff] }
0x11dc   :  { %v13938_v61 = vadd.f32 %v13937_v14, %v13875_v13  ;;  %v13879_v13 = vmul.f32 %v23706_v26, %v23706_v26  ;;  %25392 = vst [vmem:[#allocation28_spill] sm:$0xff] %v23730_v43  ;;  %v23736_v26 = vsub.f32 %v25393_v52, %v23440_v10  ;;  %v25398_v52 = vld [vmem:[#allocation54_spill] sm:$0xff] }
0x11de   :  { %v13939_v6 = vadd.f32 %v13938_v61, %v13876_v1  ;;  %v13880_v1 = vmul.f32 %v23712_v3, %v23712_v3  ;;  %25394 = vst [vmem:[#allocation49_spill] sm:$0xff] %v23736_v26  ;;  %v23742_v3 = vsub.f32 %v25395_v57, %v23440_v10  ;;  %v25399_v57 = vld [vmem:[#allocation79_spill] sm:$0xff] }
0x11e0   :  { %v13940_v18 = vadd.f32 %v13939_v6, %v13877_v47  ;;  %v13881_v47 = vmul.f32 %v23718_v59, %v23718_v59  ;;  %v23748_v59 = vsub.f32 %v25396_v51, %v23440_v10  ;;  %v25400_v51 = vld [vmem:[#allocation48_spill] sm:$0xff] }
0x11e2   :  { %v13941_v14 = vadd.f32 %v13940_v18, %v13878_v12  ;;  %v13882_v12 = vmul.f32 %v23724_v40, %v23724_v40  ;;  %25397 = vst [vmem:[#allocation23_spill] sm:$0xff] %v23748_v59  ;;  %v23754_v40 = vsub.f32 %v25398_v52, %v23440_v10 }
0x11e4   :  { %v13942_v61 = vadd.f32 %v13941_v14, %v13879_v13  ;;  %v13883_v13 = vmul.f32 %v23730_v43, %v23730_v43  ;;  %v23760_v43 = vsub.f32 %v25399_v57, %v23440_v10 }
0x11e6   :  { %v13943_v6 = vadd.f32 %v13942_v61, %v13880_v1  ;;  %v13884_v1 = vmul.f32 %v23736_v26, %v23736_v26  ;;  %v23766_v26 = vsub.f32 %v25400_v51, %v23440_v10  ;;  %v13888_v52 = vmul.f32 %v23760_v43, %v23760_v43 }
0x11e7   :  { %v13891_v10 = vmul.f32 %v23448_v17, %v23448_v17  ;;  %v13892_v51 = vmul.f32 %v23452_v24, %v23452_v24 }
0x11e8   :  { %v13944_v18 = vadd.f32 %v13943_v6, %v13881_v47  ;;  %v13885_v47 = vmul.f32 %v23742_v3, %v23742_v3 }
0x11ea   :  { %v13945_v14 = vadd.f32 %v13944_v18, %v13882_v12  ;;  %v13886_v12 = vmul.f32 %v23748_v59, %v23748_v59  ;;  %v13890_v59 = vmul.f32 %v23444_v38, %v23444_v38 }
0x11ec   :  { %v13946_v61 = vadd.f32 %v13945_v14, %v13883_v13  ;;  %v13887_v13 = vmul.f32 %v23754_v40, %v23754_v40 }
0x11ee   :  { %v13947_v6 = vadd.f32 %v13946_v61, %v13884_v1  ;;  %v13889_v61 = vmul.f32 %v23766_v26, %v23766_v26 }
0x11f0   :  { %v13948_v18 = vadd.f32 %v13947_v6, %v13885_v47 }
0x11f2   :  { %v13949_v14 = vadd.f32 %v13948_v18, %v13886_v12  ;;  %v13893_v18 = vmul.f32 %v23456_v49, %v23456_v49 }
0x11f4   :  { %v13950_v1 = vadd.f32 %v13949_v14, %v13887_v13  ;;  %v13894_v14 = vmul.f32 %v23460_v60, %v23460_v60 }
0x11f6   :  { %v13951_v57 = vadd.f32 %v13950_v1, %v13888_v52  ;;  %v13895_v1 = vmul.f32 %v23463_v44, %v23463_v44 }
0x11f8   :  { %v13952_v47 = vadd.f32 %v13951_v57, %v13889_v61  ;;  %v13896_v57 = vmul.f32 %v23466_v9, %v23466_v9 }
0x11fa   :  { %v13953_v6 = vadd.f32 %v13952_v47, %v13890_v59  ;;  %v13897_v47 = vmul.f32 %v23469_v29, %v23469_v29 }
0x11fc   :  { %v13954_v12 = vadd.f32 %v13953_v6, %v13891_v10  ;;  %v13898_v6 = vmul.f32 %v23472_v62, %v23472_v62 }
0x11fe   :  { %v13955_v13 = vadd.f32 %v13954_v12, %v13892_v51  ;;  %v13899_v12 = vmul.f32 %v23475_v8, %v23475_v8 }
0x1200   :  { %v13956_v52 = vadd.f32 %v13955_v13, %v13893_v18  ;;  %v13900_v13 = vmul.f32 %v23478_v55, %v23478_v55 }
0x1202   :  { %v13957_v61 = vadd.f32 %v13956_v52, %v13894_v14  ;;  %v13901_v52 = vmul.f32 %v23481_v58, %v23481_v58 }
0x1204   :  { %v13958_v59 = vadd.f32 %v13957_v61, %v13895_v1  ;;  %v13902_v61 = vmul.f32 %v23484_v23, %v23484_v23 }
0x1206   :  { %v13959_v10 = vadd.f32 %v13958_v59, %v13896_v57  ;;  %v13903_v59 = vmul.f32 %v23487_v28, %v23487_v28 }
0x1208   :  { %v13960_v51 = vadd.f32 %v13959_v10, %v13897_v47  ;;  %v13904_v10 = vmul.f32 %v23490_v54, %v23490_v54 }
0x120a   :  { %v13961_v18 = vadd.f32 %v13960_v51, %v13898_v6  ;;  %v13905_v51 = vmul.f32 %v23493_v25, %v23493_v25 }
0x120c   :  { %v13962_v14 = vadd.f32 %v13961_v18, %v13899_v12  ;;  %v13906_v18 = vmul.f32 %v23496_v34, %v23496_v34 }
0x120e   :  { %v13963_v1 = vadd.f32 %v13962_v14, %v13900_v13  ;;  %v13907_v14 = vmul.f32 %v23499_v15, %v23499_v15 }
0x1210   :  { %v13964_v57 = vadd.f32 %v13963_v1, %v13901_v52  ;;  %v13908_v1 = vmul.f32 %v23502_v46, %v23502_v46 }
0x1212   :  { %v13965_v47 = vadd.f32 %v13964_v57, %v13902_v61 }
0x1214   :  { %v13966_v6 = vadd.f32 %v13965_v47, %v13903_v59 }
0x1216   :  { %v13967_v12 = vadd.f32 %v13966_v6, %v13904_v10 }
0x1218   :  { %v13968_v13 = vadd.f32 %v13967_v12, %v13905_v51 }
0x121a   :  { %v13969_v52 = vadd.f32 %v13968_v13, %v13906_v18 }
0x121c   :  { %v13970_v61 = vadd.f32 %v13969_v52, %v13907_v14  ;;  %v25406_v14 = vld [vmem:[#allocation98_spill] sm:$0xff] }
0x121e   :  { %v13971_v57 = vadd.f32 %v13970_v61, %v13908_v1  ;;  %v25407_v1 = vld [vmem:[#allocation99_spill] sm:$0xff] }
0x1220   :  { %v13972_v28 = vrot.slane %v13971_v57, 4 }
0x1222   :  { %v13973_v54 = vadd.f32 %v13972_v28, %v13971_v57  ;;  %v25408_v57 = vld [vmem:[#allocation63_spill] sm:$0xff] }
0x1224   :  { %v13974_v59 = vrot.slane %v13973_v54, 2 }
0x1226   :  { %v13975_v47 = vadd.f32 %v13974_v59, %v13973_v54 }
0x1228   :  { %v13976_v23 = vrot.slane %v13975_v47, 1 }
0x122a   :  { %v13977_v25 = vadd.f32 %v13976_v23, %v13975_v47  ;;  %v25409_v47 = vld [vmem:[#allocation22_spill] sm:$0xff] }
0x122c   :  { %v13978_v10 = vmul.f32 0.001953125, %v13977_v25 }
0x122e   :  { %v13979_v6 = vadd.f32 1e-05, %v13978_v10 }
0x1230   :  { %18737 = vrsqrt.f32 %v13979_v6  ;;  %v25410_v6 = vld [vmem:[#allocation46_spill] sm:$0xff] }
0x123a   :  { %v23812_v34 = vpop.eup %18737 }
0x123b   :  { %v13981_v51 = vmul.f32 %v23812_v34, %v23506_v56  ;;  %v13982_v12 = vmul.f32 %v23812_v34, %v23510_v0  ;;  %v13983_v18 = vmul.f32 %v23812_v34, %v23514_v33  ;;  %v13984_v28 = vmul.f32 %v23812_v34, %v23522_v30 }
0x123c   :  { %v13985_v23 = vmul.f32 %v23812_v34, %v23526_v48  ;;  %v13986_v54 = vmul.f32 %v23812_v34, %v23532_v37  ;;  %v13987_v25 = vmul.f32 %v23812_v34, %v23538_v5  ;;  %v13988_v56 = vmul.f32 %v23812_v34, %v23544_v45 }
0x123d   :  { %v13989_v0 = vmul.f32 %v23812_v34, %v23550_v39  ;;  %v13990_v33 = vmul.f32 %v23812_v34, %v23556_v16  ;;  %v13991_v30 = vmul.f32 %v23812_v34, %v23562_v21  ;;  %v13992_v48 = vmul.f32 %v23812_v34, %v23568_v36  ;;  %14045 = vst [vmem:[%s25401_s23] sm:$0xff] %v13981_v51 }
0x123e   :  { %14046 = vst [vmem:[%s25401_s23 + $0x8] sm:$0xff] %v13982_v12  ;;  %14047 = vst [vmem:[%s25401_s23 + $0x10] sm:$0xff] %v13983_v18  ;;  %v13993_v37 = vmul.f32 %v23812_v34, %v23574_v4  ;;  %v13994_v5 = vmul.f32 %v23812_v34, %v23580_v7  ;;  %v13995_v45 = vmul.f32 %v23812_v34, %v23586_v32  ;;  %v25411_v12 = vld [vmem:[#allocation81_spill] sm:$0xff] }
0x123f   :  { %14048 = vst [vmem:[%s25401_s23 + $0x18] sm:$0xff] %v13984_v28  ;;  %v13996_v39 = vmul.f32 %v23812_v34, %v23592_v2  ;;  %14049 = vst [vmem:[%s25401_s23 + $0x20] sm:$0xff] %v13985_v23  ;;  %v13997_v16 = vmul.f32 %v23812_v34, %v23598_v20  ;;  %v13998_v21 = vmul.f32 %v23812_v34, %v23604_v31  ;;  %v25412_v28 = vld [vmem:[#allocation28_spill] sm:$0xff] }
0x1240   :  { %14050 = vst [vmem:[%s25401_s23 + $0x28] sm:$0xff] %v13986_v54  ;;  %14051 = vst [vmem:[%s25401_s23 + $0x30] sm:$0xff] %v13987_v25  ;;  %v13999_v36 = vmul.f32 %v23812_v34, %v23610_v63  ;;  %v14000_v4 = vmul.f32 %v23812_v34, %v23616_v11  ;;  %v14001_v7 = vmul.f32 %v23812_v34, %v23622_v41  ;;  %v25413_v54 = vld [vmem:[#allocation49_spill] sm:$0xff] }
0x1241   :  { %14052 = vst [vmem:[%s25401_s23 + $0x38] sm:$0xff] %v13988_v56  ;;  %14053 = vst [vmem:[%s25401_s23 + $0x40] sm:$0xff] %v13989_v0  ;;  %v14002_v32 = vmul.f32 %v23812_v34, %v23628_v27  ;;  %v14003_v2 = vmul.f32 %v23812_v34, %v23634_v42  ;;  %v14004_v20 = vmul.f32 %v23812_v34, %v23640_v35  ;;  %v25402_v27 = vld [vmem:[#allocation36_spill] sm:$0xff]  ;;  %v25403_v35 = vld [vmem:[#allocation62_spill] sm:$0xff] }
0x1242   :  { %14054 = vst [vmem:[%s25401_s23 + $0x48] sm:$0xff] %v13990_v33  ;;  %14055 = vst [vmem:[%s25401_s23 + $0x50] sm:$0xff] %v13991_v30  ;;  %v14005_v31 = vmul.f32 %v23812_v34, %v23646_v53  ;;  %v14006_v63 = vmul.f32 %v23812_v34, %v23652_v50  ;;  %v14007_v11 = vmul.f32 %v23812_v34, %v23658_v19  ;;  %v25404_v50 = vld [vmem:[#allocation73_spill] sm:$0xff]  ;;  %v25414_v0 = vld [vmem:[#allocation23_spill] sm:$0xff] }
0x1243   :  { %14056 = vst [vmem:[%s25401_s23 + $0x58] sm:$0xff] %v13992_v48  ;;  %14057 = vst [vmem:[%s25401_s23 + $0x60] sm:$0xff] %v13993_v37  ;;  %v14008_v41 = vmul.f32 %v23812_v34, %v23664_v22  ;;  %v14009_v42 = vmul.f32 %v23812_v34, %v25402_v27  ;;  %v14010_v53 = vmul.f32 %v23812_v34, %v25403_v35  ;;  %v25405_v22 = vld [vmem:[#allocation40_spill] sm:$0xff] }
0x1244   :  { %14058 = vst [vmem:[%s25401_s23 + $0x68] sm:$0xff] %v13994_v5  ;;  %14059 = vst [vmem:[%s25401_s23 + $0x70] sm:$0xff] %v13995_v45  ;;  %v14011_v19 = vmul.f32 %v23812_v34, %v25404_v50  ;;  %v14012_v13 = vmul.f32 %v23812_v34, %v25405_v22  ;;  %v14013_v52 = vmul.f32 %v23812_v34, %v25406_v14  ;;  %v25417_v45 = vld [vmem:[#allocation78_spill] sm:$0xff] }
0x1245   :  { %14060 = vst [vmem:[%s25401_s23 + $0x78] sm:$0xff] %v13996_v39  ;;  %14061 = vst [vmem:[%s25401_s23 + $0x80] sm:$0xff] %v13997_v16  ;;  %v14014_v61 = vmul.f32 %v23812_v34, %v25407_v1  ;;  %v14015_v59 = vmul.f32 %v23812_v34, %v25408_v57  ;;  %v14016_v10 = vmul.f32 %v23812_v34, %v25409_v47 }
0x1246   :  { %14062 = vst [vmem:[%s25401_s23 + $0x88] sm:$0xff] %v13998_v21  ;;  %14063 = vst [vmem:[%s25401_s23 + $0x90] sm:$0xff] %v13999_v36  ;;  %v14017_v51 = vmul.f32 %v23812_v34, %v25410_v6  ;;  %v14018_v18 = vmul.f32 %v23812_v34, %v25411_v12  ;;  %v14019_v23 = vmul.f32 %v23812_v34, %v25412_v28  ;;  %v25419_v21 = vld [vmem:[#allocation82_spill] sm:$0xff] }
0x1247   :  { %14064 = vst [vmem:[%s25401_s23 + $0x98] sm:$0xff] %v14000_v4  ;;  %14065 = vst [vmem:[%s25401_s23 + $0xa0] sm:$0xff] %v14001_v7  ;;  %v14020_v25 = vmul.f32 %v23812_v34, %v25413_v54  ;;  %v14021_v56 = vmul.f32 %v23812_v34, %v23742_v3  ;;  %v14022_v33 = vmul.f32 %v23812_v34, %v25414_v0 }
0x1248   :  { %14066 = vst [vmem:[%s25401_s23 + $0xa8] sm:$0xff] %v14002_v32  ;;  %14067 = vst [vmem:[%s25401_s23 + $0xb0] sm:$0xff] %v14003_v2  ;;  %v14023_v30 = vmul.f32 %v23812_v34, %v23754_v40  ;;  %v14024_v48 = vmul.f32 %v23812_v34, %v23760_v43  ;;  %v14025_v3 = vmul.f32 %v23812_v34, %v23766_v26 }
0x1249   :  { %14068 = vst [vmem:[%s25401_s23 + $0xb8] sm:$0xff] %v14004_v20  ;;  %14069 = vst [vmem:[%s25401_s23 + $0xc0] sm:$0xff] %v14005_v31  ;;  %v14026_v43 = vmul.f32 %v23812_v34, %v23444_v38  ;;  %v14027_v40 = vmul.f32 %v23812_v34, %v23448_v17  ;;  %v14028_v37 = vmul.f32 %v23812_v34, %v23452_v24 }
0x124a   :  { %14070 = vst [vmem:[%s25401_s23 + $0xc8] sm:$0xff] %v14006_v63  ;;  %14071 = vst [vmem:[%s25401_s23 + $0xd0] sm:$0xff] %v14007_v11  ;;  %v14029_v38 = vmul.f32 %v23812_v34, %v23456_v49  ;;  %v14030_v17 = vmul.f32 %v23812_v34, %v23460_v60  ;;  %v14031_v24 = vmul.f32 %v23812_v34, %v23463_v44 }
0x124b   :  { %14072 = vst [vmem:[%s25401_s23 + $0xd8] sm:$0xff] %v14008_v41  ;;  %14073 = vst [vmem:[%s25401_s23 + $0xe0] sm:$0xff] %v14009_v42  ;;  %v14032_v26 = vmul.f32 %v23812_v34, %v23466_v9  ;;  %v14033_v49 = vmul.f32 %v23812_v34, %v23469_v29  ;;  %v14034_v60 = vmul.f32 %v23812_v34, %v23472_v62  ;;  %v25415_v62 = vld [vmem:[#allocation94_spill] sm:$0xff] }
0x124c   :  { %14074 = vst [vmem:[%s25401_s23 + $0xe8] sm:$0xff] %v14010_v53  ;;  %14075 = vst [vmem:[%s25401_s23 + $0xf0] sm:$0xff] %v14011_v19  ;;  %v14035_v44 = vmul.f32 %v23812_v34, %v23475_v8  ;;  %v14036_v9 = vmul.f32 %v23812_v34, %v23478_v55  ;;  %v14037_v29 = vmul.f32 %v23812_v34, %v23481_v58  ;;  %v25416_v55 = vld [vmem:[#allocation95_spill] sm:$0xff]  ;;  %v25418_v58 = vld [vmem:[#allocation18_spill] sm:$0xff] }
0x124d   :  { %14076 = vst [vmem:[%s25401_s23 + $0xf8] sm:$0xff] %v14012_v13  ;;  %14077 = vst [vmem:[%s25401_s23 + $0x100] sm:$0xff] %v14013_v52  ;;  %v14038_v8 = vmul.f32 %v23812_v34, %v25415_v62  ;;  %v14039_v5 = vmul.f32 %v23812_v34, %v25416_v55  ;;  %v14040_v39 = vmul.f32 %v23812_v34, %v25417_v45 }
0x124e   :  { %14078 = vst [vmem:[%s25401_s23 + $0x108] sm:$0xff] %v14014_v61  ;;  %14079 = vst [vmem:[%s25401_s23 + $0x110] sm:$0xff] %v14015_v59  ;;  %v14041_v16 = vmul.f32 %v23812_v34, %v25418_v58  ;;  %v14042_v36 = vmul.f32 %v23812_v34, %v25419_v21  ;;  %v14043_v4 = vmul.f32 %v23812_v34, %v23499_v15 }
0x124f   :  { %14080 = vst [vmem:[%s25401_s23 + $0x118] sm:$0xff] %v14016_v10  ;;  %14081 = vst [vmem:[%s25401_s23 + $0x120] sm:$0xff] %v14017_v51  ;;  %v14044_v7 = vmul.f32 %v23812_v34, %v23502_v46 }
0x1250   :  { %14082 = vst [vmem:[%s25401_s23 + $0x128] sm:$0xff] %v14018_v18  ;;  %14083 = vst [vmem:[%s25401_s23 + $0x130] sm:$0xff] %v14019_v23 }
0x1251   :  { %14084 = vst [vmem:[%s25401_s23 + $0x138] sm:$0xff] %v14020_v25  ;;  %14085 = vst [vmem:[%s25401_s23 + $0x140] sm:$0xff] %v14021_v56 }
0x1252   :  { %14086 = vst [vmem:[%s25401_s23 + $0x148] sm:$0xff] %v14022_v33  ;;  %14087 = vst [vmem:[%s25401_s23 + $0x150] sm:$0xff] %v14023_v30 }
0x1253   :  { %14088 = vst [vmem:[%s25401_s23 + $0x158] sm:$0xff] %v14024_v48  ;;  %14089 = vst [vmem:[%s25401_s23 + $0x160] sm:$0xff] %v14025_v3 }
0x1254   :  { %14090 = vst [vmem:[%s25401_s23 + $0x168] sm:$0xff] %v14026_v43  ;;  %14091 = vst [vmem:[%s25401_s23 + $0x170] sm:$0xff] %v14027_v40 }
0x1255   :  { %14092 = vst [vmem:[%s25401_s23 + $0x178] sm:$0xff] %v14028_v37  ;;  %14093 = vst [vmem:[%s25401_s23 + $0x180] sm:$0xff] %v14029_v38 }
0x1256   :  { %14094 = vst [vmem:[%s25401_s23 + $0x188] sm:$0xff] %v14030_v17  ;;  %14095 = vst [vmem:[%s25401_s23 + $0x190] sm:$0xff] %v14031_v24 }
0x1257   :  { %14096 = vst [vmem:[%s25401_s23 + $0x198] sm:$0xff] %v14032_v26  ;;  %14097 = vst [vmem:[%s25401_s23 + $0x1a0] sm:$0xff] %v14033_v49 }
0x1258   :  { %14098 = vst [vmem:[%s25401_s23 + $0x1a8] sm:$0xff] %v14034_v60  ;;  %14099 = vst [vmem:[%s25401_s23 + $0x1b0] sm:$0xff] %v14035_v44 }
0x1259   :  { %14100 = vst [vmem:[%s25401_s23 + $0x1b8] sm:$0xff] %v14036_v9  ;;  %14101 = vst [vmem:[%s25401_s23 + $0x1c0] sm:$0xff] %v14037_v29 }
0x125a   :  { %14102 = vst [vmem:[%s25401_s23 + $0x1c8] sm:$0xff] %v14038_v8  ;;  %14103 = vst [vmem:[%s25401_s23 + $0x1d0] sm:$0xff] %v14039_v5 }
0x125b   :  { %14104 = vst [vmem:[%s25401_s23 + $0x1d8] sm:$0xff] %v14040_v39  ;;  %14105 = vst [vmem:[%s25401_s23 + $0x1e0] sm:$0xff] %v14041_v16 }
0x125c   :  { %14106 = vst [vmem:[%s25401_s23 + $0x1e8] sm:$0xff] %v14042_v36  ;;  %14107 = vst [vmem:[%s25401_s23 + $0x1f0] sm:$0xff] %v14043_v4 }
0x125d   :  { %14108 = vst [vmem:[%s25401_s23 + $0x1f8] sm:$0xff] %v14044_v7 }
0x125e   :  { %14113 = vsyncpa [#allocation6], 1 }
0x125f   :  { %14114 = vsyncpa [#allocation8], 1 }
0x1260   :  { %14115 = vsyncpa [#allocation11], 1 }

</bundles_post_ra>
